<compile_context>
chip_gen: v6e
topology: v6e:2x2x1
jax: 0.10.0
libtpu: 0.0.40
codegen_flags: <defaults>
</compile_context>

<pallas_src>
import functools

import jax
import jax.numpy as jnp
from jax.experimental import pallas as pl
from jax.experimental.pallas import tpu as pltpu

EPS = 1e-12                # F.normalize eps
EPS_SQ = EPS * EPS         # x * rsqrt(max(ss, EPS^2)) == x / max(||x||, EPS)

_C_PAD = 8                 # input channels zero-padded to 8 (exact)
_N_PAD = 128               # fused head output padded to one full lane tile (lane-dense)
_VMEM_LIMIT = 32 * 1024 * 1024


def _pick_row_tile(m, target):
    """Largest multiple of 8 that divides m and is <= target (fallback: m)."""
    if m % 8:
        return m
    t = min(target, m)
    t -= t % 8
    while t > 8 and m % t:
        t -= 8
    return t if m % t == 0 else m


def _pick_col_tile(n, target):
    """Largest multiple of 128 that divides n and is <= target (fallback: n)."""
    if n % 128:
        return n
    t = min(target, n)
    t -= t % 128
    while t > 128 and n % t:
        t -= 128
    return t


# --------------------------------------------------------------------------
# Kernel 1: fused 1x1-conv heads + coarse mask (per image, tiled over pixels)
# --------------------------------------------------------------------------
def _encoder_head_kernel(pix_ref, w_ref, b_ref, head_ref, *, ndim, ncls, thresh):
    """Output lanes of the (tm, 128) block:
         [0, ndim)                 'seg' features
         [ndim, ndim+ncls)         'cls_emb' logits
         [ndim+ncls, ndim+2*ncls)  per-pixel 'cls' projection (GAP'ed later)
         ndim+2*ncls               coarse foreground mask in {0, 1}
         ndim+2*ncls + 1           max softmax probability
         rest                      zeros
    """
    y = jnp.dot(pix_ref[...], w_ref[...],
                preferred_element_type=jnp.float32) + b_ref[...]      # (tm, N_PAD) f32

    # softmax over classes (per pixel), threshold, foreground mask + max prob (f32 math)
    logits = y[:, ndim:ndim + ncls]
    logits = logits - jnp.max(logits, axis=-1, keepdims=True)
    e = jnp.exp(logits)
    p = e * pl.reciprocal(jnp.sum(e, axis=-1, keepdims=True), approx=True)
    over = (p > thresh).astype(jnp.int32)
    col = jax.lax.broadcasted_iota(jnp.int32, p.shape, 1)
    # torch: argmax((p > t).int(), dim=classes) != 0
    #   <=> class-0 NOT over threshold AND some class>0 IS over threshold
    bg_over = jnp.max(jnp.where(col == 0, over, 0), axis=-1, keepdims=True) == 1
    fg_any = jnp.max(jnp.where(col > 0, over, 0), axis=-1, keepdims=True) == 1
    mask = jnp.logical_and(jnp.logical_not(bg_over), fg_any).astype(jnp.float32)
    maxp = jnp.max(p, axis=-1, keepdims=True)

    mcol = ndim + 2 * ncls
    lane = jax.lax.broadcasted_iota(jnp.int32, y.shape, 1)
    out = jnp.where(lane == mcol, mask, y)
    out = jnp.where(lane == mcol + 1, maxp, out)
    head_ref[...] = out.astype(head_ref.dtype)


def pallas_encoder_head(pix, w_fused, b_fused, *, ndim, ncls, thresh, row_tile=256):
    """(M, C_PAD) bf16 pixel rows -> fused (M, N_PAD) bf16 head output, tiled over rows."""
    M, kc = pix.shape
    _, nf = w_fused.shape
    tm = _pick_row_tile(M, row_tile)
    return pl.pallas_call(
        functools.partial(_encoder_head_kernel, ndim=ndim, ncls=ncls, thresh=thresh),
        out_shape=jax.ShapeDtypeStruct((M, nf), jnp.bfloat16),
        grid=(M // tm,),
        in_specs=[pl.BlockSpec((tm, kc), lambda i: (i, 0)),
                  pl.BlockSpec((kc, nf), lambda i: (0, 0)),
                  pl.BlockSpec((1, nf), lambda i: (0, 0))],
        out_specs=pl.BlockSpec((tm, nf), lambda i: (i, 0)),
        compiler_params=pltpu.CompilerParams(
            dimension_semantics=("parallel",),
            vmem_limit_bytes=_VMEM_LIMIT),
    )(pix, w_fused, b_fused)


# --------------------------------------------------------------------------
# Kernel 2: per-batch fused pooling / positive similarity / k prototypes / cls GAP
# --------------------------------------------------------------------------
def _pool_pos_kernel(qh_ref, qth_ref, kh_ref, pos_ref, kproto_ref, cls_ref,
                     *, ndim, ncls, inv_t):
    mcol = ndim + 2 * ncls
    qh = qh_ref[0]                                                    # (HW, N_PAD) bf16
    qth = qth_ref[0]
    kh = kh_ref[0]

    q = qh[:, :ndim].astype(jnp.float32)                              # (HW, D)
    q_mask = qh[:, mcol:mcol + 1].astype(jnp.float32)                 # (HW, 1) in {0,1}
    feat = qth[:, :ndim].astype(jnp.float32)                          # (HW, D)
    wgt = (qth[:, mcol:mcol + 1].astype(jnp.float32)
           * qth[:, mcol + 1:mcol + 2].astype(jnp.float32))           # mask * max_prob
    kseg = kh[:, :ndim].astype(jnp.float32)                           # (HW, D)

    # key(qt) features: F.normalize over D per pixel
    fn = feat * jax.lax.rsqrt(
        jnp.maximum(jnp.sum(feat * feat, axis=1, keepdims=True), EPS_SQ))
    # weighted pooling over pixels, clamp(sum_w, min=1), renormalize
    wsum = jnp.maximum(jnp.sum(wgt, axis=0, keepdims=True), 1.0)      # (1, 1)
    pooled = jnp.sum(fn * wgt, axis=0, keepdims=True) * pl.reciprocal(wsum, approx=True)
    pooled = pooled * jax.lax.rsqrt(
        jnp.maximum(jnp.sum(pooled * pooled, axis=1, keepdims=True), EPS_SQ))  # (1, D)

    # masked query prototypes; F.normalize over the *pixel* axis (torch dim=1 of (B,HW,D))
    qm = q * q_mask
    qn = qm * jax.lax.rsqrt(
        jnp.maximum(jnp.sum(qm * qm, axis=0, keepdims=True), EPS_SQ))          # (HW, D)

    # positive similarity per pixel (/T), lane-dense (1, HW) output
    pos_ref[0] = jnp.einsum('od,pd->op', pooled, qn,
                            preferred_element_type=jnp.float32) * inv_t

    # key prototypes: mean over pixels, F.normalize over D
    kp = jnp.mean(kseg, axis=0, keepdims=True)                        # (1, D)
    kproto_ref[0] = kp * jax.lax.rsqrt(
        jnp.maximum(jnp.sum(kp * kp, axis=1, keepdims=True), EPS_SQ))

    # class head: GAP of the per-pixel class projection (bias already folded in)
    cls_ref[0] = jnp.mean(qh[:, ndim + ncls:ndim + 2 * ncls].astype(jnp.float32),
                          axis=0, keepdims=True)


def pallas_pool_positive(q_head, qt_head, k_head, *, ndim, ncls, inv_t):
    # TODO(synk): for production HW sizes add an 'arbitrary' grid axis tiling HW with a
    # VMEM scratch accumulator (pl.when init/finalize) so per-batch blocks fit v7x's
    # 64 MiB VMEM; at these shapes a whole (HW, 128) bf16 block per image is tiny.
    B, HW, nf = q_head.shape
    return pl.pallas_call(
        functools.partial(_pool_pos_kernel, ndim=ndim, ncls=ncls, inv_t=inv_t),
        out_shape=(jax.ShapeDtypeStruct((B, 1, HW), jnp.float32),
                   jax.ShapeDtypeStruct((B, 1, ndim), jnp.float32),
                   jax.ShapeDtypeStruct((B, 1, ncls), jnp.float32)),
        grid=(B,),
        in_specs=[pl.BlockSpec((1, HW, nf), lambda b: (b, 0, 0)),
                  pl.BlockSpec((1, HW, nf), lambda b: (b, 0, 0)),
                  pl.BlockSpec((1, HW, nf), lambda b: (b, 0, 0))],
        out_specs=(pl.BlockSpec((1, 1, HW), lambda b: (b, 0, 0)),
                   pl.BlockSpec((1, 1, ndim), lambda b: (b, 0, 0)),
                   pl.BlockSpec((1, 1, ncls), lambda b: (b, 0, 0))),
        compiler_params=pltpu.CompilerParams(
            dimension_semantics=("parallel",),
            vmem_limit_bytes=_VMEM_LIMIT),
    )(q_head, qt_head, k_head)


# --------------------------------------------------------------------------
# Kernel 3: dense masked negative similarity (tiled over rows and queue columns)
# --------------------------------------------------------------------------
def _neg_sim_kernel(qh_ref, neg_ref, o_ref, *, ndim, ncls, inv_t):
    mcol = ndim + 2 * ncls
    qh = qh_ref[...]                                                  # (tm, N_PAD) bf16
    q = qh[:, :ndim].astype(jnp.float32)
    q_mask = qh[:, mcol:mcol + 1].astype(jnp.float32)
    # F.normalize over D; fold 1/T and the coarse mask into the LHS (tm*D ops, not tm*Nn)
    qn = q * jax.lax.rsqrt(
        jnp.maximum(jnp.sum(q * q, axis=1, keepdims=True), EPS_SQ))
    qn = (qn * (q_mask * inv_t)).astype(jnp.bfloat16)
    o_ref[...] = jnp.dot(qn, neg_ref[...], preferred_element_type=jnp.float32)


def pallas_negative_similarity(q_head, neg_matrix, *, ndim, ncls, inv_t,
                               row_tile=256, col_tile=512):
    M, nf = q_head.shape
    D, nn = neg_matrix.shape
    tm = _pick_row_tile(M, row_tile)
    tn = _pick_col_tile(nn, col_tile)
    return pl.pallas_call(
        functools.partial(_neg_sim_kernel, ndim=ndim, ncls=ncls, inv_t=inv_t),
        out_shape=jax.ShapeDtypeStruct((M, nn), jnp.float32),
        grid=(M // tm, nn // tn),
        in_specs=[pl.BlockSpec((tm, nf), lambda i, j: (i, 0)),
                  pl.BlockSpec((D, tn), lambda i, j: (0, j))],
        out_specs=pl.BlockSpec((tm, tn), lambda i, j: (i, j)),
        compiler_params=pltpu.CompilerParams(
            dimension_semantics=("parallel", "parallel"),
            vmem_limit_bytes=_VMEM_LIMIT),
    )(q_head, neg_matrix)


# --------------------------------------------------------------------------
# Synthetic encoder (get_model): 1x1-conv heads, fused into one weight matrix
# --------------------------------------------------------------------------
def init_model_params(key, c_in, ndim, num_classes):
    k1, k2, k3 = jax.random.split(key, 3)
    return {
        "seg_w": 0.1 * jax.random.normal(k1, (c_in, ndim), jnp.float32),
        "seg_b": jnp.zeros((ndim,), jnp.float32),
        "clsemb_w": 0.5 * jax.random.normal(k2, (c_in, num_classes), jnp.float32),
        "clsemb_b": jnp.zeros((num_classes,), jnp.float32),
        "cls_w": 0.5 * jax.random.normal(k3, (c_in, num_classes), jnp.float32),
        "cls_b": jnp.zeros((num_classes,), jnp.float32),
    }


def _fuse_head_params(params):
    """Concatenate the three heads into one (C_PAD, N_PAD) bf16 weight + f32 bias."""
    c_in, ndim = params["seg_w"].shape
    ncls = params["clsemb_w"].shape[1]
    w = jnp.zeros((_C_PAD, _N_PAD), jnp.float32)
    w = w.at[:c_in, :ndim].set(params["seg_w"])
    w = w.at[:c_in, ndim:ndim + ncls].set(params["clsemb_w"])
    w = w.at[:c_in, ndim + ncls:ndim + 2 * ncls].set(params["cls_w"])
    b = jnp.zeros((1, _N_PAD), jnp.float32)
    b = b.at[0, :ndim].set(params["seg_b"])
    b = b.at[0, ndim:ndim + ncls].set(params["clsemb_b"])
    b = b.at[0, ndim + ncls:ndim + 2 * ncls].set(params["cls_b"])
    return w.astype(jnp.bfloat16), b


def _prep_pixels(x_nchw):
    """(B, C, H, W) -> (B*H*W, C_PAD) bf16 pixel rows (channel zero-pad is exact)."""
    b, c, h, w = x_nchw.shape
    pix = jnp.transpose(x_nchw, (0, 2, 3, 1)).reshape(b * h * w, c)
    return jnp.pad(pix, ((0, 0), (0, _C_PAD - c))).astype(jnp.bfloat16)


# --------------------------------------------------------------------------
# ContrastiveModel forward.  Single device; DDP all_gather / batch-shuffle are no-ops.
# The whole device path is one jit (dense masked similarities, traced queue pointer).
# --------------------------------------------------------------------------
@functools.partial(jax.jit, static_argnames=("thresh", "m", "T"))
def _device_forward(state, im_q, im_qt, im_k, *, thresh, m, T):
    B, _, H, W = im_q.shape
    HW = H * W
    params_q = state["params_q"]
    params_k = state["params_k"]
    queue = state["queue"]
    queue_ptr = state["queue_ptr"]

    ndim = params_q["seg_w"].shape[1]
    ncls = params_q["clsemb_w"].shape[1]
    mcol = ndim + 2 * ncls
    assert mcol + 2 <= _N_PAD
    inv_t = 1.0 / T

    # ---- query encoder (fused heads + coarse mask, one pass over pixels) ----
    wq, bq = _fuse_head_params(params_q)
    q_head = pallas_encoder_head(_prep_pixels(im_q), wq, bq,
                                 ndim=ndim, ncls=ncls, thresh=thresh)   # (B*HW, 128) bf16

    # ---- momentum update of key encoder ----
    params_k = jax.tree_util.tree_map(
        lambda pk, pq: pk * m + pq * (1.0 - m), params_k, params_q)

    # ---- key encoder on transformed-query and key (healthy) images ----
    wk, bk = _fuse_head_params(params_k)
    qt_head = pallas_encoder_head(_prep_pixels(im_qt), wk, bk,
                                  ndim=ndim, ncls=ncls, thresh=thresh)
    k_head = pallas_encoder_head(_prep_pixels(im_k), wk, bk,
                                 ndim=ndim, ncls=ncls, thresh=thresh)
    # TODO(synk): otsu_thresholding path (apply_otsu=True) not implemented; mean pooling used.

    # ---- per-batch: weighted key pooling, positive similarity, k prototypes, cls GAP ----
    pos, kproto, cls_gap = pallas_pool_positive(
        q_head.reshape(B, HW, _N_PAD), qt_head.reshape(B, HW, _N_PAD),
        k_head.reshape(B, HW, _N_PAD), ndim=ndim, ncls=ncls, inv_t=inv_t)
    positive_dense = pos.reshape(B * HW)             # /T, zero at masked-off pixels
    k_prototypes = kproto.reshape(B, ndim)           # already L2-normalized
    class_prediction = cls_gap.reshape(B, ncls)

    # ---- dense masked negative similarity: [q @ k_proto.T | q @ queue] / T ----
    nn = B + queue.shape[1]
    nn_pad = -(-nn // 128) * 128
    neg = jnp.concatenate(
        [k_prototypes.T, queue, jnp.zeros((ndim, nn_pad - nn), jnp.float32)], axis=1)
    negative_dense = pallas_negative_similarity(
        q_head, neg.astype(jnp.bfloat16), ndim=ndim, ncls=ncls, inv_t=inv_t)
    negative_dense = negative_dense[:, :nn]

    # ---- coarse foreground mask of the query image (row selection happens outside) ----
    q_mask = q_head[:, mcol].astype(jnp.float32)     # (B*HW,) in {0, 1}

    # ---- dequeue and enqueue (traced queue pointer, no host sync) ----
    Kq = queue.shape[1]
    ptr = queue_ptr[0]
    queue = jax.lax.dynamic_update_slice(queue, k_prototypes.T, (jnp.int32(0), ptr))
    queue_ptr = (queue_ptr + B) % Kq

    new_state = dict(state, params_k=params_k, queue=queue, queue_ptr=queue_ptr)
    return (negative_dense, positive_dense, class_prediction, q_mask), new_state


def contrastive_forward(state, im_q, im_qt, im_k, cfg):
    """Returns (negative_similarity, positive_similarity, class_prediction), new_state."""
    B = im_q.shape[0]
    assert cfg["K"] % B == 0
    (neg_dense, pos_dense, cls_pred, q_mask), new_state = _device_forward(
        state, im_q, im_qt, im_k,
        thresh=cfg["coarse_threshold"], m=cfg["m"], T=cfg["T"])
    # torch.nonzero / index_select with a data-dependent row count: eager glue on the
    # already-computed dense per-pixel similarities (one host sync at the very end).
    # TODO(synk): no shape-stable Pallas equivalent for the data-dependent gather.
    q_true_idx = jnp.nonzero(q_mask > 0.5)[0]
    negative_similarity = jnp.take(neg_dense, q_true_idx, axis=0)
    positive_similarity = jnp.take(pos_dense, q_true_idx, axis=0)
    return (negative_similarity, positive_similarity, cls_pred), new_state


# --------------------------------------------------------------------------
if __name__ == "__main__":
    B, C, H, W = 2, 3, 16, 16
    ndim, num_classes, Kq = 32, 4, 64
    cfg = {"coarse_threshold": 0.2, "K": Kq, "m": 0.999, "T": 0.07}

    key = jax.random.PRNGKey(0)
    k_param, k_queue, k_im = jax.random.split(key, 3)

    params_q = init_model_params(k_param, C, ndim, num_classes)
    params_k = jax.tree_util.tree_map(lambda x: x, params_q)   # param_k <- param_q copy

    queue = jax.random.normal(k_queue, (ndim, Kq), jnp.float32)
    queue = queue / jnp.maximum(jnp.linalg.norm(queue, axis=0, keepdims=True), EPS)

    state = {
        "params_q": params_q,
        "params_k": params_k,
        "queue": queue,
        "queue_ptr": jnp.zeros((1,), jnp.int32),
    }

    ki1, ki2, ki3 = jax.random.split(k_im, 3)
    im_q = jax.random.normal(ki1, (B, C, H, W), jnp.float32)
    im_qt = jax.random.normal(ki2, (B, C, H, W), jnp.float32)
    im_k = jax.random.normal(ki3, (B, C, H, W), jnp.float32)

    (neg, pos, cls_pred), new_state = contrastive_forward(state, im_q, im_qt, im_k, cfg)
    jax.block_until_ready((neg, pos, cls_pred, new_state["queue"], new_state["queue_ptr"]))
    print("KERNEL_OK")
</pallas_src>

<mosaic_0001>
module attributes {stable_mosaic.version = 11 : i64} {
  func.func @_encoder_head_kernel(%arg0: i32, %arg1: memref<256x8xbf16, #tpu.memory_space<vmem>>, %arg2: memref<8x128xbf16, #tpu.memory_space<vmem>>, %arg3: memref<1x128xf32, #tpu.memory_space<vmem>>, %arg4: memref<256x128xbf16, #tpu.memory_space<vmem>>) attributes {dimension_semantics = [#tpu.dimension_semantics<parallel>], iteration_bounds = array<i64: 2>, scalar_prefetch = 0 : i64, scratch_operands = 0 : i64, tpu.core_type = #tpu.core_type<tc>, window_params = [{transform_indices = @transform_0, window_bounds = array<i64: 256, 8>}, {pipeline_mode = #tpu.pipeline_mode<synchronous>, transform_indices = @transform_1, window_bounds = array<i64: 8, 128>}, {pipeline_mode = #tpu.pipeline_mode<synchronous>, transform_indices = @transform_2, window_bounds = array<i64: 1, 128>}, {transform_indices = @transform_3, window_bounds = array<i64: 256, 128>}]} {
    %c0 = arith.constant 0 : index
    %c0_0 = arith.constant 0 : index
    %0 = vector.load %arg1[%c0, %c0_0] : memref<256x8xbf16, #tpu.memory_space<vmem>>, vector<256x8xbf16>
    %c0_1 = arith.constant 0 : index
    %c0_2 = arith.constant 0 : index
    %1 = vector.load %arg2[%c0_1, %c0_2] : memref<8x128xbf16, #tpu.memory_space<vmem>>, vector<8x128xbf16>
    %cst = arith.constant dense<0.000000e+00> : vector<256x128xf32>
    %2 = tpu.matmul %0, %1, %cst {dimension_numbers = #tpu.dot_dimension_numbers<[1], [0], [0], [1], [0, 0, 1, 1], [], []>} : vector<256x8xbf16>, vector<8x128xbf16>, vector<256x128xf32> -> vector<256x128xf32>
    %c0_3 = arith.constant 0 : index
    %c0_4 = arith.constant 0 : index
    %3 = vector.load %arg3[%c0_3, %c0_4] : memref<1x128xf32, #tpu.memory_space<vmem>>, vector<1x128xf32>
    %4 = vector.broadcast %3 : vector<1x128xf32> to vector<256x128xf32>
    %5 = arith.addf %2, %4 : vector<256x128xf32>
    %6 = vector.extract_strided_slice %5 {offsets = [0, 32], sizes = [256, 4], strides = [1, 1]} : vector<256x128xf32> to vector<256x4xf32>
    %cst_5 = arith.constant dense<0xFF800000> : vector<256xf32>
    %7 = vector.multi_reduction <maximumf>, %6, %cst_5 [1] : vector<256x4xf32> to vector<256xf32>
    %8 = vector.shape_cast %7 : vector<256xf32> to vector<256x1xf32>
    %9 = vector.broadcast %8 : vector<256x1xf32> to vector<256x4xf32>
    %10 = arith.subf %6, %9 : vector<256x4xf32>
    %11 = math.exp %10 : vector<256x4xf32>
    %cst_6 = arith.constant dense<0.000000e+00> : vector<256xf32>
    %12 = vector.multi_reduction <add>, %11, %cst_6 [1] : vector<256x4xf32> to vector<256xf32>
    %13 = vector.shape_cast %12 : vector<256xf32> to vector<256x1xf32>
    %14 = tpu.reciprocal %13 {approx = true} : vector<256x1xf32> -> vector<256x1xf32>
    %15 = vector.broadcast %14 : vector<256x1xf32> to vector<256x4xf32>
    %16 = arith.mulf %11, %15 : vector<256x4xf32>
    %cst_7 = arith.constant 2.000000e-01 : f32
    %17 = vector.broadcast %cst_7 : f32 to vector<256x4xf32>
    %18 = arith.cmpf ogt, %16, %17 : vector<256x4xf32>
    %19 = arith.extui %18 : vector<256x4xi1> to vector<256x4xi32>
    %20 = tpu.iota {dimensions = array<i32: 1>} : vector<256x4xi32>
    %c0_i32 = arith.constant 0 : i32
    %21 = vector.broadcast %c0_i32 : i32 to vector<256x4xi32>
    %22 = arith.cmpi eq, %20, %21 : vector<256x4xi32>
    %c0_i32_8 = arith.constant 0 : i32
    %23 = vector.broadcast %c0_i32_8 : i32 to vector<256x4xi32>
    %24 = arith.select %22, %19, %23 : vector<256x4xi1>, vector<256x4xi32>
    %cst_9 = arith.constant dense<-2147483648> : vector<256xi32>
    %25 = vector.multi_reduction <maxsi>, %24, %cst_9 [1] : vector<256x4xi32> to vector<256xi32>
    %26 = vector.shape_cast %25 : vector<256xi32> to vector<256x1xi32>
    %c1_i32 = arith.constant 1 : i32
    %27 = vector.broadcast %c1_i32 : i32 to vector<256x1xi32>
    %28 = arith.cmpi eq, %26, %27 : vector<256x1xi32>
    %c0_i32_10 = arith.constant 0 : i32
    %29 = vector.broadcast %c0_i32_10 : i32 to vector<256x4xi32>
    %30 = arith.cmpi sgt, %20, %29 : vector<256x4xi32>
    %c0_i32_11 = arith.constant 0 : i32
    %31 = vector.broadcast %c0_i32_11 : i32 to vector<256x4xi32>
    %32 = arith.select %30, %19, %31 : vector<256x4xi1>, vector<256x4xi32>
    %cst_12 = arith.constant dense<-2147483648> : vector<256xi32>
    %33 = vector.multi_reduction <maxsi>, %32, %cst_12 [1] : vector<256x4xi32> to vector<256xi32>
    %34 = vector.shape_cast %33 : vector<256xi32> to vector<256x1xi32>
    %c1_i32_13 = arith.constant 1 : i32
    %35 = vector.broadcast %c1_i32_13 : i32 to vector<256x1xi32>
    %36 = arith.cmpi eq, %34, %35 : vector<256x1xi32>
    %cst_14 = arith.constant dense<true> : vector<256x1xi1>
    %37 = arith.xori %28, %cst_14 : vector<256x1xi1>
    %38 = arith.andi %37, %36 : vector<256x1xi1>
    %39 = arith.extui %38 : vector<256x1xi1> to vector<256x1xi32>
    %40 = arith.sitofp %39 : vector<256x1xi32> to vector<256x1xf32>
    %cst_15 = arith.constant dense<0xFF800000> : vector<256xf32>
    %41 = vector.multi_reduction <maximumf>, %16, %cst_15 [1] : vector<256x4xf32> to vector<256xf32>
    %42 = vector.shape_cast %41 : vector<256xf32> to vector<256x1xf32>
    %43 = tpu.iota {dimensions = array<i32: 1>} : vector<256x128xi32>
    %c40_i32 = arith.constant 40 : i32
    %44 = vector.broadcast %c40_i32 : i32 to vector<256x128xi32>
    %45 = arith.cmpi eq, %43, %44 : vector<256x128xi32>
    %46 = vector.shape_cast %40 : vector<256x1xf32> to vector<256x1xf32>
    %47 = vector.broadcast %46 : vector<256x1xf32> to vector<256x128xf32>
    %48 = arith.select %45, %47, %5 : vector<256x128xi1>, vector<256x128xf32>
    %c41_i32 = arith.constant 41 : i32
    %49 = vector.broadcast %c41_i32 : i32 to vector<256x128xi32>
    %50 = arith.cmpi eq, %43, %49 : vector<256x128xi32>
    %51 = vector.shape_cast %42 : vector<256x1xf32> to vector<256x1xf32>
    %52 = vector.broadcast %51 : vector<256x1xf32> to vector<256x128xf32>
    %53 = arith.select %50, %52, %48 : vector<256x128xi1>, vector<256x128xf32>
    %54 = arith.truncf %53 : vector<256x128xf32> to vector<256x128xbf16>
    %c0_16 = arith.constant 0 : index
    %c0_17 = arith.constant 0 : index
    %55 = vector.load %arg4[%c0_16, %c0_17] : memref<256x128xbf16, #tpu.memory_space<vmem>>, vector<256x128xbf16>
    tpu.vector_store %arg4[%c0_16, %c0_17], %54 {strides = array<i32>} : memref<256x128xbf16, #tpu.memory_space<vmem>>, vector<256x128xbf16>,
    return
  }
  func.func @transform_0(%arg0: i32) -> (i32, i32) {
    %c0_i32 = arith.constant 0 : i32
    %c0_i32_0 = arith.constant 0 : i32
    return %arg0, %c0_i32 : i32, i32
  }
  func.func @transform_1(%arg0: i32) -> (i32, i32) {
    %c0_i32 = arith.constant 0 : i32
    %c0_i32_0 = arith.constant 0 : i32
    %c0_i32_1 = arith.constant 0 : i32
    return %c0_i32, %c0_i32_0 : i32, i32
  }
  func.func @transform_2(%arg0: i32) -> (i32, i32) {
    %c0_i32 = arith.constant 0 : i32
    %c0_i32_0 = arith.constant 0 : i32
    %c0_i32_1 = arith.constant 0 : i32
    return %c0_i32, %c0_i32_0 : i32, i32
  }
  func.func @transform_3(%arg0: i32) -> (i32, i32) {
    %c0_i32 = arith.constant 0 : i32
    %c0_i32_0 = arith.constant 0 : i32
    return %arg0, %c0_i32 : i32, i32
  }
}

module attributes {stable_mosaic.version = 11 : i64} {
  func.func @_pool_pos_kernel(%arg0: i32, %arg1: memref<1x256x128xbf16, #tpu.memory_space<vmem>>, %arg2: memref<1x256x128xbf16, #tpu.memory_space<vmem>>, %arg3: memref<1x256x128xbf16, #tpu.memory_space<vmem>>, %arg4: memref<1x1x256xf32, #tpu.memory_space<vmem>>, %arg5: memref<1x1x32xf32, #tpu.memory_space<vmem>>, %arg6: memref<1x1x4xf32, #tpu.memory_space<vmem>>) attributes {dimension_semantics = [#tpu.dimension_semantics<parallel>], iteration_bounds = array<i64: 2>, scalar_prefetch = 0 : i64, scratch_operands = 0 : i64, tpu.core_type = #tpu.core_type<tc>, window_params = [{transform_indices = @transform_0, window_bounds = array<i64: 1, 256, 128>}, {transform_indices = @transform_1, window_bounds = array<i64: 1, 256, 128>}, {transform_indices = @transform_2, window_bounds = array<i64: 1, 256, 128>}, {transform_indices = @transform_3, window_bounds = array<i64: 1, 1, 256>}, {transform_indices = @transform_4, window_bounds = array<i64: 1, 1, 32>}, {transform_indices = @transform_5, window_bounds = array<i64: 1, 1, 4>}]} {
    %c0 = arith.constant 0 : index
    %c0_0 = arith.constant 0 : index
    %c0_1 = arith.constant 0 : index
    %0 = vector.load %arg1[%c0, %c0_0, %c0_1] : memref<1x256x128xbf16, #tpu.memory_space<vmem>>, vector<1x256x128xbf16>
    %1 = vector.shape_cast %0 : vector<1x256x128xbf16> to vector<256x128xbf16>
    %c0_2 = arith.constant 0 : index
    %c0_3 = arith.constant 0 : index
    %c0_4 = arith.constant 0 : index
    %2 = vector.load %arg2[%c0_2, %c0_3, %c0_4] : memref<1x256x128xbf16, #tpu.memory_space<vmem>>, vector<1x256x128xbf16>
    %3 = vector.shape_cast %2 : vector<1x256x128xbf16> to vector<256x128xbf16>
    %c0_5 = arith.constant 0 : index
    %c0_6 = arith.constant 0 : index
    %c0_7 = arith.constant 0 : index
    %4 = vector.load %arg3[%c0_5, %c0_6, %c0_7] : memref<1x256x128xbf16, #tpu.memory_space<vmem>>, vector<1x256x128xbf16>
    %5 = vector.shape_cast %4 : vector<1x256x128xbf16> to vector<256x128xbf16>
    %6 = vector.extract_strided_slice %1 {offsets = [0, 0], sizes = [256, 32], strides = [1, 1]} : vector<256x128xbf16> to vector<256x32xbf16>
    %7 = arith.extf %6 : vector<256x32xbf16> to vector<256x32xf32>
    %8 = vector.extract_strided_slice %1 {offsets = [0, 40], sizes = [256, 1], strides = [1, 1]} : vector<256x128xbf16> to vector<256x1xbf16>
    %9 = arith.extf %8 : vector<256x1xbf16> to vector<256x1xf32>
    %10 = vector.extract_strided_slice %3 {offsets = [0, 0], sizes = [256, 32], strides = [1, 1]} : vector<256x128xbf16> to vector<256x32xbf16>
    %11 = arith.extf %10 : vector<256x32xbf16> to vector<256x32xf32>
    %12 = vector.extract_strided_slice %3 {offsets = [0, 40], sizes = [256, 1], strides = [1, 1]} : vector<256x128xbf16> to vector<256x1xbf16>
    %13 = arith.extf %12 : vector<256x1xbf16> to vector<256x1xf32>
    %14 = vector.extract_strided_slice %3 {offsets = [0, 41], sizes = [256, 1], strides = [1, 1]} : vector<256x128xbf16> to vector<256x1xbf16>
    %15 = arith.extf %14 : vector<256x1xbf16> to vector<256x1xf32>
    %16 = arith.mulf %13, %15 : vector<256x1xf32>
    %17 = vector.extract_strided_slice %5 {offsets = [0, 0], sizes = [256, 32], strides = [1, 1]} : vector<256x128xbf16> to vector<256x32xbf16>
    %18 = arith.extf %17 : vector<256x32xbf16> to vector<256x32xf32>
    %19 = arith.mulf %11, %11 : vector<256x32xf32>
    %cst = arith.constant dense<0.000000e+00> : vector<256xf32>
    %20 = vector.multi_reduction <add>, %19, %cst [1] : vector<256x32xf32> to vector<256xf32>
    %21 = vector.shape_cast %20 : vector<256xf32> to vector<256x1xf32>
    %cst_8 = arith.constant 1.000000e-24 : f32
    %22 = vector.broadcast %cst_8 : f32 to vector<256x1xf32>
    %23 = arith.maximumf %21, %22 : vector<256x1xf32>
    %24 = math.rsqrt %23 : vector<256x1xf32>
    %25 = vector.broadcast %24 : vector<256x1xf32> to vector<256x32xf32>
    %26 = arith.mulf %11, %25 : vector<256x32xf32>
    %cst_9 = arith.constant dense<0.000000e+00> : vector<1xf32>
    %27 = vector.multi_reduction <add>, %16, %cst_9 [0] : vector<256x1xf32> to vector<1xf32>
    %28 = vector.shape_cast %27 : vector<1xf32> to vector<1x1xf32>
    %cst_10 = arith.constant 1.000000e+00 : f32
    %29 = vector.broadcast %cst_10 : f32 to vector<1x1xf32>
    %30 = arith.maximumf %28, %29 : vector<1x1xf32>
    %31 = vector.broadcast %16 : vector<256x1xf32> to vector<256x32xf32>
    %32 = arith.mulf %26, %31 : vector<256x32xf32>
    %cst_11 = arith.constant dense<0.000000e+00> : vector<32xf32>
    %33 = vector.multi_reduction <add>, %32, %cst_11 [0] : vector<256x32xf32> to vector<32xf32>
    %34 = vector.shape_cast %33 : vector<32xf32> to vector<1x32xf32>
    %35 = tpu.reciprocal %30 {approx = true} : vector<1x1xf32> -> vector<1x1xf32>
    %36 = vector.broadcast %35 : vector<1x1xf32> to vector<1x32xf32>
    %37 = arith.mulf %34, %36 : vector<1x32xf32>
    %38 = arith.mulf %37, %37 : vector<1x32xf32>
    %cst_12 = arith.constant dense<0.000000e+00> : vector<1xf32>
    %39 = vector.multi_reduction <add>, %38, %cst_12 [1] : vector<1x32xf32> to vector<1xf32>
    %40 = vector.shape_cast %39 : vector<1xf32> to vector<1x1xf32>
    %cst_13 = arith.constant 1.000000e-24 : f32
    %41 = vector.broadcast %cst_13 : f32 to vector<1x1xf32>
    %42 = arith.maximumf %40, %41 : vector<1x1xf32>
    %43 = math.rsqrt %42 : vector<1x1xf32>
    %44 = vector.broadcast %43 : vector<1x1xf32> to vector<1x32xf32>
    %45 = arith.mulf %37, %44 : vector<1x32xf32>
    %46 = vector.broadcast %9 : vector<256x1xf32> to vector<256x32xf32>
    %47 = arith.mulf %7, %46 : vector<256x32xf32>
    %48 = arith.mulf %47, %47 : vector<256x32xf32>
    %cst_14 = arith.constant dense<0.000000e+00> : vector<32xf32>
    %49 = vector.multi_reduction <add>, %48, %cst_14 [0] : vector<256x32xf32> to vector<32xf32>
    %50 = vector.shape_cast %49 : vector<32xf32> to vector<1x32xf32>
    %cst_15 = arith.constant 1.000000e-24 : f32
    %51 = vector.broadcast %cst_15 : f32 to vector<1x32xf32>
    %52 = arith.maximumf %50, %51 : vector<1x32xf32>
    %53 = math.rsqrt %52 : vector<1x32xf32>
    %54 = vector.broadcast %53 : vector<1x32xf32> to vector<256x32xf32>
    %55 = arith.mulf %47, %54 : vector<256x32xf32>
    "tpu.trace_start"() <{level = 10 : i32, message = "od,pd->op"}> : () -> ()
    %cst_16 = arith.constant dense<0.000000e+00> : vector<1x256xf32>
    %56 = tpu.matmul %45, %55, %cst_16 {dimension_numbers = #tpu.dot_dimension_numbers<[1], [1], [0], [0], [0, 0, 1, 0], [], []>} : vector<1x32xf32>, vector<256x32xf32>, vector<1x256xf32> -> vector<1x256xf32>
    "tpu.trace_stop"() : () -> ()
    %cst_17 = arith.constant 14.2857141 : f32
    %57 = vector.broadcast %cst_17 : f32 to vector<1x256xf32>
    %58 = arith.mulf %56, %57 : vector<1x256xf32>
    %c0_18 = arith.constant 0 : index
    %c0_19 = arith.constant 0 : index
    %c0_20 = arith.constant 0 : index
    %59 = vector.load %arg4[%c0_18, %c0_19, %c0_20] : memref<1x1x256xf32, #tpu.memory_space<vmem>>, vector<1x1x256xf32>
    %60 = vector.shape_cast %59 : vector<1x1x256xf32> to vector<1x256xf32>
    %61 = vector.shape_cast %58 : vector<1x256xf32> to vector<1x1x256xf32>
    tpu.vector_store %arg4[%c0_18, %c0_19, %c0_20], %61 {strides = array<i32>} : memref<1x1x256xf32, #tpu.memory_space<vmem>>, vector<1x1x256xf32>,
    %cst_21 = arith.constant dense<0.000000e+00> : vector<32xf32>
    %62 = vector.multi_reduction <add>, %18, %cst_21 [0] : vector<256x32xf32> to vector<32xf32>
    %63 = vector.shape_cast %62 : vector<32xf32> to vector<1x32xf32>
    %cst_22 = arith.constant 2.560000e+02 : f32
    %64 = vector.broadcast %cst_22 : f32 to vector<1x32xf32>
    %65 = arith.divf %63, %64 : vector<1x32xf32>
    %66 = arith.mulf %65, %65 : vector<1x32xf32>
    %cst_23 = arith.constant dense<0.000000e+00> : vector<1xf32>
    %67 = vector.multi_reduction <add>, %66, %cst_23 [1] : vector<1x32xf32> to vector<1xf32>
    %68 = vector.shape_cast %67 : vector<1xf32> to vector<1x1xf32>
    %cst_24 = arith.constant 1.000000e-24 : f32
    %69 = vector.broadcast %cst_24 : f32 to vector<1x1xf32>
    %70 = arith.maximumf %68, %69 : vector<1x1xf32>
    %71 = math.rsqrt %70 : vector<1x1xf32>
    %72 = vector.broadcast %71 : vector<1x1xf32> to vector<1x32xf32>
    %73 = arith.mulf %65, %72 : vector<1x32xf32>
    %c0_25 = arith.constant 0 : index
    %c0_26 = arith.constant 0 : index
    %c0_27 = arith.constant 0 : index
    %74 = vector.load %arg5[%c0_25, %c0_26, %c0_27] : memref<1x1x32xf32, #tpu.memory_space<vmem>>, vector<1x1x32xf32>
    %75 = vector.shape_cast %74 : vector<1x1x32xf32> to vector<1x32xf32>
    %76 = vector.shape_cast %73 : vector<1x32xf32> to vector<1x1x32xf32>
    tpu.vector_store %arg5[%c0_25, %c0_26, %c0_27], %76 {strides = array<i32>} : memref<1x1x32xf32, #tpu.memory_space<vmem>>, vector<1x1x32xf32>,
    %77 = vector.extract_strided_slice %1 {offsets = [0, 36], sizes = [256, 4], strides = [1, 1]} : vector<256x128xbf16> to vector<256x4xbf16>
    %78 = arith.extf %77 : vector<256x4xbf16> to vector<256x4xf32>
    %cst_28 = arith.constant dense<0.000000e+00> : vector<4xf32>
    %79 = vector.multi_reduction <add>, %78, %cst_28 [0] : vector<256x4xf32> to vector<4xf32>
    %80 = vector.shape_cast %79 : vector<4xf32> to vector<1x4xf32>
    %cst_29 = arith.constant 2.560000e+02 : f32
    %81 = vector.broadcast %cst_29 : f32 to vector<1x4xf32>
    %82 = arith.divf %80, %81 : vector<1x4xf32>
    %c0_30 = arith.constant 0 : index
    %c0_31 = arith.constant 0 : index
    %c0_32 = arith.constant 0 : index
    %83 = vector.load %arg6[%c0_30, %c0_31, %c0_32] : memref<1x1x4xf32, #tpu.memory_space<vmem>>, vector<1x1x4xf32>
    %84 = vector.shape_cast %83 : vector<1x1x4xf32> to vector<1x4xf32>
    %85 = vector.shape_cast %82 : vector<1x4xf32> to vector<1x1x4xf32>
    tpu.vector_store %arg6[%c0_30, %c0_31, %c0_32], %85 {strides = array<i32>} : memref<1x1x4xf32, #tpu.memory_space<vmem>>, vector<1x1x4xf32>,
    return
  }
  func.func @transform_0(%arg0: i32) -> (i32, i32, i32) {
    %c0_i32 = arith.constant 0 : i32
    %c0_i32_0 = arith.constant 0 : i32
    %c0_i32_1 = arith.constant 0 : i32
    return %arg0, %c0_i32, %c0_i32_0 : i32, i32, i32
  }
  func.func @transform_1(%arg0: i32) -> (i32, i32, i32) {
    %c0_i32 = arith.constant 0 : i32
    %c0_i32_0 = arith.constant 0 : i32
    %c0_i32_1 = arith.constant 0 : i32
    return %arg0, %c0_i32, %c0_i32_0 : i32, i32, i32
  }
  func.func @transform_2(%arg0: i32) -> (i32, i32, i32) {
    %c0_i32 = arith.constant 0 : i32
    %c0_i32_0 = arith.constant 0 : i32
    %c0_i32_1 = arith.constant 0 : i32
    return %arg0, %c0_i32, %c0_i32_0 : i32, i32, i32
  }
  func.func @transform_3(%arg0: i32) -> (i32, i32, i32) {
    %c0_i32 = arith.constant 0 : i32
    %c0_i32_0 = arith.constant 0 : i32
    %c0_i32_1 = arith.constant 0 : i32
    return %arg0, %c0_i32, %c0_i32_0 : i32, i32, i32
  }
  func.func @transform_4(%arg0: i32) -> (i32, i32, i32) {
    %c0_i32 = arith.constant 0 : i32
    %c0_i32_0 = arith.constant 0 : i32
    %c0_i32_1 = arith.constant 0 : i32
    return %arg0, %c0_i32, %c0_i32_0 : i32, i32, i32
  }
  func.func @transform_5(%arg0: i32) -> (i32, i32, i32) {
    %c0_i32 = arith.constant 0 : i32
    %c0_i32_0 = arith.constant 0 : i32
    %c0_i32_1 = arith.constant 0 : i32
    return %arg0, %c0_i32, %c0_i32_0 : i32, i32, i32
  }
}

module attributes {stable_mosaic.version = 11 : i64} {
  func.func @_neg_sim_kernel(%arg0: i32, %arg1: i32, %arg2: memref<256x128xbf16, #tpu.memory_space<vmem>>, %arg3: memref<32x128xbf16, #tpu.memory_space<vmem>>, %arg4: memref<256x128xf32, #tpu.memory_space<vmem>>) attributes {dimension_semantics = [#tpu.dimension_semantics<parallel>, #tpu.dimension_semantics<parallel>], iteration_bounds = array<i64: 2, 1>, scalar_prefetch = 0 : i64, scratch_operands = 0 : i64, tpu.core_type = #tpu.core_type<tc>, window_params = [{transform_indices = @transform_0, window_bounds = array<i64: 256, 128>}, {transform_indices = @transform_1, window_bounds = array<i64: 32, 128>}, {transform_indices = @transform_2, window_bounds = array<i64: 256, 128>}]} {
    %c0 = arith.constant 0 : index
    %c0_0 = arith.constant 0 : index
    %0 = vector.load %arg2[%c0, %c0_0] : memref<256x128xbf16, #tpu.memory_space<vmem>>, vector<256x128xbf16>
    %1 = vector.extract_strided_slice %0 {offsets = [0, 0], sizes = [256, 32], strides = [1, 1]} : vector<256x128xbf16> to vector<256x32xbf16>
    %2 = arith.extf %1 : vector<256x32xbf16> to vector<256x32xf32>
    %3 = vector.extract_strided_slice %0 {offsets = [0, 40], sizes = [256, 1], strides = [1, 1]} : vector<256x128xbf16> to vector<256x1xbf16>
    %4 = arith.extf %3 : vector<256x1xbf16> to vector<256x1xf32>
    %5 = arith.mulf %2, %2 : vector<256x32xf32>
    %cst = arith.constant dense<0.000000e+00> : vector<256xf32>
    %6 = vector.multi_reduction <add>, %5, %cst [1] : vector<256x32xf32> to vector<256xf32>
    %7 = vector.shape_cast %6 : vector<256xf32> to vector<256x1xf32>
    %cst_1 = arith.constant 1.000000e-24 : f32
    %8 = vector.broadcast %cst_1 : f32 to vector<256x1xf32>
    %9 = arith.maximumf %7, %8 : vector<256x1xf32>
    %10 = math.rsqrt %9 : vector<256x1xf32>
    %11 = vector.broadcast %10 : vector<256x1xf32> to vector<256x32xf32>
    %12 = arith.mulf %2, %11 : vector<256x32xf32>
    %cst_2 = arith.constant 14.2857141 : f32
    %13 = vector.broadcast %cst_2 : f32 to vector<256x1xf32>
    %14 = arith.mulf %4, %13 : vector<256x1xf32>
    %15 = vector.broadcast %14 : vector<256x1xf32> to vector<256x32xf32>
    %16 = arith.mulf %12, %15 : vector<256x32xf32>
    %17 = arith.truncf %16 : vector<256x32xf32> to vector<256x32xbf16>
    %c0_3 = arith.constant 0 : index
    %c0_4 = arith.constant 0 : index
    %18 = vector.load %arg3[%c0_3, %c0_4] : memref<32x128xbf16, #tpu.memory_space<vmem>>, vector<32x128xbf16>
    %cst_5 = arith.constant dense<0.000000e+00> : vector<256x128xf32>
    %19 = tpu.matmul %17, %18, %cst_5 {dimension_numbers = #tpu.dot_dimension_numbers<[1], [0], [0], [1], [0, 0, 1, 1], [], []>} : vector<256x32xbf16>, vector<32x128xbf16>, vector<256x128xf32> -> vector<256x128xf32>
    %c0_6 = arith.constant 0 : index
    %c0_7 = arith.constant 0 : index
    %20 = vector.load %arg4[%c0_6, %c0_7] : memref<256x128xf32, #tpu.memory_space<vmem>>, vector<256x128xf32>
    tpu.vector_store %arg4[%c0_6, %c0_7], %19 {strides = array<i32>} : memref<256x128xf32, #tpu.memory_space<vmem>>, vector<256x128xf32>,
    return
  }
  func.func @transform_0(%arg0: i32, %arg1: i32) -> (i32, i32) {
    %c0_i32 = arith.constant 0 : i32
    %c0_i32_0 = arith.constant 0 : i32
    return %arg0, %c0_i32 : i32, i32
  }
  func.func @transform_1(%arg0: i32, %arg1: i32) -> (i32, i32) {
    %c0_i32 = arith.constant 0 : i32
    %c0_i32_0 = arith.constant 0 : i32
    return %c0_i32, %arg1 : i32, i32
  }
  func.func @transform_2(%arg0: i32, %arg1: i32) -> (i32, i32) {
    %c0_i32 = arith.constant 0 : i32
    return %arg0, %arg1 : i32, i32
  }
}

</mosaic_0001>

<bundles_post_ra>
// kernel: _device_forward.7
= control target key start
LH: loop header
LB: loop body
LE: loop exit
PB: predicated region body
PF: predicated region fallthrough
CT: control target
= control target key end

     0   :  { %s3195_s12 = smov 0   ;;  %s5405_s0 = inlined_call_operand.vmem [shape: bf16[512,8], index: 0, kind: input, shape index: {}]   ;;  %s5406_s1 = inlined_call_operand.vmem [shape: bf16[8,128], index: 1, kind: input, shape index: {}]   ;;  %s5407_s2 = inlined_call_operand.vmem [shape: f32[1,128], index: 2, kind: input, shape index: {}]   ;;  %s5408_s3 = inlined_call_operand.vmem [shape: bf16[512,128], index: 3, kind: output, shape index: {}]  }
   0x1 LB: > { %s2717_s13 = sadd.s32 4294967295, %s3169_s12   ;;  %p2721_p0 = scmp.ge.s32.totalorder %s3169_s12, 1  ;;  %s3169_s12 = sphi %s3195_s12, %s13_s12  }
   0x2   : > { %p138_p1 = scmp.lt.s32.totalorder %s3169_s12, 3 }
   0x4   : > { %p139_p2 = pnand %p2721_p0, %p138_p1 }
   0x6   : > { %142 = sbr.rel (%p139_p2) target bundleno = 1559 (0x617), region = 32 }
   0xb   : > { %v207_v0 = vld [vmem:[%s5406_s1] sm:$0xf]  ;;  %vm344_vm0 = vcmask 1043456   ;;  %s2722_s16 = sshll.u32 %s2717_s13, 5  ;;  %vm295_vm1 = vcmask 64512   ;;  %vm509_vm2 = vcmask 294144  }
   0xc   : > { %3005 = vmatprep.subr.msk.bf16.mxu0 %vm344_vm0, %v207_v0  ;;  %3006 = vmatprep.subr.msk.bf16.mxu1 %vm344_vm0, %v207_v0  ;;  %v346_v1 = vsel %vm344_vm0, %v207_v0, 0  ;;  %p163_p3 = scmp.lt.s32.totalorder %s2722_s16, 63  ;;  %v3251_v18 = vld [vmem:[%s5407_s2] ss:$0 sm:$0xff]  ;;  %s3171_s23 = smov 96   ;;  %vm830_vm3 = vcmask 31744  }
   0xd   : > { %2970 = vmatpush3.bf16.msra.mxu0 %v346_v1  ;;  %3004 = vmatpush3.bf16.msra.mxu1 %v346_v1 }
   0xe   : > { %s5940_s16 = smov (!%p163_p3, %s2722_s16), 63 }
   0xf   : > { %s2723_s17 = sshll.u32 %s5940_s16, 2 }
  0x10   : > { %s3214_s20 = scalar_lea.vmem %s5405_s0, %s2723_s17  ;;  %s4838_s26 = scalar_lea.vmem %s5408_s3, %s2723_s17 }
  0x11   : > { %v3019_v2 = vld [vmem:[%s3214_s20] sm:$0xff]   ;;  %v3021_v4 = vld [vmem:[%s3214_s20 + $0x8] sm:$0xff]   ;;  %v3023_v6 = vld [vmem:[%s3214_s20 + $0x10] sm:$0xff]  }
  0x12   : > { %v3020_v3 = vld [vmem:[%s3214_s20 + $0x40] sm:$0xff]   ;;  %2971 = vmatprep.mubr.msk.bf16.mxu0 %vm295_vm1, %v3019_v2  ;;  %v3022_v5 = vld [vmem:[%s3214_s20 + $0x48] sm:$0xff]   ;;  %v3025_v7 = vld [vmem:[%s3214_s20 + $0x50] sm:$0xff]  }
  0x13   : > { %2987 = vmatprep.mubr.msk.bf16.mxu1 %vm295_vm1, %v3020_v3  ;;  %2972 = vmatmul.mubr.msk.bf16.vlgmr.msra.gmra.mxu0 %vm295_vm1, %v3021_v4  ;;  %v3024_v8 = vld [vmem:[%s3214_s20 + $0x18] sm:$0xff]   ;;  %v3027_v10 = vld [vmem:[%s3214_s20 + $0x20] sm:$0xff]   ;;  %v3028_v12 = vld [vmem:[%s3214_s20 + $0x28] sm:$0xff]  }
  0x14   : > { %2988 = vmatmul.mubr.msk.bf16.vlgmr.msra.gmra.mxu1 %vm295_vm1, %v3022_v5  ;;  %2975 = vmatprep.mubr.msk.bf16.mxu0 %vm295_vm1, %v3023_v6  ;;  %v3026_v9 = vld [vmem:[%s3214_s20 + $0x58] sm:$0xff]   ;;  %v3029_v11 = vld [vmem:[%s3214_s20 + $0x60] sm:$0xff]   ;;  %v3030_v13 = vld [vmem:[%s3214_s20 + $0x68] sm:$0xff]  }
  0x15   : > { %2991 = vmatprep.mubr.msk.bf16.mxu1 %vm295_vm1, %v3025_v7  ;;  %v3031_v14 = vld [vmem:[%s3214_s20 + $0x30] sm:$0xff]   ;;  %v3032_v16 = vld [vmem:[%s3214_s20 + $0x38] sm:$0xff]  }
  0x16   : > { %v3033_v15 = vld [vmem:[%s3214_s20 + $0x70] sm:$0xff]   ;;  %v3034_v17 = vld [vmem:[%s3214_s20 + $0x78] sm:$0xff]  }
  0x1b   : > { %2976 = vmatmul.mubr.msk.bf16.gmra.mxu0 %vm295_vm1, %v3024_v8 }
  0x1c   : > { %2992 = vmatmul.mubr.msk.bf16.gmra.mxu1 %vm295_vm1, %v3026_v9  ;;  %2979 = vmatprep.mubr.msk.bf16.mxu0 %vm295_vm1, %v3027_v10 }
  0x1d   : > { %2995 = vmatprep.mubr.msk.bf16.mxu1 %vm295_vm1, %v3029_v11 }
  0x23   : > { %2980 = vmatmul.mubr.msk.bf16.gmra.mxu0 %vm295_vm1, %v3028_v12 }
  0x24   : > { %2996 = vmatmul.mubr.msk.bf16.gmra.mxu1 %vm295_vm1, %v3030_v13  ;;  %2983 = vmatprep.mubr.msk.bf16.mxu0 %vm295_vm1, %v3031_v14 }
  0x25   : > { %2999 = vmatprep.mubr.msk.bf16.mxu1 %vm295_vm1, %v3033_v15 }
  0x2b   : > { %2984 = vmatmul.mubr.msk.bf16.gmra.mxu0 %vm295_vm1, %v3032_v16 }
  0x2c   : > { %3000 = vmatmul.mubr.msk.bf16.gmra.mxu1 %vm295_vm1, %v3034_v17 }
  0xd3   : > { %v2973_v19 = vpop.f32.mrf.mxu0 }
  0xd4   : > { %v3254_v20 = vadd.f32 %v2973_v19, %v3251_v18  ;;  %v2989_v21 = vpop.f32.mrf.mxu1 }
  0xd5   : > { %v3257_v22 = vadd.f32 %v2989_v21, %v3251_v18  ;;  %v382_v23 = vpop.f32.mrf.mxu0 }
  0xd6   : > { %5560 = vst [vmem:[#allocation2_spill] sm:$0xff] %v3254_v20  ;;  %v516_v24 = vsel %vm509_vm2, %v3254_v20, -inf  ;;  %v446_v25 = vpop.f32.mrf.mxu1  ;;  %v3262_v26 = vadd.f32 %v3251_v18, %v382_v23 }
  0xd7   : > { %5561 = vst [vmem:[#allocation3_spill] sm:$0xff] %v3257_v22  ;;  %v564_v27 = vsel %vm509_vm2, %v3257_v22, -inf  ;;  %517 = vmax.xlane.f32.xlu1 %v516_v24  ;;  %v2974_v28 = vpop.f32.mrf.mxu0  ;;  %v3270_v32 = vadd.f32 %v3251_v18, %v446_v25 }
  0xd8   : > { %5562 = vst [vmem:[#allocation4_spill] sm:$0xff] %v3262_v26  ;;  %565 = vmax.xlane.f32.xlu0 %v564_v27  ;;  %v3267_v29 = vadd.f32 %v2974_v28, %v3251_v18  ;;  %v2990_v30 = vpop.f32.mrf.mxu1  ;;  %v510_v36 = vsel %vm509_vm2, %v3262_v26, -inf }
  0xd9   : > { %v385_v31 = vpop.f32.mrf.mxu0  ;;  %5564 = vst [vmem:[#allocation6_spill] sm:$0xff] %v3270_v32  ;;  %v3273_v33 = vadd.f32 %v2990_v30, %v3251_v18  ;;  %v558_v41 = vsel %vm509_vm2, %v3270_v32, -inf }
  0xda   : > { %5563 = vst [vmem:[#allocation5_spill] sm:$0xff] %v3267_v29  ;;  %v519_v34 = vsel %vm509_vm2, %v3267_v29, -inf  ;;  %v449_v35 = vpop.f32.mrf.mxu1  ;;  %v3287_v44 = vadd.f32 %v3251_v18, %v385_v31 }
  0xdb   : > { %5565 = vst [vmem:[#allocation7_spill] sm:$0xff] %v3273_v33  ;;  %520 = vmax.xlane.f32.xlu1 %v519_v34  ;;  %v2977_v37 = vpop.f32.mrf.mxu0  ;;  %v3280_v38 = vadd.f32 %v3251_v18, %v449_v35  ;;  %v567_v39 = vsel %vm509_vm2, %v3273_v33, -inf }
  0xdc   : > { %511 = vmax.xlane.f32.xlu0 %v510_v36  ;;  %v2993_v40 = vpop.f32.mrf.mxu1  ;;  %5567 = vst [vmem:[#allocation9_spill] sm:$0xff] %v3287_v44  ;;  %v3295_v48 = vadd.f32 %v2977_v37, %v3251_v18  ;;  %v513_v50 = vsel %vm509_vm2, %v3287_v44, -inf }
  0xdd   : > { %5566 = vst [vmem:[#allocation8_spill] sm:$0xff] %v3280_v38  ;;  %v398_v42 = vpop.f32.mrf.mxu0  ;;  %v561_v46 = vsel %vm509_vm2, %v3280_v38, -inf  ;;  %v3305_v54 = vadd.f32 %v2993_v40, %v3251_v18 }
  0xde   : > { %v462_v43 = vpop.f32.mrf.mxu1  ;;  %5569 = vst [vmem:[#allocation11_spill] sm:$0xff] %v3295_v48  ;;  %v528_v55 = vsel %vm509_vm2, %v3295_v48, -inf  ;;  %v3315_v60 = vadd.f32 %v3251_v18, %v398_v42 }
  0xdf   : > { %568 = vmax.xlane.f32.xlu1 %v567_v39  ;;  %v2978_v45 = vpop.f32.mrf.mxu0  ;;  %5571 = vst [vmem:[#allocation13_spill] sm:$0xff] %v3305_v54  ;;  %v576_v61 = vsel %vm509_vm2, %v3305_v54, -inf  ;;  %v3325_v2 = vadd.f32 %v3251_v18, %v462_v43 }
  0xe0   : > { %559 = vmax.xlane.f32.xlu0 %v558_v41  ;;  %v3292_v47 = vadd.f32 %v2978_v45, %v3251_v18  ;;  %v2994_v49 = vpop.f32.mrf.mxu1  ;;  %5573 = vst [vmem:[#allocation15_spill] sm:$0xff] %v3315_v60  ;;  %v522_v3 = vsel %vm509_vm2, %v3315_v60, -inf }
  0xe1   : > { %v401_v51 = vpop.f32.mrf.mxu0  ;;  %v3300_v52 = vadd.f32 %v2994_v49, %v3251_v18  ;;  %5575 = vst [vmem:[#allocation17_spill] sm:$0xff] %v3325_v2  ;;  %v570_v9 = vsel %vm509_vm2, %v3325_v2, -inf }
  0xe2   : > { %5568 = vst [vmem:[#allocation10_spill] sm:$0xff] %v3292_v47  ;;  %v531_v53 = vsel %vm509_vm2, %v3292_v47, -inf  ;;  %v465_v57 = vpop.f32.mrf.mxu1  ;;  %v3312_v59 = vadd.f32 %v3251_v18, %v401_v51 }
  0xe3   : > { %562 = vmax.xlane.f32.xlu1 %v561_v46  ;;  %5570 = vst [vmem:[#allocation12_spill] sm:$0xff] %v3300_v52  ;;  %v2981_v56 = vpop.f32.mrf.mxu0  ;;  %v579_v58 = vsel %vm509_vm2, %v3300_v52, -inf  ;;  %v3320_v0 = vadd.f32 %v3251_v18, %v465_v57 }
  0xe4   : > { %514 = vmax.xlane.f32.xlu0 %v513_v50  ;;  %5572 = vst [vmem:[#allocation14_spill] sm:$0xff] %v3312_v59  ;;  %v2997_v63 = vpop.f32.mrf.mxu1  ;;  %v525_v1 = vsel %vm509_vm2, %v3312_v59, -inf  ;;  %v3335_v8 = vadd.f32 %v2981_v56, %v3251_v18 }
  0xe5   : > { %v414_v62 = vpop.f32.mrf.mxu0  ;;  %5574 = vst [vmem:[#allocation16_spill] sm:$0xff] %v3320_v0  ;;  %v573_v7 = vsel %vm509_vm2, %v3320_v0, -inf  ;;  %v3345_v14 = vadd.f32 %v2997_v63, %v3251_v18 }
  0xe6   : > { %v478_v5 = vpop.f32.mrf.mxu1  ;;  %5577 = vst [vmem:[#allocation19_spill] sm:$0xff] %v3335_v8  ;;  %v540_v15 = vsel %vm509_vm2, %v3335_v8, -inf  ;;  %v3355_v23 = vadd.f32 %v3251_v18, %v414_v62 }
  0xe7   : > { %532 = vmax.xlane.f32.xlu1 %v531_v53  ;;  %v2982_v4 = vpop.f32.mrf.mxu0  ;;  %5579 = vst [vmem:[#allocation21_spill] sm:$0xff] %v3345_v14  ;;  %v588_v24 = vsel %vm509_vm2, %v3345_v14, -inf  ;;  %v3365_v31 = vadd.f32 %v3251_v18, %v478_v5 }
  0xe8   : > { %529 = vmax.xlane.f32.xlu0 %v528_v55  ;;  %v3330_v6 = vadd.f32 %v2982_v4, %v3251_v18  ;;  %v2998_v10 = vpop.f32.mrf.mxu1  ;;  %5581 = vst [vmem:[#allocation23_spill] sm:$0xff] %v3355_v23  ;;  %v534_v34 = vsel %vm509_vm2, %v3355_v23, -inf }
  0xe9   : > { %v417_v11 = vpop.f32.mrf.mxu0  ;;  %v3340_v12 = vadd.f32 %v2998_v10, %v3251_v18  ;;  %5583 = vst [vmem:[#allocation25_spill] sm:$0xff] %v3365_v31  ;;  %v582_v41 = vsel %vm509_vm2, %v3365_v31, -inf }
  0xea   : > { %5576 = vst [vmem:[#allocation18_spill] sm:$0xff] %v3330_v6  ;;  %v543_v13 = vsel %vm509_vm2, %v3330_v6, -inf  ;;  %v481_v17 = vpop.f32.mrf.mxu1  ;;  %v3350_v19 = vadd.f32 %v3251_v18, %v417_v11 }
  0xeb   : > { %580 = vmax.xlane.f32.xlu1 %v579_v58  ;;  %5578 = vst [vmem:[#allocation20_spill] sm:$0xff] %v3340_v12  ;;  %v2985_v16 = vpop.f32.mrf.mxu0  ;;  %v591_v21 = vsel %vm509_vm2, %v3340_v12, -inf  ;;  %v3360_v28 = vadd.f32 %v3251_v18, %v481_v17 }
  0xec   : > { %577 = vmax.xlane.f32.xlu0 %v576_v61  ;;  %5580 = vst [vmem:[#allocation22_spill] sm:$0xff] %v3350_v19  ;;  %v3001_v27 = vpop.f32.mrf.mxu1  ;;  %v537_v30 = vsel %vm509_vm2, %v3350_v19, -inf  ;;  %v3375_v40 = vadd.f32 %v2985_v16, %v3251_v18 }
  0xed   : > { %v430_v25 = vpop.f32.mrf.mxu0  ;;  %5582 = vst [vmem:[#allocation24_spill] sm:$0xff] %v3360_v28  ;;  %v585_v39 = vsel %vm509_vm2, %v3360_v28, -inf  ;;  %v3385_v46 = vadd.f32 %v3001_v27, %v3251_v18 }
  0xee   : > { %v494_v36 = vpop.f32.mrf.mxu1  ;;  %5585 = vst [vmem:[#allocation27_spill] sm:$0xff] %v3375_v40  ;;  %v552_v49 = vsel %vm509_vm2, %v3375_v40, -inf  ;;  %v3395_v55 = vadd.f32 %v3251_v18, %v430_v25 }
  0xef   : > { %526 = vmax.xlane.f32.xlu1 %v525_v1  ;;  %v2986_v35 = vpop.f32.mrf.mxu0  ;;  %5587 = vst [vmem:[#allocation29_spill] sm:$0xff] %v3385_v46  ;;  %v600_v56 = vsel %vm509_vm2, %v3385_v46, -inf  ;;  %v3405_v62 = vadd.f32 %v3251_v18, %v494_v36 }
  0xf0   : > { %523 = vmax.xlane.f32.xlu0 %v522_v3  ;;  %v3370_v37 = vadd.f32 %v2986_v35, %v3251_v18  ;;  %v3002_v42 = vpop.f32.mrf.mxu1  ;;  %5589 = vst [vmem:[#allocation31_spill] sm:$0xff] %v3395_v55  ;;  %v546_v63 = vsel %vm509_vm2, %v3395_v55, -inf }
  0xf1   : > { %v3380_v43 = vadd.f32 %v3002_v42, %v3251_v18  ;;  %v433_v50 = vpop.f32.mrf.mxu0  ;;  %5591 = vst [vmem:[#allocation33_spill] sm:$0xff] %v3405_v62  ;;  %v594_v3 = vsel %vm509_vm2, %v3405_v62, -inf }
  0xf2   : > { %5584 = vst [vmem:[#allocation26_spill] sm:$0xff] %v3370_v37  ;;  %v555_v45 = vsel %vm509_vm2, %v3370_v37, -inf  ;;  %v3390_v51 = vadd.f32 %v3251_v18, %v433_v50  ;;  %v497_v57 = vpop.f32.mrf.mxu1 }
  0xf3   : > { %574 = vmax.xlane.f32.xlu1 %v573_v7  ;;  %5586 = vst [vmem:[#allocation28_spill] sm:$0xff] %v3380_v43  ;;  %v603_v53 = vsel %vm509_vm2, %v3380_v43, -inf  ;;  %v3400_v58 = vadd.f32 %v3251_v18, %v497_v57 }
  0xf4   : > { %571 = vmax.xlane.f32.xlu0 %v570_v9  ;;  %5588 = vst [vmem:[#allocation30_spill] sm:$0xff] %v3390_v51  ;;  %v549_v61 = vsel %vm509_vm2, %v3390_v51, -inf }
  0xf5   : > { %5590 = vst [vmem:[#allocation32_spill] sm:$0xff] %v3400_v58  ;;  %v597_v1 = vsel %vm509_vm2, %v3400_v58, -inf }
  0xf7   : > { %544 = vmax.xlane.f32.xlu1 %v543_v13 }
  0xf8   : > { %541 = vmax.xlane.f32.xlu0 %v540_v15 }
  0xfb   : > { %592 = vmax.xlane.f32.xlu1 %v591_v21 }
  0xfc   : > { %589 = vmax.xlane.f32.xlu0 %v588_v24 }
  0xff   : > { %538 = vmax.xlane.f32.xlu1 %v537_v30 }
 0x100   : > { %535 = vmax.xlane.f32.xlu0 %v534_v34 }
 0x103   : > { %586 = vmax.xlane.f32.xlu1 %v585_v39 }
 0x104   : > { %583 = vmax.xlane.f32.xlu0 %v582_v41 }
 0x107   : > { %556 = vmax.xlane.f32.xlu1 %v555_v45 }
 0x108   : > { %553 = vmax.xlane.f32.xlu0 %v552_v49 }
 0x10b   : > { %604 = vmax.xlane.f32.xlu1 %v603_v53 }
 0x10c   : > { %601 = vmax.xlane.f32.xlu0 %v600_v56 }
 0x10f   : > { %550 = vmax.xlane.f32.xlu1 %v549_v61 }
 0x110   : > { %547 = vmax.xlane.f32.xlu0 %v546_v63 }
 0x113   : > { %598 = vmax.xlane.f32.xlu1 %v597_v1 }
 0x114   : > { %595 = vmax.xlane.f32.xlu0 %v594_v3 }
 0x160   : > { %v518_v4 = vpop.xlane.xlu1 %517 }
 0x161   : > { %v566_v5 = vpop.xlane.xlu0 %565  ;;  %v608_v7 = vsub.f32 %v3254_v20, %v518_v4 }
 0x162   : > { %v624_v18 = vsub.f32 %v3257_v22, %v566_v5 }
 0x163   : > { %v642_v9 = vmul.f32 1.442695, %v608_v7 }
 0x164   : > { %v674_v10 = vmul.f32 1.442695, %v624_v18  ;;  %v521_v11 = vpop.xlane.xlu1 %520 }
 0x165   : > { %3035 = vpow2.f32 %v642_v9  ;;  %v609_v13 = vsub.f32 %v3267_v29, %v521_v11  ;;  %v512_v15 = vpop.xlane.xlu0 %511 }
 0x166   : > { %3037 = vpow2.f32 %v674_v10  ;;  %v606_v16 = vsub.f32 %v3262_v26, %v512_v15 }
 0x167   : > { %v644_v17 = vmul.f32 1.442695, %v609_v13 }
 0x168   : > { %v638_v21 = vmul.f32 1.442695, %v606_v16  ;;  %v569_v24 = vpop.xlane.xlu1 %568 }
 0x169   : > { %3039 = vpow2.f32 %v644_v17  ;;  %v625_v25 = vsub.f32 %v3273_v33, %v569_v24  ;;  %v560_v27 = vpop.xlane.xlu0 %559 }
 0x16a   : > { %3041 = vpow2.f32 %v638_v21  ;;  %v622_v30 = vsub.f32 %v3270_v32, %v560_v27 }
 0x16b   : > { %v676_v34 = vmul.f32 1.442695, %v625_v25 }
 0x16c   : > { %v670_v35 = vmul.f32 1.442695, %v622_v30  ;;  %v563_v36 = vpop.xlane.xlu1 %562 }
 0x16d   : > { %3043 = vpow2.f32 %v676_v34  ;;  %v623_v39 = vsub.f32 %v3280_v38, %v563_v36  ;;  %v515_v41 = vpop.xlane.xlu0 %514 }
 0x16e   : > { %3045 = vpow2.f32 %v670_v35  ;;  %v607_v42 = vsub.f32 %v3287_v44, %v515_v41 }
 0x16f   : > { %v672_v50 = vmul.f32 1.442695, %v623_v39 }
 0x170   : > { %v640_v45 = vmul.f32 1.442695, %v607_v42  ;;  %v533_v49 = vpop.xlane.xlu1 %532 }
 0x171   : > { %v613_v53 = vsub.f32 %v3292_v47, %v533_v49  ;;  %v530_v56 = vpop.xlane.xlu0 %529 }
 0x172   : > { %v3422_v57 = vpop.eup %3035  ;;  %3047 = vpow2.f32 %v640_v45  ;;  %v612_v61 = vsub.f32 %v3295_v48, %v530_v56 }
 0x173   : > { %v3425_v63 = vpop.eup %3037  ;;  %738 = vrot.lane.b32.xlu1 %v3422_v57, %s3171_s23  ;;  %3049 = vpow2.f32 %v672_v50  ;;  %v652_v4 = vmul.f32 1.442695, %v613_v53 }
 0x174   : > { %v650_v1 = vmul.f32 1.442695, %v612_v61  ;;  %770 = vrot.lane.b32.xlu0 %v3425_v63, %s3171_s23  ;;  %v581_v3 = vpop.xlane.xlu1 %580 }
 0x175   : > { %v629_v5 = vsub.f32 %v3300_v52, %v581_v3  ;;  %v578_v7 = vpop.xlane.xlu0 %577 }
 0x176   : > { %v3432_v18 = vpop.eup %3039  ;;  %3051 = vpow2.f32 %v650_v1  ;;  %v628_v9 = vsub.f32 %v3305_v54, %v578_v7 }
 0x177   : > { %v3435_v10 = vpop.eup %3041  ;;  %740 = vrot.lane.b32.xlu1 %v3432_v18, %s3171_s23  ;;  %3053 = vpow2.f32 %v652_v4  ;;  %v684_v15 = vmul.f32 1.442695, %v629_v5 }
 0x178   : > { %v682_v11 = vmul.f32 1.442695, %v628_v9  ;;  %734 = vrot.lane.b32.xlu0 %v3435_v10, %s3171_s23  ;;  %v527_v13 = vpop.xlane.xlu1 %526 }
 0x179   : > { %v611_v16 = vsub.f32 %v3312_v59, %v527_v13  ;;  %v524_v17 = vpop.xlane.xlu0 %523 }
 0x17a   : > { %v3442_v21 = vpop.eup %3043  ;;  %3055 = vpow2.f32 %v682_v11  ;;  %v610_v24 = vsub.f32 %v3315_v60, %v524_v17 }
 0x17b   : > { %v3445_v25 = vpop.eup %3045  ;;  %772 = vrot.lane.b32.xlu1 %v3442_v21, %s3171_s23  ;;  %3057 = vpow2.f32 %v684_v15  ;;  %v648_v34 = vmul.f32 1.442695, %v611_v16 }
 0x17c   : > { %v646_v27 = vmul.f32 1.442695, %v610_v24  ;;  %766 = vrot.lane.b32.xlu0 %v3445_v25, %s3171_s23  ;;  %v575_v30 = vpop.xlane.xlu1 %574 }
 0x17d   : > { %v627_v35 = vsub.f32 %v3320_v0, %v575_v30  ;;  %v572_v36 = vpop.xlane.xlu0 %571 }
 0x17e   : > { %3059 = vpow2.f32 %v646_v27  ;;  %v626_v39 = vsub.f32 %v3325_v2, %v572_v36 }
 0x17f   : > { %v3453_v41 = vpop.eup %3047  ;;  %3061 = vpow2.f32 %v648_v34  ;;  %v680_v49 = vmul.f32 1.442695, %v627_v35 }
 0x180   : > { %v678_v42 = vmul.f32 1.442695, %v626_v39  ;;  %736 = vrot.lane.b32.xlu1 %v3453_v41, %s3171_s23  ;;  %v545_v45 = vpop.xlane.xlu1 %544  ;;  %v3458_v56 = vpop.eup %3049 }
 0x181   : > { %v617_v50 = vsub.f32 %v3330_v6, %v545_v45  ;;  %v542_v53 = vpop.xlane.xlu0 %541 }
 0x182   : > { %3063 = vpow2.f32 %v678_v42  ;;  %v616_v61 = vsub.f32 %v3335_v8, %v542_v53 }
 0x183   : > { %v3461_v1 = vpop.eup %3051  ;;  %3065 = vpow2.f32 %v680_v49  ;;  %v660_v5 = vmul.f32 1.442695, %v617_v50 }
 0x184   : > { %v658_v3 = vmul.f32 1.442695, %v616_v61  ;;  %768 = vrot.lane.b32.xlu1 %v3458_v56, %s3171_s23  ;;  %746 = vrot.lane.b32.xlu0 %v3461_v1, %s3171_s23  ;;  %v593_v4 = vpop.xlane.xlu1 %592  ;;  %v3468_v11 = vpop.eup %3053 }
 0x185   : > { %v633_v7 = vsub.f32 %v3340_v12, %v593_v4  ;;  %v590_v9 = vpop.xlane.xlu0 %589 }
 0x186   : > { %3067 = vpow2.f32 %v658_v3  ;;  %v632_v13 = vsub.f32 %v3345_v14, %v590_v9 }
 0x187   : > { %v3471_v15 = vpop.eup %3055  ;;  %3069 = vpow2.f32 %v660_v5  ;;  %v692_v24 = vmul.f32 1.442695, %v633_v7 }
 0x188   : > { %v690_v16 = vmul.f32 1.442695, %v632_v13  ;;  %748 = vrot.lane.b32.xlu1 %v3468_v11, %s3171_s23  ;;  %778 = vrot.lane.b32.xlu0 %v3471_v15, %s3171_s23  ;;  %v539_v17 = vpop.xlane.xlu1 %538  ;;  %v3478_v34 = vpop.eup %3057 }
 0x189   : > { %v615_v27 = vsub.f32 %v3350_v19, %v539_v17  ;;  %v536_v30 = vpop.xlane.xlu0 %535 }
 0x18a   : > { %3071 = vpow2.f32 %v690_v16  ;;  %v614_v35 = vsub.f32 %v3355_v23, %v536_v30 }
 0x18b   : > { %v3481_v36 = vpop.eup %3059  ;;  %3073 = vpow2.f32 %v692_v24  ;;  %v656_v45 = vmul.f32 1.442695, %v615_v27 }
 0x18c   : > { %v654_v39 = vmul.f32 1.442695, %v614_v35  ;;  %780 = vrot.lane.b32.xlu1 %v3478_v34, %s3171_s23  ;;  %742 = vrot.lane.b32.xlu0 %v3481_v36, %s3171_s23  ;;  %v587_v42 = vpop.xlane.xlu1 %586  ;;  %v3488_v53 = vpop.eup %3061 }
 0x18d   : > { %v631_v49 = vsub.f32 %v3360_v28, %v587_v42  ;;  %v584_v50 = vpop.xlane.xlu0 %583 }
 0x18e   : > { %3075 = vpow2.f32 %v654_v39  ;;  %v630_v61 = vsub.f32 %v3365_v31, %v584_v50 }
 0x18f   : > { %v3491_v3 = vpop.eup %3063  ;;  %3077 = vpow2.f32 %v656_v45  ;;  %v688_v7 = vmul.f32 1.442695, %v631_v49 }
 0x190   : > { %v686_v4 = vmul.f32 1.442695, %v630_v61  ;;  %744 = vrot.lane.b32.xlu1 %v3488_v53, %s3171_s23  ;;  %774 = vrot.lane.b32.xlu0 %v3491_v3, %s3171_s23  ;;  %v557_v5 = vpop.xlane.xlu1 %556  ;;  %v3498_v16 = vpop.eup %3065 }
 0x191   : > { %v621_v9 = vsub.f32 %v3370_v37, %v557_v5  ;;  %v554_v13 = vpop.xlane.xlu0 %553 }
 0x192   : > { %3079 = vpow2.f32 %v686_v4  ;;  %v620_v17 = vsub.f32 %v3375_v40, %v554_v13 }
 0x193   : > { %v3501_v24 = vpop.eup %3067  ;;  %3081 = vpow2.f32 %v688_v7  ;;  %v668_v35 = vmul.f32 1.442695, %v621_v9 }
 0x194   : > { %v666_v27 = vmul.f32 1.442695, %v620_v17  ;;  %776 = vrot.lane.b32.xlu1 %v3498_v16, %s3171_s23  ;;  %754 = vrot.lane.b32.xlu0 %v3501_v24, %s3171_s23  ;;  %v605_v30 = vpop.xlane.xlu1 %604  ;;  %v3508_v45 = vpop.eup %3069 }
 0x195   : > { %v637_v39 = vsub.f32 %v3380_v43, %v605_v30  ;;  %v602_v42 = vpop.xlane.xlu0 %601 }
 0x196   : > { %3083 = vpow2.f32 %v666_v27  ;;  %v636_v49 = vsub.f32 %v3385_v46, %v602_v42 }
 0x197   : > { %v3511_v50 = vpop.eup %3071  ;;  %3085 = vpow2.f32 %v668_v35  ;;  %v700_v5 = vmul.f32 1.442695, %v637_v39 }
 0x198   : > { %v698_v61 = vmul.f32 1.442695, %v636_v49  ;;  %756 = vrot.lane.b32.xlu1 %v3508_v45, %s3171_s23  ;;  %786 = vrot.lane.b32.xlu0 %v3511_v50, %s3171_s23  ;;  %v551_v4 = vpop.xlane.xlu1 %550  ;;  %v3518_v13 = vpop.eup %3073 }
 0x199   : > { %v619_v7 = vsub.f32 %v3390_v51, %v551_v4  ;;  %v548_v9 = vpop.xlane.xlu0 %547 }
 0x19a   : > { %3087 = vpow2.f32 %v698_v61  ;;  %v618_v17 = vsub.f32 %v3395_v55, %v548_v9 }
 0x19b   : > { %v3521_v27 = vpop.eup %3075  ;;  %3089 = vpow2.f32 %v700_v5  ;;  %v664_v35 = vmul.f32 1.442695, %v619_v7 }
 0x19c   : > { %v662_v30 = vmul.f32 1.442695, %v618_v17  ;;  %788 = vrot.lane.b32.xlu1 %v3518_v13, %s3171_s23  ;;  %750 = vrot.lane.b32.xlu0 %v3521_v27, %s3171_s23  ;;  %v599_v42 = vpop.xlane.xlu1 %598  ;;  %v3527_v49 = vpop.eup %3077 }
 0x19d   : > { %v596_v39 = vpop.xlane.xlu0 %595  ;;  %v635_v61 = vsub.f32 %v3400_v58, %v599_v42 }
 0x19e   : > { %3091 = vpow2.f32 %v662_v30  ;;  %v634_v4 = vsub.f32 %v3405_v62, %v596_v39 }
 0x19f   : > { %v3531_v9 = vpop.eup %3079  ;;  %3093 = vpow2.f32 %v664_v35  ;;  %v696_v7 = vmul.f32 1.442695, %v635_v61 }
 0x1a0   : > { %v694_v17 = vmul.f32 1.442695, %v634_v4  ;;  %752 = vrot.lane.b32.xlu1 %v3527_v49, %s3171_s23  ;;  %782 = vrot.lane.b32.xlu0 %v3531_v9, %s3171_s23  ;;  %v3537_v5 = vpop.eup %3081 }
 0x1a2   : > { %3095 = vpow2.f32 %v694_v17 }
 0x1a3   : > { %v3539_v43 = vpop.eup %3083  ;;  %3097 = vpow2.f32 %v696_v7 }
 0x1a4   : > { %784 = vrot.lane.b32.xlu1 %v3537_v5, %s3171_s23  ;;  %762 = vrot.lane.b32.xlu0 %v3539_v43, %s3171_s23  ;;  %v3545_v30 = vpop.eup %3085 }
 0x1a7   : > { %v3547_v42 = vpop.eup %3087 }
 0x1a8   : > { %764 = vrot.lane.b32.xlu1 %v3545_v30, %s3171_s23  ;;  %794 = vrot.lane.b32.xlu0 %v3547_v42, %s3171_s23  ;;  %v3553_v35 = vpop.eup %3089 }
 0x1ab   : > { %v3555_v39 = vpop.eup %3091 }
 0x1ac   : > { %796 = vrot.lane.b32.xlu1 %v3553_v35, %s3171_s23  ;;  %758 = vrot.lane.b32.xlu0 %v3555_v39, %s3171_s23  ;;  %v3561_v61 = vpop.eup %3093 }
 0x1af   : > { %v3563_v4 = vpop.eup %3095 }
 0x1b0   : > { %760 = vrot.lane.b32.xlu1 %v3561_v61, %s3171_s23  ;;  %790 = vrot.lane.b32.xlu0 %v3563_v4, %s3171_s23  ;;  %v3569_v17 = vpop.eup %3097 }
 0x1b4   : > { %792 = vrot.lane.b32.xlu1 %v3569_v17, %s3171_s23 }
 0x1e5   : > { %v739_v7 = vpop.permute.xlu1 %738 }
 0x1e6   : > { %v771_v58 = vpop.permute.xlu0 %770  ;;  %v837_v46 = vsel %vm830_vm3, %v739_v7, 0.0 }
 0x1e7   : > { %838 = vadd.xlane.f32.xlu0 %v837_v46  ;;  %v885_v55 = vsel %vm830_vm3, %v771_v58, 0.0 }
 0x1e9   : > { %v741_v62 = vpop.permute.xlu1 %740 }
 0x1ea   : > { %v735_v51 = vpop.permute.xlu0 %734  ;;  %v840_v58 = vsel %vm830_vm3, %v741_v62, 0.0 }
 0x1eb   : > { %886 = vadd.xlane.f32.xlu0 %v885_v55  ;;  %v831_v28 = vsel %vm830_vm3, %v735_v51, 0.0 }
 0x1ed   : > { %v773_v37 = vpop.permute.xlu1 %772 }
 0x1ee   : > { %v888_v40 = vsel %vm830_vm3, %v773_v37, 0.0  ;;  %v767_v19 = vpop.permute.xlu0 %766 }
 0x1ef   : > { %889 = vadd.xlane.f32.xlu1 %v888_v40  ;;  %832 = vadd.xlane.f32.xlu0 %v831_v28  ;;  %v879_v12 = vsel %vm830_vm3, %v767_v19, 0.0 }
 0x1f2   : > { %v737_v23 = vpop.permute.xlu1 %736 }
 0x1f3   : > { %v834_v6 = vsel %vm830_vm3, %v737_v23, 0.0  ;;  %880 = vadd.xlane.f32.xlu0 %v879_v12 }
 0x1f4   : > { %835 = vadd.xlane.f32.xlu1 %v834_v6 }
 0x1f6   : > { %v769_v46 = vpop.permute.xlu1 %768  ;;  %v747_v7 = vpop.permute.xlu0 %746 }
 0x1f7   : > { %v882_v55 = vsel %vm830_vm3, %v769_v46, 0.0  ;;  %841 = vadd.xlane.f32.xlu0 %v840_v58  ;;  %v849_v40 = vsel %vm830_vm3, %v747_v7, 0.0 }
 0x1f8   : > { %883 = vadd.xlane.f32.xlu1 %v882_v55 }
 0x1fa   : > { %v749_v37 = vpop.permute.xlu1 %748  ;;  %v779_v51 = vpop.permute.xlu0 %778 }
 0x1fb   : > { %v852_v28 = vsel %vm830_vm3, %v749_v37, 0.0  ;;  %850 = vadd.xlane.f32.xlu0 %v849_v40  ;;  %v897_v6 = vsel %vm830_vm3, %v779_v51, 0.0 }
 0x1fc   : > { %853 = vadd.xlane.f32.xlu1 %v852_v28 }
 0x1fe   : > { %v781_v19 = vpop.permute.xlu1 %780  ;;  %v743_v23 = vpop.permute.xlu0 %742 }
 0x1ff   : > { %v900_v12 = vsel %vm830_vm3, %v781_v19, 0.0  ;;  %898 = vadd.xlane.f32.xlu0 %v897_v6  ;;  %v843_v58 = vsel %vm830_vm3, %v743_v23, 0.0 }
 0x200   : > { %901 = vadd.xlane.f32.xlu1 %v900_v12 }
 0x202   : > { %v745_v62 = vpop.permute.xlu1 %744  ;;  %v775_v46 = vpop.permute.xlu0 %774 }
 0x203   : > { %v846_v55 = vsel %vm830_vm3, %v745_v62, 0.0  ;;  %844 = vadd.xlane.f32.xlu0 %v843_v58  ;;  %v891_v40 = vsel %vm830_vm3, %v775_v46, 0.0 }
 0x204   : > { %847 = vadd.xlane.f32.xlu1 %v846_v55 }
 0x206   : > { %v777_v7 = vpop.permute.xlu1 %776  ;;  %v755_v37 = vpop.permute.xlu0 %754 }
 0x207   : > { %v894_v28 = vsel %vm830_vm3, %v777_v7, 0.0  ;;  %892 = vadd.xlane.f32.xlu0 %v891_v40  ;;  %v861_v6 = vsel %vm830_vm3, %v755_v37, 0.0 }
 0x208   : > { %895 = vadd.xlane.f32.xlu1 %v894_v28 }
 0x20a   : > { %v757_v51 = vpop.permute.xlu1 %756  ;;  %v787_v19 = vpop.permute.xlu0 %786 }
 0x20b   : > { %v864_v12 = vsel %vm830_vm3, %v757_v51, 0.0  ;;  %862 = vadd.xlane.f32.xlu0 %v861_v6  ;;  %v909_v58 = vsel %vm830_vm3, %v787_v19, 0.0 }
 0x20c   : > { %865 = vadd.xlane.f32.xlu1 %v864_v12 }
 0x20e   : > { %v789_v23 = vpop.permute.xlu1 %788  ;;  %v751_v62 = vpop.permute.xlu0 %750 }
 0x20f   : > { %v912_v55 = vsel %vm830_vm3, %v789_v23, 0.0  ;;  %910 = vadd.xlane.f32.xlu0 %v909_v58  ;;  %v855_v40 = vsel %vm830_vm3, %v751_v62, 0.0 }
 0x210   : > { %913 = vadd.xlane.f32.xlu1 %v912_v55 }
 0x212   : > { %v753_v46 = vpop.permute.xlu1 %752  ;;  %v783_v7 = vpop.permute.xlu0 %782 }
 0x213   : > { %v858_v28 = vsel %vm830_vm3, %v753_v46, 0.0  ;;  %856 = vadd.xlane.f32.xlu0 %v855_v40  ;;  %v903_v6 = vsel %vm830_vm3, %v783_v7, 0.0 }
 0x214   : > { %859 = vadd.xlane.f32.xlu1 %v858_v28 }
 0x216   : > { %v785_v37 = vpop.permute.xlu1 %784  ;;  %v763_v51 = vpop.permute.xlu0 %762 }
 0x217   : > { %v906_v12 = vsel %vm830_vm3, %v785_v37, 0.0  ;;  %904 = vadd.xlane.f32.xlu0 %v903_v6  ;;  %v873_v58 = vsel %vm830_vm3, %v763_v51, 0.0 }
 0x218   : > { %907 = vadd.xlane.f32.xlu1 %v906_v12 }
 0x21a   : > { %v765_v19 = vpop.permute.xlu1 %764  ;;  %v795_v23 = vpop.permute.xlu0 %794 }
 0x21b   : > { %v876_v55 = vsel %vm830_vm3, %v765_v19, 0.0  ;;  %874 = vadd.xlane.f32.xlu0 %v873_v58  ;;  %v921_v40 = vsel %vm830_vm3, %v795_v23, 0.0 }
 0x21c   : > { %877 = vadd.xlane.f32.xlu1 %v876_v55 }
 0x21e   : > { %v797_v62 = vpop.permute.xlu1 %796  ;;  %v759_v46 = vpop.permute.xlu0 %758 }
 0x21f   : > { %v924_v28 = vsel %vm830_vm3, %v797_v62, 0.0  ;;  %922 = vadd.xlane.f32.xlu0 %v921_v40  ;;  %v867_v37 = vsel %vm830_vm3, %v759_v46, 0.0 }
 0x220   : > { %925 = vadd.xlane.f32.xlu1 %v924_v28  ;;  %v3172_v28 = vmov 0  }
 0x222   : > { %v761_v7 = vpop.permute.xlu1 %760  ;;  %v791_v6 = vpop.permute.xlu0 %790 }
 0x223   : > { %v870_v12 = vsel %vm830_vm3, %v761_v7, 0.0  ;;  %868 = vadd.xlane.f32.xlu0 %v867_v37  ;;  %v915_v19 = vsel %vm830_vm3, %v791_v6, 0.0 }
 0x224   : > { %871 = vadd.xlane.f32.xlu1 %v870_v12 }
 0x226   : > { %v793_v51 = vpop.permute.xlu1 %792 }
 0x227   : > { %v918_v58 = vsel %vm830_vm3, %v793_v51, 0.0  ;;  %916 = vadd.xlane.f32.xlu0 %v915_v19 }
 0x228   : > { %919 = vadd.xlane.f32.xlu1 %v918_v58 }
 0x270   : > { %v839_v23 = vpop.xlane.xlu0 %838 }
 0x271   : > { %3099 = vrcp.f32 %v839_v23 }
 0x274   : > { %v887_v55 = vpop.xlane.xlu0 %886 }
 0x275   : > { %3101 = vrcp.f32 %v887_v55 }
 0x278   : > { %v833_v37 = vpop.xlane.xlu0 %832  ;;  %v890_v23 = vpop.xlane.xlu1 %889 }
 0x27c   : > { %v881_v6 = vpop.xlane.xlu0 %880 }
 0x27e   : > { %v3100_v62 = vpop.eup %3099 }
 0x27f   : > { %v961_v40 = vmul.f32 %v3100_v62, %v3422_v57 }
 0x280   : > { %v842_v51 = vpop.xlane.xlu0 %841 }
 0x281   : > { %v2345_v46 = vsel %vm509_vm2, %v961_v40, -inf  ;;  %vm993_vm4 = vcmp.gt.f32.partialorder %v961_v40, 0.2  ;;  %3103 = vrcp.f32 %v842_v51 }
 0x282   : > { %2346 = vmax.xlane.f32.xlu0 %v2345_v46  ;;  %v1025_v7 = vsel %vm993_vm4, 1, %v3172_v28  ;;  %v3102_v12 = vpop.eup %3101  ;;  %3105 = vrcp.f32 %v833_v37 }
 0x283   : > { %1062 = vrot.lane.b32.xlu1 %v1025_v7, %s3171_s23  ;;  %v3610_v19 = vmul.f32 %v3102_v12, %v3425_v63  ;;  %3107 = vrcp.f32 %v890_v23 }
 0x284   : > { %3109 = vrcp.f32 %v881_v6  ;;  %v851_v23 = vpop.xlane.xlu0 %850 }
 0x285   : > { %5592 = vst [vmem:[#allocation34_spill] sm:$0xff] %v3610_v19  ;;  %vm1009_vm5 = vcmp.gt.f32.partialorder %v3610_v19, 0.2 }
 0x286   : > { %v1041_v57 = vsel %vm1009_vm5, 1, %v3172_v28 }
 0x28e   : > { %v3104_v58 = vpop.eup %3103 }
 0x28f   : > { %v962_v55 = vmul.f32 %v3104_v58, %v3432_v18  ;;  %v3106_v40 = vpop.eup %3105 }
 0x290   : > { %v3108_v46 = vpop.eup %3107  ;;  %v959_v63 = vmul.f32 %v3106_v40, %v3435_v10  ;;  %v836_v10 = vpop.xlane.xlu1 %835 }
 0x291   : > { %v2348_v62 = vsel %vm509_vm2, %v962_v55, -inf  ;;  %vm994_vm6 = vcmp.gt.f32.partialorder %v962_v55, 0.2  ;;  %v3619_v7 = vmul.f32 %v3108_v46, %v3442_v21  ;;  %v3110_v37 = vpop.eup %3109  ;;  %3111 = vrcp.f32 %v836_v10 }
 0x292   : > { %v2339_v12 = vsel %vm509_vm2, %v959_v63, -inf  ;;  %v1026_v51 = vsel %vm994_vm6, 1, %v3172_v28  ;;  %vm991_vm8 = vcmp.gt.f32.partialorder %v959_v63, 0.2  ;;  %v3628_v21 = vmul.f32 %v3110_v37, %v3445_v25 }
 0x293   : > { %vm1010_vm7 = vcmp.gt.f32.partialorder %v3619_v7, 0.2  ;;  %3113 = vrcp.f32 %v851_v23 }
 0x294   : > { %v1042_v18 = vsel %vm1010_vm7, 1, %v3172_v28  ;;  %5593 = vst [vmem:[#allocation35_spill] sm:$0xff] %v3628_v21  ;;  %vm1007_vm9 = vcmp.gt.f32.partialorder %v3628_v21, 0.2  ;;  %v884_v55 = vpop.xlane.xlu1 %883 }
 0x295   : > { %v1039_v58 = vsel %vm1007_vm9, 1, %v3172_v28  ;;  %3115 = vrcp.f32 %v884_v55 }
 0x298   : > { %1094 = vrot.lane.b32.xlu0 %v1041_v57, %s3171_s23  ;;  %v1023_v57 = vsel %vm991_vm8, 1, %v3172_v28  ;;  %v854_v10 = vpop.xlane.xlu1 %853 }
 0x29c   : > { %v902_v55 = vpop.xlane.xlu1 %901 }
 0x29e   : > { %v3112_v6 = vpop.eup %3111 }
 0x2a0   : > { %v3114_v40 = vpop.eup %3113 }
 0x2a1   : > { %v965_v63 = vmul.f32 %v3114_v40, %v3461_v1 }
 0x2a2   : > { %v3116_v46 = vpop.eup %3115 }
 0x2a3   : > { %vm997_vm12 = vcmp.gt.f32.partialorder %v965_v63, 0.2 }
 0x2a7   : > { %2349 = vmax.xlane.f32.xlu1 %v2348_v62  ;;  %v960_v62 = vmul.f32 %v3112_v6, %v3453_v41 }
 0x2a9   : > { %v2342_v25 = vsel %vm509_vm2, %v960_v62, -inf  ;;  %vm992_vm10 = vcmp.gt.f32.partialorder %v960_v62, 0.2 }
 0x2aa   : > { %v1024_v37 = vsel %vm992_vm10, 1, %v3172_v28 }
 0x2b7   : > { %2340 = vmax.xlane.f32.xlu0 %v2339_v12  ;;  %v3639_v12 = vmul.f32 %v3116_v46, %v3458_v56 }
 0x2b8   : > { %1064 = vrot.lane.b32.xlu1 %v1026_v51, %s3171_s23  ;;  %v899_v51 = vpop.xlane.xlu0 %898 }
 0x2b9   : > { %vm1008_vm11 = vcmp.gt.f32.partialorder %v3639_v12, 0.2  ;;  %3117 = vrcp.f32 %v899_v51 }
 0x2ba   : > { %v1040_v41 = vsel %vm1008_vm11, 1, %v3172_v28  ;;  %3119 = vrcp.f32 %v854_v10 }
 0x2bc   : > { %1096 = vrot.lane.b32.xlu1 %v1042_v18, %s3171_s23  ;;  %v2357_v18 = vsel %vm509_vm2, %v965_v63, -inf  ;;  %v845_v23 = vpop.xlane.xlu0 %844 }
 0x2bd   : > { %3121 = vrcp.f32 %v845_v23 }
 0x2be   : > { %3123 = vrcp.f32 %v902_v55 }
 0x2c0   : > { %v893_v51 = vpop.xlane.xlu0 %892 }
 0x2c1   : > { %3125 = vrcp.f32 %v893_v51 }
 0x2c6   : > { %v3118_v1 = vpop.eup %3117 }
 0x2c7   : > { %v3648_v56 = vmul.f32 %v3118_v1, %v3471_v15  ;;  %v3120_v6 = vpop.eup %3119 }
 0x2c8   : > { %v966_v62 = vmul.f32 %v3120_v6, %v3468_v11 }
 0x2c9   : > { %5594 = vst [vmem:[#allocation36_spill] sm:$0xff] %v3648_v56  ;;  %vm1013_vm13 = vcmp.gt.f32.partialorder %v3648_v56, 0.2 }
 0x2ca   : > { %v2360_v15 = vsel %vm509_vm2, %v966_v62, -inf  ;;  %vm998_vm14 = vcmp.gt.f32.partialorder %v966_v62, 0.2 }
 0x2cd   : > { %1058 = vrot.lane.b32.xlu0 %v1023_v57, %s3171_s23  ;;  %v1029_v57 = vsel %vm997_vm12, 1, %v3172_v28 }
 0x2d1   : > { %1090 = vrot.lane.b32.xlu0 %v1039_v58, %s3171_s23  ;;  %v1045_v58 = vsel %vm1013_vm13, 1, %v3172_v28 }
 0x2e0   : > { %2343 = vmax.xlane.f32.xlu1 %v2342_v25  ;;  %v3122_v25 = vpop.eup %3121 }
 0x2e1   : > { %v3124_v40 = vpop.eup %3123  ;;  %v963_v46 = vmul.f32 %v3122_v25, %v3481_v36 }
 0x2e2   : > { %v3659_v63 = vmul.f32 %v3124_v40, %v3478_v34  ;;  %v3126_v36 = vpop.eup %3125 }
 0x2e3   : > { %vm995_vm0 = vcmp.gt.f32.partialorder %v963_v46, 0.2  ;;  %v3668_v34 = vmul.f32 %v3126_v36, %v3491_v3 }
 0x2e4   : > { %vm1014_vm15 = vcmp.gt.f32.partialorder %v3659_v63, 0.2  ;;  %v1027_v1 = vsel %vm995_vm0, 1, %v3172_v28 }
 0x2e5   : > { %v1046_v11 = vsel %vm1014_vm15, 1, %v3172_v28  ;;  %5595 = vst [vmem:[#allocation37_spill] sm:$0xff] %v3668_v34  ;;  %vm1011_vm1 = vcmp.gt.f32.partialorder %v3668_v34, 0.2 }
 0x2e6   : > { %v1043_v10 = vsel %vm1011_vm1, 1, %v3172_v28 }
 0x2f0   : > { %2358 = vmax.xlane.f32.xlu0 %v2357_v18  ;;  %v2351_v18 = vsel %vm509_vm2, %v963_v46, -inf }
 0x2f1   : > { %1060 = vrot.lane.b32.xlu1 %v1024_v37, %s3171_s23  ;;  %v1030_v37 = vsel %vm998_vm14, 1, %v3172_v28 }
 0x2f5   : > { %1092 = vrot.lane.b32.xlu1 %v1040_v41, %s3171_s23  ;;  %v848_v41 = vpop.xlane.xlu1 %847 }
 0x2f6   : > { %3127 = vrcp.f32 %v848_v41 }
 0x2f9   : > { %v896_v6 = vpop.xlane.xlu1 %895 }
 0x306   : > { %1070 = vrot.lane.b32.xlu0 %v1029_v57, %s3171_s23  ;;  %v3128_v57 = vpop.eup %3127 }
 0x307   : > { %v964_v23 = vmul.f32 %v3128_v57, %v3488_v53 }
 0x309   : > { %v2354_v3 = vsel %vm509_vm2, %v964_v23, -inf  ;;  %vm996_vm4 = vcmp.gt.f32.partialorder %v964_v23, 0.2 }
 0x30a   : > { %1102 = vrot.lane.b32.xlu0 %v1045_v58, %s3171_s23  ;;  %v863_v58 = vpop.xlane.xlu0 %862  ;;  %v1028_v51 = vsel %vm996_vm4, 1, %v3172_v28 }
 0x30b   : > { %3129 = vrcp.f32 %v863_v58 }
 0x30c   : > { %3131 = vrcp.f32 %v896_v6 }
 0x30e   : > { %v911_v40 = vpop.xlane.xlu0 %910 }
 0x30f   : > { %3133 = vrcp.f32 %v911_v40 }
 0x312   : > { %v857_v41 = vpop.xlane.xlu0 %856 }
 0x316   : > { %v905_v6 = vpop.xlane.xlu0 %904 }
 0x318   : > { %v3130_v55 = vpop.eup %3129 }
 0x319   : > { %2361 = vmax.xlane.f32.xlu1 %v2360_v15  ;;  %v3132_v62 = vpop.eup %3131  ;;  %v969_v15 = vmul.f32 %v3130_v55, %v3501_v24 }
 0x31a   : > { %v3679_v25 = vmul.f32 %v3132_v62, %v3498_v16 }
 0x31b   : > { %v2369_v46 = vsel %vm509_vm2, %v969_v15, -inf  ;;  %vm1001_vm6 = vcmp.gt.f32.partialorder %v969_v15, 0.2  ;;  %v875_v15 = vpop.xlane.xlu0 %874 }
 0x31c   : > { %vm1012_vm5 = vcmp.gt.f32.partialorder %v3679_v25, 0.2  ;;  %v3134_v24 = vpop.eup %3133 }
 0x31d   : > { %v1044_v53 = vsel %vm1012_vm5, 1, %v3172_v28  ;;  %v3688_v16 = vmul.f32 %v3134_v24, %v3511_v50 }
 0x31f   : > { %5596 = vst [vmem:[#allocation38_spill] sm:$0xff] %v3688_v16  ;;  %vm1017_vm7 = vcmp.gt.f32.partialorder %v3688_v16, 0.2 }
 0x329   : > { %2352 = vmax.xlane.f32.xlu0 %v2351_v18  ;;  %v866_v18 = vpop.xlane.xlu1 %865 }
 0x32a   : > { %1072 = vrot.lane.b32.xlu1 %v1030_v37, %s3171_s23  ;;  %3135 = vrcp.f32 %v866_v18  ;;  %v1033_v37 = vsel %vm1001_vm6, 1, %v3172_v28 }
 0x32b   : > { %3137 = vrcp.f32 %v857_v41 }
 0x32e   : > { %1104 = vrot.lane.b32.xlu1 %v1046_v11, %s3171_s23  ;;  %v1049_v11 = vsel %vm1017_vm7, 1, %v3172_v28 }
 0x337   : > { %v3136_v36 = vpop.eup %3135 }
 0x338   : > { %v3138_v57 = vpop.eup %3137 }
 0x339   : > { %v967_v23 = vmul.f32 %v3138_v57, %v3521_v27  ;;  %v923_v27 = vpop.xlane.xlu0 %922 }
 0x33b   : > { %v2363_v55 = vsel %vm509_vm2, %v967_v23, -inf  ;;  %vm999_vm10 = vcmp.gt.f32.partialorder %v967_v23, 0.2 }
 0x33f   : > { %1066 = vrot.lane.b32.xlu0 %v1027_v1, %s3171_s23  ;;  %v914_v1 = vpop.xlane.xlu1 %913 }
 0x340   : > { %3139 = vrcp.f32 %v914_v1 }
 0x341   : > { %3141 = vrcp.f32 %v905_v6 }
 0x342   : > { %3143 = vrcp.f32 %v875_v15 }
 0x343   : > { %1098 = vrot.lane.b32.xlu0 %v1043_v10, %s3171_s23  ;;  %v970_v10 = vmul.f32 %v3136_v36, %v3508_v45  ;;  %3145 = vrcp.f32 %v923_v27  ;;  %v860_v40 = vpop.xlane.xlu1 %859 }
 0x344   : > { %3147 = vrcp.f32 %v860_v40 }
 0x345   : > { %v2372_v50 = vsel %vm509_vm2, %v970_v10, -inf  ;;  %vm1002_vm8 = vcmp.gt.f32.partialorder %v970_v10, 0.2 }
 0x346   : > { %v1034_v62 = vsel %vm1002_vm8, 1, %v3172_v28 }
 0x347   : > { %v908_v36 = vpop.xlane.xlu1 %907 }
 0x348   : > { %3149 = vrcp.f32 %v908_v36 }
 0x34b   : > { %v878_v10 = vpop.xlane.xlu1 %877 }
 0x34c   : > { %3151 = vrcp.f32 %v878_v10 }
 0x34d   : > { %v3140_v58 = vpop.eup %3139 }
 0x34f   : > { %v926_v57 = vpop.xlane.xlu1 %925 }
 0x352   : > { %2355 = vmax.xlane.f32.xlu1 %v2354_v3  ;;  %v3699_v3 = vmul.f32 %v3140_v58, %v3518_v13  ;;  %v3142_v13 = vpop.eup %3141 }
 0x354   : > { %vm1018_vm9 = vcmp.gt.f32.partialorder %v3699_v3, 0.2 }
 0x355   : > { %v1050_v45 = vsel %vm1018_vm9, 1, %v3172_v28 }
 0x362   : > { %2370 = vmax.xlane.f32.xlu0 %v2369_v46  ;;  %v3708_v46 = vmul.f32 %v3142_v13, %v3531_v9 }
 0x363   : > { %1068 = vrot.lane.b32.xlu1 %v1028_v51, %s3171_s23  ;;  %v3144_v51 = vpop.eup %3143 }
 0x364   : > { %5597 = vst [vmem:[#allocation39_spill] sm:$0xff] %v3708_v46  ;;  %vm1015_vm11 = vcmp.gt.f32.partialorder %v3708_v46, 0.2  ;;  %v3714_v24 = vmul.f32 %v3144_v51, %v3539_v43  ;;  %v3146_v18 = vpop.eup %3145 }
 0x365   : > { %v3720_v9 = vmul.f32 %v3146_v18, %v3547_v42  ;;  %v3148_v41 = vpop.eup %3147  ;;  %v869_v42 = vpop.xlane.xlu0 %868 }
 0x366   : > { %5598 = vst [vmem:[#allocation40_spill] sm:$0xff] %v3714_v24  ;;  %vm1005_vm12 = vcmp.gt.f32.partialorder %v3714_v24, 0.2  ;;  %v968_v1 = vmul.f32 %v3148_v41, %v3527_v49  ;;  %3153 = vrcp.f32 %v869_v42  ;;  %v3150_v58 = vpop.eup %3149 }
 0x367   : > { %1100 = vrot.lane.b32.xlu1 %v1044_v53, %s3171_s23  ;;  %v1031_v53 = vsel %vm999_vm10, 1, %v3172_v28  ;;  %5599 = vst [vmem:[#allocation41_spill] sm:$0xff] %v3720_v9  ;;  %vm1021_vm13 = vcmp.gt.f32.partialorder %v3720_v9, 0.2  ;;  %3155 = vrcp.f32 %v926_v57  ;;  %v3730_v6 = vmul.f32 %v3150_v58, %v3537_v5  ;;  %v3152_v23 = vpop.eup %3151 }
 0x368   : > { %v1053_v43 = vsel %vm1021_vm13, 1, %v3172_v28  ;;  %vm1000_vm14 = vcmp.gt.f32.partialorder %v968_v1, 0.2  ;;  %v3736_v49 = vmul.f32 %v3152_v23, %v3545_v30 }
 0x369   : > { %vm1016_vm15 = vcmp.gt.f32.partialorder %v3730_v6, 0.2  ;;  %v917_v13 = vpop.xlane.xlu0 %916 }
 0x36a   : > { %v1048_v27 = vsel %vm1016_vm15, 1, %v3172_v28  ;;  %vm1006_vm0 = vcmp.gt.f32.partialorder %v3736_v49, 0.2  ;;  %3157 = vrcp.f32 %v917_v13 }
 0x36b   : > { %v1038_v51 = vsel %vm1006_vm0, 1, %v3172_v28 }
 0x36d   : > { %v3768_v57 = vpop.xlane.xlu0 %2346 }
 0x36e   : > { %5603 = vst [vmem:[#allocation45_spill] sm:$0xff] %v3768_v57 }
 0x378   : > { %1078 = vrot.lane.b32.xlu0 %v1033_v37, %s3171_s23  ;;  %v1047_v37 = vsel %vm1015_vm11, 1, %v3172_v28 }
 0x37c   : > { %1110 = vrot.lane.b32.xlu0 %v1049_v11, %s3171_s23  ;;  %v1037_v11 = vsel %vm1005_vm12, 1, %v3172_v28 }
 0x38b   : > { %2373 = vmax.xlane.f32.xlu1 %v2372_v50  ;;  %v2366_v50 = vsel %vm509_vm2, %v968_v1, -inf }
 0x39b   : > { %2364 = vmax.xlane.f32.xlu0 %v2363_v55  ;;  %v3154_v55 = vpop.eup %3153 }
 0x39c   : > { %1080 = vrot.lane.b32.xlu1 %v1034_v62, %s3171_s23  ;;  %v1032_v62 = vsel %vm1000_vm14, 1, %v3172_v28  ;;  %v3156_v15 = vpop.eup %3155 }
 0x39d   : > { %v3743_v5 = vmul.f32 %v3156_v15, %v3553_v35 }
 0x39f   : > { %5600 = vst [vmem:[#allocation42_spill] sm:$0xff] %v3743_v5  ;;  %vm1022_vm1 = vcmp.gt.f32.partialorder %v3743_v5, 0.2 }
 0x3a0   : > { %1112 = vrot.lane.b32.xlu1 %v1050_v45, %s3171_s23  ;;  %v971_v45 = vmul.f32 %v3154_v55, %v3555_v39  ;;  %v1054_v30 = vsel %vm1022_vm1, 1, %v3172_v28  ;;  %v872_v39 = vpop.xlane.xlu1 %871 }
 0x3a1   : > { %3159 = vrcp.f32 %v872_v39 }
 0x3a2   : > { %v2375_v40 = vsel %vm509_vm2, %v971_v45, -inf  ;;  %vm1003_vm4 = vcmp.gt.f32.partialorder %v971_v45, 0.2 }
 0x3a4   : > { %v920_v18 = vpop.xlane.xlu1 %919 }
 0x3a5   : > { %3161 = vrcp.f32 %v920_v18 }
 0x3b1   : > { %1074 = vrot.lane.b32.xlu0 %v1031_v53, %s3171_s23  ;;  %v3158_v53 = vpop.eup %3157 }
 0x3b2   : > { %v3752_v35 = vmul.f32 %v3158_v53, %v3563_v4  ;;  %v1055_v4 = vlaneseq }
 0x3b4   : > { %5601 = vst [vmem:[#allocation43_spill] sm:$0xff] %v3752_v35  ;;  %vm1019_vm5 = vcmp.gt.f32.partialorder %v3752_v35, 0.2 }
 0x3b5   : > { %1106 = vrot.lane.b32.xlu0 %v1047_v37, %s3171_s23  ;;  %v1035_v37 = vsel %vm1003_vm4, 1, %v3172_v28  ;;  %v1051_v36 = vsel %vm1019_vm5, 1, %v3172_v28 }
 0x3b9   : > { %1086 = vrot.lane.b32.xlu0 %v1037_v11, %s3171_s23  ;;  %v1063_v11 = vpop.permute.xlu1 %1062 }
 0x3bd   : > { %1118 = vrot.lane.b32.xlu0 %v1053_v43, %s3171_s23  ;;  %v3759_v41 = vpop.xlane.xlu1 %2349  ;;  %v3160_v43 = vpop.eup %3159 }
 0x3be   : > { %5602 = vst [vmem:[#allocation44_spill] sm:$0xff] %v3759_v41  ;;  %v972_v10 = vmul.f32 %v3160_v43, %v3561_v61  ;;  %v3162_v13 = vpop.eup %3161 }
 0x3bf   : > { %v3793_v39 = vmul.f32 %v3162_v13, %v3569_v17 }
 0x3c0   : > { %v2378_v58 = vsel %vm509_vm2, %v972_v10, -inf  ;;  %vm1004_vm8 = vcmp.gt.f32.partialorder %v972_v10, 0.2 }
 0x3c1   : > { %v3761_v1 = vpop.permute.xlu1 %1064  ;;  %5606 = vst [vmem:[#allocation48_spill] sm:$0xff] %v3793_v39  ;;  %vm1020_vm9 = vcmp.gt.f32.partialorder %v3793_v39, 0.2 }
 0x3c4   : > { %2367 = vmax.xlane.f32.xlu1 %v2366_v50  ;;  %v3764_v50 = vand.u32 127, %v1055_v4 }
 0x3c5   : > { %v3766_v42 = vpop.permute.xlu1 %1096 }
 0x3c6   : > { %vm1057_vm6 = vcmp.eq.s32.totalorder %v3764_v50, 0  ;;  %vm1666_vm7 = vcmp.gt.s32.totalorder %v3764_v50, 0 }
 0x3c7   : > { %v1124_v55 = vsel %vm1057_vm6, %v1063_v11, 0  ;;  %v1686_v44 = vsel %vm1666_vm7, %v3766_v42, 0 }
 0x3c8   : > { %v3777_v61 = vsel %vm830_vm3, %v1124_v55, 2147483648 }
 0x3c9   : > { %v3772_v23 = vpop.xlane.xlu1 %2343 }
 0x3ca   : > { %5604 = vst [vmem:[#allocation46_spill] sm:$0xff] %v3772_v23 }
 0x3cd   : > { %v3781_v45 = vpop.permute.xlu1 %1060 }
 0x3d1   : > { %v3795_v53 = vpop.permute.xlu1 %1092 }
 0x3d2   : > { %v1139_v38 = vsel %vm1057_vm6, %v3795_v53, 0 }
 0x3d5   : > { %1076 = vrot.lane.b32.xlu1 %v1032_v62, %s3171_s23  ;;  %v1095_v62 = vpop.permute.xlu0 %1094  ;;  %v3809_v17 = vpop.xlane.xlu1 %2361 }
 0x3d6   : > { %v1140_v15 = vsel %vm1057_vm6, %v1095_v62, 0  ;;  %v1685_v4 = vsel %vm1666_vm7, %v1095_v62, 0  ;;  %5607 = vst [vmem:[#allocation49_spill] sm:$0xff] %v3809_v17  ;;  %v3933_v17 = vsel %vm830_vm3, %v1139_v38, 2147483648 }
 0x3d7   : > { %v3815_v55 = vsel %vm830_vm3, %v1685_v4, 2147483648 }
 0x3d9   : > { %1108 = vrot.lane.b32.xlu1 %v1048_v27, %s3171_s23  ;;  %v3784_v27 = vpop.xlane.xlu0 %2340 }
 0x3da   : > { %5605 = vst [vmem:[#allocation47_spill] sm:$0xff] %v3784_v27 }
 0x3dc   : > { %2376 = vmax.xlane.f32.xlu0 %v2375_v40  ;;  %v1186_v40 = vshra.s32 %v3777_v61, 16 }
 0x3dd   : > { %1088 = vrot.lane.b32.xlu1 %v1038_v51, %s3171_s23  ;;  %v3788_v51 = vsel %vm830_vm3, %v1140_v15, 2147483648  ;;  %v1059_v43 = vpop.permute.xlu0 %1058  ;;  %v1052_v15 = vsel %vm1020_vm9, 1, %v3172_v28 }
 0x3de   : > { %v3797_v18 = vcvt.s32.f32 %v1186_v40  ;;  %v1122_v62 = vsel %vm1057_vm6, %v1059_v43, 0 }
 0x3e1   : > { %1120 = vrot.lane.b32.xlu1 %v1054_v30, %s3171_s23  ;;  %v1669_v30 = vsel %vm1666_vm7, %v1063_v11, 0  ;;  %v1036_v11 = vsel %vm1004_vm8, 1, %v3172_v28  ;;  %v1091_v13 = vpop.permute.xlu0 %1090 }
 0x3e2   : > { %v1138_v4 = vsel %vm1057_vm6, %v1091_v13, 0 }
 0x3f2   : > { %1082 = vrot.lane.b32.xlu0 %v1035_v37, %s3171_s23  ;;  %v1426_v37 = vshra.s32 %v3788_v51, 16 }
 0x3f4   : > { %v3811_v10 = vcvt.s32.f32 %v1426_v37  ;;  %v3826_v37 = vsel %vm830_vm3, %v1122_v62, 2147483648 }
 0x3f5   : > { %v1156_v28 = vshra.s32 %v3826_v37, 16 }
 0x3f6   : > { %1114 = vrot.lane.b32.xlu0 %v1051_v36, %s3171_s23  ;;  %v3801_v36 = vsel %vm830_vm3, %v1669_v30, 2147483648  ;;  %v1971_v30 = vshra.s32 %v3815_v55, 16 }
 0x3f7   : > { %v3844_v31 = vcvt.s32.f32 %v1156_v28  ;;  %v1125_v28 = vsel %vm1057_vm6, %v3761_v1, 0 }
 0x3f8   : > { %v3833_v8 = vcvt.s32.f32 %v1971_v30  ;;  %v1683_v30 = vsel %vm1666_vm7, %v1091_v13, 0  ;;  %v3869_v59 = vsel %vm830_vm3, %v1125_v28, 2147483648  ;;  %v1670_v28 = vsel %vm1666_vm7, %v3761_v1, 0 }
 0x3f9   : > { %v3859_v54 = vsel %vm830_vm3, %v1683_v30, 2147483648  ;;  %v1201_v23 = vshra.s32 %v3869_v59, 16  ;;  %v3896_v60 = vsel %vm830_vm3, %v1670_v28, 2147483648  ;;  %v1123_v1 = vsel %vm1057_vm6, %v3781_v45, 0 }
 0x3fa   : > { %v1941_v13 = vshra.s32 %v3859_v54, 16  ;;  %v1746_v28 = vshra.s32 %v3896_v60, 16 }
 0x3fb   : > { %v3892_v27 = vcvt.s32.f32 %v1201_v23  ;;  %v3908_v23 = vpop.xlane.xlu0 %2358 }
 0x3fc   : > { %v3877_v30 = vcvt.s32.f32 %v1941_v13  ;;  %5609 = vst [vmem:[#allocation51_spill] sm:$0xff] %v3908_v23 }
 0x3ff   : > { %v1071_v47 = vpop.permute.xlu0 %1070 }
 0x400   : > { %v1128_v9 = vsel %vm1057_vm6, %v1071_v47, 0 }
 0x401   : > { %v3976_v29 = vsel %vm830_vm3, %v1128_v9, 2147483648 }
 0x403   : > { %v1103_v41 = vpop.permute.xlu0 %1102 }
 0x404   : > { %v1144_v16 = vsel %vm1057_vm6, %v1103_v41, 0 }
 0x405   : > { %2379 = vmax.xlane.f32.xlu1 %v2378_v58  ;;  %v1731_v58 = vshra.s32 %v3801_v36, 16 }
 0x407   : > { %v3822_v40 = vcvt.s32.f32 %v1731_v58  ;;  %v1667_v58 = vsel %vm1666_vm7, %v1059_v43, 0  ;;  %v3987_v46 = vpop.xlane.xlu0 %2352 }
 0x408   : > { %v3848_v2 = vsel %vm830_vm3, %v1667_v58, 2147483648  ;;  %5615 = vst [vmem:[#allocation57_spill] sm:$0xff] %v3987_v46  ;;  %v1673_v46 = vsel %vm1666_vm7, %v1071_v47, 0  ;;  %v1689_v47 = vsel %vm1666_vm7, %v1103_v41, 0 }
 0x409   : > { %v1701_v43 = vshra.s32 %v3848_v2, 16 }
 0x40b   : > { %v3865_v58 = vcvt.s32.f32 %v1701_v43 }
 0x415   : > { %1189 = vmax.xlane.f32.xlu0 %v3797_v18 }
 0x416   : > { %1084 = vrot.lane.b32.xlu1 %v1036_v11, %s3171_s23  ;;  %v3830_v11 = vpop.permute.xlu1 %1072 }
 0x419   : > { %1429 = vmax.xlane.f32.xlu0 %v3811_v10 }
 0x41a   : > { %1116 = vrot.lane.b32.xlu1 %v1052_v15, %s3171_s23  ;;  %v3837_v15 = vsel %vm830_vm3, %v1138_v4, 2147483648  ;;  %v3842_v62 = vpop.permute.xlu1 %1104 }
 0x41b   : > { %v1396_v14 = vshra.s32 %v3837_v15, 16 }
 0x41d   : > { %1734 = vmax.xlane.f32.xlu0 %v3822_v40  ;;  %v3855_v0 = vcvt.s32.f32 %v1396_v14  ;;  %v1141_v14 = vsel %vm1057_vm6, %v3766_v42, 0  ;;  %v1684_v42 = vsel %vm1666_vm7, %v3795_v53, 0 }
 0x41e   : > { %v3853_v4 = vpop.xlane.xlu1 %2355  ;;  %v3881_v43 = vsel %vm830_vm3, %v1141_v14, 2147483648  ;;  %v3899_v14 = vsel %vm830_vm3, %v1686_v44, 2147483648  ;;  %v3916_v44 = vsel %vm830_vm3, %v1123_v1, 2147483648  ;;  %v3923_v33 = vsel %vm830_vm3, %v1684_v42, 2147483648 }
 0x41f   : > { %5608 = vst [vmem:[#allocation50_spill] sm:$0xff] %v3853_v4  ;;  %v1441_v13 = vshra.s32 %v3881_v43, 16  ;;  %v1986_v26 = vshra.s32 %v3899_v14, 16  ;;  %v1171_v1 = vshra.s32 %v3916_v44, 16  ;;  %v1956_v53 = vshra.s32 %v3923_v33, 16 }
 0x420   : > { %v1668_v42 = vsel %vm1666_vm7, %v3781_v45, 0 }
 0x421   : > { %1974 = vmax.xlane.f32.xlu0 %v3833_v8  ;;  %v3912_v22 = vcvt.s32.f32 %v1441_v13  ;;  %v1690_v13 = vsel %vm1666_vm7, %v3842_v62, 0  ;;  %v3935_v23 = vcvt.s32.f32 %v1986_v26  ;;  %v3951_v26 = vcvt.s32.f32 %v1171_v1 }
 0x422   : > { %v3874_v4 = vpop.permute.xlu1 %1068  ;;  %v3942_v48 = vsel %vm830_vm3, %v1690_v13, 2147483648  ;;  %v3955_v39 = vsel %vm830_vm3, %v1668_v42, 2147483648  ;;  %v3957_v45 = vcvt.s32.f32 %v1956_v53 }
 0x423   : > { %5611 = vst [vmem:[#allocation53_spill] sm:$0xff] %v3942_v48  ;;  %v2046_v13 = vshra.s32 %v3942_v48, 16  ;;  %v1716_v57 = vshra.s32 %v3955_v39, 16 }
 0x425   : > { %1159 = vmax.xlane.f32.xlu0 %v3844_v31  ;;  %v3993_v9 = vcvt.s32.f32 %v1716_v57 }
 0x426   : > { %v3890_v52 = vpop.permute.xlu1 %1100 }
 0x427   : > { %v1688_v38 = vsel %vm1666_vm7, %v3890_v52, 0 }
 0x428   : > { %v3963_v35 = vsel %vm830_vm3, %v1688_v38, 2147483648  ;;  %v3978_v38 = vcvt.s32.f32 %v2046_v13  ;;  %v1246_v13 = vshra.s32 %v3976_v29, 16 }
 0x429   : > { %1399 = vmax.xlane.f32.xlu0 %v3855_v0  ;;  %5612 = vst [vmem:[#allocation54_spill] sm:$0xff] %v3963_v35  ;;  %v2016_v20 = vshra.s32 %v3963_v35, 16  ;;  %v3997_v35 = vsel %vm830_vm3, %v1144_v16, 2147483648  ;;  %v4013_v16 = vsel %vm830_vm3, %v1673_v46, 2147483648  ;;  %v4028_v46 = vsel %vm830_vm3, %v1689_v47, 2147483648 }
 0x42a   : > { %v3910_v32 = vpop.xlane.xlu1 %2373  ;;  %5613 = vst [vmem:[#allocation55_spill] sm:$0xff] %v3978_v38  ;;  %5616 = vst [vmem:[#allocation58_spill] sm:$0xff] %v3997_v35  ;;  %v4009_v57 = vcvt.s32.f32 %v1246_v13 }
 0x42b   : > { %5610 = vst [vmem:[#allocation52_spill] sm:$0xff] %v3910_v32  ;;  %v3929_v32 = vcvt.s32.f32 %v1746_v28  ;;  %v1411_v28 = vshra.s32 %v3933_v17, 16  ;;  %v3999_v56 = vcvt.s32.f32 %v2016_v20  ;;  %5620 = vst [vmem:[#allocation62_spill] sm:$0xff] %v4013_v16  ;;  %v1067_v20 = vpop.permute.xlu0 %1066 }
 0x42c   : > { %5619 = vst [vmem:[#allocation61_spill] sm:$0xff] %v4009_v57  ;;  %5624 = vst [vmem:[#allocation66_spill] sm:$0xff] %v4028_v46 }
 0x42d   : > { %1704 = vmax.xlane.f32.xlu0 %v3865_v58  ;;  %v3972_v53 = vcvt.s32.f32 %v1411_v28  ;;  %5617 = vst [vmem:[#allocation59_spill] sm:$0xff] %v3999_v56 }
 0x42e   : > { %v3944_v5 = vpop.permute.xlu1 %1080 }
 0x42f   : > { %v1678_v1 = vsel %vm1666_vm7, %v3944_v5, 0  ;;  %v1099_v41 = vpop.permute.xlu0 %1098 }
 0x430   : > { %v3984_v48 = vsel %vm830_vm3, %v1678_v1, 2147483648 }
 0x431   : > { %1944 = vmax.xlane.f32.xlu0 %v3877_v30  ;;  %5614 = vst [vmem:[#allocation56_spill] sm:$0xff] %v3984_v48  ;;  %v1866_v1 = vshra.s32 %v3984_v48, 16 }
 0x432   : > { %v3970_v42 = vpop.permute.xlu1 %1112 }
 0x433   : > { %v1694_v28 = vsel %vm1666_vm7, %v3970_v42, 0  ;;  %v4015_v19 = vcvt.s32.f32 %v1866_v1 }
 0x434   : > { %v4005_v34 = vsel %vm830_vm3, %v1694_v28, 2147483648 }
 0x435   : > { %1204 = vmax.xlane.f32.xlu0 %v3892_v27  ;;  %5618 = vst [vmem:[#allocation60_spill] sm:$0xff] %v4005_v34  ;;  %5621 = vst [vmem:[#allocation63_spill] sm:$0xff] %v4015_v19  ;;  %v2106_v48 = vshra.s32 %v4005_v34, 16  ;;  %v1126_v34 = vsel %vm1057_vm6, %v1067_v20, 0 }
 0x437   : > { %v4030_v1 = vcvt.s32.f32 %v2106_v48  ;;  %v1142_v48 = vsel %vm1057_vm6, %v1099_v41, 0 }
 0x439   : > { %1444 = vmax.xlane.f32.xlu0 %v3912_v22  ;;  %5625 = vst [vmem:[#allocation67_spill] sm:$0xff] %v4030_v1 }
 0x43d   : > { %1749 = vmax.xlane.f32.xlu0 %v3929_v32 }
 0x43e   : > { %1989 = vmax.xlane.f32.xlu1 %v3935_v23 }
 0x441   : > { %1174 = vmax.xlane.f32.xlu0 %v3951_v26 }
 0x442   : > { %1959 = vmax.xlane.f32.xlu1 %v3957_v45 }
 0x445   : > { %1414 = vmax.xlane.f32.xlu0 %v3972_v53 }
 0x446   : > { %2049 = vmax.xlane.f32.xlu1 %v3978_v38  ;;  %v1486_v38 = vshra.s32 %v3997_v35, 16 }
 0x448   : > { %v4024_v13 = vcvt.s32.f32 %v1486_v38  ;;  %v2031_v38 = vshra.s32 %v4028_v46, 16 }
 0x449   : > { %1719 = vmax.xlane.f32.xlu0 %v3993_v9 }
 0x44a   : > { %2019 = vmax.xlane.f32.xlu1 %v3999_v56  ;;  %5623 = vst [vmem:[#allocation65_spill] sm:$0xff] %v4024_v13  ;;  %v1791_v56 = vshra.s32 %v4013_v16, 16 }
 0x44d   : > { %v4020_v28 = vpop.xlane.xlu1 %2367  ;;  %1249 = vmax.xlane.f32.xlu0 %v4009_v57 }
 0x44e   : > { %5622 = vst [vmem:[#allocation64_spill] sm:$0xff] %v4020_v28  ;;  %1869 = vmax.xlane.f32.xlu1 %v4015_v19  ;;  %v4038_v28 = vcvt.s32.f32 %v1791_v56  ;;  %v4042_v19 = vsel %vm830_vm3, %v1126_v34, 2147483648  ;;  %v4055_v56 = vcvt.s32.f32 %v2031_v38  ;;  %v4059_v34 = vsel %vm830_vm3, %v1142_v48, 2147483648 }
 0x44f   : > { %5627 = vst [vmem:[#allocation69_spill] sm:$0xff] %v4042_v19  ;;  %v1216_v46 = vshra.s32 %v4042_v19, 16 }
 0x450   : > { %5626 = vst [vmem:[#allocation68_spill] sm:$0xff] %v4038_v28  ;;  %5629 = vst [vmem:[#allocation71_spill] sm:$0xff] %v4055_v56 }
 0x451   : > { %v4034_v21 = vpop.permute.xlu1 %1076  ;;  %1489 = vmax.xlane.f32.xlu0 %v4024_v13  ;;  %v1671_v13 = vsel %vm1666_vm7, %v1067_v20, 0  ;;  %v4075_v48 = vcvt.s32.f32 %v1216_v46 }
 0x452   : > { %2109 = vmax.xlane.f32.xlu1 %v4030_v1  ;;  %v4079_v35 = vsel %vm830_vm3, %v1671_v13, 2147483648 }
 0x453   : > { %5632 = vst [vmem:[#allocation74_spill] sm:$0xff] %v4075_v48  ;;  %5633 = vst [vmem:[#allocation75_spill] sm:$0xff] %v4079_v35 }
 0x455   : > { %v4046_v47 = vpop.permute.xlu1 %1108  ;;  %1794 = vmax.xlane.f32.xlu0 %v4038_v28 }
 0x456   : > { %v1692_v24 = vsel %vm1666_vm7, %v4046_v47, 0 }
 0x457   : > { %v4053_v1 = vsel %vm830_vm3, %v1692_v24, 2147483648 }
 0x458   : > { %5628 = vst [vmem:[#allocation70_spill] sm:$0xff] %v4053_v1  ;;  %v2076_v16 = vshra.s32 %v4053_v1, 16  ;;  %v1456_v1 = vshra.s32 %v4059_v34, 16 }
 0x459   : > { %v4064_v28 = vpop.permute.xlu1 %1088  ;;  %2034 = vmax.xlane.f32.xlu0 %v4055_v56  ;;  %v1687_v56 = vsel %vm1666_vm7, %v1099_v41, 0 }
 0x45a   : > { %v1682_v24 = vsel %vm1666_vm7, %v4064_v28, 0  ;;  %v4070_v38 = vcvt.s32.f32 %v2076_v16 }
 0x45b   : > { %v4073_v19 = vsel %vm830_vm3, %v1682_v24, 2147483648  ;;  %v4096_v24 = vcvt.s32.f32 %v1456_v1 }
 0x45c   : > { %5630 = vst [vmem:[#allocation72_spill] sm:$0xff] %v4070_v38  ;;  %5631 = vst [vmem:[#allocation73_spill] sm:$0xff] %v4073_v19  ;;  %2079 = vmax.xlane.f32.xlu1 %v4070_v38  ;;  %v1926_v20 = vshra.s32 %v4073_v19, 16  ;;  %v1761_v19 = vshra.s32 %v4079_v35, 16  ;;  %v4100_v38 = vsel %vm830_vm3, %v1687_v56, 2147483648 }
 0x45d   : > { %v4085_v57 = vpop.permute.xlu1 %1120  ;;  %1219 = vmax.xlane.f32.xlu0 %v4075_v48  ;;  %5636 = vst [vmem:[#allocation78_spill] sm:$0xff] %v4100_v38  ;;  %v1129_v48 = vsel %vm1057_vm6, %v3830_v11, 0  ;;  %v2001_v35 = vshra.s32 %v4100_v38, 16 }
 0x45e   : > { %v1698_v16 = vsel %vm1666_vm7, %v4085_v57, 0  ;;  %v4091_v46 = vcvt.s32.f32 %v1926_v20  ;;  %v4108_v20 = vpop.xlane.xlu0 %2370  ;;  %v4112_v1 = vcvt.s32.f32 %v1761_v19  ;;  %v4116_v56 = vsel %vm830_vm3, %v1129_v48, 2147483648 }
 0x45f   : > { %v4094_v13 = vsel %vm830_vm3, %v1698_v16, 2147483648  ;;  %5637 = vst [vmem:[#allocation79_spill] sm:$0xff] %v4108_v20  ;;  %v2384_v20 = vsel %vm509_vm2, %v3736_v49, -inf  ;;  %v1261_v19 = vshra.s32 %v4116_v56, 16 }
 0x460   : > { %5634 = vst [vmem:[#allocation76_spill] sm:$0xff] %v4091_v46  ;;  %5635 = vst [vmem:[#allocation77_spill] sm:$0xff] %v4094_v13  ;;  %1929 = vmax.xlane.f32.xlu1 %v4091_v46  ;;  %v2166_v41 = vshra.s32 %v4094_v13, 16  ;;  %v1145_v13 = vsel %vm1057_vm6, %v3842_v62, 0  ;;  %v2390_v62 = vsel %vm509_vm2, %v3639_v12, -inf }
 0x461   : > { %1459 = vmax.xlane.f32.xlu0 %v4096_v24  ;;  %v4129_v46 = vsel %vm830_vm3, %v1145_v13, 2147483648  ;;  %v4137_v38 = vcvt.s32.f32 %v1261_v19  ;;  %v1127_v13 = vsel %vm1057_vm6, %v3874_v4, 0 }
 0x462   : > { %v4110_v16 = vcvt.s32.f32 %v2166_v41  ;;  %v4125_v41 = vcvt.s32.f32 %v2001_v35  ;;  %v1079_v48 = vpop.permute.xlu0 %1078  ;;  %v1501_v49 = vshra.s32 %v4129_v46, 16  ;;  %v4153_v19 = vsel %vm830_vm3, %v1127_v13, 2147483648 }
 0x463   : > { %5640 = vst [vmem:[#allocation82_spill] sm:$0xff] %v4137_v38  ;;  %5642 = vst [vmem:[#allocation84_spill] sm:$0xff] %v4153_v19  ;;  %v1672_v13 = vsel %vm1666_vm7, %v3874_v4, 0  ;;  %v2414_v4 = vsel %vm509_vm2, %v3730_v6, -inf }
 0x464   : > { %5638 = vst [vmem:[#allocation80_spill] sm:$0xff] %v4110_v16  ;;  %2169 = vmax.xlane.f32.xlu1 %v4110_v16  ;;  %5639 = vst [vmem:[#allocation81_spill] sm:$0xff] %v4125_v41  ;;  %v1674_v16 = vsel %vm1666_vm7, %v3830_v11, 0 }
 0x465   : > { %1764 = vmax.xlane.f32.xlu0 %v4112_v1  ;;  %v4141_v35 = vsel %vm830_vm3, %v1674_v16, 2147483648  ;;  %v1143_v16 = vsel %vm1057_vm6, %v3890_v52, 0  ;;  %v2408_v52 = vsel %vm509_vm2, %v3659_v63, -inf }
 0x466   : > { %5641 = vst [vmem:[#allocation83_spill] sm:$0xff] %v4141_v35  ;;  %v1111_v11 = vpop.permute.xlu0 %1110  ;;  %v1806_v12 = vshra.s32 %v4141_v35, 16  ;;  %v4167_v35 = vsel %vm830_vm3, %v1143_v16, 2147483648 }
 0x467   : > { %5645 = vst [vmem:[#allocation87_spill] sm:$0xff] %v4167_v35 }
 0x468   : > { %2385 = vmax.xlane.f32.xlu1 %v2384_v20  ;;  %v2396_v20 = vsel %vm509_vm2, %v3619_v7, -inf  ;;  %v4163_v7 = vcvt.s32.f32 %v1806_v12  ;;  %v4179_v12 = vsel %vm830_vm3, %v1672_v13, 2147483648  ;;  %v1148_v13 = vsel %vm1057_vm6, %v1111_v11, 0 }
 0x469   : > { %2004 = vmax.xlane.f32.xlu0 %v4125_v41  ;;  %v4149_v41 = vcvt.s32.f32 %v1501_v49  ;;  %v1231_v49 = vshra.s32 %v4153_v19, 16  ;;  %5647 = vst [vmem:[#allocation89_spill] sm:$0xff] %v4179_v12  ;;  %v1776_v63 = vshra.s32 %v4179_v12, 16 }
 0x46a   : > { %5644 = vst [vmem:[#allocation86_spill] sm:$0xff] %v4163_v7 }
 0x46c   : > { %2391 = vmax.xlane.f32.xlu1 %v2390_v62  ;;  %v4159_v62 = vpop.xlane.xlu0 %2364 }
 0x46d   : > { %1264 = vmax.xlane.f32.xlu0 %v4137_v38  ;;  %5643 = vst [vmem:[#allocation85_spill] sm:$0xff] %v4159_v62  ;;  %v2402_v38 = vsel %vm509_vm2, %v3679_v25, -inf  ;;  %v1471_v25 = vshra.s32 %v4167_v35, 16  ;;  %v2420_v35 = vsel %vm509_vm2, %v3699_v3, -inf }
 0x46f   : > { %v4186_v16 = vcvt.s32.f32 %v1471_v25  ;;  %v4201_v25 = vsel %vm830_vm3, %v1148_v13, 2147483648 }
 0x470   : > { %2397 = vmax.xlane.f32.xlu1 %v2396_v20  ;;  %v4175_v20 = vcvt.s32.f32 %v1231_v49  ;;  %v1075_v62 = vpop.permute.xlu0 %1074  ;;  %5651 = vst [vmem:[#allocation93_spill] sm:$0xff] %v4201_v25  ;;  %v1546_v12 = vshra.s32 %v4201_v25, 16 }
 0x471   : > { %1504 = vmax.xlane.f32.xlu0 %v4149_v41  ;;  %5648 = vst [vmem:[#allocation90_spill] sm:$0xff] %v4186_v16 }
 0x472   : > { %5646 = vst [vmem:[#allocation88_spill] sm:$0xff] %v4175_v20 }
 0x474   : > { %2403 = vmax.xlane.f32.xlu1 %v2402_v38  ;;  %v1132_v38 = vsel %vm1057_vm6, %v1079_v48, 0 }
 0x475   : > { %1809 = vmax.xlane.f32.xlu0 %v4163_v7  ;;  %v4190_v49 = vsel %vm830_vm3, %v1132_v38, 2147483648  ;;  %v1677_v38 = vsel %vm1666_vm7, %v1079_v48, 0 }
 0x476   : > { %5649 = vst [vmem:[#allocation91_spill] sm:$0xff] %v4190_v49  ;;  %v1306_v6 = vshra.s32 %v4190_v49, 16 }
 0x478   : > { %2409 = vmax.xlane.f32.xlu1 %v2408_v52  ;;  %v1107_v52 = vpop.permute.xlu0 %1106 }
 0x479   : > { %1234 = vmax.xlane.f32.xlu0 %v4175_v20  ;;  %v4197_v20 = vcvt.s32.f32 %v1776_v63  ;;  %v1693_v63 = vsel %vm1666_vm7, %v1111_v11, 0 }
 0x47a   : > { %v4221_v13 = vsel %vm830_vm3, %v1693_v63, 2147483648 }
 0x47b   : > { %5650 = vst [vmem:[#allocation92_spill] sm:$0xff] %v4197_v20  ;;  %5655 = vst [vmem:[#allocation97_spill] sm:$0xff] %v4221_v13  ;;  %v2091_v11 = vshra.s32 %v4221_v13, 16 }
 0x47c   : > { %2415 = vmax.xlane.f32.xlu1 %v2414_v4  ;;  %v4206_v4 = vcvt.s32.f32 %v1306_v6  ;;  %v4212_v3 = vpop.permute.xlu0 %1086  ;;  %v1130_v6 = vsel %vm1057_vm6, %v1075_v62, 0 }
 0x47d   : > { %1474 = vmax.xlane.f32.xlu0 %v4186_v16  ;;  %v4210_v16 = vsel %vm830_vm3, %v1677_v38, 2147483648  ;;  %v4241_v49 = vcvt.s32.f32 %v2091_v11 }
 0x47e   : > { %5652 = vst [vmem:[#allocation94_spill] sm:$0xff] %v4206_v4  ;;  %5653 = vst [vmem:[#allocation95_spill] sm:$0xff] %v4210_v16  ;;  %v1851_v48 = vshra.s32 %v4210_v16, 16 }
 0x47f   : > { %5660 = vst [vmem:[#allocation102_spill] sm:$0xff] %v4241_v49 }
 0x480   : > { %2421 = vmax.xlane.f32.xlu1 %v2420_v35  ;;  %v4217_v35 = vcvt.s32.f32 %v1546_v12  ;;  %v4226_v38 = vpop.permute.xlu0 %1118  ;;  %v4228_v25 = vcvt.s32.f32 %v1851_v48  ;;  %v1146_v12 = vsel %vm1057_vm6, %v1107_v52, 0 }
 0x481   : > { %1779 = vmax.xlane.f32.xlu0 %v4197_v20  ;;  %v4245_v48 = vsel %vm830_vm3, %v1146_v12, 2147483648 }
 0x482   : > { %5654 = vst [vmem:[#allocation96_spill] sm:$0xff] %v4217_v35  ;;  %5656 = vst [vmem:[#allocation98_spill] sm:$0xff] %v4228_v25  ;;  %v1516_v11 = vshra.s32 %v4245_v48, 16 }
 0x483   : > { %5661 = vst [vmem:[#allocation103_spill] sm:$0xff] %v4245_v48 }
 0x484   : > { %v4237_v63 = vpop.xlane.xlu0 %2376  ;;  %v4277_v48 = vcvt.s32.f32 %v1516_v11 }
 0x485   : > { %1309 = vmax.xlane.f32.xlu0 %v4206_v4  ;;  %v4232_v4 = vsel %vm830_vm3, %v1130_v6, 2147483648  ;;  %5658 = vst [vmem:[#allocation100_spill] sm:$0xff] %v4237_v63  ;;  %v1675_v6 = vsel %vm1666_vm7, %v1075_v62, 0  ;;  %v1691_v62 = vsel %vm1666_vm7, %v1107_v52, 0 }
 0x486   : > { %5657 = vst [vmem:[#allocation99_spill] sm:$0xff] %v4232_v4  ;;  %v4281_v19 = vsel %vm830_vm3, %v1691_v62, 2147483648 }
 0x488   : > { %v4261_v12 = vpop.permute.xlu0 %1082 }
 0x489   : > { %1549 = vmax.xlane.f32.xlu0 %v4217_v35  ;;  %v1276_v35 = vshra.s32 %v4232_v4, 16 }
 0x48c   : > { %v4292_v11 = vpop.permute.xlu0 %1114 }
 0x48d   : > { %1854 = vmax.xlane.f32.xlu0 %v4228_v25  ;;  %v4255_v25 = vcvt.s32.f32 %v1276_v35 }
 0x48e   : > { %v4239_v16 = vpop.xlane.xlu1 %2379 }
 0x48f   : > { %5659 = vst [vmem:[#allocation101_spill] sm:$0xff] %v4239_v16  ;;  %5662 = vst [vmem:[#allocation104_spill] sm:$0xff] %v4255_v25  ;;  %v4259_v16 = vsel %vm830_vm3, %v1675_v6, 2147483648 }
 0x490   : > { %5663 = vst [vmem:[#allocation105_spill] sm:$0xff] %v4259_v16 }
 0x491   : > { %2094 = vmax.xlane.f32.xlu0 %v4241_v49 }
 0x492   : > { %v4250_v13 = vpop.permute.xlu1 %1084 }
 0x493   : > { %v1680_v63 = vsel %vm1666_vm7, %v4250_v13, 0 }
 0x494   : > { %v4264_v4 = vsel %vm830_vm3, %v1680_v63, 2147483648  ;;  %v1821_v63 = vshra.s32 %v4259_v16, 16  ;;  %v1185_v16 = vand.u32 65535, %v3777_v61 }
 0x495   : > { %5664 = vst [vmem:[#allocation106_spill] sm:$0xff] %v4264_v4  ;;  %1279 = vmax.xlane.f32.xlu0 %v4255_v25  ;;  %v1896_v49 = vshra.s32 %v4264_v4, 16  ;;  %v1133_v4 = vsel %vm1057_vm6, %v3944_v5, 0  ;;  %v1149_v5 = vsel %vm1057_vm6, %v3970_v42, 0 }
 0x496   : > { %v4270_v20 = vpop.permute.xlu1 %1116  ;;  %v4297_v62 = vcvt.s32.f32 %v1821_v63  ;;  %v4301_v7 = vsel %vm830_vm3, %v1133_v4, 2147483648  ;;  %v1187_v61 = vcvt.s32.f32 %v1185_v16 }
 0x497   : > { %v1696_v35 = vsel %vm1666_vm7, %v4270_v20, 0  ;;  %v4275_v6 = vcvt.s32.f32 %v1896_v49  ;;  %v1321_v4 = vshra.s32 %v4301_v7, 16 }
 0x498   : > { %v4284_v52 = vsel %vm830_vm3, %v1696_v35, 2147483648  ;;  %5668 = vst [vmem:[#allocation110_spill] sm:$0xff] %v4297_v62  ;;  %v2061_v35 = vshra.s32 %v4281_v19, 16 }
 0x499   : > { %5665 = vst [vmem:[#allocation107_spill] sm:$0xff] %v4275_v6  ;;  %5666 = vst [vmem:[#allocation108_spill] sm:$0xff] %v4284_v52  ;;  %1899 = vmax.xlane.f32.xlu1 %v4275_v6  ;;  %1519 = vmax.xlane.f32.xlu0 %v4277_v48  ;;  %v2136_v49 = vshra.s32 %v4284_v52, 16  ;;  %v4317_v52 = vsel %vm830_vm3, %v1149_v5, 2147483648 }
 0x49a   : > { %v4311_v63 = vcvt.s32.f32 %v2061_v35  ;;  %v1730_v35 = vand.u32 65535, %v3801_v36 }
 0x49b   : > { %v4295_v25 = vcvt.s32.f32 %v2136_v49  ;;  %v1425_v49 = vand.u32 65535, %v3788_v51 }
 0x49c   : > { %5669 = vst [vmem:[#allocation111_spill] sm:$0xff] %v4311_v63  ;;  %v1732_v36 = vcvt.s32.f32 %v1730_v35 }
 0x49d   : > { %5667 = vst [vmem:[#allocation109_spill] sm:$0xff] %v4295_v25  ;;  %2139 = vmax.xlane.f32.xlu1 %v4295_v25  ;;  %1824 = vmax.xlane.f32.xlu0 %v4297_v62  ;;  %v1131_v25 = vsel %vm1057_vm6, %v4034_v21, 0  ;;  %v1427_v51 = vcvt.s32.f32 %v1425_v49  ;;  %v4326_v62 = vcvt.s32.f32 %v1321_v4  ;;  %v1970_v4 = vand.u32 65535, %v3815_v55 }
 0x49e   : > { %v4308_v6 = vpop.xlane.xlu0 %1189  ;;  %v4332_v5 = vsel %vm830_vm3, %v1131_v25, 2147483648  ;;  %v1155_v55 = vand.u32 65535, %v3826_v37 }
 0x49f   : > { %vm1191_vm10 = vcmp.eq.f32.partialorder %v3797_v18, %v4308_v6  ;;  %v1561_v18 = vshra.s32 %v4317_v52, 16 }
 0x4a0   : > { %v1192_v42 = vsel %vm1191_vm10, %v1187_v61, -inf }
 0x4a1   : > { %2064 = vmax.xlane.f32.xlu0 %v4311_v63  ;;  %1193 = vmax.xlane.f32.xlu1 %v1192_v42  ;;  %v1147_v42 = vsel %vm1057_vm6, %v4046_v47, 0  ;;  %v4341_v63 = vcvt.s32.f32 %v1561_v18  ;;  %v1676_v47 = vsel %vm1666_vm7, %v4034_v21, 0  ;;  %v1972_v18 = vcvt.s32.f32 %v1970_v4 }
 0x4a2   : > { %v4323_v16 = vpop.xlane.xlu0 %1429  ;;  %v4347_v25 = vsel %vm830_vm3, %v1147_v42, 2147483648  ;;  %v4362_v42 = vsel %vm830_vm3, %v1676_v47, 2147483648  ;;  %v1136_v21 = vsel %vm1057_vm6, %v4212_v3, 0  ;;  %v1157_v4 = vcvt.s32.f32 %v1155_v55 }
 0x4a3   : > { %5670 = vst [vmem:[#allocation112_spill] sm:$0xff] %v4323_v16  ;;  %vm1431_vm11 = vcmp.eq.f32.partialorder %v3811_v10, %v4323_v16  ;;  %v1291_v10 = vshra.s32 %v4332_v5, 16  ;;  %5672 = vst [vmem:[#allocation114_spill] sm:$0xff] %v4362_v42  ;;  %v4379_v47 = vsel %vm830_vm3, %v1136_v21, 2147483648 }
 0x4a4   : > { %v1432_v61 = vsel %vm1431_vm11, %v1427_v51, -inf }
 0x4a5   : > { %1324 = vmax.xlane.f32.xlu0 %v4326_v62  ;;  %1433 = vmax.xlane.f32.xlu1 %v1432_v61  ;;  %v4356_v61 = vcvt.s32.f32 %v1291_v10  ;;  %v1395_v10 = vand.u32 65535, %v3837_v15 }
 0x4a6   : > { %v4338_v49 = vpop.xlane.xlu0 %1734 }
 0x4a7   : > { %vm1736_vm12 = vcmp.eq.f32.partialorder %v3822_v40, %v4338_v49  ;;  %v1531_v40 = vshra.s32 %v4347_v25, 16  ;;  %v1397_v15 = vcvt.s32.f32 %v1395_v10 }
 0x4a8   : > { %v1737_v51 = vsel %vm1736_vm12, %v1732_v36, -inf }
 0x4a9   : > { %1564 = vmax.xlane.f32.xlu0 %v4341_v63  ;;  %1738 = vmax.xlane.f32.xlu1 %v1737_v51  ;;  %v4373_v51 = vcvt.s32.f32 %v1531_v40  ;;  %v1700_v40 = vand.u32 65535, %v3848_v2 }
 0x4aa   : > { %v4353_v35 = vpop.xlane.xlu0 %1974 }
 0x4ab   : > { %5671 = vst [vmem:[#allocation113_spill] sm:$0xff] %v4353_v35  ;;  %vm1976_vm13 = vcmp.eq.f32.partialorder %v3833_v8, %v4353_v35  ;;  %v1836_v8 = vshra.s32 %v4362_v42, 16  ;;  %v1152_v35 = vsel %vm1057_vm6, %v4226_v38, 0  ;;  %v1702_v2 = vcvt.s32.f32 %v1700_v40 }
 0x4ac   : > { %v4364_v36 = vsel %vm1976_vm13, %v1972_v18, -inf  ;;  %v4394_v21 = vsel %vm830_vm3, %v1152_v35, 2147483648 }
 0x4ad   : > { %1294 = vmax.xlane.f32.xlu0 %v4356_v61  ;;  %v4388_v16 = vcvt.s32.f32 %v1836_v8  ;;  %v1940_v8 = vand.u32 65535, %v3859_v54  ;;  %v1200_v54 = vand.u32 65535, %v3869_v59 }
 0x4ae   : > { %v4370_v37 = vpop.xlane.xlu0 %1159 }
 0x4af   : > { %vm1161_vm14 = vcmp.eq.f32.partialorder %v3844_v31, %v4370_v37  ;;  %v1366_v31 = vshra.s32 %v4379_v47, 16 }
 0x4b0   : > { %v1162_v18 = vsel %vm1161_vm14, %v1157_v4, -inf }
 0x4b1   : > { %1534 = vmax.xlane.f32.xlu0 %v4373_v51  ;;  %1163 = vmax.xlane.f32.xlu1 %v1162_v18  ;;  %v1681_v18 = vsel %vm1666_vm7, %v4212_v3, 0  ;;  %v4403_v42 = vcvt.s32.f32 %v1366_v31  ;;  %v1697_v3 = vsel %vm1666_vm7, %v4226_v38, 0  ;;  %v1942_v31 = vcvt.s32.f32 %v1940_v8 }
 0x4b2   : > { %v4385_v55 = vpop.xlane.xlu0 %1399  ;;  %v4409_v35 = vsel %vm830_vm3, %v1681_v18, 2147483648  ;;  %v4424_v18 = vsel %vm830_vm3, %v1697_v3, 2147483648  ;;  %v1134_v38 = vsel %vm1057_vm6, %v4261_v12, 0  ;;  %v1202_v8 = vcvt.s32.f32 %v1200_v54 }
 0x4b3   : > { %5673 = vst [vmem:[#allocation115_spill] sm:$0xff] %v4385_v55  ;;  %vm1401_vm15 = vcmp.eq.f32.partialorder %v3855_v0, %v4385_v55  ;;  %v1606_v0 = vshra.s32 %v4394_v21, 16  ;;  %v4441_v3 = vsel %vm830_vm3, %v1134_v38, 2147483648 }
 0x4b4   : > { %v1402_v4 = vsel %vm1401_vm15, %v1397_v15, -inf  ;;  %5676 = vst [vmem:[#allocation118_spill] sm:$0xff] %v4441_v3 }
 0x4b5   : > { %1839 = vmax.xlane.f32.xlu0 %v4388_v16  ;;  %1403 = vmax.xlane.f32.xlu1 %v1402_v4  ;;  %v4418_v4 = vcvt.s32.f32 %v1606_v0  ;;  %v1440_v0 = vand.u32 65535, %v3881_v43 }
 0x4b6   : > { %v4400_v10 = vpop.xlane.xlu0 %1704 }
 0x4b7   : > { %vm1706_vm0 = vcmp.eq.f32.partialorder %v3865_v58, %v4400_v10  ;;  %5675 = vst [vmem:[#allocation117_spill] sm:$0xff] %v4418_v4  ;;  %v1911_v58 = vshra.s32 %v4409_v35, 16  ;;  %v1442_v43 = vcvt.s32.f32 %v1440_v0 }
 0x4b8   : > { %v1707_v15 = vsel %vm1706_vm0, %v1702_v2, -inf }
 0x4b9   : > { %1369 = vmax.xlane.f32.xlu0 %v4403_v42  ;;  %1708 = vmax.xlane.f32.xlu1 %v1707_v15  ;;  %v4435_v15 = vcvt.s32.f32 %v1911_v58  ;;  %v1745_v58 = vand.u32 65535, %v3896_v60 }
 0x4ba   : > { %v4415_v40 = vpop.xlane.xlu0 %1944 }
 0x4bb   : > { %5674 = vst [vmem:[#allocation116_spill] sm:$0xff] %v4415_v40  ;;  %vm1946_vm1 = vcmp.eq.f32.partialorder %v3877_v30, %v4415_v40  ;;  %v2151_v30 = vshra.s32 %v4424_v18, 16  ;;  %v1150_v40 = vsel %vm1057_vm6, %v4292_v11, 0  ;;  %v1747_v60 = vcvt.s32.f32 %v1745_v58 }
 0x4bc   : > { %v4426_v2 = vsel %vm1946_vm1, %v1942_v31, -inf  ;;  %v4456_v38 = vsel %vm830_vm3, %v1150_v40, 2147483648  ;;  %v1695_v58 = vsel %vm1666_vm7, %v4292_v11, 0 }
 0x4bd   : > { %1609 = vmax.xlane.f32.xlu0 %v4418_v4  ;;  %v4450_v55 = vcvt.s32.f32 %v2151_v30  ;;  %v1985_v30 = vand.u32 65535, %v3899_v14  ;;  %v1576_v40 = vshra.s32 %v4456_v38, 16  ;;  %v4491_v11 = vsel %vm830_vm3, %v1695_v58, 2147483648 }
 0x4be   : > { %v4432_v59 = vpop.xlane.xlu0 %1204  ;;  %v2121_v58 = vshra.s32 %v4491_v11, 16 }
 0x4bf   : > { %vm1206_vm4 = vcmp.eq.f32.partialorder %v3892_v27, %v4432_v59  ;;  %v1336_v27 = vshra.s32 %v4441_v3, 16 }
 0x4c0   : > { %v1207_v31 = vsel %vm1206_vm4, %v1202_v8, -inf }
 0x4c1   : > { %1914 = vmax.xlane.f32.xlu0 %v4435_v15  ;;  %1208 = vmax.xlane.f32.xlu1 %v1207_v31  ;;  %v1679_v31 = vsel %vm1666_vm7, %v4261_v12, 0  ;;  %v4468_v3 = vcvt.s32.f32 %v1336_v27 }
 0x4c2   : > { %v4447_v54 = vpop.xlane.xlu0 %1444  ;;  %v4474_v12 = vsel %vm830_vm3, %v1679_v31, 2147483648 }
 0x4c3   : > { %vm1446_vm5 = vcmp.eq.f32.partialorder %v3912_v22, %v4447_v54  ;;  %v1170_v22 = vand.u32 65535, %v3916_v44  ;;  %v1987_v44 = vcvt.s32.f32 %v1985_v30  ;;  %v1881_v31 = vshra.s32 %v4474_v12, 16 }
 0x4c4   : > { %v1447_v8 = vsel %vm1446_vm5, %v1442_v43, -inf }
 0x4c5   : > { %2154 = vmax.xlane.f32.xlu0 %v4450_v55  ;;  %1448 = vmax.xlane.f32.xlu1 %v1447_v8  ;;  %v1172_v27 = vcvt.s32.f32 %v1170_v22  ;;  %v4485_v8 = vcvt.s32.f32 %v1576_v40  ;;  %v4504_v40 = vcvt.s32.f32 %v1881_v31 }
 0x4c6   : > { %v4462_v0 = vpop.xlane.xlu0 %1749 }
 0x4c7   : > { %v4466_v4 = vpop.xlane.xlu1 %1989  ;;  %vm1751_vm8 = vcmp.eq.f32.partialorder %v3929_v32, %v4462_v0  ;;  %v1410_v32 = vand.u32 65535, %v3933_v17  ;;  %v1137_v17 = vsel %vm1057_vm6, %v4064_v28, 0  ;;  %v1153_v28 = vsel %vm1057_vm6, %v4085_v57, 0 }
 0x4c8   : > { %5677 = vst [vmem:[#allocation119_spill] sm:$0xff] %v4466_v4  ;;  %v1752_v43 = vsel %vm1751_vm8, %v1747_v60, -inf  ;;  %vm1991_vm9 = vcmp.eq.f32.partialorder %v3935_v23, %v4466_v4 }
 0x4c9   : > { %1339 = vmax.xlane.f32.xlu0 %v4468_v3  ;;  %1753 = vmax.xlane.f32.xlu1 %v1752_v43  ;;  %v1992_v43 = vsel %vm1991_vm9, %v1987_v44, -inf  ;;  %v1412_v22 = vcvt.s32.f32 %v1410_v32  ;;  %v4510_v44 = vsel %vm830_vm3, %v1137_v17, 2147483648 }
 0x4ca   : > { %v4482_v14 = vpop.xlane.xlu0 %1174  ;;  %v1381_v17 = vshra.s32 %v4510_v44, 16 }
 0x4cb   : > { %5678 = vst [vmem:[#allocation120_spill] sm:$0xff] %v4482_v14  ;;  %vm1176_vm10 = vcmp.eq.f32.partialorder %v3951_v26, %v4482_v14  ;;  %v4493_v60 = vpop.xlane.xlu1 %1959  ;;  %v1715_v26 = vand.u32 65535, %v3955_v39 }
 0x4cc   : > { %5679 = vst [vmem:[#allocation121_spill] sm:$0xff] %v4493_v60  ;;  %v4495_v23 = vsel %vm1176_vm10, %v1172_v27, -inf  ;;  %vm1961_vm12 = vcmp.eq.f32.partialorder %v3957_v45, %v4493_v60  ;;  %v5684_v45 = vld [vmem:[#allocation61_spill] sm:$0xff] }
 0x4cd   : > { %1579 = vmax.xlane.f32.xlu0 %v4485_v8  ;;  %1993 = vmax.xlane.f32.xlu1 %v1992_v43  ;;  %v1717_v31 = vcvt.s32.f32 %v1715_v26  ;;  %v4521_v43 = vcvt.s32.f32 %v2121_v58  ;;  %v4538_v58 = vcvt.s32.f32 %v1381_v17  ;;  %v5686_v17 = vld [vmem:[#allocation58_spill] sm:$0xff] }
 0x4ce   : > { %v4501_v30 = vpop.xlane.xlu0 %1414 }
 0x4cf   : > { %5680 = vst [vmem:[#allocation122_spill] sm:$0xff] %v4501_v30  ;;  %vm1416_vm7 = vcmp.eq.f32.partialorder %v3972_v53, %v4501_v30  ;;  %v4516_v32 = vpop.xlane.xlu1 %2049  ;;  %v1955_v53 = vand.u32 65535, %v3923_v33  ;;  %v1485_v30 = vand.u32 65535, %v5686_v17  ;;  %v5690_v17 = vld [vmem:[#allocation62_spill] sm:$0xff] }
 0x4d0   : > { %v1417_v27 = vsel %vm1416_vm7, %v1412_v22, -inf  ;;  %v4527_v22 = vsel %vm830_vm3, %v1153_v28, 2147483648 }
 0x4d1   : > { %1884 = vmax.xlane.f32.xlu0 %v4504_v40  ;;  %1418 = vmax.xlane.f32.xlu1 %v1417_v27  ;;  %v1135_v27 = vsel %vm1057_vm6, %v4250_v13, 0  ;;  %v1957_v26 = vcvt.s32.f32 %v1955_v53  ;;  %v1621_v28 = vshra.s32 %v4527_v22, 16 }
 0x4d2   : > { %v4518_v39 = vpop.xlane.xlu0 %1719 }
 0x4d3   : > { %5681 = vst [vmem:[#allocation123_spill] sm:$0xff] %v4518_v39  ;;  %vm1721_vm11 = vcmp.eq.f32.partialorder %v3993_v9, %v4518_v39  ;;  %v1245_v9 = vand.u32 65535, %v3976_v29  ;;  %v4544_v39 = vpop.xlane.xlu1 %2019  ;;  %v1962_v13 = vsel %vm1961_vm12, %v1957_v26, -inf }
 0x4d4   : > { %v1722_v57 = vsel %vm1721_vm11, %v1717_v31, -inf  ;;  %v4542_v31 = vsel %vm830_vm3, %v1135_v27, 2147483648  ;;  %v4555_v27 = vcvt.s32.f32 %v1621_v28  ;;  %v1790_v28 = vand.u32 65535, %v5690_v17 }
 0x4d5   : > { %2124 = vmax.xlane.f32.xlu0 %v4521_v43  ;;  %1723 = vmax.xlane.f32.xlu1 %v1722_v57  ;;  %5683 = vst [vmem:[#allocation125_spill] sm:$0xff] %v4542_v31  ;;  %v1151_v57 = vsel %vm1057_vm6, %v4270_v20, 0  ;;  %v1247_v53 = vcvt.s32.f32 %v1245_v9  ;;  %v1351_v60 = vshra.s32 %v4542_v31, 16  ;;  %v5689_v20 = vld [vmem:[#allocation65_spill] sm:$0xff]  ;;  %v1487_v9 = vcvt.s32.f32 %v1485_v30 }
 0x4d6   : > { %v4535_v33 = vpop.xlane.xlu0 %1249  ;;  %5687 = vst [vmem:[#allocation58_spill] sm:$0xff] %v4555_v27  ;;  %v4559_v26 = vsel %vm830_vm3, %v1151_v57, 2147483648 }
 0x4d7   : > { %5682 = vst [vmem:[#allocation124_spill] sm:$0xff] %v4535_v33  ;;  %vm1251_vm13 = vcmp.eq.f32.partialorder %v5684_v45, %v4535_v33  ;;  %5688 = vst [vmem:[#allocation126_spill] sm:$0xff] %v4559_v26  ;;  %v4569_v4 = vcvt.s32.f32 %v1351_v60  ;;  %v1591_v31 = vshra.s32 %v4559_v26, 16 }
 0x4d8   : > { %v1252_v14 = vsel %vm1251_vm13, %v1247_v53, -inf }
 0x4d9   : > { %1384 = vmax.xlane.f32.xlu0 %v4538_v58  ;;  %1963 = vmax.xlane.f32.xlu1 %v1962_v13  ;;  %v4564_v13 = vpop.xlane.xlu1 %1869  ;;  %5691 = vst [vmem:[#allocation65_spill] sm:$0xff] %v4569_v4  ;;  %v4578_v33 = vcvt.s32.f32 %v1591_v31 }
 0x4da   : > { %v4552_v29 = vpop.xlane.xlu0 %1489 }
 0x4db   : > { %5685 = vst [vmem:[#allocation61_spill] sm:$0xff] %v4552_v29  ;;  %vm1491_vm6 = vcmp.eq.f32.partialorder %v5689_v20, %v4552_v29  ;;  %v1792_v20 = vcvt.s32.f32 %v1790_v28  ;;  %v5693_v29 = vld [vmem:[#allocation69_spill] sm:$0xff]  ;;  %5694 = vst [vmem:[#allocation62_spill] sm:$0xff] %v4578_v33  ;;  %v5698_v28 = vld [vmem:[#allocation40_spill] sm:$0xff] }
 0x4dc   : > { %v1492_v57 = vsel %vm1491_vm6, %v1487_v9, -inf  ;;  %v2381_v31 = vsel %vm509_vm2, %v5698_v28, -inf }
 0x4dd   : > { %1624 = vmax.xlane.f32.xlu0 %v4555_v27  ;;  %1253 = vmax.xlane.f32.xlu1 %v1252_v14  ;;  %v5692_v14 = vld [vmem:[#allocation68_spill] sm:$0xff]  ;;  %v1215_v27 = vand.u32 65535, %v5693_v29  ;;  %v4580_v30 = vpop.xlane.xlu1 %2109 }
 0x4de   : > { %v4566_v45 = vpop.xlane.xlu0 %1794 }
 0x4df   : > { %vm1796_vm3 = vcmp.eq.f32.partialorder %v5692_v14, %v4566_v45  ;;  %v1217_v17 = vcvt.s32.f32 %v1215_v27  ;;  %v5696_v14 = vld [vmem:[#allocation74_spill] sm:$0xff] }
 0x4e0   : > { %v1797_v60 = vsel %vm1796_vm3, %v1792_v20, -inf }
 0x4e1   : > { %1354 = vmax.xlane.f32.xlu0 %v4569_v4  ;;  %1493 = vmax.xlane.f32.xlu1 %v1492_v57  ;;  %v1455_v57 = vand.u32 65535, %v4059_v34  ;;  %v5701_v34 = vld [vmem:[#allocation35_spill] sm:$0xff] }
 0x4e2   : > { %v4575_v53 = vpop.xlane.xlu0 %2034  ;;  %v2387_v27 = vsel %vm509_vm2, %v5701_v34, -inf  ;;  %v5707_v34 = vld [vmem:[#allocation37_spill] sm:$0xff] }
 0x4e5   : > { %1594 = vmax.xlane.f32.xlu0 %v4578_v33  ;;  %1798 = vmax.xlane.f32.xlu1 %v1797_v60  ;;  %v4588_v26 = vpop.xlane.xlu1 %2079  ;;  %v1457_v33 = vcvt.s32.f32 %v1455_v57  ;;  %v5700_v60 = vld [vmem:[#allocation75_spill] sm:$0xff]  ;;  %v5704_v57 = vld [vmem:[#allocation34_spill] sm:$0xff] }
 0x4e6   : > { %v4583_v9 = vpop.xlane.xlu0 %1219  ;;  %5697 = vst [vmem:[#allocation69_spill] sm:$0xff] %v4588_v26  ;;  %v1760_v4 = vand.u32 65535, %v5700_v60 }
 0x4e7   : > { %5695 = vst [vmem:[#allocation68_spill] sm:$0xff] %v4583_v9  ;;  %vm1221_vm14 = vcmp.eq.f32.partialorder %v5696_v14, %v4583_v9 }
 0x4e8   : > { %v1222_v29 = vsel %vm1221_vm14, %v1217_v17, -inf  ;;  %v1762_v17 = vcvt.s32.f32 %v1760_v4 }
 0x4e9   : > { %2382 = vmax.xlane.f32.xlu0 %v2381_v31  ;;  %1223 = vmax.xlane.f32.xlu1 %v1222_v29  ;;  %v4599_v9 = vpop.xlane.xlu1 %1929  ;;  %v2393_v31 = vsel %vm509_vm2, %v5704_v57, -inf  ;;  %v5709_v57 = vld [vmem:[#allocation82_spill] sm:$0xff] }
 0x4ea   : > { %v4592_v20 = vpop.xlane.xlu0 %1459  ;;  %5702 = vst [vmem:[#allocation40_spill] sm:$0xff] %v4599_v9 }
 0x4eb   : > { %5699 = vst [vmem:[#allocation74_spill] sm:$0xff] %v4592_v20  ;;  %vm1461_vm15 = vcmp.eq.f32.partialorder %v4096_v24, %v4592_v20 }
 0x4ec   : > { %v1462_v14 = vsel %vm1461_vm15, %v1457_v33, -inf  ;;  %v1260_v33 = vand.u32 65535, %v4116_v56 }
 0x4ed   : > { %2388 = vmax.xlane.f32.xlu0 %v2387_v27  ;;  %1463 = vmax.xlane.f32.xlu1 %v1462_v14  ;;  %v4610_v60 = vpop.xlane.xlu1 %2169  ;;  %v2399_v27 = vsel %vm509_vm2, %v5707_v34, -inf }
 0x4ee   : > { %v4601_v28 = vpop.xlane.xlu0 %1764  ;;  %5706 = vst [vmem:[#allocation34_spill] sm:$0xff] %v4610_v60  ;;  %v1262_v14 = vcvt.s32.f32 %v1260_v33 }
 0x4ef   : > { %5703 = vst [vmem:[#allocation75_spill] sm:$0xff] %v4601_v28  ;;  %vm1766_vm0 = vcmp.eq.f32.partialorder %v4112_v1, %v4601_v28  ;;  %v1500_v1 = vand.u32 65535, %v4129_v46  ;;  %v5714_v46 = vld [vmem:[#allocation39_spill] sm:$0xff] }
 0x4f0   : > { %v1767_v29 = vsel %vm1766_vm0, %v1762_v17, -inf  ;;  %v5710_v17 = vld [vmem:[#allocation36_spill] sm:$0xff]  ;;  %v2411_v33 = vsel %vm509_vm2, %v5714_v46, -inf }
 0x4f1   : > { %2394 = vmax.xlane.f32.xlu0 %v2393_v31  ;;  %1768 = vmax.xlane.f32.xlu1 %v1767_v29  ;;  %v2405_v31 = vsel %vm509_vm2, %v5710_v17, -inf  ;;  %v4621_v56 = vpop.xlane.xlu1 %2385  ;;  %v1502_v34 = vcvt.s32.f32 %v1500_v1 }
 0x4f2   : > { %v4607_v24 = vpop.xlane.xlu0 %2004  ;;  %5711 = vst [vmem:[#allocation82_spill] sm:$0xff] %v4621_v56  ;;  %v5717_v56 = vld [vmem:[#allocation86_spill] sm:$0xff] }
 0x4f3   : > { %5705 = vst [vmem:[#allocation35_spill] sm:$0xff] %v4607_v24 }
 0x4f5   : > { %2400 = vmax.xlane.f32.xlu0 %v2399_v27  ;;  %v5713_v27 = vld [vmem:[#allocation83_spill] sm:$0xff]  ;;  %v4635_v1 = vpop.xlane.xlu1 %2391 }
 0x4f6   : > { %v4614_v4 = vpop.xlane.xlu0 %1264  ;;  %v1805_v20 = vand.u32 65535, %v5713_v27  ;;  %5718 = vst [vmem:[#allocation39_spill] sm:$0xff] %v4635_v1  ;;  %v5719_v27 = vld [vmem:[#allocation38_spill] sm:$0xff] }
 0x4f7   : > { %5708 = vst [vmem:[#allocation37_spill] sm:$0xff] %v4614_v4  ;;  %vm1266_vm1 = vcmp.eq.f32.partialorder %v5709_v57, %v4614_v4  ;;  %v2417_v4 = vsel %vm509_vm2, %v5719_v27, -inf  ;;  %v5726_v27 = vld [vmem:[#allocation87_spill] sm:$0xff]  ;;  %v5727_v1 = vld [vmem:[#allocation90_spill] sm:$0xff] }
 0x4f8   : > { %v1267_v29 = vsel %vm1266_vm1, %v1262_v14, -inf  ;;  %v1807_v14 = vcvt.s32.f32 %v1805_v20  ;;  %v5722_v20 = vld [vmem:[#allocation84_spill] sm:$0xff] }
 0x4f9   : > { %2406 = vmax.xlane.f32.xlu0 %v2405_v31  ;;  %1268 = vmax.xlane.f32.xlu1 %v1267_v29  ;;  %v5716_v31 = vld [vmem:[#allocation53_spill] sm:$0xff] }
 0x4fa   : > { %v4623_v28 = vpop.xlane.xlu0 %1504  ;;  %v2045_v29 = vand.u32 65535, %v5716_v31 }
 0x4fb   : > { %5712 = vst [vmem:[#allocation36_spill] sm:$0xff] %v4623_v28  ;;  %vm1506_vm4 = vcmp.eq.f32.partialorder %v4149_v41, %v4623_v28  ;;  %v5723_v28 = vld [vmem:[#allocation88_spill] sm:$0xff] }
 0x4fc   : > { %v1507_v57 = vsel %vm1506_vm4, %v1502_v34, -inf  ;;  %v5720_v34 = vld [vmem:[#allocation55_spill] sm:$0xff] }
 0x4fd   : > { %2412 = vmax.xlane.f32.xlu0 %v2411_v33  ;;  %1508 = vmax.xlane.f32.xlu1 %v1507_v57  ;;  %vm2051_vm8 = vcmp.eq.f32.partialorder %v5720_v34, %v4516_v32  ;;  %v2047_v33 = vcvt.s32.f32 %v2045_v29  ;;  %v1230_v57 = vand.u32 65535, %v5722_v20  ;;  %v5730_v20 = vld [vmem:[#allocation89_spill] sm:$0xff] }
 0x4fe   : > { %v4630_v17 = vpop.xlane.xlu0 %1809 }
 0x4ff   : > { %5715 = vst [vmem:[#allocation83_spill] sm:$0xff] %v4630_v17  ;;  %vm1811_vm5 = vcmp.eq.f32.partialorder %v5717_v56, %v4630_v17  ;;  %v2052_v31 = vsel %vm2051_vm8, %v2047_v33, -inf  ;;  %v4647_v56 = vpop.xlane.xlu1 %2397  ;;  %v5729_v33 = vld [vmem:[#allocation66_spill] sm:$0xff] }
 0x500   : > { %v1812_v41 = vsel %vm1811_vm5, %v1807_v14, -inf  ;;  %5724 = vst [vmem:[#allocation86_spill] sm:$0xff] %v4647_v56 }
 0x501   : > { %2418 = vmax.xlane.f32.xlu0 %v2417_v4  ;;  %1813 = vmax.xlane.f32.xlu1 %v1812_v41  ;;  %v1232_v4 = vcvt.s32.f32 %v1230_v57  ;;  %v1470_v41 = vand.u32 65535, %v5726_v27  ;;  %v5732_v57 = vld [vmem:[#allocation92_spill] sm:$0xff] }
 0x502   : > { %v4641_v46 = vpop.xlane.xlu0 %1234 }
 0x503   : > { %5721 = vst [vmem:[#allocation53_spill] sm:$0xff] %v4641_v46  ;;  %vm1236_vm9 = vcmp.eq.f32.partialorder %v5723_v28, %v4641_v46  ;;  %v1472_v28 = vcvt.s32.f32 %v1470_v41  ;;  %v4659_v56 = vpop.xlane.xlu1 %2403  ;;  %v5734_v41 = vld [vmem:[#allocation78_spill] sm:$0xff] }
 0x504   : > { %v1237_v34 = vsel %vm1236_vm9, %v1232_v4, -inf  ;;  %5731 = vst [vmem:[#allocation84_spill] sm:$0xff] %v4659_v56 }
 0x505   : > { %1978 = vmax.xlane.f32.xlu0 %v4364_v36  ;;  %2053 = vmax.xlane.f32.xlu1 %v2052_v31  ;;  %v2030_v36 = vand.u32 65535, %v5729_v33  ;;  %v1775_v31 = vand.u32 65535, %v5730_v20  ;;  %v5735_v33 = vld [vmem:[#allocation54_spill] sm:$0xff] }
 0x506   : > { %v4649_v14 = vpop.xlane.xlu0 %1474  ;;  %v2015_v20 = vand.u32 65535, %v5735_v33 }
 0x507   : > { %5725 = vst [vmem:[#allocation38_spill] sm:$0xff] %v4649_v14  ;;  %vm1476_vm10 = vcmp.eq.f32.partialorder %v5727_v1, %v4649_v14  ;;  %v5733_v1 = vld [vmem:[#allocation71_spill] sm:$0xff]  ;;  %v2032_v4 = vcvt.s32.f32 %v2030_v36  ;;  %v1777_v27 = vcvt.s32.f32 %v1775_v31 }
 0x508   : > { %v1477_v46 = vsel %vm1476_vm10, %v1472_v28, -inf  ;;  %vm2036_vm11 = vcmp.eq.f32.partialorder %v5733_v1, %v4575_v53  ;;  %v5736_v28 = vld [vmem:[#allocation81_spill] sm:$0xff]  ;;  %v2017_v31 = vcvt.s32.f32 %v2015_v20  ;;  %v5739_v1 = vld [vmem:[#allocation91_spill] sm:$0xff]  ;;  %v5744_v20 = vld [vmem:[#allocation98_spill] sm:$0xff] }
 0x509   : > { %1948 = vmax.xlane.f32.xlu0 %v4426_v2  ;;  %1238 = vmax.xlane.f32.xlu1 %v1237_v34  ;;  %v2000_v34 = vand.u32 65535, %v5734_v41  ;;  %v2037_v14 = vsel %vm2036_vm11, %v2032_v4, -inf  ;;  %vm2006_vm12 = vcmp.eq.f32.partialorder %v5736_v28, %v4607_v24  ;;  %v1305_v41 = vand.u32 65535, %v5739_v1  ;;  %v5743_v24 = vld [vmem:[#allocation97_spill] sm:$0xff] }
 0x50a   : > { %v4655_v29 = vpop.xlane.xlu0 %1779  ;;  %vm3173_vm11 = vmmov 1  }
 0x50b   : > { %5728 = vst [vmem:[#allocation55_spill] sm:$0xff] %v4655_v29  ;;  %vm1781_vm7 = vcmp.eq.f32.partialorder %v5732_v57, %v4655_v29  ;;  %v2002_v36 = vcvt.s32.f32 %v2000_v34  ;;  %v5740_v29 = vld [vmem:[#allocation95_spill] sm:$0xff]  ;;  %v1307_v28 = vcvt.s32.f32 %v1305_v41  ;;  %v2090_v34 = vand.u32 65535, %v5743_v24  ;;  %v5748_v24 = vld [vmem:[#allocation102_spill] sm:$0xff] }
 0x50c   : > { %v1782_v56 = vsel %vm1781_vm7, %v1777_v27, -inf  ;;  %v1850_v33 = vand.u32 65535, %v5740_v29 }
 0x50d   : > { %1178 = vmax.xlane.f32.xlu0 %v4495_v23  ;;  %1478 = vmax.xlane.f32.xlu1 %v1477_v46  ;;  %v5737_v23 = vld [vmem:[#allocation59_spill] sm:$0xff]  ;;  %v4674_v46 = vpop.xlane.xlu1 %2409  ;;  %v2007_v4 = vsel %vm2006_vm12, %v2002_v36, -inf }
 0x50e   : > { %v4666_v2 = vpop.xlane.xlu0 %1309  ;;  %vm2021_vm13 = vcmp.eq.f32.partialorder %v5737_v23, %v4544_v39  ;;  %5738 = vst [vmem:[#allocation88_spill] sm:$0xff] %v4674_v46  ;;  %v1852_v23 = vcvt.s32.f32 %v1850_v33  ;;  %v5742_v46 = vld [vmem:[#allocation93_spill] sm:$0xff]  ;;  %v2092_v33 = vcvt.s32.f32 %v2090_v34 }
 0x50f   : > { %v2022_v27 = vsel %vm2021_vm13, %v2017_v31, -inf  ;;  %v1545_v17 = vand.u32 65535, %v5742_v46  ;;  %v5746_v31 = vld [vmem:[#allocation96_spill] sm:$0xff] }
 0x511   : > { %2038 = vmax.xlane.f32.xlu0 %v2037_v14  ;;  %1783 = vmax.xlane.f32.xlu1 %v1782_v56  ;;  %v5741_v56 = vld [vmem:[#allocation94_spill] sm:$0xff]  ;;  %v4688_v1 = vpop.xlane.xlu1 %2415  ;;  %v1547_v41 = vcvt.s32.f32 %v1545_v17 }
 0x512   : > { %v4676_v57 = vpop.xlane.xlu0 %1549  ;;  %vm1311_vm6 = vcmp.eq.f32.partialorder %v5741_v56, %v4666_v2  ;;  %5745 = vst [vmem:[#allocation87_spill] sm:$0xff] %v4688_v1  ;;  %v5752_v1 = vld [vmem:[#allocation104_spill] sm:$0xff] }
 0x513   : > { %v1312_v29 = vsel %vm1311_vm6, %v1307_v28, -inf  ;;  %vm1551_vm14 = vcmp.eq.f32.partialorder %v5746_v31, %v4676_v57 }
 0x514   : > { %v1552_v56 = vsel %vm1551_vm14, %v1547_v41, -inf }
 0x515   : > { %2008 = vmax.xlane.f32.xlu0 %v2007_v4  ;;  %2023 = vmax.xlane.f32.xlu1 %v2022_v27  ;;  %v5747_v27 = vld [vmem:[#allocation99_spill] sm:$0xff]  ;;  %v4697_v28 = vpop.xlane.xlu1 %2421 }
 0x516   : > { %v4682_v14 = vpop.xlane.xlu0 %1854  ;;  %v1275_v46 = vand.u32 65535, %v5747_v27  ;;  %5749 = vst [vmem:[#allocation90_spill] sm:$0xff] %v4697_v28 }
 0x517   : > { %vm1856_vm3 = vcmp.eq.f32.partialorder %v5744_v20, %v4682_v14 }
 0x518   : > { %v1857_v36 = vsel %vm1856_vm3, %v1852_v23, -inf  ;;  %v1277_v31 = vcvt.s32.f32 %v1275_v46 }
 0x519   : > { %1313 = vmax.xlane.f32.xlu1 %v1312_v29  ;;  %1858 = vmax.xlane.f32.xlu0 %v1857_v36  ;;  %v5751_v29 = vld [vmem:[#allocation103_spill] sm:$0xff] }
 0x51a   : > { %v4692_v4 = vpop.xlane.xlu0 %2094  ;;  %v1515_v36 = vand.u32 65535, %v5751_v29 }
 0x51b   : > { %vm2096_vm15 = vcmp.eq.f32.partialorder %v5748_v24, %v4692_v4 }
 0x51c   : > { %v2097_v20 = vsel %vm2096_vm15, %v2092_v33, -inf  ;;  %v1517_v41 = vcvt.s32.f32 %v1515_v36  ;;  %v5755_v33 = vld [vmem:[#allocation105_spill] sm:$0xff]  ;;  %v1196_v36 = vcvt.f32.s32 %v4308_v6  ;;  %v1560_v6 = vand.u32 65535, %v4317_v52 }
 0x51d   : > { %1553 = vmax.xlane.f32.xlu1 %v1552_v56  ;;  %2098 = vmax.xlane.f32.xlu0 %v2097_v20  ;;  %v1820_v24 = vand.u32 65535, %v5755_v33 }
 0x51e   : > { %v4699_v23 = vpop.xlane.xlu0 %1279 }
 0x51f   : > { %5750 = vst [vmem:[#allocation66_spill] sm:$0xff] %v4699_v23  ;;  %vm1281_vm0 = vcmp.eq.f32.partialorder %v5752_v1, %v4699_v23  ;;  %v1822_v29 = vcvt.s32.f32 %v1820_v24  ;;  %v2060_v1 = vand.u32 65535, %v4281_v19  ;;  %v1197_v19 = vshll.u32 %v1196_v36, 16  ;;  %v5761_v36 = vld [vmem:[#allocation56_spill] sm:$0xff] }
 0x520   : > { %v1282_v17 = vsel %vm1281_vm0, %v1277_v31, -inf  ;;  %v5758_v31 = vld [vmem:[#allocation110_spill] sm:$0xff] }
 0x521   : > { %1283 = vmax.xlane.f32.xlu1 %v1282_v17 }
 0x522   : > { %v4704_v34 = vpop.xlane.xlu1 %1899  ;;  %v4706_v27 = vpop.xlane.xlu0 %1519 }
 0x523   : > { %5753 = vst [vmem:[#allocation89_spill] sm:$0xff] %v4704_v34  ;;  %5754 = vst [vmem:[#allocation92_spill] sm:$0xff] %v4706_v27  ;;  %vm1521_vm1 = vcmp.eq.f32.partialorder %v4277_v48, %v4706_v27  ;;  %v2062_v48 = vcvt.s32.f32 %v2060_v1 }
 0x524   : > { %v1522_v56 = vsel %vm1521_vm1, %v1517_v41, -inf  ;;  %v1320_v41 = vand.u32 65535, %v4301_v7 }
 0x525   : > { %1523 = vmax.xlane.f32.xlu1 %v1522_v56  ;;  %v5760_v56 = vld [vmem:[#allocation111_spill] sm:$0xff] }
 0x526   : > { %v4711_v46 = vpop.xlane.xlu1 %2139  ;;  %v4713_v20 = vpop.xlane.xlu0 %1824 }
 0x527   : > { %5756 = vst [vmem:[#allocation71_spill] sm:$0xff] %v4711_v46  ;;  %5757 = vst [vmem:[#allocation78_spill] sm:$0xff] %v4713_v20  ;;  %vm1826_vm4 = vcmp.eq.f32.partialorder %v5758_v31, %v4713_v20 }
 0x528   : > { %v1827_v17 = vsel %vm1826_vm4, %v1822_v29, -inf  ;;  %v1322_v29 = vcvt.s32.f32 %v1320_v41 }
 0x529   : > { %1828 = vmax.xlane.f32.xlu1 %v1827_v17  ;;  %v1741_v17 = vcvt.f32.s32 %v4338_v49 }
 0x52a   : > { %v1194_v33 = vpop.xlane.xlu1 %1193  ;;  %v4719_v28 = vpop.xlane.xlu0 %2064 }
 0x52b   : > { %5759 = vst [vmem:[#allocation54_spill] sm:$0xff] %v4719_v28  ;;  %vm2066_vm5 = vcmp.eq.f32.partialorder %v5760_v56, %v4719_v28  ;;  %v1195_v27 = vcvt.f32.s32 %v1194_v33  ;;  %v1742_v28 = vshll.u32 %v1741_v17, 16 }
 0x52c   : > { %v2067_v24 = vsel %vm2066_vm5, %v2062_v48, -inf  ;;  %v1562_v48 = vcvt.s32.f32 %v1560_v6  ;;  %v5783_v6 = vld [vmem:[#allocation2_spill] sm:$0xff] }
 0x52d   : > { %2068 = vmax.xlane.f32.xlu0 %v2067_v24  ;;  %v1198_v7 = vadd.s32 %v1197_v19, %v1195_v27  ;;  %v1865_v24 = vand.u32 65535, %v5761_v36  ;;  %v5764_v19 = vld [vmem:[#allocation60_spill] sm:$0xff] }
 0x52e   : > { %v4724_v23 = vpop.xlane.xlu1 %1433  ;;  %v4726_v31 = vpop.xlane.xlu0 %1324 }
 0x52f   : > { %vm1326_vm8 = vcmp.eq.f32.partialorder %v4326_v62, %v4726_v31  ;;  %vm1636_vm10 = vcmp.eq.s32.totalorder %v1198_v7, 1  ;;  %v5762_v62 = vld [vmem:[#allocation63_spill] sm:$0xff]  ;;  %v1867_v41 = vcvt.s32.f32 %v1865_v24 }
 0x530   : > { %v1327_v1 = vsel %vm1326_vm8, %v1322_v29, -inf  ;;  %vm1871_vm7 = vcmp.eq.f32.partialorder %v5762_v62, %v4564_v13  ;;  %v2105_v29 = vand.u32 65535, %v5764_v19  ;;  %vm2213_vm12 = vmxor %vm1636_vm10, %vm3173_vm11 }
 0x531   : > { %1328 = vmax.xlane.f32.xlu1 %v1327_v1 }
 0x532   : > { %v1739_v56 = vpop.xlane.xlu1 %1738  ;;  %v4732_v33 = vpop.xlane.xlu0 %1564  ;;  %v2107_v1 = vcvt.s32.f32 %v2105_v29 }
 0x533   : > { %v1740_v20 = vcvt.f32.s32 %v1739_v56  ;;  %vm1566_vm9 = vcmp.eq.f32.partialorder %v4341_v63, %v4732_v33  ;;  %v1872_v63 = vsel %vm1871_vm7, %v1867_v41, -inf  ;;  %v1290_v56 = vand.u32 65535, %v4332_v5 }
 0x534   : > { %v1567_v52 = vsel %vm1566_vm9, %v1562_v48, -inf  ;;  %v1711_v41 = vcvt.f32.s32 %v4400_v10 }
 0x535   : > { %v1743_v49 = vadd.s32 %v1742_v28, %v1740_v20  ;;  %1568 = vmax.xlane.f32.xlu1 %v1567_v52  ;;  %v5767_v28 = vld [vmem:[#allocation67_spill] sm:$0xff]  ;;  %v1166_v20 = vcvt.f32.s32 %v4370_v37  ;;  %v1292_v62 = vcvt.s32.f32 %v1290_v56  ;;  %v1530_v37 = vand.u32 65535, %v4347_v25 }
 0x536   : > { %v4739_v27 = vpop.xlane.xlu0 %1294  ;;  %vm2111_vm3 = vcmp.eq.f32.partialorder %v5767_v28, %v4580_v30  ;;  %v5771_v28 = vld [vmem:[#allocation114_spill] sm:$0xff] }
 0x537   : > { %5763 = vst [vmem:[#allocation81_spill] sm:$0xff] %v4739_v27  ;;  %vm2181_vm13 = vcmp.eq.s32.totalorder %v1743_v49, 1  ;;  %v2112_v36 = vsel %vm2111_vm3, %v2107_v1, -inf  ;;  %vm1296_vm14 = vcmp.eq.f32.partialorder %v4356_v61, %v4739_v27  ;;  %v1167_v24 = vshll.u32 %v1166_v20, 16 }
 0x538   : > { %vm4743_vm6 = vmand %vm2213_vm12, %vm2181_vm13  ;;  %v1297_v29 = vsel %vm1296_vm14, %v1292_v62, -inf  ;;  %v1532_v61 = vcvt.s32.f32 %v1530_v37  ;;  %v1835_v20 = vand.u32 65535, %v5771_v28  ;;  %v2150_v28 = vand.u32 65535, %v4424_v18 }
 0x539   : > { %1873 = vmax.xlane.f32.xlu1 %v1872_v63  ;;  %v1605_v18 = vand.u32 65535, %v4394_v21  ;;  %vm2435_vm14 = vcmp.eq.s32.totalorder %v3764_v50, 40 }
 0x53a   : > { %v1164_v17 = vpop.xlane.xlu1 %1163  ;;  %v4750_v7 = vpop.xlane.xlu0 %1534 }
 0x53b   : > { %5768 = vst [vmem:[#allocation59_spill] sm:$0xff] %v4750_v7  ;;  %v1165_v48 = vcvt.f32.s32 %v1164_v17  ;;  %vm1536_vm15 = vcmp.eq.f32.partialorder %v4373_v51, %v4750_v7  ;;  %v1712_v17 = vshll.u32 %v1711_v41, 16  ;;  %v5773_v51 = vld [vmem:[#allocation70_spill] sm:$0xff]  ;;  %v1365_v41 = vand.u32 65535, %v4379_v47 }
 0x53c   : > { %v1537_v56 = vsel %vm1536_vm15, %v1532_v61, -inf  ;;  %v1607_v21 = vcvt.s32.f32 %v1605_v18 }
 0x53d   : > { %2113 = vmax.xlane.f32.xlu1 %v2112_v36  ;;  %v1168_v19 = vadd.s32 %v1167_v24, %v1165_v48  ;;  %v1837_v48 = vcvt.s32.f32 %v1835_v20  ;;  %v2075_v36 = vand.u32 65535, %v5773_v51  ;;  %v1910_v24 = vand.u32 65535, %v4409_v35 }
 0x53e   : > { %v4755_v52 = vpop.xlane.xlu1 %1403  ;;  %v4757_v49 = vpop.xlane.xlu0 %1839  ;;  %v1451_v20 = vcvt.f32.s32 %v4447_v54  ;;  %v2152_v51 = vcvt.s32.f32 %v2150_v28 }
 0x53f   : > { %5769 = vst [vmem:[#allocation91_spill] sm:$0xff] %v4757_v49  ;;  %vm1634_vm0 = vcmp.eq.s32.totalorder %v1168_v19, 1  ;;  %vm1841_vm1 = vcmp.eq.f32.partialorder %v4388_v16, %v4757_v49  ;;  %v5776_v16 = vld [vmem:[#allocation72_spill] sm:$0xff]  ;;  %v1211_v19 = vcvt.f32.s32 %v4432_v59  ;;  %v2077_v35 = vcvt.s32.f32 %v2075_v36 }
 0x540   : > { %vm2211_vm4 = vmxor %vm1634_vm0, %vm3173_vm11  ;;  %v1842_v37 = vsel %vm1841_vm1, %v1837_v48, -inf  ;;  %vm2081_vm9 = vcmp.eq.f32.partialorder %v5776_v16, %v4588_v26  ;;  %v1912_v61 = vcvt.s32.f32 %v1910_v24  ;;  %v1367_v48 = vcvt.s32.f32 %v1365_v41  ;;  %v5779_v16 = vld [vmem:[#allocation117_spill] sm:$0xff] }
 0x541   : > { %1298 = vmax.xlane.f32.xlu1 %v1297_v29  ;;  %v1212_v47 = vshll.u32 %v1211_v19, 16  ;;  %v1452_v54 = vshll.u32 %v1451_v20, 16  ;;  %v1756_v36 = vcvt.f32.s32 %v4462_v0  ;;  %v5538_v20 = vmov 0.0  }
 0x542   : > { %v1709_v5 = vpop.xlane.xlu1 %1708  ;;  %v4763_v63 = vpop.xlane.xlu0 %1369 }
 0x543   : > { %5770 = vst [vmem:[#allocation95_spill] sm:$0xff] %v4763_v63  ;;  %v1710_v1 = vcvt.f32.s32 %v1709_v5  ;;  %vm1371_vm7 = vcmp.eq.f32.partialorder %v4403_v42, %v4763_v63 }
 0x545   : > { %v1713_v25 = vadd.s32 %v1712_v17, %v1710_v1  ;;  %1538 = vmax.xlane.f32.xlu1 %v1537_v56  ;;  %v2082_v1 = vsel %vm2081_vm9, %v2077_v35, -inf  ;;  %v5781_v35 = vld [vmem:[#allocation118_spill] sm:$0xff] }
 0x546   : > { %v4768_v10 = vpop.xlane.xlu0 %1609  ;;  %v1335_v0 = vand.u32 65535, %v5781_v35 }
 0x547   : > { %5772 = vst [vmem:[#allocation94_spill] sm:$0xff] %v4768_v10  ;;  %vm2179_vm5 = vcmp.eq.s32.totalorder %v1713_v25, 1  ;;  %vm1611_vm13 = vcmp.eq.f32.partialorder %v5779_v16, %v4768_v10  ;;  %v5786_v16 = vld [vmem:[#allocation45_spill] sm:$0xff] }
 0x548   : > { %vm4773_vm8 = vmand %vm2211_vm4, %vm2179_vm5 }
 0x549   : > { %1843 = vmax.xlane.f32.xlu1 %v1842_v37  ;;  %v1372_v37 = vsel %vm1371_vm7, %v1367_v48, -inf  ;;  %v1575_v48 = vand.u32 65535, %v4456_v38  ;;  %v5784_v38 = vld [vmem:[#allocation5_spill] sm:$0xff] }
 0x54a   : > { %v1209_v29 = vpop.xlane.xlu1 %1208  ;;  %v4781_v5 = vpop.xlane.xlu0 %1914 }
 0x54b   : > { %5777 = vst [vmem:[#allocation93_spill] sm:$0xff] %v4781_v5  ;;  %vm1916_vm10 = vcmp.eq.f32.partialorder %v4435_v15, %v4781_v5  ;;  %v1210_v17 = vcvt.f32.s32 %v1209_v29  ;;  %v5830_v5 = vld [vmem:[#allocation83_spill] sm:$0xff] }
 0x54c   : > { %v1917_v56 = vsel %vm1916_vm10, %v1912_v61, -inf  ;;  %v1757_v61 = vshll.u32 %v1756_v36, 16  ;;  %v1816_v63 = vcvt.f32.s32 %v5830_v5  ;;  %v5833_v5 = vld [vmem:[#allocation55_spill] sm:$0xff] }
 0x54d   : > { %2083 = vmax.xlane.f32.xlu1 %v2082_v1  ;;  %1918 = vmax.xlane.f32.xlu0 %v1917_v56  ;;  %v1213_v24 = vadd.s32 %v1212_v47, %v1210_v17  ;;  %v2761_v17 = vsel %vm4743_vm6, 1.0, %v5538_v20  ;;  %vm2468_vm6 = vcmp.eq.s32.totalorder %v3764_v50, 41 }
 0x54e   : > { %v1449_v59 = vpop.xlane.xlu1 %1448  ;;  %v4789_v25 = vpop.xlane.xlu0 %2154 }
 0x54f   : > { %5778 = vst [vmem:[#allocation97_spill] sm:$0xff] %v4789_v25  ;;  %v1450_v15 = vcvt.f32.s32 %v1449_v59  ;;  %vm2156_vm12 = vcmp.eq.f32.partialorder %v4450_v55, %v4789_v25  ;;  %vm1637_vm3 = vcmp.eq.s32.totalorder %v1213_v24, 1  ;;  %v1612_v55 = vsel %vm1611_vm13, %v1607_v21, -inf  ;;  %v5829_v25 = vld [vmem:[#allocation36_spill] sm:$0xff] }
 0x550   : > { %v2157_v42 = vsel %vm2156_vm12, %v2152_v51, -inf  ;;  %v1337_v59 = vcvt.s32.f32 %v1335_v0  ;;  %v1880_v51 = vand.u32 65535, %v4474_v12  ;;  %vm2214_vm0 = vmxor %vm1637_vm3, %vm3173_vm11  ;;  %v1577_v24 = vcvt.s32.f32 %v1575_v48 }
 0x551   : > { %v4797_v19 = vadd.s32 %v1452_v54, %v1450_v15  ;;  %1373 = vmax.xlane.f32.xlu1 %v1372_v37  ;;  %2158 = vmax.xlane.f32.xlu0 %v2157_v42  ;;  %v2120_v42 = vand.u32 65535, %v4491_v11 }
 0x552   : > { %v1754_v41 = vpop.xlane.xlu1 %1753  ;;  %v4799_v29 = vpop.xlane.xlu0 %1339  ;;  %v1882_v37 = vcvt.s32.f32 %v1880_v51  ;;  %v1620_v51 = vand.u32 65535, %v4527_v22 }
 0x553   : > { %5780 = vst [vmem:[#allocation98_spill] sm:$0xff] %v4799_v29  ;;  %v1755_v28 = vcvt.f32.s32 %v1754_v41  ;;  %vm1341_vm15 = vcmp.eq.f32.partialorder %v4468_v3, %v4799_v29  ;;  %v2438_v3 = vsel %vm2435_vm14, %v2761_v17, %v5783_v6  ;;  %v1380_v17 = vand.u32 65535, %v4510_v44  ;;  %v5790_v6 = vld [vmem:[#allocation43_spill] sm:$0xff]  ;;  %v5791_v44 = vld [vmem:[#allocation124_spill] sm:$0xff] }
 0x554   : > { %v1342_v18 = vsel %vm1341_vm15, %v1337_v59, -inf  ;;  %v2471_v41 = vsel %vm2468_vm6, %v5786_v16, %v2438_v3  ;;  %v2423_v3 = vsel %vm509_vm2, %v5790_v6, -inf  ;;  %v5795_v16 = vld [vmem:[#allocation41_spill] sm:$0xff]  ;;  %v5799_v6 = vld [vmem:[#allocation80_spill] sm:$0xff] }
 0x555   : > { %v1758_v1 = vadd.s32 %v1757_v61, %v1755_v28  ;;  %1613 = vmax.xlane.f32.xlu1 %v1612_v55  ;;  %v2122_v55 = vcvt.s32.f32 %v2120_v42  ;;  %v1382_v48 = vcvt.s32.f32 %v1380_v17  ;;  %v5794_v42 = vld [vmem:[#allocation58_spill] sm:$0xff]  ;;  %vm2171_vm3 = vcmp.eq.f32.partialorder %v5799_v6, %v4610_v60 }
 0x556   : > { %v4808_v56 = vpop.xlane.xlu1 %1993  ;;  %v4810_v47 = vpop.xlane.xlu0 %1579  ;;  %v5819_v60 = vld [vmem:[#allocation42_spill] sm:$0xff] }
 0x557   : > { %5782 = vst [vmem:[#allocation96_spill] sm:$0xff] %v4810_v47  ;;  %vm2182_vm1 = vcmp.eq.s32.totalorder %v1758_v1, 1  ;;  %vm1581_vm5 = vcmp.eq.f32.partialorder %v4485_v8, %v4810_v47  ;;  %v5787_v8 = vld [vmem:[#allocation44_spill] sm:$0xff]  ;;  %v1995_v29 = vcvt.f32.s32 %v4808_v56 }
 0x558   : > { %vm2246_vm4 = vmand %vm2214_vm0, %vm2182_vm1  ;;  %v1582_v11 = vsel %vm1581_vm5, %v1577_v24, -inf  ;;  %v5793_v24 = vld [vmem:[#allocation73_spill] sm:$0xff] }
 0x559   : > { %v2762_v54 = vsel %vm2246_vm4, 1.0, %v5538_v20  ;;  %1343 = vmax.xlane.f32.xlu1 %v1342_v18 }
 0x55a   : > { %v2439_v12 = vsel %vm2435_vm14, %v2762_v54, %v5784_v38  ;;  %v4825_v36 = vpop.xlane.xlu1 %1418  ;;  %v4827_v15 = vpop.xlane.xlu0 %1884 }
 0x55b   : > { %5785 = vst [vmem:[#allocation99_spill] sm:$0xff] %v4827_v15  ;;  %v2472_v21 = vsel %vm2468_vm6, %v5787_v8, %v2439_v12  ;;  %vm1886_vm9 = vcmp.eq.f32.partialorder %v4504_v40, %v4827_v15  ;;  %v1622_v12 = vcvt.s32.f32 %v1620_v51  ;;  %v5796_v8 = vld [vmem:[#allocation76_spill] sm:$0xff]  ;;  %v5826_v15 = vld [vmem:[#allocation37_spill] sm:$0xff] }
 0x55c   : > { %v2865_v35 = vpack.c.bf16 %v2472_v21, %v2471_v41  ;;  %v1887_v0 = vsel %vm1886_vm9, %v1882_v37, -inf  ;;  %v1925_v37 = vand.u32 65535, %v5793_v24  ;;  %vm1931_vm13 = vcmp.eq.f32.partialorder %v5796_v8, %v4599_v9 }
 0x55d   : > { %1583 = vmax.xlane.f32.xlu1 %v1582_v11  ;;  %1888 = vmax.xlane.f32.xlu0 %v1887_v0  ;;  %v1271_v47 = vcvt.f32.s32 %v5826_v15  ;;  %v1511_v15 = vcvt.f32.s32 %v5829_v25  ;;  %v1405_v25 = vcvt.f32.s32 %v4755_v52 }
 0x55e   : > { %2937 = vst [vmem:[%s4838_s26 + $0x8] sm:$0xff] %v2865_v35   ;;  %v4846_v61 = vpop.xlane.xlu1 %1723  ;;  %v4848_v28 = vpop.xlane.xlu0 %2124  ;;  %v1927_v0 = vcvt.s32.f32 %v1925_v37 }
 0x55f   : > { %5788 = vst [vmem:[#allocation102_spill] sm:$0xff] %v4848_v28  ;;  %vm2126_vm10 = vcmp.eq.f32.partialorder %v4521_v43, %v4848_v28  ;;  %v1256_v43 = vcvt.f32.s32 %v5791_v44  ;;  %v5825_v28 = vld [vmem:[#allocation74_spill] sm:$0xff] }
 0x560   : > { %v2127_v1 = vsel %vm2126_vm10, %v2122_v55, -inf  ;;  %v5798_v55 = vld [vmem:[#allocation77_spill] sm:$0xff]  ;;  %v1932_v51 = vsel %vm1931_vm13, %v1927_v0, -inf }
 0x561   : > { %2128 = vmax.xlane.f32.xlu0 %v2127_v1  ;;  %v1257_v21 = vshll.u32 %v1256_v43, 16  ;;  %v2165_v17 = vand.u32 65535, %v5798_v55  ;;  %v1801_v1 = vcvt.f32.s32 %v4566_v45  ;;  %v5801_v43 = vld [vmem:[#allocation125_spill] sm:$0xff]  ;;  %v5807_v55 = vld [vmem:[#allocation62_spill] sm:$0xff] }
 0x562   : > { %v4853_v59 = vpop.xlane.xlu1 %1963  ;;  %v4855_v40 = vpop.xlane.xlu0 %1384 }
 0x563   : > { %5789 = vst [vmem:[#allocation103_spill] sm:$0xff] %v4855_v40  ;;  %vm1386_vm7 = vcmp.eq.f32.partialorder %v4538_v58, %v4855_v40  ;;  %v2429_v58 = vsel %vm509_vm2, %v5795_v16, -inf  ;;  %v2167_v44 = vcvt.s32.f32 %v2165_v17  ;;  %v1965_v56 = vcvt.f32.s32 %v4853_v59 }
 0x564   : > { %v1387_v18 = vsel %vm1386_vm7, %v1382_v48, -inf }
 0x565   : > { %2424 = vmax.xlane.f32.xlu0 %v2423_v3  ;;  %1388 = vmax.xlane.f32.xlu1 %v1387_v18  ;;  %v2172_v37 = vsel %vm2171_vm3, %v2167_v44, -inf  ;;  %v5809_v44 = vld [vmem:[#allocation108_spill] sm:$0xff] }
 0x566   : > { %v1254_v54 = vpop.xlane.xlu1 %1253  ;;  %v4863_v38 = vpop.xlane.xlu0 %1624 }
 0x567   : > { %5792 = vst [vmem:[#allocation104_spill] sm:$0xff] %v4863_v38  ;;  %vm1626_vm12 = vcmp.eq.f32.partialorder %v5794_v42, %v4863_v38  ;;  %v1255_v22 = vcvt.f32.s32 %v1254_v54  ;;  %v1350_v54 = vand.u32 65535, %v5801_v43  ;;  %v5802_v42 = vld [vmem:[#allocation65_spill] sm:$0xff]  ;;  %v2135_v43 = vand.u32 65535, %v5809_v44 }
 0x568   : > { %v1627_v41 = vsel %vm1626_vm12, %v1622_v12, -inf  ;;  %v1802_v12 = vshll.u32 %v1801_v1, 16  ;;  %v5817_v44 = vld [vmem:[#allocation121_spill] sm:$0xff] }
 0x569   : > { %2430 = vmax.xlane.f32.xlu0 %v2429_v58  ;;  %1628 = vmax.xlane.f32.xlu1 %v1627_v41  ;;  %v1258_v48 = vadd.s32 %v1257_v21, %v1255_v22  ;;  %v1352_v58 = vcvt.s32.f32 %v1350_v54  ;;  %v5804_v41 = vld [vmem:[#allocation126_spill] sm:$0xff]  ;;  %v5810_v54 = vld [vmem:[#allocation112_spill] sm:$0xff] }
 0x56a   : > { %v4872_v35 = vpop.xlane.xlu1 %1493  ;;  %v4874_v11 = vpop.xlane.xlu0 %1354  ;;  %v1590_v8 = vand.u32 65535, %v5804_v41 }
 0x56b   : > { %5797 = vst [vmem:[#allocation105_spill] sm:$0xff] %v4874_v11  ;;  %vm1640_vm15 = vcmp.eq.s32.totalorder %v1258_v48, 1  ;;  %vm1356_vm0 = vcmp.eq.f32.partialorder %v5802_v42, %v4874_v11  ;;  %v5808_v48 = vld [vmem:[#allocation106_spill] sm:$0xff]  ;;  %v5812_v42 = vld [vmem:[#allocation107_spill] sm:$0xff]  ;;  %v2137_v11 = vcvt.s32.f32 %v2135_v43 }
 0x56c   : > { %vm2217_vm1 = vmxor %vm1640_vm15, %vm3173_vm11  ;;  %v1357_v0 = vsel %vm1356_vm0, %v1352_v58, -inf  ;;  %v1592_v1 = vcvt.s32.f32 %v1590_v8  ;;  %vm1901_vm10 = vcmp.eq.f32.partialorder %v5812_v42, %v4704_v34  ;;  %v2432_v42 = vsel %vm509_vm2, %v5819_v60, -inf  ;;  %v5822_v43 = vld [vmem:[#allocation123_spill] sm:$0xff] }
 0x56d   : > { %1933 = vmax.xlane.f32.xlu1 %v1932_v51  ;;  %v1895_v51 = vand.u32 65535, %v5808_v48  ;;  %v5815_v48 = vld [vmem:[#allocation119_spill] sm:$0xff] }
 0x56e   : > { %v1799_v3 = vpop.xlane.xlu1 %1798  ;;  %v4880_v18 = vpop.xlane.xlu0 %1594  ;;  %v1996_v20 = vcvt.f32.s32 %v5815_v48  ;;  %v5821_v48 = vld [vmem:[#allocation109_spill] sm:$0xff] }
 0x56f   : > { %5800 = vst [vmem:[#allocation110_spill] sm:$0xff] %v4880_v18  ;;  %v1800_v24 = vcvt.f32.s32 %v1799_v3  ;;  %vm1596_vm9 = vcmp.eq.f32.partialorder %v5807_v55, %v4880_v18  ;;  %v1897_v8 = vcvt.s32.f32 %v1895_v51  ;;  %v5820_v51 = vld [vmem:[#allocation122_spill] sm:$0xff]  ;;  %vm2141_vm7 = vcmp.eq.f32.partialorder %v5821_v48, %v4711_v46  ;;  %v5824_v48 = vld [vmem:[#allocation68_spill] sm:$0xff] }
 0x570   : > { %v1597_v3 = vsel %vm1596_vm9, %v1592_v1, -inf  ;;  %v5816_v1 = vld [vmem:[#allocation120_spill] sm:$0xff]  ;;  %v2142_v46 = vsel %vm2141_vm7, %v2137_v11, -inf  ;;  %v5827_v11 = vld [vmem:[#allocation75_spill] sm:$0xff] }
 0x571   : > { %v1803_v45 = vadd.s32 %v1802_v12, %v1800_v24  ;;  %2173 = vmax.xlane.f32.xlu1 %v2172_v37  ;;  %v1436_v12 = vcvt.f32.s32 %v5810_v54  ;;  %v5811_v24 = vld [vmem:[#allocation113_spill] sm:$0xff]  ;;  %v1181_v18 = vcvt.f32.s32 %v5816_v1  ;;  %v1902_v54 = vsel %vm1901_vm10, %v1897_v8, -inf }
 0x572   : > { %v4885_v22 = vpop.xlane.xlu1 %1223  ;;  %v4887_v16 = vpop.xlane.xlu0 %2382  ;;  %v1981_v37 = vcvt.f32.s32 %v5811_v24  ;;  %v5818_v24 = vld [vmem:[#allocation48_spill] sm:$0xff]  ;;  %v2056_v8 = vcvt.f32.s32 %v4516_v32  ;;  %v1226_v32 = vcvt.f32.s32 %v5824_v48  ;;  %v5828_v48 = vld [vmem:[#allocation35_spill] sm:$0xff] }
 0x573   : > { %5803 = vst [vmem:[#allocation111_spill] sm:$0xff] %v4887_v16  ;;  %vm2185_vm4 = vcmp.eq.s32.totalorder %v1803_v45, 1  ;;  %v5813_v45 = vld [vmem:[#allocation115_spill] sm:$0xff]  ;;  %v1966_v16 = vcvt.f32.s32 %v5817_v44  ;;  %v1726_v44 = vcvt.f32.s32 %v5822_v43  ;;  %v4934_v9 = vshll.u32 %v1181_v18, 16 }
 0x574   : > { %vm4891_vm5 = vmand %vm2217_vm1, %vm2185_vm4  ;;  %v1406_v58 = vcvt.f32.s32 %v5813_v45  ;;  %v4918_v45 = vshll.u32 %v1436_v12, 16  ;;  %v4920_v34 = vshll.u32 %v1981_v37, 16  ;;  %v1997_v37 = vshll.u32 %v1996_v20, 16 }
 0x575   : > { %1358 = vmax.xlane.f32.xlu1 %v1357_v0  ;;  %v5814_v0 = vld [vmem:[#allocation116_spill] sm:$0xff]  ;;  %v4944_v20 = vshll.u32 %v1726_v44, 16  ;;  %v1227_v44 = vshll.u32 %v1226_v32, 16  ;;  %v1225_v52 = vcvt.f32.s32 %v4885_v22 }
 0x576   : > { %v4897_v17 = vpop.xlane.xlu0 %2388  ;;  %v4900_v6 = vpop.xlane.xlu1 %1463  ;;  %v1951_v55 = vcvt.f32.s32 %v5814_v0  ;;  %v1421_v0 = vcvt.f32.s32 %v5820_v51  ;;  %v1407_v1 = vshll.u32 %v1406_v58, 16  ;;  %v5823_v51 = vld [vmem:[#allocation61_spill] sm:$0xff]  ;;  %v2041_v58 = vcvt.f32.s32 %v4575_v53 }
 0x577   : > { %v1496_v40 = vcvt.f32.s32 %v5823_v51  ;;  %v1998_v26 = vadd.s32 %v1997_v37, %v1995_v29  ;;  %v1786_v29 = vcvt.f32.s32 %v5833_v5  ;;  %v1817_v37 = vshll.u32 %v1816_v63, 16 }
 0x578   : > { %v4932_v12 = vshll.u32 %v1951_v55, 16  ;;  %v1422_v43 = vshll.u32 %v1421_v0, 16  ;;  %v4942_v55 = vshll.u32 %v2056_v8, 16  ;;  %v1771_v0 = vcvt.f32.s32 %v5827_v11  ;;  %v5831_v11 = vld [vmem:[#allocation53_spill] sm:$0xff] }
 0x579   : > { %1598 = vmax.xlane.f32.xlu1 %v1597_v3  ;;  %v2426_v3 = vsel %vm509_vm2, %v5818_v24, -inf  ;;  %v2026_v24 = vcvt.f32.s32 %v4544_v39  ;;  %v1466_v39 = vcvt.f32.s32 %v5825_v28  ;;  %v2011_v28 = vcvt.f32.s32 %v5828_v48 }
 0x57a   : > { %v4908_v41 = vpop.xlane.xlu0 %2394  ;;  %v4928_v38 = vpop.xlane.xlu1 %1768  ;;  %v4957_v8 = vshll.u32 %v2041_v58, 16  ;;  %v1241_v49 = vcvt.f32.s32 %v5831_v11  ;;  %v1435_v48 = vcvt.f32.s32 %v4724_v23  ;;  %v1772_v58 = vshll.u32 %v1771_v0, 16 }
 0x57b   : > { %v4946_v18 = vshll.u32 %v2026_v24, 16  ;;  %v4959_v10 = vshll.u32 %v1466_v39, 16  ;;  %v4967_v32 = vshll.u32 %v2011_v28, 16  ;;  %v1512_v39 = vshll.u32 %v1511_v15, 16 }
 0x57c   : > { %vm1653_vm2 = vcmp.eq.s32.totalorder %v4797_v19, 1  ;;  %v1316_v23 = vcvt.f32.s32 %v4666_v2  ;;  %vm2198_vm12 = vcmp.eq.s32.totalorder %v1998_v26, 1  ;;  %v1408_v0 = vadd.s32 %v1407_v1, %v1405_v25 }
 0x57d   : > { %1903 = vmax.xlane.f32.xlu1 %v1902_v54  ;;  %v1967_v54 = vshll.u32 %v1966_v16, 16  ;;  %v1420_v16 = vcvt.f32.s32 %v4825_v36  ;;  %v1272_v36 = vshll.u32 %v1271_v47, 16  ;;  %v5832_v47 = vld [vmem:[#allocation38_spill] sm:$0xff]  ;;  %vm2230_vm3 = vmxor %vm1653_vm2, %vm3173_vm11  ;;  %v5834_v19 = vmov 0.0  }
 0x57e   : > { %v4930_v60 = vpop.xlane.xlu0 %2400  ;;  %v1481_v27 = vcvt.f32.s32 %v5832_v47  ;;  %v2765_v2 = vsel %vm4891_vm5, 1.0, %v5834_v19  ;;  %v1770_v63 = vcvt.f32.s32 %v4928_v38  ;;  %vm4989_vm0 = vmand %vm2230_vm3, %vm2198_vm12  ;;  %v4993_v15 = vshll.u32 %v1316_v23, 16 }
 0x57f   : > { %v1423_v59 = vadd.s32 %v1422_v43, %v1420_v16  ;;  %v4974_v43 = vshll.u32 %v1241_v49, 16  ;;  %v1438_v16 = vadd.s32 %v4918_v45, %v1435_v48  ;;  %v4986_v49 = vshll.u32 %v1786_v29, 16 }
 0x580   : > { %v1228_v38 = vadd.s32 %v1227_v44, %v1225_v52  ;;  %vm1650_vm9 = vcmp.eq.s32.totalorder %v1408_v0, 1  ;;  %v1773_v25 = vadd.s32 %v1772_v58, %v1770_v63  ;;  %v5844_v52 = vld [vmem:[#allocation49_spill] sm:$0xff]  ;;  %v5860_v63 = vld [vmem:[#allocation15_spill] sm:$0xff] }
 0x581   : > { %2143 = vmax.xlane.f32.xlu1 %v2142_v46  ;;  %v4955_v46 = vshll.u32 %v1496_v40, 16  ;;  %vm1651_vm13 = vcmp.eq.s32.totalorder %v1423_v59, 1  ;;  %vm1652_vm5 = vcmp.eq.s32.totalorder %v1438_v16, 1  ;;  %v2778_v59 = vsel %vm4989_vm0, 1.0, %v5834_v19  ;;  %vm5040_vm0 = vmxor %vm1650_vm9, %vm3173_vm11  ;;  %v5847_v16 = vld [vmem:[#allocation7_spill] sm:$0xff] }
 0x582   : > { %v1269_v53 = vpop.xlane.xlu1 %1268  ;;  %v4949_v51 = vpop.xlane.xlu0 %2406  ;;  %vm2228_vm4 = vmxor %vm1651_vm13, %vm3173_vm11  ;;  %vm1638_vm13 = vcmp.eq.s32.totalorder %v1228_v38, 1  ;;  %v1465_v38 = vcvt.f32.s32 %v4900_v6 }
 0x583   : > { %v1270_v24 = vcvt.f32.s32 %v1269_v53  ;;  %v1968_v53 = vadd.s32 %v1967_v54, %v1965_v56  ;;  %v1556_v56 = vcvt.f32.s32 %v4676_v57  ;;  %vm5031_vm3 = vmxor %vm1652_vm5, %vm3173_vm11 }
 0x585   : > { %2427 = vmax.xlane.f32.xlu1 %v2426_v3  ;;  %v1273_v3 = vadd.s32 %v1272_v36, %v1270_v24  ;;  %vm2196_vm15 = vcmp.eq.s32.totalorder %v1968_v53, 1  ;;  %v5839_v24 = vld [vmem:[#allocation11_spill] sm:$0xff]  ;;  %v1495_v53 = vcvt.f32.s32 %v4872_v35 }
 0x586   : > { %v1509_v40 = vpop.xlane.xlu1 %1508  ;;  %v4965_v7 = vpop.xlane.xlu0 %2412  ;;  %vm5000_vm10 = vmand %vm2228_vm4, %vm2196_vm15  ;;  %v2442_v36 = vsel %vm2435_vm14, %v2765_v2, %v5839_v24  ;;  %v5848_v24 = vld [vmem:[#allocation8_spill] sm:$0xff] }
 0x587   : > { %vm1641_vm1 = vcmp.eq.s32.totalorder %v1273_v3, 1  ;;  %v1510_v1 = vcvt.f32.s32 %v1509_v40  ;;  %v1725_v40 = vcvt.f32.s32 %v4846_v61  ;;  %v2759_v3 = vsel %vm4773_vm8, 1.0, %v5834_v19  ;;  %v5840_v61 = vld [vmem:[#allocation51_spill] sm:$0xff] }
 0x588   : > { %vm2218_vm7 = vmxor %vm1641_vm1, %vm3173_vm11  ;;  %v2475_v35 = vsel %vm2468_vm6, %v5840_v61, %v2442_v36  ;;  %vm2183_vm8 = vcmp.eq.s32.totalorder %v1773_v25, 1  ;;  %v1498_v0 = vadd.s32 %v4955_v46, %v1495_v53  ;;  %v5853_v25 = vld [vmem:[#allocation3_spill] sm:$0xff] }
 0x589   : > { %2433 = vmax.xlane.f32.xlu1 %v2432_v42  ;;  %v4984_v42 = vshll.u32 %v1481_v27, 16  ;;  %v1861_v27 = vcvt.f32.s32 %v4682_v14  ;;  %v1513_v47 = vadd.s32 %v1512_v39, %v1510_v1  ;;  %v5841_v39 = vld [vmem:[#allocation10_spill] sm:$0xff]  ;;  %vm2215_vm1 = vmxor %vm1638_vm13, %vm3173_vm11  ;;  %v1728_v26 = vadd.s32 %v4944_v20, %v1725_v40 }
 0x58a   : > { %v1814_v54 = vpop.xlane.xlu1 %1813  ;;  %v4977_v28 = vpop.xlane.xlu0 %2418 }
 0x58b   : > { %v1815_v22 = vcvt.f32.s32 %v1814_v54  ;;  %vm1657_vm4 = vcmp.eq.s32.totalorder %v1513_v47, 1  ;;  %vm2180_vm13 = vcmp.eq.s32.totalorder %v1728_v26, 1 }
 0x58d   : > { %v1818_v21 = vadd.s32 %v1817_v37, %v1815_v22  ;;  %v2776_v37 = vsel %vm5000_vm10, 1.0, %v5834_v19  ;;  %v2455_v22 = vsel %vm2435_vm14, %v2778_v59, %v5847_v16  ;;  %vm5060_vm10 = vmand %vm2215_vm1, %vm2183_vm8  ;;  %v5852_v59 = vld [vmem:[#allocation86_spill] sm:$0xff] }
 0x58e   : > { %v2054_v11 = vpop.xlane.xlu1 %2053  ;;  %v1979_v48 = vpop.xlane.xlu0 %1978  ;;  %v2453_v36 = vsel %vm2435_vm14, %v2776_v37, %v5848_v24  ;;  %v2488_v6 = vsel %vm2468_vm6, %v5852_v59, %v2455_v22  ;;  %v5861_v24 = vld [vmem:[#allocation47_spill] sm:$0xff] }
 0x58f   : > { %vm2186_vm2 = vcmp.eq.s32.totalorder %v1818_v21, 1  ;;  %v2055_v44 = vcvt.f32.s32 %v2054_v11  ;;  %v1980_v14 = vcvt.f32.s32 %v1979_v48  ;;  %v5049_v21 = vshll.u32 %v1861_v27, 16 }
 0x590   : > { %vm2250_vm12 = vmand %vm2218_vm7, %vm2186_vm2 }
 0x591   : > { %v2766_v5 = vsel %vm2250_vm12, 1.0, %v5834_v19  ;;  %v2058_v58 = vadd.s32 %v4942_v55, %v2055_v44  ;;  %v1983_v29 = vadd.s32 %v4920_v34, %v1980_v14  ;;  %v5851_v44 = vld [vmem:[#allocation4_spill] sm:$0xff]  ;;  %vm2234_vm7 = vmxor %vm1657_vm4, %vm3173_vm11 }
 0x592   : > { %v2443_v23 = vsel %vm2435_vm14, %v2766_v5, %v5841_v39  ;;  %v1239_v62 = vpop.xlane.xlu1 %1238  ;;  %v1949_v55 = vpop.xlane.xlu0 %1948  ;;  %v2436_v14 = vsel %vm2435_vm14, %v2759_v3, %v5851_v44  ;;  %v5856_v3 = vld [vmem:[#allocation39_spill] sm:$0xff] }
 0x593   : > { %v2476_v54 = vsel %vm2468_vm6, %v5844_v52, %v2443_v23  ;;  %vm2197_vm15 = vcmp.eq.s32.totalorder %v1983_v29, 1  ;;  %v1240_v2 = vcvt.f32.s32 %v1239_v62  ;;  %v1950_v1 = vcvt.f32.s32 %v1949_v55  ;;  %v5857_v62 = vld [vmem:[#allocation6_spill] sm:$0xff] }
 0x594   : > { %v2875_v45 = vpack.c.bf16 %v2476_v54, %v2475_v35  ;;  %vm2202_vm5 = vcmp.eq.s32.totalorder %v2058_v58, 1  ;;  %vm2261_vm9 = vmand %vm5031_vm3, %vm2197_vm15  ;;  %v2486_v37 = vsel %vm2468_vm6, %v5856_v3, %v2453_v36  ;;  %vm1656_vm3 = vcmp.eq.s32.totalorder %v1498_v0, 1 }
 0x595   : > { %v2777_v20 = vsel %vm2261_vm9, 1.0, %v5834_v19  ;;  %v1953_v46 = vadd.s32 %v4932_v12, %v1950_v1  ;;  %v1243_v53 = vadd.s32 %v4974_v43, %v1240_v2  ;;  %vm5080_vm2 = vmand %vm2234_vm7, %vm2202_vm5  ;;  %v1468_v58 = vadd.s32 %v4959_v10, %v1465_v38  ;;  %v5869_v12 = vld [vmem:[#allocation14_spill] sm:$0xff] }
 0x596   : > { %2939 = vst [vmem:[%s4838_s26 + $0x18] sm:$0xff] %v2875_v45   ;;  %v1479_v27 = vpop.xlane.xlu1 %1478  ;;  %v1179_v48 = vpop.xlane.xlu0 %1178  ;;  %v2454_v40 = vsel %vm2435_vm14, %v2777_v20, %v5853_v25  ;;  %v2782_v34 = vsel %vm5080_vm2, 1.0, %v5834_v19  ;;  %vm5106_vm15 = vmxor %vm1656_vm3, %vm3173_vm11  ;;  %v2101_v0 = vcvt.f32.s32 %v4692_v4 }
 0x597   : > { %v2487_v5 = vsel %vm2468_vm6, %v4908_v41, %v2454_v40  ;;  %vm2195_vm12 = vcmp.eq.s32.totalorder %v1953_v46, 1  ;;  %v1480_v29 = vcvt.f32.s32 %v1479_v27  ;;  %v1180_v47 = vcvt.f32.s32 %v1179_v48  ;;  %v5864_v46 = vld [vmem:[#allocation9_spill] sm:$0xff]  ;;  %v5865_v48 = vld [vmem:[#allocation88_spill] sm:$0xff] }
 0x598   : > { %v2905_v43 = vpack.c.bf16 %v2488_v6, %v2487_v5  ;;  %vm2259_vm8 = vmand %vm5040_vm0, %vm2195_vm12  ;;  %v2763_v41 = vsel %vm5060_vm10, 1.0, %v5834_v19  ;;  %vm1639_vm0 = vcmp.eq.s32.totalorder %v1243_v53, 1  ;;  %vm1654_vm5 = vcmp.eq.s32.totalorder %v1468_v58, 1  ;;  %v5871_v58 = vld [vmem:[#allocation13_spill] sm:$0xff] }
 0x599   : > { %v2775_v61 = vsel %vm2259_vm8, 1.0, %v5834_v19  ;;  %v1183_v35 = vadd.s32 %v4934_v9, %v1180_v47  ;;  %v1483_v2 = vadd.s32 %v4984_v42, %v1480_v29  ;;  %v2440_v16 = vsel %vm2435_vm14, %v2763_v41, %v5860_v63  ;;  %v5862_v42 = vld [vmem:[#allocation12_spill] sm:$0xff]  ;;  %vm2216_vm10 = vmxor %vm1639_vm0, %vm3173_vm11 }
 0x59a   : > { %v1784_v39 = vpop.xlane.xlu1 %1783  ;;  %v2039_v23 = vpop.xlane.xlu0 %2038  ;;  %2945 = vst [vmem:[%s4838_s26 + $0x48] sm:$0xff] %v2905_v43   ;;  %v2452_v55 = vsel %vm2435_vm14, %v2775_v61, %v5857_v62  ;;  %v2459_v36 = vsel %vm2435_vm14, %v2782_v34, %v5862_v42  ;;  %vm5150_vm8 = vmxor %vm1654_vm5, %vm3173_vm11  ;;  %v5873_v63 = vld [vmem:[#allocation84_spill] sm:$0xff]  ;;  %v5877_v42 = vld [vmem:[#allocation66_spill] sm:$0xff] }
 0x59b   : > { %v1785_v10 = vcvt.f32.s32 %v1784_v39  ;;  %v2040_v52 = vcvt.f32.s32 %v2039_v23  ;;  %v2485_v9 = vsel %vm2468_vm6, %v4897_v17, %v2452_v55  ;;  %vm1635_vm1 = vcmp.eq.s32.totalorder %v1183_v35, 1 }
 0x59c   : > { %v2900_v22 = vpack.c.bf16 %v2486_v37, %v2485_v9  ;;  %vm2212_vm4 = vmxor %vm1635_vm1, %vm3173_vm11  ;;  %v2469_v17 = vsel %vm2468_vm6, %v5861_v24, %v2436_v14  ;;  %vm1655_vm12 = vcmp.eq.s32.totalorder %v1483_v2, 1  ;;  %v2492_v44 = vsel %vm2468_vm6, %v5865_v48, %v2459_v36  ;;  %v5866_v14 = vld [vmem:[#allocation46_spill] sm:$0xff] }
 0x59d   : > { %v1788_v45 = vadd.s32 %v4986_v49, %v1785_v10  ;;  %v2043_v1 = vadd.s32 %v4957_v8, %v2040_v52  ;;  %vm2244_vm9 = vmand %vm2212_vm4, %vm2180_vm13  ;;  %v5863_v49 = vld [vmem:[#allocation57_spill] sm:$0xff]  ;;  %v1557_v55 = vshll.u32 %v1556_v56, 16  ;;  %v5872_v10 = vld [vmem:[#allocation16_spill] sm:$0xff]  ;;  %v1286_v36 = vcvt.f32.s32 %v5877_v42 }
 0x59e   : > { %v2024_v38 = vpop.xlane.xlu1 %2023  ;;  %v2009_v11 = vpop.xlane.xlu0 %2008  ;;  %2944 = vst [vmem:[%s4838_s26 + $0x40] sm:$0xff] %v2900_v22   ;;  %v2760_v8 = vsel %vm2244_vm9, 1.0, %v5834_v19  ;;  %v2473_v20 = vsel %vm2468_vm6, %v5863_v49, %v2440_v16  ;;  %v5874_v16 = vld [vmem:[#allocation17_spill] sm:$0xff]  ;;  %v2102_v22 = vshll.u32 %v2101_v0, 16  ;;  %v5887_v24 = vld [vmem:[#allocation18_spill] sm:$0xff] }
 0x59f   : > { %vm2184_vm7 = vcmp.eq.s32.totalorder %v1788_v45, 1  ;;  %vm2201_vm2 = vcmp.eq.s32.totalorder %v2043_v1, 1  ;;  %v2025_v4 = vcvt.f32.s32 %v2024_v38  ;;  %v2437_v26 = vsel %vm2435_vm14, %v2760_v8, %v5864_v46  ;;  %v5878_v8 = vld [vmem:[#allocation92_spill] sm:$0xff]  ;;  %v5879_v46 = vld [vmem:[#allocation78_spill] sm:$0xff] }
 0x5a0   : > { %vm2248_vm13 = vmand %vm2216_vm10, %vm2184_vm7  ;;  %v2010_v27 = vcvt.f32.s32 %v2009_v11  ;;  %v2470_v59 = vsel %vm2468_vm6, %v5866_v14, %v2437_v26  ;;  %v1287_v0 = vshll.u32 %v1286_v36, 16  ;;  %v1831_v26 = vcvt.f32.s32 %v5879_v46  ;;  %v5888_v36 = vld [vmem:[#allocation79_spill] sm:$0xff] }
 0x5a1   : > { %v2764_v6 = vsel %vm2248_vm13, 1.0, %v5834_v19  ;;  %vm2265_vm3 = vmand %vm5106_vm15, %vm2201_vm2  ;;  %v2028_v25 = vadd.s32 %v4946_v18, %v2025_v4  ;;  %v2860_v53 = vpack.c.bf16 %v2470_v59, %v2469_v17  ;;  %v5870_v18 = vld [vmem:[#allocation50_spill] sm:$0xff]  ;;  %v1526_v4 = vcvt.f32.s32 %v5878_v8 }
 0x5a2   : > { %v2441_v5 = vsel %vm2435_vm14, %v2764_v6, %v5869_v12  ;;  %v2781_v29 = vsel %vm2265_vm3, 1.0, %v5834_v19  ;;  %v2013_v47 = vadd.s32 %v4967_v32, %v2010_v27  ;;  %v1314_v3 = vpop.xlane.xlu1 %1313  ;;  %v1859_v37 = vpop.xlane.xlu0 %1858  ;;  %vm2232_vm15 = vmxor %vm1655_vm12, %vm3173_vm11  ;;  %v5880_v27 = vld [vmem:[#allocation21_spill] sm:$0xff]  ;;  %v1832_v40 = vshll.u32 %v1831_v26, 16  ;;  %v5891_v26 = vld [vmem:[#allocation20_spill] sm:$0xff] }
 0x5a3   : > { %v2474_v43 = vsel %vm2468_vm6, %v5870_v18, %v2441_v5  ;;  %v2458_v41 = vsel %vm2435_vm14, %v2781_v29, %v5871_v58  ;;  %vm2200_vm0 = vcmp.eq.s32.totalorder %v2028_v25, 1  ;;  %v1315_v61 = vcvt.f32.s32 %v1314_v3  ;;  %2861 = vst [vmem:[%s4838_s26] sm:$0xff] %v2860_v53   ;;  %v5881_v53 = vld [vmem:[#allocation54_spill] sm:$0xff] }
 0x5a4   : > { %v2870_v35 = vpack.c.bf16 %v2474_v43, %v2473_v20  ;;  %v2491_v32 = vsel %vm2468_vm6, %v4949_v51, %v2458_v41  ;;  %vm2264_vm1 = vmand %vm2232_vm15, %vm2200_vm0  ;;  %vm2199_vm4 = vcmp.eq.s32.totalorder %v2013_v47, 1  ;;  %v1860_v39 = vcvt.f32.s32 %v1859_v37 }
 0x5a5   : > { %v2915_v23 = vpack.c.bf16 %v2492_v44, %v2491_v32  ;;  %v2780_v34 = vsel %vm2264_vm1, 1.0, %v5834_v19  ;;  %vm2263_vm5 = vmand %vm5150_vm8, %vm2199_vm4  ;;  %v1318_v62 = vadd.s32 %v4993_v15, %v1315_v61  ;;  %v1527_v6 = vshll.u32 %v1526_v4, 16 }
 0x5a6   : > { %2938 = vst [vmem:[%s4838_s26 + $0x10] sm:$0xff] %v2870_v35   ;;  %v2457_v52 = vsel %vm2435_vm14, %v2780_v34, %v5872_v10  ;;  %v2779_v51 = vsel %vm2263_vm5, 1.0, %v5834_v19  ;;  %v1863_v54 = vadd.s32 %v5049_v21, %v1860_v39  ;;  %v1554_v9 = vpop.xlane.xlu1 %1553  ;;  %v2099_v2 = vpop.xlane.xlu0 %2098  ;;  %v2071_v12 = vcvt.f32.s32 %v5881_v53 }
 0x5a7   : > { %2947 = vst [vmem:[%s4838_s26 + $0x58] sm:$0xff] %v2915_v23   ;;  %v2490_v15 = vsel %vm2468_vm6, %v5873_v63, %v2457_v52  ;;  %v2456_v57 = vsel %vm2435_vm14, %v2779_v51, %v5874_v16  ;;  %vm1644_vm9 = vcmp.eq.s32.totalorder %v1318_v62, 1  ;;  %v1555_v56 = vcvt.f32.s32 %v1554_v9  ;;  %v5884_v23 = vld [vmem:[#allocation25_spill] sm:$0xff] }
 0x5a8   : > { %v2489_v45 = vsel %vm2468_vm6, %v4930_v60, %v2456_v57  ;;  %vm2221_vm10 = vmxor %vm1644_vm9, %vm3173_vm11  ;;  %vm2189_vm7 = vcmp.eq.s32.totalorder %v1863_v54, 1  ;;  %v2100_v21 = vcvt.f32.s32 %v2099_v2  ;;  %v2072_v37 = vshll.u32 %v2071_v12, 16 }
 0x5a9   : > { %v2910_v1 = vpack.c.bf16 %v2490_v15, %v2489_v45  ;;  %vm5194_vm2 = vmand %vm2221_vm10, %vm2189_vm7  ;;  %v1558_v17 = vadd.s32 %v1557_v55, %v1555_v56  ;;  %v1331_v58 = vcvt.f32.s32 %v4726_v31  ;;  %v1571_v39 = vcvt.f32.s32 %v4732_v33  ;;  %v5885_v56 = vld [vmem:[#allocation19_spill] sm:$0xff] }
 0x5aa   : > { %v2103_v38 = vadd.s32 %v2102_v22, %v2100_v21  ;;  %v1284_v11 = vpop.xlane.xlu1 %1283  ;;  %v1876_v55 = vcvt.f32.s32 %v4564_v13  ;;  %v2116_v2 = vcvt.f32.s32 %v4580_v30  ;;  %v2769_v15 = vsel %vm5194_vm2, 1.0, %v5834_v19  ;;  %v5886_v21 = vld [vmem:[#allocation81_spill] sm:$0xff] }
 0x5ab   : > { %2946 = vst [vmem:[%s4838_s26 + $0x50] sm:$0xff] %v2910_v1   ;;  %vm1660_vm12 = vcmp.eq.s32.totalorder %v1558_v17, 1  ;;  %v1285_v60 = vcvt.f32.s32 %v1284_v11  ;;  %v1332_v32 = vshll.u32 %v1331_v58, 16  ;;  %v1572_v51 = vshll.u32 %v1571_v39, 16  ;;  %v5889_v11 = vld [vmem:[#allocation52_spill] sm:$0xff]  ;;  %v5895_v58 = vld [vmem:[#allocation95_spill] sm:$0xff] }
 0x5ac   : > { %vm2237_vm13 = vmxor %vm1660_vm12, %vm3173_vm11  ;;  %vm2205_vm3 = vcmp.eq.s32.totalorder %v2103_v38, 1  ;;  %v1877_v9 = vshll.u32 %v1876_v55, 16  ;;  %v2117_v57 = vshll.u32 %v2116_v2, 16  ;;  %v2446_v22 = vsel %vm2435_vm14, %v2769_v15, %v5885_v56  ;;  %v5897_v55 = vld [vmem:[#allocation23_spill] sm:$0xff]  ;;  %v5901_v56 = vld [vmem:[#allocation85_spill] sm:$0xff] }
 0x5ad   : > { %vm2269_vm8 = vmand %vm2237_vm13, %vm2205_vm3  ;;  %v1288_v14 = vadd.s32 %v1287_v0, %v1285_v60  ;;  %v1301_v1 = vcvt.f32.s32 %v5886_v21  ;;  %v2479_v38 = vsel %vm2468_vm6, %v5888_v36, %v2446_v22 }
 0x5ae   : > { %v2785_v49 = vsel %vm2269_vm8, 1.0, %v5834_v19  ;;  %v1524_v20 = vpop.xlane.xlu1 %1523 }
 0x5af   : > { %v2462_v48 = vsel %vm2435_vm14, %v2785_v49, %v5880_v27  ;;  %v1525_v59 = vcvt.f32.s32 %v1524_v20  ;;  %vm1642_vm15 = vcmp.eq.s32.totalorder %v1288_v14, 1  ;;  %v1302_v49 = vshll.u32 %v1301_v1, 16  ;;  %v5890_v20 = vld [vmem:[#allocation59_spill] sm:$0xff] }
 0x5b0   : > { %v5210_v44 = vsel %vm2468_vm6, %v4977_v28, %v2462_v48  ;;  %vm2219_vm0 = vmxor %vm1642_vm15, %vm3173_vm11  ;;  %v1541_v46 = vcvt.f32.s32 %v5890_v20  ;;  %v5892_v14 = vld [vmem:[#allocation91_spill] sm:$0xff] }
 0x5b1   : > { %v1528_v29 = vadd.s32 %v1527_v6, %v1525_v59  ;;  %v1846_v59 = vcvt.f32.s32 %v5892_v14  ;;  %v5893_v6 = vld [vmem:[#allocation90_spill] sm:$0xff]  ;;  %v5905_v20 = vld [vmem:[#allocation87_spill] sm:$0xff] }
 0x5b2   : > { %v1829_v25 = vpop.xlane.xlu1 %1828 }
 0x5b3   : > { %v1830_v5 = vcvt.f32.s32 %v1829_v25  ;;  %vm1658_vm4 = vcmp.eq.s32.totalorder %v1528_v29, 1 }
 0x5b4   : > { %vm2235_vm9 = vmxor %vm1658_vm4, %vm3173_vm11 }
 0x5b5   : > { %v1833_v47 = vadd.s32 %v1832_v40, %v1830_v5  ;;  %v1542_v5 = vshll.u32 %v1541_v46, 16 }
 0x5b6   : > { %v2069_v3 = vpop.xlane.xlu0 %2068 }
 0x5b7   : > { %vm2187_vm1 = vcmp.eq.s32.totalorder %v1833_v47, 1  ;;  %v2070_v18 = vcvt.f32.s32 %v2069_v3  ;;  %v5894_v47 = vld [vmem:[#allocation69_spill] sm:$0xff] }
 0x5b8   : > { %vm5214_vm5 = vmand %vm2219_vm0, %vm2187_vm1  ;;  %v2086_v3 = vcvt.f32.s32 %v5894_v47 }
 0x5b9   : > { %v2073_v43 = vadd.s32 %v2072_v37, %v2070_v18  ;;  %v1847_v37 = vshll.u32 %v1846_v59, 16 }
 0x5ba   : > { %v1329_v41 = vpop.xlane.xlu1 %1328 }
 0x5bb   : > { %vm2203_vm10 = vcmp.eq.s32.totalorder %v2073_v43, 1  ;;  %v1330_v61 = vcvt.f32.s32 %v1329_v41  ;;  %v1376_v41 = vcvt.f32.s32 %v5895_v58  ;;  %v5912_v58 = vld [vmem:[#allocation102_spill] sm:$0xff] }
 0x5bc   : > { %vm2267_vm7 = vmand %vm2235_vm9, %vm2203_vm10 }
 0x5bd   : > { %v2783_v35 = vsel %vm2267_vm7, 1.0, %v5834_v19  ;;  %v1333_v10 = vadd.s32 %v1332_v32, %v1330_v61  ;;  %v2767_v61 = vsel %vm5214_vm5, 1.0, %v5834_v19  ;;  %v5896_v32 = vld [vmem:[#allocation93_spill] sm:$0xff] }
 0x5be   : > { %v2460_v34 = vsel %vm2435_vm14, %v2783_v35, %v5884_v23  ;;  %v1569_v62 = vpop.xlane.xlu1 %1568 }
 0x5bf   : > { %v5229_v31 = vsel %vm2468_vm6, %v4965_v7, %v2460_v34  ;;  %v1570_v52 = vcvt.f32.s32 %v1569_v62  ;;  %vm1645_vm12 = vcmp.eq.s32.totalorder %v1333_v10, 1  ;;  %v2087_v34 = vshll.u32 %v2086_v3, 16 }
 0x5c0   : > { %vm2222_vm13 = vmxor %vm1645_vm12, %vm3173_vm11  ;;  %v2444_v10 = vsel %vm2435_vm14, %v2767_v61, %v5897_v55 }
 0x5c1   : > { %v1573_v63 = vadd.s32 %v1572_v51, %v1570_v52  ;;  %v1377_v51 = vshll.u32 %v1376_v41, 16  ;;  %v2477_v22 = vsel %vm2468_vm6, %v5901_v56, %v2444_v10  ;;  %v2131_v41 = vcvt.f32.s32 %v5912_v58  ;;  %v5915_v10 = vld [vmem:[#allocation103_spill] sm:$0xff] }
 0x5c2   : > { %v1874_v54 = vpop.xlane.xlu1 %1873 }
 0x5c3   : > { %v1875_v33 = vcvt.f32.s32 %v1874_v54  ;;  %vm1661_vm8 = vcmp.eq.s32.totalorder %v1573_v63, 1  ;;  %v5899_v63 = vld [vmem:[#allocation97_spill] sm:$0xff] }
 0x5c4   : > { %vm2238_vm2 = vmxor %vm1661_vm8, %vm3173_vm11  ;;  %v2161_v15 = vcvt.f32.s32 %v5899_v63 }
 0x5c5   : > { %v1878_v13 = vadd.s32 %v1877_v9, %v1875_v33  ;;  %v5898_v9 = vld [vmem:[#allocation94_spill] sm:$0xff] }
 0x5c6   : > { %v2114_v16 = vpop.xlane.xlu1 %2113  ;;  %v1616_v2 = vcvt.f32.s32 %v5898_v9 }
 0x5c7   : > { %vm2190_vm3 = vcmp.eq.s32.totalorder %v1878_v13, 1  ;;  %v2115_v7 = vcvt.f32.s32 %v2114_v16  ;;  %v5900_v13 = vld [vmem:[#allocation22_spill] sm:$0xff] }
 0x5c8   : > { %vm2254_vm15 = vmand %vm2222_vm13, %vm2190_vm3 }
 0x5c9   : > { %v2770_v30 = vsel %vm2254_vm15, 1.0, %v5834_v19  ;;  %v2118_v45 = vadd.s32 %v2117_v57, %v2115_v7 }
 0x5ca   : > { %v2447_v17 = vsel %vm2435_vm14, %v2770_v30, %v5887_v24  ;;  %v1299_v42 = vpop.xlane.xlu1 %1298  ;;  %v5902_v30 = vld [vmem:[#allocation64_spill] sm:$0xff] }
 0x5cb   : > { %v2480_v60 = vsel %vm2468_vm6, %v5889_v11, %v2447_v17  ;;  %vm2206_vm0 = vcmp.eq.s32.totalorder %v2118_v45, 1  ;;  %v1300_v8 = vcvt.f32.s32 %v1299_v42  ;;  %v2162_v11 = vshll.u32 %v2161_v15, 16 }
 0x5cc   : > { %v2885_v0 = vpack.c.bf16 %v2480_v60, %v2479_v38  ;;  %vm2270_vm1 = vmand %vm2238_vm2, %vm2206_vm0  ;;  %v1617_v38 = vshll.u32 %v1616_v2, 16  ;;  %v5903_v60 = vld [vmem:[#allocation24_spill] sm:$0xff] }
 0x5cd   : > { %v2786_v4 = vsel %vm2270_vm1, 1.0, %v5834_v19  ;;  %v1303_v53 = vadd.s32 %v1302_v49, %v1300_v8 }
 0x5ce   : > { %2941 = vst [vmem:[%s4838_s26 + $0x28] sm:$0xff] %v2885_v0   ;;  %v2463_v27 = vsel %vm2435_vm14, %v2786_v4, %v5891_v26  ;;  %v1539_v48 = vpop.xlane.xlu1 %1538  ;;  %v5904_v4 = vld [vmem:[#allocation98_spill] sm:$0xff] }
 0x5cf   : > { %v2496_v25 = vsel %vm2468_vm6, %v5893_v6, %v2463_v27  ;;  %v1540_v12 = vcvt.f32.s32 %v1539_v48  ;;  %vm1643_vm4 = vcmp.eq.s32.totalorder %v1303_v53, 1  ;;  %v1346_v49 = vcvt.f32.s32 %v5904_v4  ;;  %v5908_v6 = vld [vmem:[#allocation96_spill] sm:$0xff]  ;;  %v5924_v4 = vld [vmem:[#allocation111_spill] sm:$0xff] }
 0x5d0   : > { %v2925_v40 = vpack.c.bf16 %v2496_v25, %v5210_v44  ;;  %v1921_v44 = vcvt.f32.s32 %v5896_v32  ;;  %vm2220_vm9 = vmxor %vm1643_vm4, %vm3173_vm11  ;;  %v1586_v25 = vcvt.f32.s32 %v5908_v6 }
 0x5d1   : > { %v1543_v43 = vadd.s32 %v1542_v5, %v1540_v12  ;;  %v1347_v53 = vshll.u32 %v1346_v49, 16  ;;  %v5909_v12 = vld [vmem:[#allocation99_spill] sm:$0xff] }
 0x5d2   : > { %2949 = vst [vmem:[%s4838_s26 + $0x68] sm:$0xff] %v2925_v40   ;;  %v1844_v29 = vpop.xlane.xlu1 %1843  ;;  %v1922_v33 = vshll.u32 %v1921_v44, 16  ;;  %v1891_v5 = vcvt.f32.s32 %v5909_v12  ;;  %v1587_v3 = vshll.u32 %v1586_v25, 16  ;;  %v5926_v25 = vld [vmem:[#allocation110_spill] sm:$0xff] }
 0x5d3   : > { %v1845_v18 = vcvt.f32.s32 %v1844_v29  ;;  %vm1659_vm7 = vcmp.eq.s32.totalorder %v1543_v43, 1 }
 0x5d4   : > { %vm2236_vm5 = vmxor %vm1659_vm7, %vm3173_vm11  ;;  %v1892_v43 = vshll.u32 %v1891_v5, 16  ;;  %v5927_v5 = vld [vmem:[#allocation89_spill] sm:$0xff] }
 0x5d5   : > { %v1848_v35 = vadd.s32 %v1847_v37, %v1845_v18 }
 0x5d6   : > { %v2084_v39 = vpop.xlane.xlu1 %2083  ;;  %v1919_v23 = vpop.xlane.xlu0 %1918 }
 0x5d7   : > { %vm2188_vm10 = vcmp.eq.s32.totalorder %v1848_v35, 1  ;;  %v2085_v62 = vcvt.f32.s32 %v2084_v39  ;;  %v1920_v52 = vcvt.f32.s32 %v1919_v23  ;;  %v2132_v23 = vshll.u32 %v2131_v41, 16  ;;  %v5928_v41 = vld [vmem:[#allocation71_spill] sm:$0xff] }
 0x5d8   : > { %vm2252_vm12 = vmand %vm2220_vm9, %vm2188_vm10 }
 0x5d9   : > { %v2768_v28 = vsel %vm2252_vm12, 1.0, %v5834_v19  ;;  %v2088_v54 = vadd.s32 %v2087_v34, %v2085_v62  ;;  %v1923_v24 = vadd.s32 %v1922_v33, %v1920_v52  ;;  %v1391_v52 = vcvt.f32.s32 %v5915_v10  ;;  %v5918_v33 = vld [vmem:[#allocation40_spill] sm:$0xff] }
 0x5da   : > { %v2445_v16 = vsel %vm2435_vm14, %v2768_v28, %v5900_v13  ;;  %v1374_v57 = vpop.xlane.xlu1 %1373  ;;  %v2159_v7 = vpop.xlane.xlu0 %2158  ;;  %v1936_v63 = vcvt.f32.s32 %v5918_v33 }
 0x5db   : > { %v2478_v45 = vsel %vm2468_vm6, %v5902_v30, %v2445_v16  ;;  %vm2204_vm13 = vcmp.eq.s32.totalorder %v2088_v54, 1  ;;  %v1375_v21 = vcvt.f32.s32 %v1374_v57  ;;  %v2160_v17 = vcvt.f32.s32 %v2159_v7  ;;  %v5919_v30 = vld [vmem:[#allocation104_spill] sm:$0xff] }
 0x5dc   : > { %v2880_v1 = vpack.c.bf16 %v2478_v45, %v2477_v22  ;;  %vm2268_vm3 = vmand %vm2236_vm5, %vm2204_vm13  ;;  %vm2193_vm15 = vcmp.eq.s32.totalorder %v1923_v24, 1  ;;  %v1392_v9 = vshll.u32 %v1391_v52, 16  ;;  %v1937_v16 = vshll.u32 %v1936_v63, 16  ;;  %v5921_v24 = vld [vmem:[#allocation34_spill] sm:$0xff] }
 0x5dd   : > { %v2784_v42 = vsel %vm2268_vm3, 1.0, %v5834_v19  ;;  %v1378_v36 = vadd.s32 %v1377_v51, %v1375_v21  ;;  %v2163_v48 = vadd.s32 %v2162_v11, %v2160_v17  ;;  %v1631_v45 = vcvt.f32.s32 %v5919_v30  ;;  %v5920_v21 = vld [vmem:[#allocation27_spill] sm:$0xff]  ;;  %v5932_v63 = vld [vmem:[#allocation30_spill] sm:$0xff] }
 0x5de   : > { %2940 = vst [vmem:[%s4838_s26 + $0x20] sm:$0xff] %v2880_v1   ;;  %v2461_v0 = vsel %vm2435_vm14, %v2784_v42, %v5903_v60  ;;  %v1614_v8 = vpop.xlane.xlu1 %1613  ;;  %v2176_v17 = vcvt.f32.s32 %v5921_v24  ;;  %v5923_v60 = vld [vmem:[#allocation26_spill] sm:$0xff] }
 0x5df   : > { %v2494_v46 = vsel %vm2468_vm6, %v5905_v20, %v2461_v0  ;;  %vm1648_vm8 = vcmp.eq.s32.totalorder %v1378_v36, 1  ;;  %v1615_v26 = vcvt.f32.s32 %v1614_v8  ;;  %vm2209_vm4 = vcmp.eq.s32.totalorder %v2163_v48, 1  ;;  %v5922_v36 = vld [vmem:[#allocation105_spill] sm:$0xff]  ;;  %v5925_v20 = vld [vmem:[#allocation82_spill] sm:$0xff] }
 0x5e0   : > { %v2920_v27 = vpack.c.bf16 %v2494_v46, %v5229_v31  ;;  %vm2225_vm2 = vmxor %vm1648_vm8, %vm3173_vm11 }
 0x5e1   : > { %vm5297_vm0 = vmand %vm2225_vm2, %vm2193_vm15  ;;  %v1618_v59 = vadd.s32 %v1617_v38, %v1615_v26  ;;  %v1361_v38 = vcvt.f32.s32 %v5922_v36  ;;  %v5938_v36 = vld [vmem:[#allocation28_spill] sm:$0xff] }
 0x5e2   : > { %2948 = vst [vmem:[%s4838_s26 + $0x60] sm:$0xff] %v2920_v27   ;;  %v1344_v40 = vpop.xlane.xlu1 %1343  ;;  %v2773_v7 = vsel %vm5297_vm0, 1.0, %v5834_v19  ;;  %v1632_v27 = vshll.u32 %v1631_v45, 16 }
 0x5e3   : > { %vm1664_vm1 = vcmp.eq.s32.totalorder %v1618_v59, 1  ;;  %v1345_v29 = vcvt.f32.s32 %v1344_v40  ;;  %v2450_v1 = vsel %vm2435_vm14, %v2773_v7, %v5920_v21  ;;  %v2177_v59 = vshll.u32 %v2176_v17, 16  ;;  %v5934_v7 = vld [vmem:[#allocation101_spill] sm:$0xff]  ;;  %v5937_v17 = vld [vmem:[#allocation32_spill] sm:$0xff] }
 0x5e4   : > { %vm2241_vm9 = vmxor %vm1664_vm1, %vm3173_vm11  ;;  %v2483_v49 = vsel %vm2468_vm6, %v5924_v4, %v2450_v1  ;;  %v1362_v6 = vshll.u32 %v1361_v38, 16  ;;  %v1601_v40 = vcvt.f32.s32 %v5926_v25  ;;  %v5936_v1 = vld [vmem:[#allocation29_spill] sm:$0xff] }
 0x5e5   : > { %vm5305_vm10 = vmand %vm2241_vm9, %vm2209_vm4  ;;  %v1348_v47 = vadd.s32 %v1347_v53, %v1345_v29  ;;  %v1906_v29 = vcvt.f32.s32 %v5927_v5 }
 0x5e6   : > { %v1584_v37 = vpop.xlane.xlu1 %1583  ;;  %v1889_v18 = vpop.xlane.xlu0 %1888  ;;  %v2789_v33 = vsel %vm5305_vm10, 1.0, %v5834_v19 }
 0x5e7   : > { %v1585_v61 = vcvt.f32.s32 %v1584_v37  ;;  %v1890_v35 = vcvt.f32.s32 %v1889_v18  ;;  %vm1646_vm7 = vcmp.eq.s32.totalorder %v1348_v47, 1  ;;  %v1602_v18 = vshll.u32 %v1601_v40, 16 }
 0x5e8   : > { %vm2223_vm5 = vmxor %vm1646_vm7, %vm3173_vm11  ;;  %v1907_v58 = vshll.u32 %v1906_v29, 16  ;;  %v2466_v24 = vsel %vm2435_vm14, %v2789_v33, %v5936_v1 }
 0x5e9   : > { %v1588_v32 = vadd.s32 %v1587_v3, %v1585_v61  ;;  %v1893_v44 = vadd.s32 %v1892_v43, %v1890_v35  ;;  %v2146_v61 = vcvt.f32.s32 %v5928_v41 }
 0x5ea   : > { %v2129_v39 = vpop.xlane.xlu0 %2128 }
 0x5eb   : > { %vm2191_vm12 = vcmp.eq.s32.totalorder %v1893_v44, 1  ;;  %v2130_v34 = vcvt.f32.s32 %v2129_v39  ;;  %vm1662_vm13 = vcmp.eq.s32.totalorder %v1588_v32, 1  ;;  %v2147_v10 = vshll.u32 %v2146_v61, 16 }
 0x5ec   : > { %vm5311_vm3 = vmand %vm2223_vm5, %vm2191_vm12 }
 0x5ed   : > { %v2133_v55 = vadd.s32 %v2132_v23, %v2130_v34  ;;  %vm2239_vm8 = vmxor %vm1662_vm13, %vm3173_vm11  ;;  %v2771_v44 = vsel %vm5311_vm3, 1.0, %v5834_v19 }
 0x5ee   : > { %v1389_v51 = vpop.xlane.xlu1 %1388  ;;  %v2425_v23 = vpop.xlane.xlu0 %2424 }
 0x5ef   : > { %vm2207_vm15 = vcmp.eq.s32.totalorder %v2133_v55, 1  ;;  %v1390_v54 = vcvt.f32.s32 %v1389_v51  ;;  %v5931_v51 = vld [vmem:[#allocation31_spill] sm:$0xff] }
 0x5f0   : > { %vm5317_vm2 = vmand %vm2239_vm8, %vm2207_vm15 }
 0x5f1   : > { %v1393_v15 = vadd.s32 %v1392_v9, %v1390_v54  ;;  %v2448_v54 = vsel %vm2435_vm14, %v2771_v44, %v5931_v51  ;;  %v2787_v62 = vsel %vm5317_vm2, 1.0, %v5834_v19 }
 0x5f2   : > { %v1629_v2 = vpop.xlane.xlu1 %1628  ;;  %v2431_v30 = vpop.xlane.xlu0 %2430 }
 0x5f3   : > { %vm1649_vm1 = vcmp.eq.s32.totalorder %v1393_v15, 1  ;;  %v1630_v11 = vcvt.f32.s32 %v1629_v2 }
 0x5f4   : > { %vm2226_vm4 = vmxor %vm1649_vm1, %vm3173_vm11 }
 0x5f5   : > { %v1633_v53 = vadd.s32 %v1632_v27, %v1630_v11 }
 0x5f6   : > { %v1934_v13 = vpop.xlane.xlu1 %1933 }
 0x5f7   : > { %v1935_v57 = vcvt.f32.s32 %v1934_v13  ;;  %vm1665_vm0 = vcmp.eq.s32.totalorder %v1633_v53, 1 }
 0x5f8   : > { %vm2242_vm13 = vmxor %vm1665_vm0, %vm3173_vm11 }
 0x5f9   : > { %v1938_v56 = vadd.s32 %v1937_v16, %v1935_v57  ;;  %v5933_v16 = vld [vmem:[#allocation100_spill] sm:$0xff] }
 0x5fa   : > { %v2174_v22 = vpop.xlane.xlu1 %2173  ;;  %v2481_v57 = vsel %vm2468_vm6, %v5933_v16, %v2448_v54 }
 0x5fb   : > { %vm2194_vm9 = vcmp.eq.s32.totalorder %v1938_v56, 1  ;;  %v2175_v26 = vcvt.f32.s32 %v2174_v22  ;;  %v5935_v56 = vld [vmem:[#allocation33_spill] sm:$0xff] }
 0x5fc   : > { %vm2258_vm7 = vmand %vm2226_vm4, %vm2194_vm9  ;;  %v2464_v22 = vsel %vm2435_vm14, %v2787_v62, %v5935_v56 }
 0x5fd   : > { %v2774_v42 = vsel %vm2258_vm7, 1.0, %v5834_v19  ;;  %v2178_v47 = vadd.s32 %v2177_v59, %v2175_v26 }
 0x5fe   : > { %v2451_v0 = vsel %vm2435_vm14, %v2774_v42, %v5923_v60  ;;  %v1359_v8 = vpop.xlane.xlu1 %1358  ;;  %v2497_v60 = vsel %vm2468_vm6, %v2425_v23, %v2464_v22 }
 0x5ff   : > { %v2484_v46 = vsel %vm2468_vm6, %v5925_v20, %v2451_v0  ;;  %v1360_v14 = vcvt.f32.s32 %v1359_v8  ;;  %vm2210_vm12 = vcmp.eq.s32.totalorder %v2178_v47, 1 }
 0x600   : > { %v2895_v48 = vpack.c.bf16 %v2484_v46, %v2483_v49  ;;  %vm5350_vm8 = vmand %vm2242_vm13, %vm2210_vm12 }
 0x601   : > { %v1363_v3 = vadd.s32 %v1362_v6, %v1360_v14  ;;  %v2790_v28 = vsel %vm5350_vm8, 1.0, %v5834_v19 }
 0x602   : > { %2943 = vst [vmem:[%s4838_s26 + $0x38] sm:$0xff] %v2895_v48   ;;  %v1599_v12 = vpop.xlane.xlu1 %1598  ;;  %v2467_v38 = vsel %vm2435_vm14, %v2790_v28, %v5938_v36 }
 0x603   : > { %v1600_v37 = vcvt.f32.s32 %v1599_v12  ;;  %vm1647_vm5 = vcmp.eq.s32.totalorder %v1363_v3, 1 }
 0x604   : > { %vm2224_vm15 = vmxor %vm1647_vm5, %vm3173_vm11 }
 0x605   : > { %v1603_v32 = vadd.s32 %v1602_v18, %v1600_v37 }
 0x606   : > { %v1904_v43 = vpop.xlane.xlu1 %1903 }
 0x607   : > { %v1905_v35 = vcvt.f32.s32 %v1904_v43  ;;  %vm1663_vm4 = vcmp.eq.s32.totalorder %v1603_v32, 1 }
 0x608   : > { %vm2240_vm2 = vmxor %vm1663_vm4, %vm3173_vm11 }
 0x609   : > { %v1908_v39 = vadd.s32 %v1907_v58, %v1905_v35 }
 0x60a   : > { %v2144_v55 = vpop.xlane.xlu1 %2143 }
 0x60b   : > { %vm2192_vm1 = vcmp.eq.s32.totalorder %v1908_v39, 1  ;;  %v2145_v52 = vcvt.f32.s32 %v2144_v55 }
 0x60c   : > { %vm2256_vm3 = vmand %vm2224_vm15, %vm2192_vm1 }
 0x60d   : > { %v2772_v9 = vsel %vm2256_vm3, 1.0, %v5834_v19  ;;  %v2148_v2 = vadd.s32 %v2147_v10, %v2145_v52 }
 0x60e   : > { %v2449_v15 = vsel %vm2435_vm14, %v2772_v9, %v5932_v63  ;;  %v2428_v13 = vpop.xlane.xlu1 %2427 }
 0x60f   : > { %v2482_v31 = vsel %vm2468_vm6, %v5934_v7, %v2449_v15  ;;  %vm2208_vm10 = vcmp.eq.s32.totalorder %v2148_v2, 1 }
 0x610   : > { %v2890_v45 = vpack.c.bf16 %v2482_v31, %v2481_v57  ;;  %vm2272_vm9 = vmand %vm2240_vm2, %vm2208_vm10 }
 0x611   : > { %v2788_v21 = vsel %vm2272_vm9, 1.0, %v5834_v19  ;;  %v2499_v19 = vsel %vm2468_vm6, %v2431_v30, %v2466_v24 }
 0x612   : > { %2942 = vst [vmem:[%s4838_s26 + $0x30] sm:$0xff] %v2890_v45   ;;  %v2465_v42 = vsel %vm2435_vm14, %v2788_v21, %v5937_v17  ;;  %v2434_v11 = vpop.xlane.xlu1 %2433 }
 0x613   : > { %v2498_v0 = vsel %vm2468_vm6, %v2428_v13, %v2465_v42  ;;  %v2500_v8 = vsel %vm2468_vm6, %v2434_v11, %v2467_v38 }
 0x614   : > { %v2930_v4 = vpack.c.bf16 %v2498_v0, %v2497_v60  ;;  %v2935_v49 = vpack.c.bf16 %v2500_v8, %v2499_v19 }
 0x616   : > { %2950 = vst [vmem:[%s4838_s26 + $0x70] sm:$0xff] %v2930_v4   ;;  %2951 = vst [vmem:[%s4838_s26 + $0x78] sm:$0xff] %v2935_v49  }
 0x617 PF: > { %s13_s12 = sadd.s32 1, %s3169_s12  }
 0x618   : > { %p10_p4 = scmp.ge.s32.totalorder %s13_s12, 4  }
 0x61a   :  { %12 = sbr.rel (!%p10_p4) target bundleno = 1 (0x1), region = 62 }

// kernel: _device_forward.8
= control target key start
LH: loop header
LB: loop body
LE: loop exit
PB: predicated region body
PF: predicated region fallthrough
CT: control target
= control target key end

     0   :  { %11 = vsyncpa [#allocation3], 0  ;;  %s4039_s0 = inlined_call_operand.vmem [shape: bf16[2,256,128], index: 0, kind: input, shape index: {}]   ;;  %s4040_s1 = inlined_call_operand.vmem [shape: bf16[2,256,128], index: 1, kind: input, shape index: {}]   ;;  %s4041_s2 = inlined_call_operand.vmem [shape: bf16[2,256,128], index: 2, kind: input, shape index: {}]   ;;  %s4042_s3 = inlined_call_operand.hbm [shape: f32[2,1,256], index: 3, kind: output, shape index: {0}]   ;;  %s4043_s4 = inlined_call_operand.vmem [shape: f32[2,1,32], index: 4, kind: output, shape index: {1}]   ;;  %s4044_s5 = inlined_call_operand.hbm [shape: f32[2,1,4], index: 5, kind: output, shape index: {2}]  }
   0x1   :  { %13 = vsyncpa [#allocation3 + $0x1], 0 }
   0x2   :  { %14 = vsyncpa [#allocation5], 0 }
   0x3   :  { %16 = vsyncpa [#allocation5 + $0x1], 0  ;;  %s2771_s18 = smov 0   ;;  %s2773_s19 = smov 0  }
   0x4   :  { %s2775_s20 = smov 0   ;;  %s2777_s21 = smov 0  }
   0x5 LB: > { %s2792_s22 = sadd.s32 4294967295, %s2733_s21   ;;  %s2051_s23 = sadd.s32 4294967294, %s2733_s21   ;;  %s2733_s21 = sphi %s2777_s21, %s4231_s21   ;;  %s2729_s20 = sphi %s2775_s20, %s4230_s20   ;;  %s2725_s19 = sphi %s2773_s19, %s4229_s19   ;;  %s2721_s18 = sphi %s2771_s18, %s4228_s18  }
   0x6   : > { %s2796_s24 = sadd.s32 1, %s2733_s21   ;;  %s107_s25 = sadd.s32 1, %s2729_s20 }
   0x7   : > { %s104_s26 = ssub.s32 %s2733_s21, %s2796_s24  ;;  %p117_p0 = scmp.ne.s32.totalorder %s2729_s20, %s2725_s19 }
   0x8   : > { %p105_p1 = scmp.eq.s32.totalorder %s104_s26, 0  ;;  %p118_p2 = scmp.eq.s32.totalorder %s2792_s22, 1 }
   0x9   : > { %p123_p3 = scmp.ne.s32.totalorder %s2725_s19, %s2721_s18  ;;  %p124_p4 = scmp.eq.s32.totalorder %s2051_s23, 1 }
   0xa   : > { %s2807_s27 = scalar_select %p105_p1, %s2729_s20, %s107_s25  }
   0xb   : > { %p2809_p5 = por %p118_p2, %p117_p0  ;;  %p2813_p6 = por %p124_p4, %p123_p3 }
   0xc   : > { %p2054_p7 = scmp.ge.s32.totalorder %s2733_s21, 1  ;;  %p218_p8 = scmp.lt.s32.totalorder %s2733_s21, 3 }
   0xe   : > { %p219_p9 = pnand %p2054_p7, %p218_p8 }
  0x10   : > { %222 = sbr.rel (%p219_p9) target bundleno = 858 (0x35a), region = 32 }
  0x15   : > { %p263_p10 = scmp.lt.s32.totalorder %s2792_s22, 1  ;;  %s2735_s10 = smov 127   ;;  %vm665_vm0 = vcmask 261120   ;;  %v2736_v61 = vmov 40   ;;  %vm858_vm1 = vcmask 335168   ;;  %vm1806_vm2 = vcmask 326944  }
  0x16   : > { %2504 = vset.pattern.permute.xlu1 %v2736_v61  ;;  %2535 = vset.pattern.permute.xlu0 %v2736_v61  ;;  %s2737_s17 = smov 92   ;;  %s3974_s23 = sand.u32 1, %s2725_s19   ;;  %vm1881_vm3 = vcmask 24576  }
  0x17   : > { %s2821_s30 = scalar_select %p263_p10, %s2792_s22, 1 }
  0x18   : > { %s2098_s25 = sshll.u32 %s2792_s22, 4  ;;  %s262_s26 = scalar_lea.vmem [#allocation4], %s3974_s23 }
  0x19   : > { %s2824_s6 = sshll.u32 %s2821_s30, 7  ;;  %s2738_s12 = smov [#allocation4]  }
  0x1a   : > { %s2830_s9 = scalar_lea.vmem %s4040_s1, %s2824_s6  ;;  %s3126_s13 = scalar_lea.vmem %s4039_s0, %s2824_s6 }
  0x1b   : > { %v2313_v0 = vld [vmem:[%s2830_s9 + $0x10] sm:$0xff]   ;;  %v2170_v1 = vld [vmem:[%s2830_s9] sm:$0xff]   ;;  %v2314_v2 = vld [vmem:[%s2830_s9 + $0x18] sm:$0xff]   ;;  %s3779_s16 = scalar_lea.vmem %s4041_s2, %s2824_s6  ;;  %s1921_s6 = sshll.u32 %s262_s26, 4  ;;  %s1922_s6 = int_to_ptr.vmem [resolvable:$true] %s1921_s6 }
  0x1c   : > { %v2835_v3 = vunpack.c.l.bf16 %v2313_v0  ;;  %v2837_v4 = vunpack.c.h.bf16 %v2313_v0  ;;  %v2839_v5 = vunpack.c.l.bf16 %v2170_v1  ;;  %v2841_v6 = vunpack.c.h.bf16 %v2170_v1  ;;  %v2312_v7 = vld [vmem:[%s2830_s9 + $0x8] sm:$0xff]   ;;  %v2315_v13 = vld [vmem:[%s2830_s9 + $0x20] sm:$0xff]   ;;  %v2318_v22 = vld [vmem:[%s2830_s9 + $0x38] sm:$0xff]   ;;  %s2643_s11 = scalar_lea.vmem %s1922_s6, 16 }
  0x1d   : > { %v2316_v8 = vld [vmem:[%s2830_s9 + $0x28] sm:$0xff]   ;;  %v2845_v9 = vunpack.c.l.bf16 %v2314_v2  ;;  %v2847_v10 = vunpack.c.h.bf16 %v2314_v2  ;;  %v2849_v11 = vunpack.c.l.bf16 %v2312_v7  ;;  %v2851_v12 = vunpack.c.h.bf16 %v2312_v7  ;;  %v2317_v23 = vld [vmem:[%s2830_s9 + $0x30] sm:$0xff]   ;;  %v2319_v31 = vld [vmem:[%s2830_s9 + $0x40] sm:$0xff]   ;;  %p2644_p11 = scmp.ne.s32.totalorder %s1922_s6, %s2643_s11 }
  0x1e   : > { %v2434_v14 = vpack.i.bf16 %v2837_v4, %v2835_v3  ;;  %v2424_v15 = vpack.i.bf16 %v2841_v6, %v2839_v5  ;;  %v2858_v16 = vunpack.c.l.bf16 %v2316_v8  ;;  %v2860_v17 = vunpack.c.h.bf16 %v2316_v8  ;;  %v2320_v30 = vld [vmem:[%s2830_s9 + $0x48] sm:$0xff]   ;;  %v2322_v38 = vld [vmem:[%s2830_s9 + $0x58] sm:$0xff]   ;;  %v2321_v39 = vld [vmem:[%s2830_s9 + $0x50] sm:$0xff]  }
  0x1f   : > { %v2439_v18 = vpack.i.bf16 %v2847_v10, %v2845_v9  ;;  %v2429_v19 = vpack.i.bf16 %v2851_v12, %v2849_v11  ;;  %v2868_v20 = vunpack.c.l.bf16 %v2315_v13  ;;  %v2870_v21 = vunpack.c.h.bf16 %v2315_v13  ;;  %v2323_v46 = vld [vmem:[%s2830_s9 + $0x60] sm:$0xff]   ;;  %v2324_v60 = vld [vmem:[%s2830_s9 + $0x68] sm:$0xff]   ;;  %v2325_v0 = vld [vmem:[%s2830_s9 + $0x70] sm:$0xff]   ;;  %p2645_p12 = pnand %p2644_p11, %p2809_p5 }
  0x20   : > { %2435 = vrot.lane.b32.xlu1 %v2434_v14, %s2735_s10  ;;  %2425 = vrot.lane.b32.xlu0 %v2424_v15, %s2735_s10  ;;  %v2449_v24 = vpack.i.bf16 %v2860_v17, %v2858_v16  ;;  %v2876_v25 = vunpack.c.l.bf16 %v2318_v22  ;;  %v2882_v27 = vunpack.c.h.bf16 %v2318_v22  ;;  %v2884_v28 = vunpack.c.l.bf16 %v2317_v23 }
  0x21   : > { %v2444_v26 = vpack.i.bf16 %v2870_v21, %v2868_v20  ;;  %v2886_v29 = vunpack.c.h.bf16 %v2317_v23  ;;  %v2890_v32 = vunpack.c.l.bf16 %v2320_v30  ;;  %v2892_v33 = vunpack.c.h.bf16 %v2320_v30  ;;  %p2646_p13 = pneg %p2645_p12 }
  0x22   : > { %4114 = vst [vmem:[#allocation8_spill] sm:$0xff] %v2876_v25  ;;  %4115 = vst [vmem:[#allocation9_spill] sm:$0xff] %v2882_v27  ;;  %v2459_v34 = vpack.i.bf16 %v2882_v27, %v2876_v25  ;;  %v2900_v36 = vunpack.c.l.bf16 %v2319_v31  ;;  %v2902_v37 = vunpack.c.h.bf16 %v2319_v31  ;;  %v2908_v41 = vunpack.c.l.bf16 %v2322_v38 }
  0x23   : > { %4116 = vst [vmem:[#allocation10_spill] sm:$0xff] %v2886_v29  ;;  %4117 = vst [vmem:[#allocation11_spill] sm:$0xff] %v2890_v32  ;;  %v2454_v35 = vpack.i.bf16 %v2886_v29, %v2884_v28  ;;  %v2469_v40 = vpack.i.bf16 %v2892_v33, %v2890_v32  ;;  %v2914_v43 = vunpack.c.h.bf16 %v2322_v38  ;;  %v2916_v44 = vunpack.c.l.bf16 %v2321_v39 }
  0x24   : > { %2440 = vrot.lane.b32.xlu1 %v2439_v18, %s2735_s10  ;;  %2430 = vrot.lane.b32.xlu0 %v2429_v19, %s2735_s10  ;;  %4118 = vst [vmem:[#allocation12_spill] sm:$0xff] %v2892_v33  ;;  %4119 = vst [vmem:[#allocation13_spill] sm:$0xff] %v2900_v36  ;;  %v2464_v42 = vpack.i.bf16 %v2902_v37, %v2900_v36  ;;  %v2918_v45 = vunpack.c.h.bf16 %v2321_v39  ;;  %v2927_v49 = vunpack.c.l.bf16 %v2323_v46  ;;  %v2929_v50 = vunpack.c.h.bf16 %v2323_v46 }
  0x25   : > { %4120 = vst [vmem:[#allocation14_spill] sm:$0xff] %v2902_v37  ;;  %4121 = vst [vmem:[#allocation15_spill] sm:$0xff] %v2908_v41  ;;  %v2479_v47 = vpack.i.bf16 %v2914_v43, %v2908_v41  ;;  %v634_v52 = vmul.f32 %v2841_v6, %v2841_v6  ;;  %v633_v53 = vmul.f32 %v2839_v5, %v2839_v5  ;;  %v2949_v62 = vunpack.c.l.bf16 %v2324_v60 }
  0x26   : > { %4122 = vst [vmem:[#allocation16_spill] sm:$0xff] %v2914_v43  ;;  %4123 = vst [vmem:[#allocation17_spill] sm:$0xff] %v2916_v44  ;;  %v2474_v48 = vpack.i.bf16 %v2918_v45, %v2916_v44  ;;  %v2484_v51 = vpack.i.bf16 %v2929_v50, %v2927_v49  ;;  %v635_v56 = vmul.f32 %v2849_v11, %v2849_v11  ;;  %v2951_v63 = vunpack.c.h.bf16 %v2324_v60 }
  0x27   : > { %4124 = vst [vmem:[#allocation18_spill] sm:$0xff] %v2918_v45  ;;  %4125 = vst [vmem:[#allocation19_spill] sm:$0xff] %v2927_v49  ;;  %v669_v54 = vsel %vm665_vm0, %v634_v52, 0.0  ;;  %v666_v55 = vsel %vm665_vm0, %v633_v53, 0.0  ;;  %v636_v58 = vmul.f32 %v2851_v12, %v2851_v12  ;;  %v2956_v2 = vunpack.c.l.bf16 %v2325_v0 }
  0x28   : > { %2450 = vrot.lane.b32.xlu1 %v2449_v24, %s2735_s10  ;;  %2445 = vrot.lane.b32.xlu0 %v2444_v26, %s2735_s10  ;;  %4126 = vst [vmem:[#allocation20_spill] sm:$0xff] %v2929_v50  ;;  %v672_v57 = vsel %vm665_vm0, %v635_v56, 0.0  ;;  %4127 = vst [vmem:[#allocation21_spill] sm:$0xff] %v2949_v62  ;;  %v2489_v1 = vpack.i.bf16 %v2951_v63, %v2949_v62  ;;  %v2958_v7 = vunpack.c.h.bf16 %v2325_v0  ;;  %v2326_v24 = vld [vmem:[%s2830_s9 + $0x78] sm:$0xff]   ;;  %s3981_s9 = scalar_lea.hbm %s4044_s5, %s2098_s25 }
  0x29   : > { %v675_v59 = vsel %vm665_vm0, %v636_v58, 0.0  ;;  %4128 = vst [vmem:[#allocation22_spill] sm:$0xff] %v2951_v63  ;;  %4129 = vst [vmem:[#allocation23_spill] sm:$0xff] %v2956_v2  ;;  %v637_v13 = vmul.f32 %v2835_v3, %v2835_v3  ;;  %v638_v15 = vmul.f32 %v2837_v4, %v2837_v4  ;;  %v639_v19 = vmul.f32 %v2845_v9, %v2845_v9 }
  0x2a   : > { %4130 = vst [vmem:[#allocation24_spill] sm:$0xff] %v2958_v7  ;;  %v2494_v8 = vpack.i.bf16 %v2958_v7, %v2956_v2  ;;  %v640_v23 = vmul.f32 %v2847_v10, %v2847_v10  ;;  %v641_v30 = vmul.f32 %v2868_v20, %v2868_v20  ;;  %v2979_v31 = vunpack.c.l.bf16 %v2326_v24 }
  0x2b   : > { %v678_v14 = vsel %vm665_vm0, %v637_v13, 0.0  ;;  %v681_v18 = vsel %vm665_vm0, %v638_v15, 0.0  ;;  %v684_v22 = vsel %vm665_vm0, %v639_v19, 0.0  ;;  %v642_v39 = vmul.f32 %v2870_v21, %v2870_v21 }
  0x2c   : > { %2460 = vrot.lane.b32.xlu1 %v2459_v34, %s2735_s10  ;;  %2455 = vrot.lane.b32.xlu0 %v2454_v35, %s2735_s10  ;;  %v687_v26 = vsel %vm665_vm0, %v640_v23, 0.0  ;;  %4131 = vst [vmem:[#allocation25_spill] sm:$0xff] %v2979_v31  ;;  %v2981_v34 = vunpack.c.h.bf16 %v2326_v24  ;;  %v690_v35 = vsel %vm665_vm0, %v641_v30, 0.0  ;;  %v644_v46 = vmul.f32 %v2860_v17, %v2860_v17 }
  0x2d   : > { %v645_v52 = vmul.f32 %v2884_v28, %v2884_v28  ;;  %v647_v60 = vmul.f32 %v2876_v25, %v2876_v25 }
  0x2e   : > { %4132 = vst [vmem:[#allocation26_spill] sm:$0xff] %v2981_v34  ;;  %v2499_v38 = vpack.i.bf16 %v2981_v34, %v2979_v31 }
  0x2f   : > { %v702_v58 = vsel %vm665_vm0, %v645_v52, 0.0  ;;  %v708_v19 = vsel %vm665_vm0, %v647_v60, 0.0  ;;  %v653_v60 = vmul.f32 %v2916_v44, %v2916_v44 }
  0x30   : > { %2470 = vrot.lane.b32.xlu1 %v2469_v40, %s2735_s10  ;;  %2465 = vrot.lane.b32.xlu0 %v2464_v42, %s2735_s10  ;;  %v693_v42 = vsel %vm665_vm0, %v642_v39, 0.0 }
  0x34   : > { %2480 = vrot.lane.b32.xlu1 %v2479_v47, %s2735_s10  ;;  %2475 = vrot.lane.b32.xlu0 %v2474_v48, %s2735_s10 }
  0x38   : > { %2485 = vrot.lane.b32.xlu0 %v2484_v51, %s2735_s10  ;;  %v699_v51 = vsel %vm665_vm0, %v644_v46, 0.0 }
  0x57   : > { %670 = vadd.xlane.f32.xlu0 %v669_v54  ;;  %v646_v54 = vmul.f32 %v2886_v29, %v2886_v29 }
  0x58   : > { %667 = vadd.xlane.f32.xlu1 %v666_v55 }
  0x5c   : > { %673 = vadd.xlane.f32.xlu1 %v672_v57 }
  0x60   : > { %676 = vadd.xlane.f32.xlu1 %v675_v59  ;;  %v705_v59 = vsel %vm665_vm0, %v646_v54, 0.0  ;;  %v648_v54 = vmul.f32 %v2882_v27, %v2882_v27 }
  0x6d   : > { %2490 = vrot.lane.b32.xlu0 %v2489_v1, %s2735_s10 }
  0x71   : > { %2495 = vrot.lane.b32.xlu1 %v2494_v8, %s2735_s10 }
  0x8c   : > { %679 = vadd.xlane.f32.xlu0 %v678_v14 }
  0x92   : > { %v2426_v40 = vpop.permute.xlu0 %2425  ;;  %v2436_v13 = vpop.permute.xlu1 %2435 }
  0x93   : > { %v2428_v47 = vunpack.i.h.bf16 %v2426_v40  ;;  %v2427_v48 = vunpack.i.l.bf16 %v2426_v40  ;;  %v2437_v23 = vunpack.i.l.bf16 %v2436_v13 }
  0x95   : > { %682 = vadd.xlane.f32.xlu1 %v681_v18  ;;  %v2998_v55 = vmul.f32 %v2428_v47, %v2841_v6  ;;  %v3001_v56 = vmul.f32 %v2427_v48, %v2839_v5  ;;  %v3028_v39 = vmul.f32 %v2437_v23, %v2835_v3  ;;  %v643_v47 = vmul.f32 %v2858_v16, %v2858_v16 }
  0x96   : > { %v2431_v53 = vpop.permute.xlu0 %2430  ;;  %v2441_v40 = vpop.permute.xlu1 %2440  ;;  %v651_v48 = vmul.f32 %v2890_v32, %v2890_v32  ;;  %v652_v23 = vmul.f32 %v2892_v33, %v2892_v33 }
  0x97   : > { %v2432_v57 = vunpack.i.l.bf16 %v2431_v53  ;;  %v860_v61 = vsel %vm858_vm1, %v2998_v55, 0.0  ;;  %v859_v0 = vsel %vm858_vm1, %v3001_v56, 0.0  ;;  %v2433_v1 = vunpack.i.h.bf16 %v2431_v53 }
  0x98   : > { %v861_v14 = vadd.f32 %v860_v61, %v859_v0  ;;  %v866_v52 = vsel %vm858_vm1, %v3028_v39, 0.0  ;;  %v2443_v0 = vunpack.i.h.bf16 %v2441_v40 }
  0x99   : > { %685 = vadd.xlane.f32.xlu1 %v684_v22  ;;  %v3012_v8 = vmul.f32 %v2432_v57, %v2849_v11  ;;  %v3015_v15 = vmul.f32 %v2433_v1, %v2851_v12  ;;  %v649_v22 = vmul.f32 %v2900_v36, %v2900_v36 }
  0x9a   : > { %v2446_v61 = vpop.permute.xlu0 %2445 }
  0x9b   : > { %v862_v18 = vsel %vm858_vm1, %v3012_v8, 0.0  ;;  %v714_v30 = vsel %vm665_vm0, %v649_v22, 0.0  ;;  %v726_v22 = vsel %vm665_vm0, %v653_v60, 0.0 }
  0x9c   : > { %v863_v24 = vadd.f32 %v862_v18, %v861_v14  ;;  %v711_v14 = vsel %vm665_vm0, %v648_v54, 0.0 }
  0x9d   : > { %688 = vadd.xlane.f32.xlu1 %v687_v26  ;;  %v864_v26 = vsel %vm858_vm1, %v3015_v15, 0.0 }
  0xa1   : > { %691 = vadd.xlane.f32.xlu1 %v690_v35  ;;  %v650_v35 = vmul.f32 %v2902_v37, %v2902_v37 }
  0xa2   : > { %2500 = vrot.lane.b32.xlu0 %v2499_v38, %s2735_s10  ;;  %v2438_v38 = vunpack.i.h.bf16 %v2436_v13  ;;  %s1892_s10 = scalar_lea.sflag [#allocation5], %s3974_s23 }
  0xa3   : > { %v717_v46 = vsel %vm665_vm0, %v650_v35, 0.0  ;;  %v654_v35 = vmul.f32 %v2918_v45, %v2918_v45 }
  0xa4   : > { %v3038_v53 = vmul.f32 %v2438_v38, %v2837_v4  ;;  %v657_v38 = vmul.f32 %v2927_v49, %v2927_v49 }
  0xa5   : > { %694 = vadd.xlane.f32.xlu1 %v693_v42  ;;  %v865_v42 = vadd.f32 %v864_v26, %v863_v24  ;;  %v655_v24 = vmul.f32 %v2908_v41, %v2908_v41  ;;  %v3058_v26 = vmul.f32 %v2443_v0, %v2847_v10  ;;  %v729_v54 = vsel %vm665_vm0, %v654_v35, 0.0 }
  0xa6   : > { %v868_v1 = vsel %vm858_vm1, %v3038_v53, 0.0  ;;  %v661_v0 = vmul.f32 %v2956_v2, %v2956_v2 }
  0xa7   : > { %v867_v57 = vadd.f32 %v866_v52, %v865_v42  ;;  %v2448_v42 = vunpack.i.h.bf16 %v2446_v61  ;;  %v2451_v52 = vpop.permute.xlu1 %2450 }
  0xa9   : > { %700 = vadd.xlane.f32.xlu1 %v699_v51  ;;  %v2442_v51 = vunpack.i.l.bf16 %v2441_v40  ;;  %v869_v18 = vadd.f32 %v868_v1, %v867_v57  ;;  %v738_v57 = vsel %vm665_vm0, %v657_v38, 0.0  ;;  %v2452_v1 = vunpack.i.l.bf16 %v2451_v52 }
  0xab   : > { %v3049_v13 = vmul.f32 %v2442_v51, %v2845_v9  ;;  %v872_v51 = vsel %vm858_vm1, %v3058_v26, 0.0  ;;  %v3091_v35 = vmul.f32 %v2452_v1, %v2858_v16 }
  0xad   : > { %703 = vadd.xlane.f32.xlu1 %v702_v58  ;;  %v696_v58 = vsel %vm665_vm0, %v643_v47, 0.0  ;;  %v723_v47 = vsel %vm665_vm0, %v652_v23, 0.0  ;;  %v658_v23 = vmul.f32 %v2929_v50, %v2929_v50 }
  0xb1   : > { %706 = vadd.xlane.f32.xlu1 %v705_v59  ;;  %v720_v59 = vsel %vm665_vm0, %v651_v48, 0.0  ;;  %v732_v48 = vsel %vm665_vm0, %v655_v24, 0.0  ;;  %v2456_v24 = vpop.permute.xlu0 %2455 }
  0xb5   : > { %709 = vadd.xlane.f32.xlu1 %v708_v19  ;;  %v2447_v19 = vunpack.i.l.bf16 %v2446_v61  ;;  %v656_v61 = vmul.f32 %v2914_v43, %v2914_v43 }
  0xb9   : > { %715 = vadd.xlane.f32.xlu1 %v714_v30  ;;  %v870_v30 = vsel %vm858_vm1, %v3049_v13, 0.0 }
  0xba   : > { %v871_v40 = vadd.f32 %v870_v30, %v869_v18  ;;  %v2453_v30 = vunpack.i.h.bf16 %v2451_v52 }
  0xbd   : > { %718 = vadd.xlane.f32.xlu1 %v717_v46  ;;  %v3067_v46 = vmul.f32 %v2447_v19, %v2868_v20  ;;  %v735_v19 = vsel %vm665_vm0, %v656_v61, 0.0 }
  0xbf   : > { %v874_v60 = vsel %vm858_vm1, %v3067_v46, 0.0 }
  0xc1   : > { %697 = vadd.xlane.f32.xlu0 %v696_v58  ;;  %721 = vadd.xlane.f32.xlu1 %v720_v59  ;;  %v873_v58 = vadd.f32 %v872_v51, %v871_v40  ;;  %v3076_v59 = vmul.f32 %v2448_v42, %v2870_v21  ;;  %v2457_v40 = vunpack.i.l.bf16 %v2456_v24  ;;  %v741_v42 = vsel %vm665_vm0, %v658_v23, 0.0 }
  0xc2   : > { %v878_v51 = vsel %vm858_vm1, %v3091_v35, 0.0 }
  0xc3   : > { %v876_v18 = vsel %vm858_vm1, %v3076_v59, 0.0 }
  0xc5   : > { %712 = vadd.xlane.f32.xlu0 %v711_v14  ;;  %727 = vadd.xlane.f32.xlu1 %v726_v22  ;;  %v875_v14 = vadd.f32 %v874_v60, %v873_v58  ;;  %v750_v22 = vsel %vm665_vm0, %v661_v0, 0.0  ;;  %v660_v60 = vmul.f32 %v2951_v63, %v2951_v63  ;;  %v2461_v0 = vpop.permute.xlu1 %2460 }
  0xc6   : > { %v2462_v23 = vunpack.i.l.bf16 %v2461_v0 }
  0xc7   : > { %v877_v38 = vadd.f32 %v876_v18, %v875_v14 }
  0xc9   : > { %724 = vadd.xlane.f32.xlu0 %v723_v47  ;;  %733 = vadd.xlane.f32.xlu1 %v732_v48  ;;  %v659_v47 = vmul.f32 %v2949_v62, %v2949_v62  ;;  %v3097_v48 = vmul.f32 %v2453_v30, %v2860_v17  ;;  %v879_v52 = vadd.f32 %v878_v51, %v877_v38 }
  0xca   : > { %v3129_v51 = vmul.f32 %v2462_v23, %v2876_v25 }
  0xcb   : > { %v744_v58 = vsel %vm665_vm0, %v659_v47, 0.0  ;;  %v880_v61 = vsel %vm858_vm1, %v3097_v48, 0.0  ;;  %v2463_v47 = vunpack.i.h.bf16 %v2461_v0 }
  0xcc   : > { %v881_v1 = vadd.f32 %v880_v61, %v879_v52  ;;  %v664_v52 = vmul.f32 %v2981_v34, %v2981_v34  ;;  %v2106_v61 = vld [vmem:[%s3126_s13] sm:$0xff]   ;;  %v886_v0 = vsel %vm858_vm1, %v3129_v51, 0.0 }
  0xcd   : > { %730 = vadd.xlane.f32.xlu0 %v729_v54  ;;  %739 = vadd.xlane.f32.xlu1 %v738_v57  ;;  %v2458_v54 = vunpack.i.h.bf16 %v2456_v24  ;;  %v3102_v57 = vmul.f32 %v2457_v40, %v2884_v28  ;;  %v663_v40 = vmul.f32 %v2979_v31, %v2979_v31 }
  0xcf   : > { %v3110_v14 = vmul.f32 %v2458_v54, %v2886_v29  ;;  %v882_v18 = vsel %vm858_vm1, %v3102_v57, 0.0 }
  0xd0   : > { %v883_v24 = vadd.f32 %v882_v18, %v881_v1  ;;  %v3139_v1 = vmul.f32 %v2463_v47, %v2882_v27  ;;  %v759_v18 = vsel %vm665_vm0, %v664_v52, 0.0  ;;  %v2297_v52 = vld [vmem:[%s3126_s13 + $0x8] sm:$0xff]  }
  0xd1   : > { %736 = vadd.xlane.f32.xlu0 %v735_v19  ;;  %751 = vadd.xlane.f32.xlu1 %v750_v22  ;;  %v747_v19 = vsel %vm665_vm0, %v660_v60, 0.0  ;;  %v662_v22 = vmul.f32 %v2958_v7, %v2958_v7  ;;  %v884_v30 = vsel %vm858_vm1, %v3110_v14, 0.0  ;;  %v756_v60 = vsel %vm665_vm0, %v663_v40, 0.0 }
  0xd2   : > { %v885_v54 = vadd.f32 %v884_v30, %v883_v24  ;;  %v3148_v24 = vunpack.c.h.bf16 %v2106_v61  ;;  %v888_v30 = vsel %vm858_vm1, %v3139_v1, 0.0 }
  0xd3   : > { %v753_v38 = vsel %vm665_vm0, %v662_v22, 0.0 }
  0xd5   : > { %742 = vadd.xlane.f32.xlu0 %v741_v42  ;;  %v2466_v42 = vpop.permute.xlu0 %2465 }
  0xd6   : > { %v2468_v22 = vunpack.i.h.bf16 %v2466_v42 }
  0xd8   : > { %v3153_v47 = vmul.f32 %v2468_v22, %v2902_v37 }
  0xd9   : > { %745 = vadd.xlane.f32.xlu0 %v744_v58  ;;  %v2467_v58 = vunpack.i.l.bf16 %v2466_v42 }
  0xdb   : > { %v3143_v23 = vmul.f32 %v2467_v58, %v2900_v36 }
  0xdd   : > { %748 = vadd.xlane.f32.xlu0 %v747_v19  ;;  %v887_v19 = vadd.f32 %v886_v0, %v885_v54  ;;  %v890_v42 = vsel %vm858_vm1, %v3143_v23, 0.0  ;;  %v3165_v0 = vunpack.c.h.bf16 %v2297_v52 }
  0xdf   : > { %v889_v40 = vadd.f32 %v888_v30, %v887_v19 }
  0xe1   : > { %754 = vadd.xlane.f32.xlu0 %v753_v38  ;;  %v2471_v38 = vpop.permute.xlu1 %2470  ;;  %v891_v58 = vadd.f32 %v890_v42, %v889_v40  ;;  %v2298_v42 = vld [vmem:[%s3126_s13 + $0x10] sm:$0xff]  }
  0xe2   : > { %931 = vperm.xlu1 %2504, %v3001_v56   ;;  %v3146_v56 = vunpack.c.l.bf16 %v2106_v61  ;;  %v2472_v54 = vunpack.i.l.bf16 %v2471_v38  ;;  %v3163_v61 = vunpack.c.l.bf16 %v2297_v52  ;;  %v2473_v19 = vunpack.i.h.bf16 %v2471_v38 }
  0xe4   : > { %v3168_v22 = vmul.f32 %v2472_v54, %v2890_v32  ;;  %v2510_v40 = vpack.i.bf16 %v3165_v0, %v3163_v61  ;;  %v3177_v37 = vmul.f32 %v2473_v19, %v2892_v33 }
  0xe5   : > { %757 = vadd.xlane.f32.xlu0 %v756_v60  ;;  %v892_v60 = vsel %vm858_vm1, %v3153_v47, 0.0  ;;  %v2481_v52 = vpop.permute.xlu1 %2480 }
  0xe6   : > { %941 = vperm.xlu1 %2504, %v3012_v8   ;;  %v2505_v8 = vpack.i.bf16 %v3148_v24, %v3146_v56 }
  0xe9   : > { %760 = vadd.xlane.f32.xlu0 %v759_v18  ;;  %v2476_v18 = vpop.permute.xlu0 %2475  ;;  %v3188_v32 = vpop.xlane.xlu1 %667 }
  0xea   : > { %946 = vperm.xlu1 %2504, %v3015_v15   ;;  %v893_v15 = vadd.f32 %v892_v60, %v891_v58  ;;  %v2477_v30 = vunpack.i.l.bf16 %v2476_v18  ;;  %v2478_v36 = vunpack.i.h.bf16 %v2476_v18  ;;  %v3182_v58 = vunpack.c.l.bf16 %v2298_v42 }
  0xeb   : > { %v896_v60 = vsel %vm858_vm1, %v3177_v37, 0.0 }
  0xec   : > { %v3180_v54 = vmul.f32 %v2477_v30, %v2916_v44  ;;  %v3191_v19 = vmul.f32 %v2478_v36, %v2918_v45 }
  0xed   : > { %v2486_v30 = vpop.permute.xlu0 %2485  ;;  %v3207_v45 = vpop.xlane.xlu1 %673 }
  0xee   : > { %2506 = vperm.xlu1 %2504, %v2505_v8   ;;  %v894_v8 = vsel %vm858_vm1, %v3168_v22, 0.0  ;;  %v898_v18 = vsel %vm858_vm1, %v3180_v54, 0.0  ;;  %v900_v44 = vsel %vm858_vm1, %v3191_v19, 0.0 }
  0xef   : > { %v895_v38 = vadd.f32 %v894_v8, %v893_v15 }
  0xf1   : > { %v897_v27 = vadd.f32 %v896_v60, %v895_v38  ;;  %v3205_v60 = vpop.xlane.xlu0 %670 }
  0xf2   : > { %966 = vperm.xlu1 %2504, %v3058_v26   ;;  %v3184_v26 = vunpack.c.h.bf16 %v2298_v42  ;;  %v2482_v42 = vunpack.i.l.bf16 %v2481_v52 }
  0xf3   : > { %v899_v8 = vadd.f32 %v898_v18, %v897_v27  ;;  %v2300_v18 = vld [vmem:[%s3126_s13 + $0x20] sm:$0xff]  }
  0xf4   : > { %v2515_v15 = vpack.i.bf16 %v3184_v26, %v3182_v58  ;;  %v3211_v33 = vmul.f32 %v2482_v42, %v2908_v41 }
  0xf5   : > { %v901_v25 = vadd.f32 %v900_v44, %v899_v8  ;;  %v3225_v44 = vunpack.c.l.bf16 %v2300_v18 }
  0xf6   : > { %2511 = vperm.xlu1 %2504, %v2510_v40   ;;  %v2299_v40 = vld [vmem:[%s3126_s13 + $0x18] sm:$0xff]  }
  0xf7   : > { %v3201_v38 = vunpack.c.l.bf16 %v2299_v40  ;;  %v3203_v36 = vunpack.c.h.bf16 %v2299_v40  ;;  %v902_v40 = vsel %vm858_vm1, %v3211_v33, 0.0 }
  0xf8   : > { %v903_v42 = vadd.f32 %v902_v40, %v901_v25 }
  0xf9   : > { %v2520_v27 = vpack.i.bf16 %v3203_v36, %v3201_v38 }
  0xfa   : > { %976 = vperm.xlu1 %2504, %v3076_v59   ;;  %v2483_v59 = vunpack.i.h.bf16 %v2481_v52  ;;  %v3223_v52 = vpop.xlane.xlu1 %676 }
  0xfc   : > { %v3221_v29 = vmul.f32 %v2483_v59, %v2914_v43 }
  0xfe   : > { %2516 = vperm.xlu1 %2504, %v2515_v15   ;;  %v2487_v15 = vunpack.i.l.bf16 %v2486_v30  ;;  %v904_v59 = vsel %vm858_vm1, %v3221_v29, 0.0 }
  0xff   : > { %936 = vperm.xlu0 %2535, %v2998_v55   ;;  %v2491_v55 = vpop.permute.xlu0 %2490  ;;  %v905_v43 = vadd.f32 %v904_v59, %v903_v42  ;;  %v2301_v59 = vld [vmem:[%s3126_s13 + $0x28] sm:$0xff]  }
 0x100   : > { %v3231_v8 = vmul.f32 %v2487_v15, %v2927_v49  ;;  %v2492_v41 = vunpack.i.l.bf16 %v2491_v55 }
 0x102   : > { %986 = vperm.xlu1 %2504, %v3097_v48   ;;  %v3227_v48 = vunpack.c.h.bf16 %v2300_v18  ;;  %v2493_v18 = vunpack.i.h.bf16 %v2491_v55  ;;  %v3245_v15 = vmul.f32 %v2492_v41, %v2949_v62  ;;  %v3261_v41 = vunpack.c.l.bf16 %v2301_v59 }
 0x103   : > { %951 = vperm.xlu0 %2535, %v3028_v39   ;;  %v2488_v39 = vunpack.i.h.bf16 %v2486_v30  ;;  %v906_v30 = vsel %vm858_vm1, %v3231_v8, 0.0 }
 0x104   : > { %v2525_v25 = vpack.i.bf16 %v3227_v48, %v3225_v44  ;;  %v907_v40 = vadd.f32 %v906_v30, %v905_v43  ;;  %v3263_v43 = vunpack.c.h.bf16 %v2301_v59 }
 0x106   : > { %2521 = vperm.xlu1 %2504, %v2520_v27   ;;  %v2496_v27 = vpop.permute.xlu1 %2495 }
 0x107   : > { %956 = vperm.xlu0 %2535, %v3038_v53   ;;  %v3240_v53 = vmul.f32 %v2488_v39, %v2929_v50  ;;  %v2497_v42 = vunpack.i.l.bf16 %v2496_v27  ;;  %v910_v39 = vsel %vm858_vm1, %v3245_v15, 0.0 }
 0x109   : > { %v3257_v50 = vmul.f32 %v2497_v42, %v2956_v2  ;;  %v2536_v42 = vpack.i.bf16 %v3263_v43, %v3261_v41 }
 0x10a   : > { %996 = vperm.xlu1 %2504, %v3110_v14   ;;  %v908_v14 = vsel %vm858_vm1, %v3240_v53, 0.0 }
 0x10b   : > { %961 = vperm.xlu0 %2535, %v3049_v13   ;;  %v3251_v13 = vmul.f32 %v2493_v18, %v2951_v63  ;;  %v909_v55 = vadd.f32 %v908_v14, %v907_v40  ;;  %v2498_v18 = vunpack.i.h.bf16 %v2496_v27  ;;  %v914_v40 = vsel %vm858_vm1, %v3257_v50, 0.0 }
 0x10d   : > { %v912_v30 = vsel %vm858_vm1, %v3251_v13, 0.0  ;;  %v598_v27 = vmul.f32 %v2498_v18, %v2958_v7  ;;  %v2304_v7 = vld [vmem:[%s3126_s13 + $0x40] sm:$0xff]  }
 0x10e   : > { %2526 = vperm.xlu1 %2504, %v2525_v25   ;;  %v911_v25 = vadd.f32 %v910_v39, %v909_v55  ;;  %v2303_v39 = vld [vmem:[%s3126_s13 + $0x38] sm:$0xff]  }
 0x10f   : > { %971 = vperm.xlu0 %2535, %v3067_v46   ;;  %v2302_v46 = vld [vmem:[%s3126_s13 + $0x30] sm:$0xff]   ;;  %v916_v18 = vsel %vm858_vm1, %v598_v27, 0.0 }
 0x110   : > { %v913_v14 = vadd.f32 %v912_v30, %v911_v25  ;;  %v2305_v30 = vld [vmem:[%s3126_s13 + $0x48] sm:$0xff]  }
 0x112   : > { %1001 = vperm.xlu1 %2504, %v3129_v51   ;;  %v3273_v51 = vunpack.c.l.bf16 %v2302_v46  ;;  %v915_v55 = vadd.f32 %v914_v40, %v913_v14 }
 0x113   : > { %981 = vperm.xlu0 %2535, %v3091_v35   ;;  %v3275_v35 = vunpack.c.h.bf16 %v2302_v46  ;;  %v3285_v46 = vunpack.c.l.bf16 %v2303_v39 }
 0x114   : > { %v917_v40 = vadd.f32 %v916_v18, %v915_v55 }
 0x115   : > { %v3268_v63 = vpop.xlane.xlu0 %679  ;;  %4133 = vst [vmem:[#allocation27_spill] sm:$0xff] %v3275_v35  ;;  %4134 = vst [vmem:[#allocation28_spill] sm:$0xff] %v3285_v46 }
 0x116   : > { %1006 = vperm.xlu1 %2504, %v3139_v1   ;;  %v2530_v1 = vpack.i.bf16 %v3275_v35, %v3273_v51 }
 0x117   : > { %991 = vperm.xlu0 %2535, %v3102_v57   ;;  %v3287_v57 = vunpack.c.h.bf16 %v2303_v39 }
 0x119   : > { %v2501_v59 = vpop.permute.xlu0 %2500  ;;  %4135 = vst [vmem:[#allocation29_spill] sm:$0xff] %v3287_v57 }
 0x11a   : > { %v2503_v2 = vunpack.i.h.bf16 %v2501_v59  ;;  %v2502_v62 = vunpack.i.l.bf16 %v2501_v59  ;;  %1016 = vperm.xlu1 %2504, %v3153_v47  }
 0x11b   : > { %2537 = vperm.xlu0 %2535, %v2536_v42   ;;  %v3305_v42 = vunpack.c.h.bf16 %v2305_v30 }
 0x11c   : > { %v3290_v49 = vmul.f32 %v2503_v2, %v2981_v34  ;;  %v599_v25 = vmul.f32 %v2502_v62, %v2979_v31  ;;  %v2541_v2 = vpack.i.bf16 %v3287_v57, %v3285_v46  ;;  %v3303_v62 = vunpack.c.l.bf16 %v2305_v30  ;;  %v2307_v30 = vld [vmem:[%s3126_s13 + $0x58] sm:$0xff]  }
 0x11d   : > { %4137 = vst [vmem:[#allocation31_spill] sm:$0xff] %v3305_v42 }
 0x11e   : > { %v920_v47 = vsel %vm858_vm1, %v3290_v49, 0.0  ;;  %v918_v14 = vsel %vm858_vm1, %v599_v25, 0.0  ;;  %v3298_v59 = vpop.xlane.xlu1 %682  ;;  %2531 = vperm.xlu1 %2504, %v2530_v1   ;;  %4136 = vst [vmem:[#allocation30_spill] sm:$0xff] %v3303_v62  ;;  %v2551_v1 = vpack.i.bf16 %v3305_v42, %v3303_v62 }
 0x11f   : > { %1011 = vperm.xlu0 %2535, %v3143_v23   ;;  %v919_v39 = vadd.f32 %v918_v14, %v917_v40  ;;  %v3325_v14 = vunpack.c.l.bf16 %v2307_v30  ;;  %v767_v46 = vmax.f32 %v3298_v59, 1e-24 }
 0x121   : > { %v921_v55 = vadd.f32 %v920_v47, %v919_v39  ;;  %v3320_v47 = vunpack.c.l.bf16 %v2304_v7  ;;  %4140 = vst [vmem:[#allocation34_spill] sm:$0xff] %v3325_v14 }
 0x122   : > { %v3307_v18 = vpop.xlane.xlu1 %685  ;;  %1021 = vperm.xlu1 %2504, %v3168_v22   ;;  %v3322_v22 = vunpack.c.h.bf16 %v2304_v7 }
 0x123   : > { %2542 = vperm.xlu0 %2535, %v2541_v2   ;;  %v922_v34 = vrot.slane %v921_v55, 4  ;;  %4138 = vst [vmem:[#allocation32_spill] sm:$0xff] %v3320_v47 }
 0x124   : > { %4139 = vst [vmem:[#allocation33_spill] sm:$0xff] %v3322_v22 }
 0x125   : > { %v923_v23 = vadd.f32 %v922_v34, %v921_v55  ;;  %v3327_v34 = vunpack.c.h.bf16 %v2307_v30 }
 0x126   : > { %v3312_v31 = vpop.xlane.xlu1 %688  ;;  %1026 = vperm.xlu1 %2504, %v3177_v37  }
 0x127   : > { %2552 = vperm.xlu0 %2535, %v2551_v1   ;;  %v924_v57 = vrot.slane %v923_v23, 2  ;;  %4141 = vst [vmem:[#allocation35_spill] sm:$0xff] %v3327_v34  ;;  %v2561_v7 = vpack.i.bf16 %v3327_v34, %v3325_v14  ;;  %v2309_v1 = vld [vmem:[%s3126_s13 + $0x68] sm:$0xff]  }
 0x129   : > { %v925_v37 = vadd.f32 %v924_v57, %v923_v23 }
 0x12a   : > { %v3317_v40 = vpop.xlane.xlu1 %691  ;;  %1031 = vperm.xlu1 %2504, %v3180_v54   ;;  %v2546_v54 = vpack.i.bf16 %v3322_v22, %v3320_v47  ;;  %v763_v22 = vmax.f32 %v3205_v60, 1e-24  ;;  %v765_v47 = vmax.f32 %v3223_v52, 1e-24  ;;  %v769_v52 = vmax.f32 %v3312_v31, 1e-24 }
 0x12b   : > { %1056 = vperm.xlu0 %2535, %v3240_v53   ;;  %v926_v53 = vrot.slane %v925_v37, 1 }
 0x12d   : > { %v927_v55 = vadd.f32 %v926_v53, %v925_v37  ;;  %v3351_v37 = vunpack.c.l.bf16 %v2309_v1 }
 0x12e   : > { %v3329_v2 = vpop.xlane.xlu1 %694  ;;  %1036 = vperm.xlu1 %2504, %v3191_v19   ;;  %v2306_v19 = vld [vmem:[%s3126_s13 + $0x50] sm:$0xff]  }
 0x12f   : > { %1061 = vperm.xlu0 %2535, %v3245_v15   ;;  %v928_v23 = vmax.f32 %v927_v55, 1.0  ;;  %v3347_v30 = vunpack.c.l.bf16 %v2306_v19  ;;  %v3349_v34 = vunpack.c.h.bf16 %v2306_v19  ;;  %4144 = vst [vmem:[#allocation38_spill] sm:$0xff] %v3351_v37 }
 0x131   : > { %4142 = vst [vmem:[#allocation36_spill] sm:$0xff] %v3347_v30  ;;  %4143 = vst [vmem:[#allocation37_spill] sm:$0xff] %v3349_v34  ;;  %2571 = vrcp.f32 %v928_v23 }
 0x132   : > { %v3337_v39 = vpop.xlane.xlu1 %700  ;;  %2547 = vperm.xlu1 %2504, %v2546_v54   ;;  %v2310_v54 = vld [vmem:[%s3126_s13 + $0x70] sm:$0xff]  }
 0x133   : > { %2562 = vperm.xlu0 %2535, %v2561_v7   ;;  %v3360_v7 = vunpack.c.l.bf16 %v2310_v54 }
 0x135   : > { %4145 = vst [vmem:[#allocation39_spill] sm:$0xff] %v3360_v7 }
 0x136   : > { %v3339_v57 = vpop.xlane.xlu1 %703  ;;  %1041 = vperm.xlu1 %2504, %v3211_v33  }
 0x137   : > { %1076 = vperm.xlu0 %2535, %v598_v27   ;;  %v2556_v27 = vpack.i.bf16 %v3349_v34, %v3347_v30  ;;  %v3388_v34 = vunpack.c.h.bf16 %v2309_v1 }
 0x139   : > { %4149 = vst [vmem:[#allocation43_spill] sm:$0xff] %v3388_v34 }
 0x13a   : > { %v3344_v15 = vpop.xlane.xlu1 %706  ;;  %1046 = vperm.xlu1 %2504, %v3221_v29   ;;  %v2311_v29 = vld [vmem:[%s3126_s13 + $0x78] sm:$0xff]  }
 0x13b   : > { %1081 = vperm.xlu0 %2535, %v599_v25   ;;  %v2308_v25 = vld [vmem:[%s3126_s13 + $0x60] sm:$0xff]   ;;  %v3367_v55 = vunpack.c.l.bf16 %v2311_v29  ;;  %s2647_s13 = sshll.u32 %s2738_s12, 4  ;;  %s2648_s13 = int_to_ptr.vmem [resolvable:$false] %s2647_s13 }
 0x13c   : > { %v3369_v19 = vunpack.c.l.bf16 %v2308_v25  ;;  %v3371_v23 = vunpack.c.h.bf16 %v2308_v25  ;;  %s2649_s14 = scalar_lea.vmem %s2648_s13, 32  ;;  %p2650_p0 = scmp.lt.s32.totalorder %s1922_s6, %s2648_s13 }
 0x13d   : > { %4146 = vst [vmem:[#allocation40_spill] sm:$0xff] %v3367_v55  ;;  %p2651_p1 = scmp.lt.s32.totalorder %s2649_s14, %s2643_s11 }
 0x13e   : > { %v3354_v33 = vpop.xlane.xlu1 %709  ;;  %1051 = vperm.xlu1 %2504, %v3231_v8   ;;  %4147 = vst [vmem:[#allocation41_spill] sm:$0xff] %v3369_v19  ;;  %4148 = vst [vmem:[#allocation42_spill] sm:$0xff] %v3371_v23 }
 0x13f   : > { %1336 = vperm.xlu0 %2535, %v3351_v37   ;;  %v2572_v37 = vpop.eup %2571  ;;  %p2652_p2 = por %p2651_p1, %p2650_p0 }
 0x141   : > { %p2653_p3 = pnand %p2652_p2, %p2646_p13 }
 0x142   : > { %v3363_v53 = vpop.xlane.xlu1 %715  ;;  %2557 = vperm.xlu1 %2504, %v2556_v27  }
 0x143   : > { %1346 = vperm.xlu0 %2535, %v3360_v7   ;;  %v2566_v7 = vpack.i.bf16 %v3371_v23, %v3369_v19  ;;  %v3402_v19 = vunpack.c.h.bf16 %v2311_v29  ;;  %v764_v29 = vmax.f32 %v3207_v45, 1e-24 }
 0x145   : > { %4152 = vst [vmem:[#allocation46_spill] sm:$0xff] %v3402_v19 }
 0x146   : > { %v3373_v8 = vpop.xlane.xlu1 %718  ;;  %1066 = vperm.xlu1 %2504, %v3251_v13  }
 0x147   : > { %1356 = vperm.xlu0 %2535, %v3367_v55  }
 0x14a   : > { %v3377_v14 = vpop.xlane.xlu1 %721  ;;  %1071 = vperm.xlu1 %2504, %v3257_v50   ;;  %v3380_v27 = vpop.xlane.xlu0 %697  ;;  %v3395_v50 = vunpack.c.h.bf16 %v2310_v54 }
 0x14b   : > { %1193 = vperm.xlu0 %2535, %v2572_v37  }
 0x14c   : > { %4150 = vst [vmem:[#allocation44_spill] sm:$0xff] %v3395_v50 }
 0x14e   : > { %v3384_v30 = vpop.xlane.xlu1 %727  ;;  %2567 = vperm.xlu1 %2504, %v2566_v7   ;;  %v3386_v25 = vpop.xlane.xlu0 %712 }
 0x152   : > { %v3390_v13 = vpop.xlane.xlu1 %733  ;;  %1086 = vperm.xlu1 %2504, %v3290_v49   ;;  %v3393_v55 = vpop.xlane.xlu0 %724 }
 0x156   : > { %v3397_v42 = vpop.xlane.xlu1 %739  ;;  %1341 = vperm.xlu1 %2504, %v3388_v34   ;;  %v3400_v37 = vpop.xlane.xlu0 %730  ;;  %v762_v34 = vmax.f32 %v3188_v32, 1e-24  ;;  %v768_v32 = vmax.f32 %v3307_v18, 1e-24  ;;  %v773_v18 = vmax.f32 %v3337_v39, 1e-24 }
 0x157   : > { %4151 = vst [vmem:[#allocation45_spill] sm:$0xff] %v3397_v42 }
 0x158   : > { %2573 = vrsqrt.f32 %v762_v34 }
 0x159   : > { %2575 = vrsqrt.f32 %v763_v22 }
 0x15a   : > { %v3404_v7 = vpop.xlane.xlu1 %751  ;;  %1351 = vperm.xlu1 %2504, %v3395_v50   ;;  %v3407_v1 = vpop.xlane.xlu0 %736  ;;  %2577 = vrsqrt.f32 %v764_v29  ;;  %v774_v29 = vmax.f32 %v3339_v57, 1e-24 }
 0x15b   : > { %4153 = vst [vmem:[#allocation47_spill] sm:$0xff] %v3404_v7  ;;  %2579 = vrsqrt.f32 %v765_v47  ;;  %v771_v47 = vmax.f32 %v3329_v2, 1e-24 }
 0x15e   : > { %v932_v23 = vpop.permute.xlu1 %931  ;;  %1361 = vperm.xlu1 %2504, %v3402_v19   ;;  %v3410_v49 = vpop.xlane.xlu0 %742  ;;  %v766_v19 = vmax.f32 %v3268_v63, 1e-24  ;;  %v770_v63 = vmax.f32 %v3317_v40, 1e-24 }
 0x15f   : > { %4154 = vst [vmem:[#allocation48_spill] sm:$0xff] %v3410_v49 }
 0x160   : > { %2581 = vrsqrt.f32 %v766_v19 }
 0x161   : > { %2583 = vrsqrt.f32 %v767_v46 }
 0x162   : > { %v942_v54 = vpop.permute.xlu1 %941  ;;  %v3412_v62 = vpop.xlane.xlu0 %745  ;;  %2585 = vrsqrt.f32 %v768_v32  ;;  %v772_v32 = vmax.f32 %v3380_v27, 1e-24 }
 0x163   : > { %4155 = vst [vmem:[#allocation49_spill] sm:$0xff] %v3412_v62  ;;  %2587 = vrsqrt.f32 %v769_v52 }
 0x164   : > { %2589 = vrsqrt.f32 %v770_v63 }
 0x165   : > { %v2574_v59 = vpop.eup %2573  ;;  %2591 = vrsqrt.f32 %v771_v47 }
 0x166   : > { %v947_v7 = vpop.permute.xlu1 %946  ;;  %v3418_v50 = vpop.xlane.xlu0 %748  ;;  %v826_v40 = vmul.f32 %v2574_v59, %v2839_v5  ;;  %2593 = vrsqrt.f32 %v773_v18  ;;  %v775_v5 = vmax.f32 %v3344_v15, 1e-24 }
 0x167   : > { %4156 = vst [vmem:[#allocation50_spill] sm:$0xff] %v3418_v50  ;;  %v2576_v46 = vpop.eup %2575  ;;  %2595 = vrsqrt.f32 %v774_v29 }
 0x168   : > { %v2578_v19 = vpop.eup %2577  ;;  %v827_v2 = vmul.f32 %v2576_v46, %v2841_v6  ;;  %v776_v6 = vmax.f32 %v3354_v33, 1e-24  ;;  %2597 = vrsqrt.f32 %v772_v32 }
 0x169   : > { %v2580_v31 = vpop.eup %2579  ;;  %v828_v39 = vmul.f32 %v2578_v19, %v2849_v11  ;;  %2599 = vrsqrt.f32 %v775_v5 }
 0x16a   : > { %v2507_v62 = vpop.permute.xlu1 %2506  ;;  %v3422_v49 = vpop.xlane.xlu0 %754  ;;  %v829_v57 = vmul.f32 %v2580_v31, %v2851_v12  ;;  %2601 = vrsqrt.f32 %v776_v6 }
 0x16b   : > { %4157 = vst [vmem:[#allocation51_spill] sm:$0xff] %v3422_v49  ;;  %v2509_v52 = vunpack.i.h.bf16 %v2507_v62  ;;  %v2508_v50 = vunpack.i.l.bf16 %v2507_v62  ;;  %v1091_v59 = vmul.f32 %v942_v54, %v828_v39 }
 0x16c   : > { %v1092_v62 = vmul.f32 %v947_v7, %v829_v57 }
 0x16d   : > { %v2582_v49 = vpop.eup %2581  ;;  %v3456_v46 = vmul.f32 %v2508_v50, %v3146_v56  ;;  %v1124_v31 = vsel %vm665_vm0, %v1091_v59, 0.0  ;;  %v777_v50 = vmax.f32 %v3386_v25, 1e-24 }
 0x16e   : > { %v3425_v45 = vpop.permute.xlu1 %966  ;;  %v3427_v60 = vpop.xlane.xlu0 %757  ;;  %v830_v11 = vmul.f32 %v2582_v49, %v2835_v3  ;;  %v1126_v32 = vsel %vm665_vm0, %v1092_v62, 0.0 }
 0x16f   : > { %4158 = vst [vmem:[#allocation52_spill] sm:$0xff] %v3427_v60  ;;  %v2584_v42 = vpop.eup %2583  ;;  %4161 = vst [vmem:[#allocation55_spill] sm:$0xff] %v3456_v46  ;;  %2603 = vrsqrt.f32 %v777_v50 }
 0x170   : > { %v831_v33 = vmul.f32 %v2584_v42, %v2837_v4  ;;  %v2586_v29 = vpop.eup %2585  ;;  %v1396_v4 = vmul.f32 %v3456_v46, %v3456_v46 }
 0x171   : > { %v2588_v7 = vpop.eup %2587  ;;  %v832_v25 = vmul.f32 %v2586_v29, %v2845_v9 }
 0x172   : > { %v3431_v22 = vpop.permute.xlu1 %2511  ;;  %v3434_v34 = vpop.xlane.xlu0 %760  ;;  %v833_v59 = vmul.f32 %v2588_v7, %v2847_v10  ;;  %v1428_v62 = vsel %vm665_vm0, %v1396_v4, 0.0 }
 0x173   : > { %4159 = vst [vmem:[#allocation53_spill] sm:$0xff] %v3434_v34  ;;  %v1089_v34 = vmul.f32 %v932_v23, %v826_v40  ;;  %v2513_v27 = vunpack.i.l.bf16 %v3431_v22  ;;  %v3451_v23 = vmul.f32 %v2509_v52, %v3148_v24  ;;  %v2514_v42 = vunpack.i.h.bf16 %v3431_v22  ;;  %v2590_v5 = vpop.eup %2589 }
 0x174   : > { %v779_v22 = vmax.f32 %v3373_v8, 1e-24  ;;  %v1096_v7 = vmul.f32 %v3425_v45, %v833_v59 }
 0x175   : > { %4160 = vst [vmem:[#allocation54_spill] sm:$0xff] %v3451_v23  ;;  %v1121_v12 = vsel %vm665_vm0, %v1089_v34, 0.0  ;;  %v3464_v3 = vmul.f32 %v2513_v27, %v3163_v61  ;;  %v1397_v34 = vmul.f32 %v3451_v23, %v3451_v23  ;;  %v3486_v9 = vmul.f32 %v2514_v42, %v3165_v0 }
 0x176   : > { %v3438_v60 = vpop.permute.xlu1 %976  ;;  %v1134_v59 = vsel %vm665_vm0, %v1096_v7, 0.0 }
 0x177   : > { %4162 = vst [vmem:[#allocation56_spill] sm:$0xff] %v3464_v3  ;;  %v1398_v27 = vmul.f32 %v3464_v3, %v3464_v3  ;;  %4163 = vst [vmem:[#allocation57_spill] sm:$0xff] %v3486_v9 }
 0x179   : > { %v1431_v50 = vsel %vm665_vm0, %v1398_v27, 0.0 }
 0x17a   : > { %v937_v63 = vpop.permute.xlu0 %936  ;;  %v3445_v35 = vpop.permute.xlu1 %2516 }
 0x17b   : > { %v1090_v47 = vmul.f32 %v937_v63, %v827_v2  ;;  %v2518_v52 = vunpack.i.l.bf16 %v3445_v35  ;;  %v778_v2 = vmax.f32 %v3363_v53, 1e-24  ;;  %v1429_v53 = vsel %vm665_vm0, %v1397_v34, 0.0 }
 0x17c   : > { %v1430_v4 = vadd.f32 %v1429_v53, %v1428_v62 }
 0x17d   : > { %v1122_v15 = vsel %vm665_vm0, %v1090_v47, 0.0  ;;  %v3489_v10 = vmul.f32 %v2518_v52, %v3182_v58  ;;  %2605 = vrsqrt.f32 %v778_v2  ;;  %v1399_v52 = vmul.f32 %v3486_v9, %v3486_v9  ;;  %v4204_v9 = vld [vmem:[#allocation35_spill] sm:$0xff] }
 0x17e   : > { %v1123_v54 = vadd.f32 %v1122_v15, %v1121_v12  ;;  %v952_v18 = vpop.permute.xlu0 %951  ;;  %v3459_v19 = vpop.permute.xlu1 %986  ;;  %2607 = vrsqrt.f32 %v779_v22 }
 0x17f   : > { %v1093_v49 = vmul.f32 %v952_v18, %v830_v11  ;;  %v2592_v12 = vpop.eup %2591  ;;  %4164 = vst [vmem:[#allocation58_spill] sm:$0xff] %v3489_v10  ;;  %v2519_v18 = vunpack.i.h.bf16 %v3445_v35  ;;  %v1433_v62 = vsel %vm665_vm0, %v1399_v52, 0.0 }
 0x180   : > { %v1125_v40 = vadd.f32 %v1124_v31, %v1123_v54  ;;  %v2594_v54 = vpop.eup %2593  ;;  %v834_v31 = vmul.f32 %v2590_v5, %v2868_v20  ;;  %v835_v35 = vmul.f32 %v2592_v12, %v2870_v21  ;;  %v1400_v20 = vmul.f32 %v3489_v10, %v3489_v10 }
 0x181   : > { %v1128_v47 = vsel %vm665_vm0, %v1093_v49, 0.0  ;;  %v2596_v49 = vpop.eup %2595  ;;  %v837_v45 = vmul.f32 %v2594_v54, %v2860_v17 }
 0x182   : > { %v1127_v39 = vadd.f32 %v1126_v32, %v1125_v40  ;;  %v957_v57 = vpop.permute.xlu0 %956  ;;  %v3475_v63 = vpop.permute.xlu1 %2521  ;;  %v780_v32 = vmax.f32 %v3377_v14, 1e-24  ;;  %v838_v21 = vmul.f32 %v2596_v49, %v2884_v28  ;;  %v1098_v27 = vmul.f32 %v3438_v60, %v835_v35 }
 0x183   : > { %v1094_v6 = vmul.f32 %v957_v57, %v831_v33  ;;  %v2523_v34 = vunpack.i.l.bf16 %v3475_v63  ;;  %v2598_v42 = vpop.eup %2597  ;;  %v3508_v57 = vmul.f32 %v2519_v18, %v3184_v26  ;;  %v2524_v22 = vunpack.i.h.bf16 %v3475_v63 }
 0x184   : > { %v1129_v11 = vadd.f32 %v1128_v47, %v1127_v39  ;;  %v1432_v39 = vadd.f32 %v1431_v50, %v1430_v4  ;;  %v2600_v17 = vpop.eup %2599  ;;  %2609 = vrsqrt.f32 %v780_v32  ;;  %v1435_v28 = vsel %vm665_vm0, %v1400_v20, 0.0 }
 0x185   : > { %v1130_v15 = vsel %vm665_vm0, %v1094_v6, 0.0  ;;  %v3514_v47 = vmul.f32 %v2523_v34, %v3201_v38  ;;  %v2602_v12 = vpop.eup %2601  ;;  %v781_v60 = vmax.f32 %v3393_v55, 1e-24  ;;  %v1138_v49 = vsel %vm665_vm0, %v1098_v27, 0.0  ;;  %v4165_v55 = vld [vmem:[#allocation10_spill] sm:$0xff] }
 0x186   : > { %v1131_v8 = vadd.f32 %v1130_v15, %v1129_v11  ;;  %v962_v33 = vpop.permute.xlu0 %961  ;;  %v3493_v29 = vpop.permute.xlu1 %996  ;;  %v836_v11 = vmul.f32 %v2598_v42, %v2858_v16  ;;  %v1434_v18 = vadd.f32 %v1433_v62, %v1432_v39  ;;  %v1100_v16 = vmul.f32 %v3459_v19, %v837_v45  ;;  %v4166_v19 = vld [vmem:[#allocation8_spill] sm:$0xff] }
 0x187   : > { %v1095_v40 = vmul.f32 %v962_v33, %v832_v25  ;;  %v1402_v7 = vmul.f32 %v3514_v47, %v3514_v47  ;;  %v839_v32 = vmul.f32 %v2600_v17, %v4165_v55  ;;  %v2604_v35 = vpop.eup %2603  ;;  %v782_v42 = vmax.f32 %v3384_v30, 1e-24 }
 0x188   : > { %v1436_v34 = vadd.f32 %v1435_v28, %v1434_v18  ;;  %v840_v45 = vmul.f32 %v2602_v12, %v4166_v19  ;;  %2611 = vrsqrt.f32 %v781_v60 }
 0x189   : > { %v1132_v2 = vsel %vm665_vm0, %v1095_v40, 0.0  ;;  %v3529_v40 = vmul.f32 %v2524_v22, %v3203_v36  ;;  %v1439_v17 = vsel %vm665_vm0, %v1402_v7, 0.0  ;;  %v1102_v30 = vmul.f32 %v3493_v29, %v839_v32  ;;  %v4168_v7 = vld [vmem:[#allocation13_spill] sm:$0xff]  ;;  %v4169_v32 = vld [vmem:[#allocation14_spill] sm:$0xff] }
 0x18a   : > { %v1133_v25 = vadd.f32 %v1132_v2, %v1131_v8  ;;  %v972_v14 = vpop.permute.xlu0 %971  ;;  %v2527_v5 = vpop.permute.xlu1 %2526  ;;  %v1401_v8 = vmul.f32 %v3508_v57, %v3508_v57  ;;  %2613 = vrsqrt.f32 %v782_v42 }
 0x18b   : > { %v1097_v6 = vmul.f32 %v972_v14, %v834_v31  ;;  %v2528_v54 = vunpack.i.l.bf16 %v2527_v5  ;;  %v2529_v39 = vunpack.i.h.bf16 %v2527_v5  ;;  %v2606_v27 = vpop.eup %2605 }
 0x18c   : > { %v1135_v53 = vadd.f32 %v1134_v59, %v1133_v25  ;;  %v1437_v2 = vsel %vm665_vm0, %v1401_v8, 0.0  ;;  %v2608_v62 = vpop.eup %2607 }
 0x18d   : > { %v1136_v15 = vsel %vm665_vm0, %v1097_v6, 0.0  ;;  %v3534_v52 = vmul.f32 %v2528_v54, %v3225_v44  ;;  %v1142_v6 = vsel %vm665_vm0, %v1100_v16, 0.0  ;;  %v4167_v54 = vld [vmem:[#allocation9_spill] sm:$0xff]  ;;  %v3549_v8 = vmul.f32 %v2529_v39, %v3227_v48 }
 0x18e   : > { %v1137_v33 = vadd.f32 %v1136_v15, %v1135_v53  ;;  %v982_v31 = vpop.permute.xlu0 %981  ;;  %v1002_v63 = vpop.permute.xlu1 %1001  ;;  %v1438_v53 = vadd.f32 %v1437_v2, %v1436_v34  ;;  %v841_v60 = vmul.f32 %v2604_v35, %v4167_v54 }
 0x18f   : > { %v1099_v50 = vmul.f32 %v982_v31, %v836_v11  ;;  %v1403_v11 = vmul.f32 %v3529_v40, %v3529_v40  ;;  %v1404_v5 = vmul.f32 %v3534_v52, %v3534_v52  ;;  %v1103_v28 = vmul.f32 %v1002_v63, %v840_v45 }
 0x190   : > { %v1139_v4 = vadd.f32 %v1138_v49, %v1137_v33  ;;  %v1440_v18 = vadd.f32 %v1439_v17, %v1438_v53  ;;  %v1146_v31 = vsel %vm665_vm0, %v1102_v30, 0.0  ;;  %v783_v63 = vmax.f32 %v3400_v37, 1e-24 }
 0x191   : > { %v1140_v20 = vsel %vm665_vm0, %v1099_v50, 0.0  ;;  %v842_v50 = vmul.f32 %v2606_v27, %v4168_v7  ;;  %v1441_v34 = vsel %vm665_vm0, %v1403_v11, 0.0  ;;  %v2610_v35 = vpop.eup %2609  ;;  %v1443_v42 = vsel %vm665_vm0, %v1404_v5, 0.0 }
 0x192   : > { %v1141_v25 = vadd.f32 %v1140_v20, %v1139_v4  ;;  %v992_v14 = vpop.permute.xlu0 %991  ;;  %v1007_v59 = vpop.permute.xlu1 %1006  ;;  %v843_v4 = vmul.f32 %v2608_v62, %v4169_v32  ;;  %v1148_v20 = vsel %vm665_vm0, %v1103_v28, 0.0  ;;  %v1442_v2 = vadd.f32 %v1441_v34, %v1440_v18  ;;  %v4170_v62 = vld [vmem:[#allocation11_spill] sm:$0xff] }
 0x193   : > { %v1101_v22 = vmul.f32 %v992_v14, %v838_v21  ;;  %v1104_v49 = vmul.f32 %v1007_v59, %v841_v60  ;;  %v1405_v39 = vmul.f32 %v3549_v8, %v3549_v8  ;;  %2615 = vrsqrt.f32 %v783_v63 }
 0x194   : > { %v1143_v12 = vadd.f32 %v1142_v6, %v1141_v25  ;;  %v1444_v30 = vadd.f32 %v1443_v42, %v1442_v2  ;;  %v844_v5 = vmul.f32 %v2610_v35, %v4170_v62  ;;  %v784_v28 = vmax.f32 %v3390_v13, 1e-24  ;;  %v4171_v35 = vld [vmem:[#allocation12_spill] sm:$0xff] }
 0x195   : > { %v1144_v15 = vsel %vm665_vm0, %v1101_v22, 0.0  ;;  %v1150_v59 = vsel %vm665_vm0, %v1104_v49, 0.0 }
 0x196   : > { %v1145_v29 = vadd.f32 %v1144_v15, %v1143_v12  ;;  %v2538_v21 = vpop.permute.xlu0 %2537  ;;  %v1017_v33 = vpop.permute.xlu1 %1016  ;;  %v1445_v15 = vsel %vm665_vm0, %v1405_v39, 0.0  ;;  %2617 = vrsqrt.f32 %v784_v28  ;;  %v4176_v28 = vld [vmem:[#allocation28_spill] sm:$0xff] }
 0x197   : > { %v2539_v16 = vunpack.i.l.bf16 %v2538_v21  ;;  %v2540_v19 = vunpack.i.h.bf16 %v2538_v21  ;;  %v1106_v6 = vmul.f32 %v1017_v33, %v843_v4  ;;  %v1446_v7 = vadd.f32 %v1445_v15, %v1444_v30 }
 0x198   : > { %v1147_v55 = vadd.f32 %v1146_v31, %v1145_v29  ;;  %v2612_v29 = vpop.eup %2611 }
 0x199   : > { %v3559_v45 = vmul.f32 %v2539_v16, %v3261_v41  ;;  %v3567_v11 = vmul.f32 %v2540_v19, %v3263_v43  ;;  %v1154_v33 = vsel %vm665_vm0, %v1106_v6, 0.0  ;;  %v785_v16 = vmax.f32 %v3407_v1, 1e-24  ;;  %v2614_v19 = vpop.eup %2613  ;;  %v4174_v6 = vld [vmem:[#allocation48_spill] sm:$0xff] }
 0x19a   : > { %v1149_v25 = vadd.f32 %v1148_v20, %v1147_v55  ;;  %v1012_v37 = vpop.permute.xlu0 %1011  ;;  %v2532_v14 = vpop.permute.xlu1 %2531  ;;  %v845_v42 = vmul.f32 %v2612_v29, %v4171_v35  ;;  %v4178_v35 = vld [vmem:[#allocation18_spill] sm:$0xff] }
 0x19b   : > { %v1406_v27 = vmul.f32 %v3559_v45, %v3559_v45  ;;  %v1105_v17 = vmul.f32 %v1012_v37, %v842_v50  ;;  %v2533_v53 = vunpack.i.l.bf16 %v2532_v14  ;;  %v1407_v13 = vmul.f32 %v3567_v11, %v3567_v11 }
 0x19c   : > { %v1151_v22 = vadd.f32 %v1150_v59, %v1149_v25  ;;  %v2534_v63 = vunpack.i.h.bf16 %v2532_v14  ;;  %2619 = vrsqrt.f32 %v785_v16  ;;  %v4172_v25 = vld [vmem:[#allocation45_spill] sm:$0xff]  ;;  %v4173_v59 = vld [vmem:[#allocation27_spill] sm:$0xff] }
 0x19d   : > { %v1152_v12 = vsel %vm665_vm0, %v1105_v17, 0.0  ;;  %v1447_v21 = vsel %vm665_vm0, %v1406_v27, 0.0  ;;  %v3576_v31 = vmul.f32 %v2533_v53, %v3273_v51  ;;  %v786_v37 = vmax.f32 %v4172_v25, 1e-24  ;;  %v4175_v53 = vld [vmem:[#allocation17_spill] sm:$0xff] }
 0x19e   : > { %v1153_v54 = vadd.f32 %v1152_v12, %v1151_v22  ;;  %v2543_v60 = vpop.permute.xlu0 %2542  ;;  %v1022_v18 = vpop.permute.xlu1 %1021  ;;  %v1448_v55 = vadd.f32 %v1447_v21, %v1446_v7  ;;  %v1449_v14 = vsel %vm665_vm0, %v1407_v13, 0.0  ;;  %v3590_v27 = vmul.f32 %v2534_v63, %v4173_v59  ;;  %v4177_v16 = vld [vmem:[#allocation49_spill] sm:$0xff] }
 0x19f   : > { %v1107_v49 = vmul.f32 %v1022_v18, %v844_v5  ;;  %v1408_v1 = vmul.f32 %v3576_v31, %v3576_v31  ;;  %v2544_v2 = vunpack.i.l.bf16 %v2543_v60  ;;  %v787_v17 = vmax.f32 %v4174_v6, 1e-24  ;;  %v4181_v6 = vld [vmem:[#allocation47_spill] sm:$0xff] }
 0x1a0   : > { %v1155_v50 = vadd.f32 %v1154_v33, %v1153_v54  ;;  %v1450_v30 = vadd.f32 %v1449_v14, %v1448_v55  ;;  %v846_v12 = vmul.f32 %v2614_v19, %v4175_v53  ;;  %v2616_v29 = vpop.eup %2615  ;;  %2621 = vrsqrt.f32 %v786_v37  ;;  %v4179_v19 = vld [vmem:[#allocation29_spill] sm:$0xff] }
 0x1a1   : > { %v1156_v34 = vsel %vm665_vm0, %v1107_v49, 0.0  ;;  %v1451_v5 = vsel %vm665_vm0, %v1408_v1, 0.0  ;;  %v3597_v15 = vmul.f32 %v2544_v2, %v4176_v28  ;;  %v1409_v21 = vmul.f32 %v3590_v27, %v3590_v27 }
 0x1a2   : > { %v1157_v32 = vadd.f32 %v1156_v34, %v1155_v50  ;;  %v3582_v4 = vpop.permute.xlu0 %2552  ;;  %v1027_v20 = vpop.permute.xlu1 %1026  ;;  %v2545_v33 = vunpack.i.h.bf16 %v2543_v60  ;;  %2623 = vrsqrt.f32 %v787_v17  ;;  %v788_v7 = vmax.f32 %v4177_v16, 1e-24  ;;  %v4180_v60 = vld [vmem:[#allocation50_spill] sm:$0xff]  ;;  %v4185_v16 = vld [vmem:[#allocation15_spill] sm:$0xff] }
 0x1a3   : > { %v1108_v39 = vmul.f32 %v1027_v20, %v845_v42  ;;  %v1452_v50 = vadd.f32 %v1451_v5, %v1450_v30  ;;  %v1410_v34 = vmul.f32 %v3597_v15, %v3597_v15  ;;  %v847_v42 = vmul.f32 %v2616_v29, %v4178_v35  ;;  %v2618_v14 = vpop.eup %2617  ;;  %v4183_v29 = vld [vmem:[#allocation32_spill] sm:$0xff] }
 0x1a4   : > { %v1453_v20 = vsel %vm665_vm0, %v1409_v21, 0.0  ;;  %v3610_v1 = vmul.f32 %v2545_v33, %v4179_v19  ;;  %2625 = vrsqrt.f32 %v788_v7  ;;  %v790_v17 = vmax.f32 %v4181_v6, 1e-24 }
 0x1a5   : > { %v1158_v22 = vsel %vm665_vm0, %v1108_v39, 0.0  ;;  %v1454_v2 = vadd.f32 %v1453_v20, %v1452_v50  ;;  %v1455_v30 = vsel %vm665_vm0, %v1410_v34, 0.0  ;;  %v848_v7 = vmul.f32 %v2618_v14, %v4185_v16  ;;  %v4190_v16 = vld [vmem:[#allocation30_spill] sm:$0xff] }
 0x1a6   : > { %v1032_v62 = vpop.permute.xlu1 %1031  ;;  %v3599_v54 = vpop.permute.xlu0 %1056  ;;  %v1159_v49 = vadd.f32 %v1158_v22, %v1157_v32  ;;  %v789_v32 = vmax.f32 %v4180_v60, 1e-24  ;;  %v4188_v60 = vld [vmem:[#allocation16_spill] sm:$0xff] }
 0x1a7   : > { %v1109_v18 = vmul.f32 %v1032_v62, %v846_v12  ;;  %v4182_v12 = vld [vmem:[#allocation51_spill] sm:$0xff]  ;;  %v1456_v33 = vadd.f32 %v1455_v30, %v1454_v2  ;;  %v4189_v2 = vld [vmem:[#allocation52_spill] sm:$0xff] }
 0x1a8   : > { %v791_v62 = vmax.f32 %v4182_v12, 1e-24  ;;  %2627 = vrsqrt.f32 %v789_v32 }
 0x1a9   : > { %v1160_v13 = vsel %vm665_vm0, %v1109_v18, 0.0  ;;  %v2620_v5 = vpop.eup %2619  ;;  %v1411_v18 = vmul.f32 %v3610_v1, %v3610_v1  ;;  %2629 = vrsqrt.f32 %v790_v17 }
 0x1aa   : > { %v1037_v63 = vpop.permute.xlu1 %1036  ;;  %v1161_v55 = vadd.f32 %v1160_v13, %v1159_v49  ;;  %v3613_v39 = vpop.permute.xlu0 %1061  ;;  %v2554_v13 = vunpack.i.l.bf16 %v3582_v4  ;;  %2631 = vrsqrt.f32 %v791_v62  ;;  %v849_v32 = vmul.f32 %v2620_v5, %v4188_v60  ;;  %v4194_v60 = vld [vmem:[#allocation20_spill] sm:$0xff] }
 0x1ab   : > { %v1110_v25 = vmul.f32 %v1037_v63, %v847_v42  ;;  %v4186_v63 = vld [vmem:[#allocation33_spill] sm:$0xff] }
 0x1ac   : > { %v3640_v46 = vmul.f32 %v2554_v13, %v4190_v16  ;;  %v4195_v13 = vld [vmem:[#allocation31_spill] sm:$0xff] }
 0x1ad   : > { %v1162_v49 = vsel %vm665_vm0, %v1110_v25, 0.0  ;;  %v792_v25 = vmax.f32 %v4189_v2, 1e-24  ;;  %v2622_v17 = vpop.eup %2621 }
 0x1ae   : > { %v2548_v37 = vpop.permute.xlu1 %2547  ;;  %v3631_v42 = vpop.permute.xlu0 %2562  ;;  %v1163_v14 = vadd.f32 %v1162_v49, %v1161_v55  ;;  %4191 = vst [vmem:[#allocation9_spill] sm:$0xff] %v3640_v46  ;;  %v4192_v55 = vld [vmem:[#allocation53_spill] sm:$0xff] }
 0x1af   : > { %v2550_v22 = vunpack.i.h.bf16 %v2548_v37  ;;  %v2549_v53 = vunpack.i.l.bf16 %v2548_v37  ;;  %v1457_v37 = vsel %vm665_vm0, %v1411_v18, 0.0  ;;  %v2624_v62 = vpop.eup %2623  ;;  %2633 = vrsqrt.f32 %v792_v25 }
 0x1b0   : > { %v1458_v30 = vadd.f32 %v1457_v37, %v1456_v33  ;;  %v793_v49 = vmax.f32 %v4192_v55, 1e-24 }
 0x1b1   : > { %v3621_v21 = vmul.f32 %v2549_v53, %v4183_v29  ;;  %v3627_v34 = vmul.f32 %v2550_v22, %v4186_v63  ;;  %v2555_v22 = vunpack.i.h.bf16 %v3582_v4 }
 0x1b2   : > { %v1042_v50 = vpop.permute.xlu1 %1041  ;;  %v1077_v2 = vpop.permute.xlu0 %1076  ;;  %2635 = vrsqrt.f32 %v793_v49  ;;  %v1807_v49 = vsel %vm1806_vm2, %v3146_v56, 0.0  ;;  %v4202_v56 = vld [vmem:[#allocation22_spill] sm:$0xff] }
 0x1b3   : > { %4184 = vst [vmem:[#allocation10_spill] sm:$0xff] %v3621_v21  ;;  %4187 = vst [vmem:[#allocation8_spill] sm:$0xff] %v3627_v34  ;;  %v1412_v35 = vmul.f32 %v3621_v21, %v3621_v21  ;;  %v1111_v20 = vmul.f32 %v1042_v50, %v848_v7  ;;  %v1413_v5 = vmul.f32 %v3627_v34, %v3627_v34  ;;  %v2626_v21 = vpop.eup %2625 }
 0x1b4   : > { %v3649_v23 = vmul.f32 %v2555_v22, %v4195_v13 }
 0x1b5   : > { %v1459_v6 = vsel %vm665_vm0, %v1412_v35, 0.0  ;;  %v1164_v53 = vsel %vm665_vm0, %v1111_v20, 0.0  ;;  %v4193_v35 = vld [vmem:[#allocation19_spill] sm:$0xff]  ;;  %v851_v20 = vmul.f32 %v2624_v62, %v4194_v60 }
 0x1b6   : > { %v1047_v12 = vpop.permute.xlu1 %1046  ;;  %v1165_v7 = vadd.f32 %v1164_v53, %v1163_v14  ;;  %v1460_v18 = vadd.f32 %v1459_v6, %v1458_v30  ;;  %v850_v4 = vmul.f32 %v2622_v17, %v4193_v35  ;;  %4196 = vst [vmem:[#allocation13_spill] sm:$0xff] %v3649_v23  ;;  %v1414_v14 = vmul.f32 %v3640_v46, %v3640_v46  ;;  %v2628_v35 = vpop.eup %2627 }
 0x1b7   : > { %v1112_v50 = vmul.f32 %v1047_v12, %v849_v32  ;;  %v1461_v32 = vsel %vm665_vm0, %v1413_v5, 0.0  ;;  %v1114_v6 = vmul.f32 %v3599_v54, %v851_v20  ;;  %v4197_v12 = vld [vmem:[#allocation21_spill] sm:$0xff]  ;;  %v1415_v60 = vmul.f32 %v3649_v23, %v3649_v23  ;;  %v1082_v20 = vpop.permute.xlu0 %1081 }
 0x1b8   : > { %v1462_v30 = vadd.f32 %v1461_v32, %v1460_v18  ;;  %v852_v62 = vmul.f32 %v2626_v21, %v4197_v12  ;;  %v1463_v5 = vsel %vm665_vm0, %v1414_v14, 0.0  ;;  %v2630_v18 = vpop.eup %2629  ;;  %v853_v3 = vmul.f32 %v2628_v35, %v4202_v56  ;;  %v4205_v35 = vld [vmem:[#allocation24_spill] sm:$0xff] }
 0x1b9   : > { %v1166_v33 = vsel %vm665_vm0, %v1112_v50, 0.0  ;;  %v2564_v50 = vunpack.i.l.bf16 %v3631_v42  ;;  %v1170_v21 = vsel %vm665_vm0, %v1114_v6, 0.0 }
 0x1ba   : > { %v1052_v37 = vpop.permute.xlu1 %1051  ;;  %v1167_v53 = vadd.f32 %v1166_v33, %v1165_v7  ;;  %v1808_v7 = vsel %vm1806_vm2, %v3148_v24, 0.0  ;;  %v1464_v33 = vadd.f32 %v1463_v5, %v1462_v30  ;;  %v1115_v32 = vmul.f32 %v3613_v39, %v852_v62 }
 0x1bb   : > { %v1113_v25 = vmul.f32 %v1052_v37, %v850_v4  ;;  %v2632_v37 = vpop.eup %2631  ;;  %v1465_v30 = vsel %vm665_vm0, %v1415_v60, 0.0  ;;  %v1809_v62 = vadd.f32 %v1808_v7, %v1807_v49  ;;  %v1337_v10 = vpop.permute.xlu0 %1336 }
 0x1bc   : > { %v1466_v5 = vadd.f32 %v1465_v30, %v1464_v33  ;;  %v2634_v56 = vpop.eup %2633  ;;  %v1812_v30 = vsel %vm1806_vm2, %v3165_v0, 0.0 }
 0x1bd   : > { %v1168_v17 = vsel %vm665_vm0, %v1113_v25, 0.0  ;;  %v2565_v25 = vunpack.i.h.bf16 %v3631_v42 }
 0x1be   : > { %v1169_v22 = vadd.f32 %v1168_v17, %v1167_v53  ;;  %v2558_v55 = vpop.permute.xlu1 %2557  ;;  %v4198_v53 = vld [vmem:[#allocation37_spill] sm:$0xff]  ;;  %v4199_v17 = vld [vmem:[#allocation36_spill] sm:$0xff] }
 0x1bf   : > { %v2560_v4 = vunpack.i.h.bf16 %v2558_v55  ;;  %v2559_v54 = vunpack.i.l.bf16 %v2558_v55  ;;  %v4201_v55 = vld [vmem:[#allocation34_spill] sm:$0xff] }
 0x1c0   : > { %v3675_v24 = vmul.f32 %v2564_v50, %v4201_v55  ;;  %v1171_v34 = vadd.f32 %v1170_v21, %v1169_v22  ;;  %v1172_v50 = vsel %vm665_vm0, %v1115_v32, 0.0  ;;  %v3686_v22 = vmul.f32 %v2565_v25, %v4204_v9 }
 0x1c1   : > { %v3669_v14 = vmul.f32 %v2560_v4, %v4198_v53  ;;  %v3672_v12 = vmul.f32 %v2559_v54, %v4199_v17  ;;  %v4203_v54 = vld [vmem:[#allocation23_spill] sm:$0xff]  ;;  %v855_v21 = vmul.f32 %v2632_v37, %v4205_v35 }
 0x1c2   : > { %v1067_v6 = vpop.permute.xlu1 %1066  ;;  %v854_v46 = vmul.f32 %v2630_v18, %v4203_v54  ;;  %v1418_v23 = vmul.f32 %v3675_v24, %v3675_v24  ;;  %v1173_v7 = vadd.f32 %v1172_v50, %v1171_v34  ;;  %v1810_v18 = vsel %vm1806_vm2, %v3163_v61, 0.0  ;;  %v2636_v34 = vpop.eup %2635 }
 0x1c3   : > { %4200 = vst [vmem:[#allocation14_spill] sm:$0xff] %v3672_v12  ;;  %v1417_v39 = vmul.f32 %v3669_v14, %v3669_v14  ;;  %v1416_v42 = vmul.f32 %v3672_v12, %v3672_v12  ;;  %v1116_v4 = vmul.f32 %v1067_v6, %v853_v3  ;;  %v1118_v33 = vmul.f32 %v1077_v2, %v855_v21 }
 0x1c4   : > { %v1811_v50 = vadd.f32 %v1810_v18, %v1809_v62  ;;  %v1471_v61 = vsel %vm665_vm0, %v1418_v23, 0.0  ;;  %v4209_v18 = vld [vmem:[#allocation41_spill] sm:$0xff]  ;;  %v4210_v23 = vld [vmem:[#allocation26_spill] sm:$0xff] }
 0x1c5   : > { %v1467_v60 = vsel %vm665_vm0, %v1416_v42, 0.0  ;;  %v1174_v3 = vsel %vm665_vm0, %v1116_v4, 0.0  ;;  %v1469_v32 = vsel %vm665_vm0, %v1417_v39, 0.0  ;;  %v4206_v42 = vld [vmem:[#allocation25_spill] sm:$0xff]  ;;  %v1419_v4 = vmul.f32 %v3686_v22, %v3686_v22 }
 0x1c6   : > { %v1468_v12 = vadd.f32 %v1467_v60, %v1466_v5  ;;  %v1072_v49 = vpop.permute.xlu1 %1071  ;;  %v1175_v6 = vadd.f32 %v1174_v3, %v1173_v7  ;;  %v856_v54 = vmul.f32 %v2634_v56, %v4206_v42  ;;  %v1347_v60 = vpop.permute.xlu0 %1346  ;;  %v4207_v56 = vld [vmem:[#allocation38_spill] sm:$0xff] }
 0x1c7   : > { %v1117_v25 = vmul.f32 %v1072_v49, %v854_v46  ;;  %v1178_v46 = vsel %vm665_vm0, %v1118_v33, 0.0  ;;  %v3705_v3 = vmul.f32 %v4207_v56, %v1337_v10  ;;  %v4208_v49 = vld [vmem:[#allocation42_spill] sm:$0xff]  ;;  %v1473_v33 = vsel %vm665_vm0, %v1419_v4, 0.0 }
 0x1c8   : > { %v1470_v37 = vadd.f32 %v1469_v32, %v1468_v12  ;;  %v1119_v12 = vmul.f32 %v1082_v20, %v856_v54  ;;  %v1814_v20 = vsel %vm1806_vm2, %v3182_v58, 0.0 }
 0x1c9   : > { %v1176_v5 = vsel %vm665_vm0, %v1117_v25, 0.0  ;;  %v857_v25 = vmul.f32 %v2636_v34, %v4210_v23  ;;  %v4211_v34 = vld [vmem:[#allocation39_spill] sm:$0xff]  ;;  %v1816_v23 = vsel %vm1806_vm2, %v3184_v26, 0.0 }
 0x1ca   : > { %v1177_v2 = vadd.f32 %v1176_v5, %v1175_v6  ;;  %v2568_v35 = vpop.permute.xlu1 %2567  ;;  %v1472_v0 = vadd.f32 %v1471_v61, %v1470_v37  ;;  %v1813_v6 = vadd.f32 %v1812_v30, %v1811_v50  ;;  %v1180_v37 = vsel %vm665_vm0, %v1119_v12, 0.0 }
 0x1cb   : > { %v2570_v39 = vunpack.i.h.bf16 %v2568_v35  ;;  %v2569_v21 = vunpack.i.l.bf16 %v2568_v35  ;;  %v1422_v30 = vmul.f32 %v3705_v3, %v3705_v3  ;;  %v3725_v50 = vmul.f32 %v4211_v34, %v1347_v60 }
 0x1cc   : > { %v1179_v7 = vadd.f32 %v1178_v46, %v1177_v2  ;;  %v1474_v61 = vadd.f32 %v1473_v33, %v1472_v0  ;;  %v1815_v35 = vadd.f32 %v1814_v20, %v1813_v6  ;;  %v1357_v46 = vpop.permute.xlu0 %1356  ;;  %v4213_v6 = vld [vmem:[#allocation40_spill] sm:$0xff] }
 0x1cd   : > { %v3708_v62 = vmul.f32 %v2570_v39, %v4208_v49  ;;  %v3711_v32 = vmul.f32 %v2569_v21, %v4209_v18  ;;  %v3739_v20 = vmul.f32 %v4213_v6, %v1357_v46 }
 0x1ce   : > { %v1087_v42 = vpop.permute.xlu1 %1086  ;;  %v1181_v2 = vadd.f32 %v1180_v37, %v1179_v7  ;;  %v4212_v7 = vld [vmem:[#allocation43_spill] sm:$0xff]  ;;  %v1424_v37 = vmul.f32 %v3725_v50, %v3725_v50 }
 0x1cf   : > { %v1421_v10 = vmul.f32 %v3708_v62, %v3708_v62  ;;  %v1420_v54 = vmul.f32 %v3711_v32, %v3711_v32  ;;  %v1120_v5 = vmul.f32 %v1087_v42, %v857_v25  ;;  %v1479_v42 = vsel %vm665_vm0, %v1422_v30, 0.0 }
 0x1d0   : > { %v1483_v46 = vsel %vm665_vm0, %v1424_v37, 0.0 }
 0x1d1   : > { %v1475_v58 = vsel %vm665_vm0, %v1420_v54, 0.0  ;;  %v1182_v4 = vsel %vm665_vm0, %v1120_v5, 0.0  ;;  %v1477_v0 = vsel %vm665_vm0, %v1421_v10, 0.0  ;;  %v1817_v5 = vadd.f32 %v1816_v23, %v1815_v35 }
 0x1d2   : > { %v1476_v12 = vadd.f32 %v1475_v58, %v1474_v61  ;;  %v1183_v39 = vadd.f32 %v1182_v4, %v1181_v2  ;;  %v1342_v21 = vpop.permute.xlu1 %1341  ;;  %v1818_v2 = vsel %vm1806_vm2, %v3201_v38, 0.0  ;;  %v4214_v4 = vld [vmem:[#allocation44_spill] sm:$0xff]  ;;  %v1820_v38 = vsel %vm1806_vm2, %v3203_v36, 0.0  ;;  %v1194_v36 = vpop.permute.xlu0 %1193 }
 0x1d3   : > { %v3733_v25 = vmul.f32 %v4212_v7, %v1342_v21 }
 0x1d4   : > { %v1478_v33 = vadd.f32 %v1477_v0, %v1476_v12  ;;  %v1184_v60 = vrot.slane %v1183_v39, 4  ;;  %v1426_v0 = vmul.f32 %v3739_v20, %v3739_v20 }
 0x1d5   : > { %v1423_v54 = vmul.f32 %v3733_v25, %v3733_v25 }
 0x1d6   : > { %v1185_v26 = vadd.f32 %v1184_v60, %v1183_v39  ;;  %v1480_v61 = vadd.f32 %v1479_v42, %v1478_v33  ;;  %v1352_v10 = vpop.permute.xlu1 %1351  ;;  %v1819_v39 = vadd.f32 %v1818_v2, %v1817_v5  ;;  %v1822_v2 = vsel %vm1806_vm2, %v3225_v44, 0.0 }
 0x1d7   : > { %v1481_v58 = vsel %vm665_vm0, %v1423_v54, 0.0  ;;  %v3747_v30 = vmul.f32 %v4214_v4, %v1352_v10  ;;  %v4215_v54 = vld [vmem:[#allocation46_spill] sm:$0xff] }
 0x1d8   : > { %v1186_v12 = vrot.slane %v1185_v26, 2  ;;  %v1482_v21 = vadd.f32 %v1481_v58, %v1480_v61  ;;  %v1487_v58 = vsel %vm665_vm0, %v1426_v0, 0.0  ;;  %v1821_v4 = vadd.f32 %v1820_v38, %v1819_v39 }
 0x1d9   : > { %v1425_v35 = vmul.f32 %v3747_v30, %v3747_v30  ;;  %v1824_v39 = vsel %vm1806_vm2, %v3227_v48, 0.0 }
 0x1da   : > { %v1187_v23 = vadd.f32 %v1186_v12, %v1185_v26  ;;  %v1484_v33 = vadd.f32 %v1483_v46, %v1482_v21  ;;  %v1362_v60 = vpop.permute.xlu1 %1361 }
 0x1db   : > { %v1485_v42 = vsel %vm665_vm0, %v1425_v35, 0.0  ;;  %v3758_v10 = vmul.f32 %v4215_v54, %v1362_v60  ;;  %v1823_v35 = vadd.f32 %v1822_v2, %v1821_v4 }
 0x1dc   : > { %v1188_v61 = vrot.slane %v1187_v23, 1  ;;  %v1486_v37 = vadd.f32 %v1485_v42, %v1484_v33  ;;  %v2234_v42 = vld [vmem:[%s3779_s16] sm:$0xff]  }
 0x1dd   : > { %v1427_v6 = vmul.f32 %v3758_v10, %v3758_v10  ;;  %v1825_v38 = vadd.f32 %v1824_v39, %v1823_v35  ;;  %v2235_v48 = vunpack.c.l.bf16 %v2234_v42  ;;  %v2328_v39 = vld [vmem:[%s3779_s16 + $0x10] sm:$0xff]  }
 0x1de   : > { %v1488_v5 = vadd.f32 %v1487_v58, %v1486_v37  ;;  %v1189_v26 = vadd.f32 %v1188_v61, %v1187_v23  ;;  %v2236_v61 = vunpack.c.h.bf16 %v2234_v42  ;;  %v2244_v42 = vunpack.c.h.bf16 %v2328_v39 }
 0x1df   : > { %v1489_v12 = vsel %vm665_vm0, %v1427_v6, 0.0  ;;  %v1826_v6 = vsel %vm1806_vm2, %v3261_v41, 0.0  ;;  %v1726_v41 = vsel %vm665_vm0, %v2235_v48, 0.0 }
 0x1e0   : > { %v1490_v21 = vadd.f32 %v1489_v12, %v1488_v5  ;;  %v3766_v46 = vmul.f32 %v1194_v36, %v1189_v26  ;;  %v1827_v37 = vadd.f32 %v1826_v6, %v1825_v38  ;;  %v2327_v5 = vld [vmem:[%s3779_s16 + $0x8] sm:$0xff]   ;;  %v1828_v26 = vsel %vm1806_vm2, %v3263_v43, 0.0 }
 0x1e1   : > { %v2239_v2 = vunpack.c.l.bf16 %v2327_v5  ;;  %v1727_v36 = vsel %vm665_vm0, %v2236_v61, 0.0  ;;  %v2240_v35 = vunpack.c.h.bf16 %v2327_v5  ;;  %v2243_v38 = vunpack.c.l.bf16 %v2328_v39 }
 0x1e2   : > { %v1491_v33 = vrot.slane %v1490_v21, 4  ;;  %v1197_v0 = vmul.f32 %v3766_v46, %v3766_v46  ;;  %v1728_v12 = vadd.f32 %v1727_v36, %v1726_v41 }
 0x1e3   : > { %v1731_v43 = vsel %vm665_vm0, %v2240_v35, 0.0  ;;  %v1733_v48 = vsel %vm665_vm0, %v2243_v38, 0.0 }
 0x1e4   : > { %v1492_v60 = vadd.f32 %v1491_v33, %v1490_v21  ;;  %v1198_v23 = vsel %vm665_vm0, %v1197_v0, 0.0  ;;  %v1729_v33 = vsel %vm665_vm0, %v2239_v2, 0.0  ;;  %v1829_v0 = vadd.f32 %v1828_v26, %v1827_v37 }
 0x1e5   : > { %1199 = vadd.xlane.f32.xlu1 %v1198_v23  ;;  %v1830_v23 = vsel %vm1806_vm2, %v3273_v51, 0.0  ;;  %v1735_v26 = vsel %vm665_vm0, %v2244_v42, 0.0  ;;  %v1834_v2 = vsel %vm1806_vm2, %v4176_v28, 0.0 }
 0x1e6   : > { %v1493_v44 = vrot.slane %v1492_v60, 2  ;;  %v1831_v61 = vadd.f32 %v1830_v23, %v1829_v0  ;;  %v1838_v23 = vsel %vm1806_vm2, %v4183_v29, 0.0 }
 0x1e8   : > { %v1494_v4 = vadd.f32 %v1493_v44, %v1492_v60  ;;  %v1730_v60 = vadd.f32 %v1729_v33, %v1728_v12  ;;  %v1836_v33 = vsel %vm1806_vm2, %v4179_v19, 0.0  ;;  %v1840_v19 = vsel %vm1806_vm2, %v4186_v63, 0.0 }
 0x1ea   : > { %v1495_v58 = vrot.slane %v1494_v4, 1  ;;  %v1732_v44 = vadd.f32 %v1731_v43, %v1730_v60 }
 0x1ec   : > { %v1496_v21 = vadd.f32 %v1495_v58, %v1494_v4  ;;  %v2329_v4 = vld [vmem:[%s3779_s16 + $0x18] sm:$0xff]   ;;  %v1832_v58 = vsel %vm1806_vm2, %v4173_v59, 0.0  ;;  %v1734_v37 = vadd.f32 %v1733_v48, %v1732_v44  ;;  %v2331_v44 = vld [vmem:[%s3779_s16 + $0x28] sm:$0xff]  }
 0x1ed   : > { %v2247_v5 = vunpack.c.l.bf16 %v2329_v4  ;;  %v1833_v51 = vadd.f32 %v1832_v58, %v1831_v61  ;;  %v2248_v36 = vunpack.c.h.bf16 %v2329_v4  ;;  %v2255_v61 = vunpack.c.l.bf16 %v2331_v44 }
 0x1ee   : > { %v1497_v6 = vmax.f32 %v1496_v21, 1e-24  ;;  %v1736_v41 = vadd.f32 %v1735_v26, %v1734_v37  ;;  %v2330_v21 = vld [vmem:[%s3779_s16 + $0x20] sm:$0xff]   ;;  %v2332_v37 = vld [vmem:[%s3779_s16 + $0x30] sm:$0xff]   ;;  %v1842_v26 = vsel %vm1806_vm2, %v4190_v16, 0.0  ;;  %v2256_v63 = vunpack.c.h.bf16 %v2331_v44 }
 0x1ef   : > { %v1737_v12 = vsel %vm665_vm0, %v2247_v5, 0.0  ;;  %v1835_v35 = vadd.f32 %v1834_v2, %v1833_v51  ;;  %v2251_v0 = vunpack.c.l.bf16 %v2330_v21  ;;  %v1739_v39 = vsel %vm665_vm0, %v2248_v36, 0.0 }
 0x1f0   : > { %2637 = vrsqrt.f32 %v1497_v6  ;;  %v1738_v59 = vadd.f32 %v1737_v12, %v1736_v41  ;;  %v2252_v28 = vunpack.c.h.bf16 %v2330_v21  ;;  %v2259_v41 = vunpack.c.l.bf16 %v2332_v37 }
 0x1f1   : > { %v1837_v60 = vadd.f32 %v1836_v33, %v1835_v35  ;;  %v1741_v43 = vsel %vm665_vm0, %v2251_v0, 0.0  ;;  %v2260_v12 = vunpack.c.h.bf16 %v2332_v37  ;;  %v1747_v33 = vsel %vm665_vm0, %v2256_v63, 0.0 }
 0x1f2   : > { %v1740_v38 = vadd.f32 %v1739_v39, %v1738_v59  ;;  %v1743_v4 = vsel %vm665_vm0, %v2252_v28, 0.0  ;;  %v1749_v0 = vsel %vm665_vm0, %v2259_v41, 0.0  ;;  %v2334_v39 = vld [vmem:[%s3779_s16 + $0x40] sm:$0xff]  }
 0x1f3   : > { %v1839_v42 = vadd.f32 %v1838_v23, %v1837_v60  ;;  %v2267_v44 = vunpack.c.l.bf16 %v2334_v39 }
 0x1f4   : > { %v1742_v48 = vadd.f32 %v1741_v43, %v1740_v38  ;;  %v1846_v38 = vsel %vm1806_vm2, %v4199_v17, 0.0 }
 0x1f5   : > { %v1841_v5 = vadd.f32 %v1840_v19, %v1839_v42  ;;  %v2335_v19 = vld [vmem:[%s3779_s16 + $0x48] sm:$0xff]  }
 0x1f6   : > { %v1744_v2 = vadd.f32 %v1743_v4, %v1742_v48  ;;  %v2268_v4 = vunpack.c.h.bf16 %v2334_v39  ;;  %v2271_v37 = vunpack.c.l.bf16 %v2335_v19  ;;  %v2338_v39 = vld [vmem:[%s3779_s16 + $0x60] sm:$0xff]  }
 0x1f7   : > { %v1843_v36 = vadd.f32 %v1842_v26, %v1841_v5  ;;  %v1757_v5 = vsel %vm665_vm0, %v2267_v44, 0.0  ;;  %v2336_v26 = vld [vmem:[%s3779_s16 + $0x50] sm:$0xff]  }
 0x1fd   : > { %v3808_v6 = vpop.eup %2637 }
 0x1fe   : > { %v1530_v58 = vmul.f32 %v3808_v6, %v3758_v10  ;;  %v1514_v29 = vmul.f32 %v3808_v6, %v3610_v1  ;;  %v1529_v51 = vmul.f32 %v3808_v6, %v3739_v20  ;;  %v1745_v10 = vsel %vm665_vm0, %v2255_v61, 0.0  ;;  %v2333_v1 = vld [vmem:[%s3779_s16 + $0x38] sm:$0xff]  }
 0x1ff   : > { %v1513_v16 = vmul.f32 %v3808_v6, %v3597_v15  ;;  %v1844_v20 = vsel %vm1806_vm2, %v4195_v13, 0.0  ;;  %v1528_v21 = vmul.f32 %v3808_v6, %v3747_v30  ;;  %v1746_v35 = vadd.f32 %v1745_v10, %v1744_v2 }
 0x200   : > { %2342 = vmatprep.subr.msk.mxu0 %vm665_vm0, %v1530_v58  ;;  %v2263_v59 = vunpack.c.l.bf16 %v2333_v1  ;;  %v1845_v60 = vadd.f32 %v1844_v20, %v1843_v36  ;;  %v1512_v13 = vmul.f32 %v3808_v6, %v3590_v27  ;;  %v2264_v23 = vunpack.c.h.bf16 %v2333_v1 }
 0x201   : > { %2343 = vmatpush3.xpose.msk.msra.mxu0 %vm665_vm0, %v1514_v29  ;;  %v1748_v15 = vadd.f32 %v1747_v33, %v1746_v35  ;;  %v1751_v30 = vsel %vm665_vm0, %v2260_v12, 0.0  ;;  %v1527_v28 = vmul.f32 %v3808_v6, %v3725_v50  ;;  %v1511_v61 = vmul.f32 %v3808_v6, %v3576_v31 }
 0x202   : > { %2344 = vmatprep.subr.msk.mxu0 %vm665_vm0, %v1529_v51  ;;  %v1753_v42 = vsel %vm665_vm0, %v2263_v59, 0.0  ;;  %v1847_v48 = vadd.f32 %v1846_v38, %v1845_v60  ;;  %v1755_v17 = vsel %vm665_vm0, %v2264_v23, 0.0  ;;  %v1848_v50 = vsel %vm1806_vm2, %v4198_v53, 0.0 }
 0x203   : > { %v1750_v43 = vadd.f32 %v1749_v0, %v1748_v15  ;;  %v1526_v58 = vmul.f32 %v3808_v6, %v3733_v25  ;;  %v1510_v63 = vmul.f32 %v3808_v6, %v3567_v11  ;;  %v2272_v2 = vunpack.c.h.bf16 %v2335_v19 }
 0x204   : > { %v1849_v51 = vadd.f32 %v1848_v50, %v1847_v48  ;;  %v1759_v53 = vsel %vm665_vm0, %v2268_v4, 0.0  ;;  %v1850_v25 = vsel %vm1806_vm2, %v4201_v55, 0.0  ;;  %v1525_v41 = vmul.f32 %v3808_v6, %v3705_v3 }
 0x205   : > { %2345 = vmatpush3.xpose.msk.msra.mxu0 %vm665_vm0, %v1513_v16  ;;  %v1752_v27 = vadd.f32 %v1751_v30, %v1750_v43  ;;  %v2275_v1 = vunpack.c.l.bf16 %v2336_v26  ;;  %v1761_v36 = vsel %vm665_vm0, %v2271_v37, 0.0  ;;  %v2337_v16 = vld [vmem:[%s3779_s16 + $0x58] sm:$0xff]   ;;  %v1509_v20 = vmul.f32 %v3808_v6, %v3559_v45  ;;  %v2339_v43 = vld [vmem:[%s3779_s16 + $0x68] sm:$0xff]  }
 0x206   : > { %2346 = vmatprep.subr.msk.mxu0 %vm665_vm0, %v1528_v21  ;;  %v1851_v12 = vadd.f32 %v1850_v25, %v1849_v51  ;;  %v2276_v21 = vunpack.c.h.bf16 %v2336_v26  ;;  %v1763_v55 = vsel %vm665_vm0, %v2272_v2, 0.0  ;;  %v1852_v3 = vsel %vm1806_vm2, %v4204_v9, 0.0  ;;  %v2341_v51 = vld [vmem:[%s3779_s16 + $0x78] sm:$0xff]  }
 0x207   : > { %v1754_v29 = vadd.f32 %v1753_v42, %v1752_v27  ;;  %v1524_v35 = vmul.f32 %v3808_v6, %v3708_v62  ;;  %v2279_v59 = vunpack.c.l.bf16 %v2337_v16  ;;  %v1765_v0 = vsel %vm665_vm0, %v2275_v1, 0.0 }
 0x208   : > { %v1853_v15 = vadd.f32 %v1852_v3, %v1851_v12  ;;  %v1508_v60 = vmul.f32 %v3808_v6, %v3549_v8  ;;  %v1767_v9 = vsel %vm665_vm0, %v2276_v21, 0.0  ;;  %v1854_v62 = vsel %vm1806_vm2, %v4209_v18, 0.0 }
 0x209   : > { %2347 = vmatpush3.xpose.msk.msra.mxu0 %vm665_vm0, %v1512_v13  ;;  %v1756_v31 = vadd.f32 %v1755_v17, %v1754_v29  ;;  %v2280_v13 = vunpack.c.h.bf16 %v2337_v16  ;;  %v1523_v23 = vmul.f32 %v3808_v6, %v3711_v32  ;;  %v2283_v38 = vunpack.c.l.bf16 %v2338_v39  ;;  %v2340_v17 = vld [vmem:[%s3779_s16 + $0x70] sm:$0xff]  }
 0x20a   : > { %2348 = vmatprep.subr.msk.mxu0 %vm665_vm0, %v1527_v28  ;;  %v1769_v28 = vsel %vm665_vm0, %v2279_v59, 0.0  ;;  %v1855_v44 = vadd.f32 %v1854_v62, %v1853_v15  ;;  %v1507_v42 = vmul.f32 %v3808_v6, %v3534_v52  ;;  %v2284_v19 = vunpack.c.h.bf16 %v2338_v39  ;;  %v4219_v39 = vld [vmem:[#allocation13_spill] sm:$0xff] }
 0x20b   : > { %v1758_v10 = vadd.f32 %v1757_v5, %v1756_v31  ;;  %v1771_v18 = vsel %vm665_vm0, %v2280_v13, 0.0  ;;  %v1856_v32 = vsel %vm1806_vm2, %v4208_v49, 0.0  ;;  %v1522_v27 = vmul.f32 %v3808_v6, %v3686_v22 }
 0x20c   : > { %v1773_v4 = vsel %vm665_vm0, %v2283_v38, 0.0  ;;  %v1857_v50 = vadd.f32 %v1856_v32, %v1855_v44  ;;  %v2288_v29 = vunpack.c.h.bf16 %v2339_v43  ;;  %v1775_v49 = vsel %vm665_vm0, %v2284_v19, 0.0  ;;  %v4222_v38 = vld [vmem:[#allocation9_spill] sm:$0xff]  ;;  %v4224_v32 = vld [vmem:[#allocation8_spill] sm:$0xff] }
 0x20d   : > { %2349 = vmatpush3.xpose.msk.msra.mxu0 %vm665_vm0, %v1511_v61  ;;  %v1760_v11 = vadd.f32 %v1759_v53, %v1758_v10  ;;  %v2287_v61 = vunpack.c.l.bf16 %v2339_v43  ;;  %v1858_v22 = vsel %vm1806_vm2, %v4207_v56, 0.0  ;;  %v1521_v37 = vmul.f32 %v3808_v6, %v3675_v24 }
 0x20e   : > { %2350 = vmatprep.subr.msk.mxu0 %vm665_vm0, %v1526_v58  ;;  %v1506_v58 = vmul.f32 %v3808_v6, %v3529_v40  ;;  %v2291_v26 = vunpack.c.l.bf16 %v2340_v17  ;;  %v1859_v40 = vadd.f32 %v1858_v22, %v1857_v50  ;;  %v1505_v2 = vmul.f32 %v3808_v6, %v3514_v47  ;;  %v4226_v50 = vld [vmem:[#allocation10_spill] sm:$0xff] }
 0x20f   : > { %v1762_v33 = vadd.f32 %v1761_v36, %v1760_v11  ;;  %v1777_v31 = vsel %vm665_vm0, %v2287_v61, 0.0  ;;  %v2292_v53 = vunpack.c.h.bf16 %v2340_v17  ;;  %v1779_v56 = vsel %vm665_vm0, %v2288_v29, 0.0 }
 0x210   : > { %v1860_v24 = vsel %vm1806_vm2, %v4212_v7, 0.0  ;;  %v1520_v25 = vmul.f32 %v3808_v6, %v3669_v14  ;;  %v2295_v10 = vunpack.c.l.bf16 %v2341_v51  ;;  %v1781_v1 = vsel %vm665_vm0, %v2291_v26, 0.0  ;;  %v4216_v14 = vld [vmem:[#allocation14_spill] sm:$0xff] }
 0x211   : > { %2351 = vmatpush3.xpose.msk.msra.mxu0 %vm665_vm0, %v1510_v63  ;;  %v1764_v45 = vadd.f32 %v1763_v55, %v1762_v33  ;;  %v1861_v16 = vadd.f32 %v1860_v24, %v1859_v40  ;;  %v1504_v47 = vmul.f32 %v3808_v6, %v3508_v57  ;;  %v2296_v11 = vunpack.c.h.bf16 %v2341_v51  ;;  %v4217_v33 = vld [vmem:[#allocation58_spill] sm:$0xff] }
 0x212   : > { %2352 = vmatprep.subr.msk.mxu0 %vm665_vm0, %v1525_v41  ;;  %v1783_v12 = vsel %vm665_vm0, %v2292_v53, 0.0  ;;  %v1862_v7 = vsel %vm1806_vm2, %v4211_v34, 0.0  ;;  %v1785_v55 = vsel %vm665_vm0, %v2295_v10, 0.0  ;;  %v1503_v57 = vmul.f32 %v3808_v6, %v4217_v33 }
 0x213   : > { %v1766_v30 = vadd.f32 %v1765_v0, %v1764_v45  ;;  %v1787_v59 = vsel %vm665_vm0, %v2296_v11, 0.0  ;;  %v4218_v0 = vld [vmem:[#allocation44_spill] sm:$0xff]  ;;  %v1518_v45 = vmul.f32 %v3808_v6, %v4219_v39 }
 0x214   : > { %v1864_v34 = vsel %vm1806_vm2, %v4218_v0, 0.0 }
 0x215   : > { %2353 = vmatpush3.xpose.msk.msra.mxu0 %vm665_vm0, %v1509_v20  ;;  %v1768_v8 = vadd.f32 %v1767_v9, %v1766_v30  ;;  %v1519_v20 = vmul.f32 %v3808_v6, %v4216_v14  ;;  %v4220_v9 = vld [vmem:[#allocation57_spill] sm:$0xff] }
 0x216   : > { %2354 = vmatprep.subr.msk.mxu0 %vm665_vm0, %v1524_v35  ;;  %v1863_v35 = vadd.f32 %v1862_v7, %v1861_v16  ;;  %v1502_v62 = vmul.f32 %v3808_v6, %v4220_v9 }
 0x217   : > { %v1770_v48 = vadd.f32 %v1769_v28, %v1768_v8  ;;  %v1517_v28 = vmul.f32 %v3808_v6, %v4222_v38 }
 0x218   : > { %v1865_v13 = vadd.f32 %v1864_v34, %v1863_v35 }
 0x219   : > { %2355 = vmatpush3.xpose.msk.msra.mxu0 %vm665_vm0, %v1508_v60  ;;  %v1772_v52 = vadd.f32 %v1771_v18, %v1770_v48  ;;  %v1868_v18 = vsel %vm1806_vm2, %v4215_v54, 0.0 }
 0x21a   : > { %2356 = vmatprep.subr.msk.mxu0 %vm665_vm0, %v1523_v23  ;;  %v4221_v23 = vld [vmem:[#allocation40_spill] sm:$0xff] }
 0x21b   : > { %v1774_v5 = vadd.f32 %v1773_v4, %v1772_v52  ;;  %v1866_v30 = vsel %vm1806_vm2, %v4221_v23, 0.0  ;;  %v4225_v4 = vld [vmem:[#allocation54_spill] sm:$0xff] }
 0x21c   : > { %v1867_v44 = vadd.f32 %v1866_v30, %v1865_v13  ;;  %v1500_v17 = vmul.f32 %v3808_v6, %v4225_v4 }
 0x21d   : > { %2357 = vmatpush3.xpose.msk.msra.mxu0 %vm665_vm0, %v1507_v42  ;;  %v1776_v63 = vadd.f32 %v1775_v49, %v1774_v5  ;;  %v4223_v42 = vld [vmem:[#allocation56_spill] sm:$0xff]  ;;  %v4227_v49 = vld [vmem:[#allocation55_spill] sm:$0xff] }
 0x21e   : > { %2358 = vmatprep.subr.msk.mxu0 %vm665_vm0, %v1522_v27  ;;  %v1501_v19 = vmul.f32 %v3808_v6, %v4223_v42  ;;  %v1516_v27 = vmul.f32 %v3808_v6, %v4224_v32  ;;  %v1869_v52 = vadd.f32 %v1868_v18, %v1867_v44  ;;  %v1499_v22 = vmul.f32 %v3808_v6, %v4227_v49 }
 0x21f   : > { %v1778_v41 = vadd.f32 %v1777_v31, %v1776_v63 }
 0x221   : > { %2359 = vmatpush3.xpose.msk.msra.mxu0 %vm665_vm0, %v1506_v58  ;;  %v1780_v36 = vadd.f32 %v1779_v56, %v1778_v41  ;;  %v1515_v58 = vmul.f32 %v3808_v6, %v4226_v50 }
 0x222   : > { %2360 = vmatprep.subr.msk.mxu0 %vm665_vm0, %v1521_v37  ;;  %v1870_v37 = vrot.slane %v1869_v52, 4 }
 0x223   : > { %v1782_v21 = vadd.f32 %v1781_v1, %v1780_v36 }
 0x224   : > { %v1871_v31 = vadd.f32 %v1870_v37, %v1869_v52 }
 0x225   : > { %2361 = vmatpush3.xpose.msk.msra.mxu0 %vm665_vm0, %v1505_v2  ;;  %v1784_v3 = vadd.f32 %v1783_v12, %v1782_v21 }
 0x226   : > { %2362 = vmatprep.subr.msk.mxu0 %vm665_vm0, %v1520_v25  ;;  %v1872_v63 = vrot.slane %v1871_v31, 2 }
 0x227   : > { %v1786_v15 = vadd.f32 %v1785_v55, %v1784_v3 }
 0x228   : > { %v1873_v40 = vadd.f32 %v1872_v63, %v1871_v31 }
 0x229   : > { %2363 = vmatpush3.xpose.msk.msra.mxu0 %vm665_vm0, %v1504_v47  ;;  %v1788_v60 = vadd.f32 %v1787_v59, %v1786_v15 }
 0x22a   : > { %2364 = vmatprep.subr.msk.mxu0 %vm665_vm0, %v1519_v20  ;;  %v1874_v2 = vrot.slane %v1873_v40, 1 }
 0x22b   : > { %v1789_v43 = vrot.slane %v1788_v60, 4 }
 0x22c   : > { %v1875_v53 = vadd.f32 %v1874_v2, %v1873_v40 }
 0x22d   : > { %2365 = vmatpush3.xpose.msk.msra.mxu0 %vm665_vm0, %v1503_v57  ;;  %v1790_v8 = vadd.f32 %v1789_v43, %v1788_v60 }
 0x22e   : > { %2366 = vmatprep.subr.msk.mxu0 %vm665_vm0, %v1518_v45  ;;  %v1876_v56 = vmul.f32 0.00390625, %v1875_v53 }
 0x22f   : > { %v1791_v48 = vrot.slane %v1790_v8, 2 }
 0x231   : > { %2367 = vmatpush3.xpose.msk.msra.mxu0 %vm665_vm0, %v1502_v62  ;;  %v1792_v61 = vadd.f32 %v1791_v48, %v1790_v8 }
 0x232   : > { %2368 = vmatprep.subr.msk.mxu0 %vm665_vm0, %v1517_v28 }
 0x233   : > { %v1793_v29 = vrot.slane %v1792_v61, 1 }
 0x235   : > { %2369 = vmatpush3.xpose.msk.msra.mxu0 %vm665_vm0, %v1501_v19  ;;  %v1794_v54 = vadd.f32 %v1793_v29, %v1792_v61 }
 0x236   : > { %2370 = vmatprep.subr.msk.mxu0 %vm665_vm0, %v1516_v27 }
 0x237   : > { %v1796_v5 = vmul.f32 0.00390625, %v1794_v54 }
 0x239   : > { %2371 = vmatpush3.xpose.msk.msra.mxu0 %vm665_vm0, %v1500_v17  ;;  %v1797_v26 = vmul.f32 %v1796_v5, %v1796_v5 }
 0x23a   : > { %2372 = vmatprep.subr.msk.mxu0 %vm665_vm0, %v1515_v58 }
 0x23b   : > { %v1798_v51 = vsel %vm665_vm0, %v1797_v26, 0.0 }
 0x23c   : > { %1799 = vadd.xlane.f32.xlu0 %v1798_v51 }
 0x23d   : > { %2373 = vmatpush3.xpose.msk.msra.mxu0 %vm665_vm0, %v1499_v22 }
 0x252   : > { %1878 = vrot.lane.b32.xlu0 %v1876_v56, %s2737_s17 }
 0x26e   : > { %v1200_v24 = vpop.xlane.xlu1 %1199 }
 0x26f   : > { %v1201_v6 = vmax.f32 %v1200_v24, 1e-24 }
 0x271   : > { %2639 = vrsqrt.f32 %v1201_v6 }
 0x27e   : > { %v2640_v25 = vpop.eup %2639 }
 0x27f   : > { %v1203_v41 = vmul.f32 %v2640_v25, %v3766_v46 }
 0x281   : > { %2374 = vmatprep.mubr.msk.f32.mxu0 %vm665_vm0, %v1203_v41 }
 0x282   : > { %2375 = vmatmul.mubr.msk.f32.vlgmr.msra.gmra.mxu0 %vm665_vm0, %v1203_v41 }
 0x2c5   : > { %v1800_v10 = vpop.xlane.xlu0 %1799 }
 0x2c6   : > { %v1801_v1 = vmax.f32 %v1800_v10, 1e-24 }
 0x2c8   : > { %2641 = vrsqrt.f32 %v1801_v1 }
 0x2c9   : > { %v1879_v46 = vpop.permute.xlu0 %1878 }
 0x2ca   : > { %1882 = vst.msk [vmem:[%s262_s26] sm:$0x1] %vm1881_vm3, %v1879_v46 }
 0x2cb   : > { %2656 = shalt.err (!%p2653_p3)
}
 0x2cc   : > { %s2657_s15 = scalar_lea.hbm %s3981_s9, 16  ;;  %s2661_s25 = scalar_lea.hbm %s4044_s5, 32 }
 0x2cd   : > { %p2658_p4 = scmp.ne.s32.totalorder %s3981_s9, %s2657_s15  ;;  %p2662_p9 = scmp.lt.s32.totalorder %s3981_s9, %s4044_s5 }
 0x2ce   : > { %p2663_p10 = scmp.lt.s32.totalorder %s2661_s25, %s2657_s15 }
 0x2cf   : > { %p2659_p7 = pnand %p2658_p4, %p2809_p5 }
 0x2d0   : > { %p2664_p11 = por %p2663_p10, %p2662_p9 }
 0x2d1   : > { %p2660_p8 = pneg %p2659_p7 }
 0x2d3   : > { %p2665_p12 = pnand %p2664_p11, %p2660_p8 }
 0x2d5   : > { %2668 = shalt.err (!%p2665_p12)
}
 0x2d6   : > { %2377 = dma.vmem_to_hbm [thread:$0]  (%p2809_p5), %s1922_s6, 16, %s3981_s9, %s1892_s10   ;;  %v2642_v36 = vpop.eup %2641  ;;  %vm1804_vm4 = vcmask 253952   ;;  %v2739_v47 = vmov 1966171168   ;;  %v1709_v12 = vlaneseq }
 0x2d7   : > { %s280_s12 = scalar_lea.vmem %s4043_s4, %s2821_s30  ;;  %v1803_v16 = vmul.f32 %v2642_v36, %v1796_v5  ;;  %v1707_v11 = vunpack.c.l.s4 %v2739_v47  ;;  %s2055_s13 = sshll.u32 %s3974_s23, 1 }
 0x2d8   : > { %v1710_v14 = vshrl.u32 %v1709_v12, 7  ;;  %s2104_s6 = sshll.u32 %s2792_s22, 5  ;;  %s251_s30 = scalar_lea.vmem [#allocation2], %s2055_s13  ;;  %vm1723_vm5 = vcmp.lt.s32.totalorder %v1709_v12, 256 }
 0x2d9   : > { %1805 = vst.msk [vmem:[%s280_s12] sm:$0x1] %vm1804_vm4, %v1803_v16  ;;  %v1708_v7 = vunpack.c.0.s8 %v1707_v11  ;;  %s1905_s9 = sshll.u32 %s251_s30, 4  ;;  %s1903_s15 = scalar_lea.hbm %s4042_s3, %s2104_s6  ;;  %s1906_s9 = int_to_ptr.vmem [resolvable:$true] %s1905_s9 }
 0x2da   : > { %s1884_s16 = scalar_lea.sflag [#allocation3], %s3974_s23  ;;  %s2669_s17 = scalar_lea.vmem %s1906_s9, 32 }
 0x2db   : > { %v1711_v35 = vsub.s32 %v1708_v7, %v1710_v14  ;;  %p2670_p13 = scmp.ne.s32.totalorder %s1906_s9, %s2669_s17  ;;  %s2740_s25 = smov [#allocation2]  }
 0x2dc   : > { %s2673_s26 = sshll.u32 %s2740_s25, 4  ;;  %s2674_s26 = int_to_ptr.vmem [resolvable:$false] %s2673_s26 }
 0x2dd   : > { %p2671_p0 = pnand %p2670_p13, %p2809_p5  ;;  %s2675_s22 = scalar_lea.vmem %s2674_s26, 64 }
 0x2de   : > { %p2676_p2 = scmp.lt.s32.totalorder %s1906_s9, %s2674_s26  ;;  %p2677_p3 = scmp.lt.s32.totalorder %s2675_s22, %s2669_s17 }
 0x2df   : > { %p2672_p1 = pneg %p2671_p0 }
 0x2e0   : > { %p2678_p4 = por %p2677_p3, %p2676_p2 }
 0x2e2   : > { %p2679_p7 = pnand %p2678_p4, %p2672_p1 }
 0x342   : > { %v1696_v20 = vpop.f32.mrf.mxu0 }
 0x343   : > { %v1701_v55 = vmul.f32 14.285714, %v1696_v20 }
 0x344   : > { %v1698_v21 = vpop.f32.mrf.mxu0 }
 0x345   : > { %v1702_v3 = vmul.f32 14.285714, %v1698_v21 }
 0x347   : > { %v1705_v33 = vcombine.low %v1701_v55, %v1702_v3 }
 0x349   : > { %v1712_v57 = vrot.slane %v1705_v33, %v1711_v35 }
 0x34b   : > { %v1719_v59 = vrot.slane %v1712_v57, %v1711_v35 }
 0x34d   : > { %1725 = vst.msk [vmem:[%s251_s30] sm:$0x3] %vm1723_vm5, %v1719_v59 }
 0x34e   : > { %2682 = shalt.err (!%p2679_p7)
}
 0x34f   : > { %s2683_s7 = scalar_lea.hbm %s1903_s15, 32  ;;  %s2687_s11 = scalar_lea.hbm %s4042_s3, 64 }
 0x350   : > { %p2684_p8 = scmp.ne.s32.totalorder %s1903_s15, %s2683_s7  ;;  %p2688_p11 = scmp.lt.s32.totalorder %s1903_s15, %s4042_s3 }
 0x351   : > { %p2689_p12 = scmp.lt.s32.totalorder %s2687_s11, %s2683_s7 }
 0x352   : > { %p2685_p9 = pnand %p2684_p8, %p2809_p5 }
 0x353   : > { %p2690_p13 = por %p2689_p12, %p2688_p11 }
 0x354   : > { %p2686_p10 = pneg %p2685_p9 }
 0x356   : > { %p2691_p0 = pnand %p2690_p13, %p2686_p10 }
 0x358   : > { %2694 = shalt.err (!%p2691_p0)
}
 0x359   : > { %2376 = dma.vmem_to_hbm [thread:$0]  (%p2809_p5), %s1906_s9, 32, %s1903_s15, %s1884_s16  }
 0x35a PF: > { %p2387_p1 = scmp.ge.s32.totalorder %s2733_s21, 2  ;;  %s1933_s6 = sand.u32 1, %s2721_s18  }
 0x35b   : > { %s1934_s30 = scalar_lea.sflag [#allocation3], %s1933_s6 }
 0x35c   : > { %p2381_p2 = pnand %p2387_p1, %p2813_p6 }
 0x35e   : > { %p2382_p3 = pneg %p2381_p2 }
 0x360   : > { %2712 = dma.done.wait (%p2382_p3), %s1934_s30, 32  }
 0x361   : > { %2714 = vsyncadd (%p2382_p3), %s1934_s30, 4294967264  ;;  %s1949_s10 = scalar_lea.sflag [#allocation5], %s1933_s6 }
 0x362   : > { %2716 = dma.done.wait (%p2382_p3), %s1949_s10, 16  }
 0x363   : > { %2718 = vsyncadd (%p2382_p3), %s1949_s10, 4294967280  ;;  %p19_p5 = scmp.ge.s32.totalorder %s2796_s24, 4   ;;  %s4228_s18 = smov %s2725_s19 }
 0x364   : > { %s4229_s19 = smov %s2729_s20  ;;  %s4230_s20 = smov %s2807_s27 }
 0x365   : > { %s4231_s21 = smov %s2796_s24  ;;  %21 = sbr.rel (!%p19_p5) target bundleno = 5 (0x5), region = 102 }
 0x36a   :  { %1953 = vsyncpa [#allocation3], 1 }
 0x36b   :  { %1955 = vsyncpa [#allocation3 + $0x1], 1 }
 0x36c   :  { %1956 = vsyncpa [#allocation5], 1 }
 0x36d   :  { %1958 = vsyncpa [#allocation5 + $0x1], 1 }

// kernel: _device_forward.9
= control target key start
LH: loop header
LB: loop body
LE: loop exit
PB: predicated region body
PF: predicated region fallthrough
CT: control target
= control target key end

     0   :  { %s1361_s9 = smov 0   ;;  %s1363_s10 = smov 0   ;;  %s1765_s0 = inlined_call_operand.vmem [shape: bf16[512,128], index: 0, kind: input, shape index: {}]   ;;  %s1766_s1 = inlined_call_operand.vmem [shape: bf16[32,128], index: 1, kind: input, shape index: {}]   ;;  %s1767_s2 = inlined_call_operand.vmem [shape: f32[512,128], index: 2, kind: output, shape index: {}]  }
   0x1   :  { %s1365_s11 = smov 0  }
   0x2 LB: > { %s24_s12 = sadd.s32 1, %s1339_s10  ;;  %p1066_p0 = scmp.ge.s32.totalorder %s1343_s11, 1  ;;  %s1343_s11 = sphi %s1365_s11, %s12_s11   ;;  %s1339_s10 = sphi %s1363_s10, %s1804_s10   ;;  %s1335_s9 = sphi %s1361_s9, %s1803_s9  }
   0x3   : > { %p26_p1 = scmp.ge.s32.totalorder %s24_s12, 2  ;;  %p136_p2 = scmp.lt.s32.totalorder %s1343_s11, 3 }
   0x5   : > { %s1806_s12 = smov (%p26_p1, %s24_s12), 0  ;;  %p137_p3 = pnand %p1066_p0, %p136_p2 }
   0x7   : > { %140 = sbr.rel (%p137_p3) target bundleno = 502 (0x1f6), region = 28 }
   0xc   : > { %s1067_s13 = sshll.u32 %s1335_s9, 5  ;;  %v1345_v0 = vmov 40   ;;  %vm281_vm0 = vcmask 261120  }
   0xd   : > { %p166_p4 = scmp.lt.s32.totalorder %s1067_s13, 63  ;;  %1254 = vset.pattern.permute.xlu1 %v1345_v0  ;;  %1253 = vset.pattern.permute.xlu0 %v1345_v0 }
   0xf   : > { %s1808_s13 = smov (!%p166_p4, %s1067_s13), 63 }
  0x10   : > { %s1068_s14 = sshll.u32 %s1808_s13, 2  ;;  %s1070_s22 = sshll.u32 %s1808_s13, 3 }
  0x11   : > { %s1385_s17 = scalar_lea.vmem %s1765_s0, %s1068_s14  ;;  %s1722_s25 = scalar_lea.vmem %s1767_s2, %s1070_s22 }
  0x12   : > { %v1162_v1 = vld [vmem:[%s1385_s17 + $0x40] sm:$0xff]   ;;  %v1155_v3 = vld [vmem:[%s1385_s17 + $0x8] sm:$0xff]   ;;  %v1156_v23 = vld [vmem:[%s1385_s17 + $0x10] sm:$0xff]  }
  0x13   : > { %v1092_v2 = vld [vmem:[%s1385_s17] sm:$0xff]   ;;  %v1390_v4 = vunpack.c.l.bf16 %v1162_v1  ;;  %v1394_v6 = vunpack.c.h.bf16 %v1162_v1  ;;  %v1398_v8 = vunpack.c.h.bf16 %v1155_v3  ;;  %v1400_v9 = vunpack.c.l.bf16 %v1155_v3  ;;  %v1163_v14 = vld [vmem:[%s1385_s17 + $0x48] sm:$0xff]   ;;  %v1164_v30 = vld [vmem:[%s1385_s17 + $0x50] sm:$0xff]  }
  0x14   : > { %v1392_v5 = vunpack.c.l.bf16 %v1092_v2  ;;  %v1396_v7 = vunpack.c.h.bf16 %v1092_v2  ;;  %v1413_v17 = vunpack.c.h.bf16 %v1163_v14  ;;  %v1415_v18 = vunpack.c.l.bf16 %v1163_v14  ;;  %v1157_v37 = vld [vmem:[%s1385_s17 + $0x18] sm:$0xff]   ;;  %v1158_v51 = vld [vmem:[%s1385_s17 + $0x20] sm:$0xff]   ;;  %v1159_v1 = vld [vmem:[%s1385_s17 + $0x28] sm:$0xff]  }
  0x15   : > { %v265_v10 = vmul.f32 %v1390_v4, %v1390_v4  ;;  %v266_v12 = vmul.f32 %v1394_v6, %v1394_v6  ;;  %v252_v21 = vmul.f32 %v1398_v8, %v1398_v8  ;;  %v251_v22 = vmul.f32 %v1400_v9, %v1400_v9  ;;  %v1165_v44 = vld [vmem:[%s1385_s17 + $0x58] sm:$0xff]   ;;  %v1166_v58 = vld [vmem:[%s1385_s17 + $0x60] sm:$0xff]   ;;  %v1167_v14 = vld [vmem:[%s1385_s17 + $0x68] sm:$0xff]  }
  0x16   : > { %v249_v11 = vmul.f32 %v1392_v5, %v1392_v5  ;;  %v250_v13 = vmul.f32 %v1396_v7, %v1396_v7  ;;  %v268_v24 = vmul.f32 %v1413_v17, %v1413_v17  ;;  %v267_v25 = vmul.f32 %v1415_v18, %v1415_v18 }
  0x17   : > { %v330_v15 = vsel %vm281_vm0, %v265_v10, 0.0  ;;  %v333_v19 = vsel %vm281_vm0, %v266_v12, 0.0  ;;  %v291_v26 = vsel %vm281_vm0, %v252_v21, 0.0  ;;  %v288_v27 = vsel %vm281_vm0, %v251_v22, 0.0 }
  0x18   : > { %v282_v16 = vsel %vm281_vm0, %v249_v11, 0.0  ;;  %331 = vadd.xlane.f32.xlu1 %v330_v15  ;;  %v285_v20 = vsel %vm281_vm0, %v250_v13, 0.0  ;;  %v1430_v28 = vunpack.c.h.bf16 %v1156_v23  ;;  %v1432_v29 = vunpack.c.l.bf16 %v1156_v23  ;;  %v1160_v23 = vld [vmem:[%s1385_s17 + $0x30] sm:$0xff]  }
  0x19   : > { %283 = vadd.xlane.f32.xlu0 %v282_v16  ;;  %v339_v31 = vsel %vm281_vm0, %v268_v24, 0.0  ;;  %v336_v32 = vsel %vm281_vm0, %v267_v25, 0.0  ;;  %v1441_v35 = vunpack.c.h.bf16 %v1164_v30  ;;  %v1443_v36 = vunpack.c.l.bf16 %v1164_v30 }
  0x1a   : > { %v254_v33 = vmul.f32 %v1430_v28, %v1430_v28  ;;  %v253_v34 = vmul.f32 %v1432_v29, %v1432_v29  ;;  %v1446_v38 = vunpack.c.h.bf16 %v1157_v37  ;;  %v1448_v39 = vunpack.c.l.bf16 %v1157_v37 }
  0x1b   : > { %v270_v42 = vmul.f32 %v1441_v35, %v1441_v35  ;;  %v269_v43 = vmul.f32 %v1443_v36, %v1443_v36  ;;  %v1457_v45 = vunpack.c.h.bf16 %v1165_v44  ;;  %v1459_v46 = vunpack.c.l.bf16 %v1165_v44 }
  0x1c   : > { %334 = vadd.xlane.f32.xlu1 %v333_v19  ;;  %v297_v40 = vsel %vm281_vm0, %v254_v33, 0.0  ;;  %v294_v41 = vsel %vm281_vm0, %v253_v34, 0.0  ;;  %v256_v49 = vmul.f32 %v1446_v38, %v1446_v38  ;;  %v255_v50 = vmul.f32 %v1448_v39, %v1448_v39 }
  0x1d   : > { %286 = vadd.xlane.f32.xlu0 %v285_v20  ;;  %v345_v47 = vsel %vm281_vm0, %v270_v42, 0.0  ;;  %v342_v48 = vsel %vm281_vm0, %v269_v43, 0.0  ;;  %v272_v52 = vmul.f32 %v1457_v45, %v1457_v45  ;;  %v1470_v53 = vunpack.c.h.bf16 %v1158_v51  ;;  %v1161_v43 = vld [vmem:[%s1385_s17 + $0x38] sm:$0xff]  }
  0x1e   : > { %v303_v54 = vsel %vm281_vm0, %v256_v49, 0.0  ;;  %v300_v55 = vsel %vm281_vm0, %v255_v50, 0.0  ;;  %v271_v56 = vmul.f32 %v1459_v46, %v1459_v46  ;;  %v1476_v57 = vunpack.c.l.bf16 %v1158_v51 }
  0x1f   : > { %v351_v59 = vsel %vm281_vm0, %v272_v52, 0.0  ;;  %v258_v60 = vmul.f32 %v1470_v53, %v1470_v53  ;;  %v1485_v63 = vunpack.c.h.bf16 %v1166_v58  ;;  %v1487_v0 = vunpack.c.l.bf16 %v1166_v58  ;;  %v1169_v52 = vld [vmem:[%s1385_s17 + $0x78] sm:$0xff]  }
  0x20   : > { %292 = vadd.xlane.f32.xlu1 %v291_v26  ;;  %v348_v61 = vsel %vm281_vm0, %v271_v56, 0.0  ;;  %v257_v62 = vmul.f32 %v1476_v57, %v1476_v57  ;;  %v1490_v2 = vunpack.c.h.bf16 %v1159_v1  ;;  %v1492_v3 = vunpack.c.l.bf16 %v1159_v1 }
  0x21   : > { %289 = vadd.xlane.f32.xlu0 %v288_v27  ;;  %v309_v10 = vsel %vm281_vm0, %v258_v60, 0.0  ;;  %v274_v12 = vmul.f32 %v1485_v63, %v1485_v63  ;;  %v273_v13 = vmul.f32 %v1487_v0, %v1487_v0  ;;  %v1503_v16 = vunpack.c.h.bf16 %v1167_v14 }
  0x22   : > { %1779 = vst [vmem:[#allocation2_spill] sm:$0xff] %v1492_v3  ;;  %v306_v11 = vsel %vm281_vm0, %v257_v62, 0.0  ;;  %v260_v15 = vmul.f32 %v1490_v2, %v1490_v2  ;;  %v259_v21 = vmul.f32 %v1492_v3, %v1492_v3  ;;  %v1509_v22 = vunpack.c.l.bf16 %v1167_v14 }
  0x23   : > { %1780 = vst [vmem:[#allocation3_spill] sm:$0xff] %v1503_v16  ;;  %v357_v19 = vsel %vm281_vm0, %v274_v12, 0.0  ;;  %v354_v20 = vsel %vm281_vm0, %v273_v13, 0.0  ;;  %v276_v24 = vmul.f32 %v1503_v16, %v1503_v16  ;;  %v1514_v25 = vunpack.c.h.bf16 %v1160_v23 }
  0x24   : > { %340 = vadd.xlane.f32.xlu1 %v339_v31  ;;  %1781 = vst [vmem:[#allocation4_spill] sm:$0xff] %v1509_v22  ;;  %v315_v26 = vsel %vm281_vm0, %v260_v15, 0.0  ;;  %v312_v27 = vsel %vm281_vm0, %v259_v21, 0.0  ;;  %v275_v30 = vmul.f32 %v1509_v22, %v1509_v22  ;;  %v1520_v31 = vunpack.c.l.bf16 %v1160_v23  ;;  %v1255_v21 = vld [vmem:[%s1766_s1 + $0x8] sm:$0xff]  }
  0x25   : > { %337 = vadd.xlane.f32.xlu0 %v336_v32  ;;  %1782 = vst [vmem:[#allocation5_spill] sm:$0xff] %v1514_v25  ;;  %v1168_v32 = vld [vmem:[%s1385_s17 + $0x70] sm:$0xff]   ;;  %v363_v33 = vsel %vm281_vm0, %v276_v24, 0.0  ;;  %v262_v34 = vmul.f32 %v1514_v25, %v1514_v25  ;;  %v1534_v44 = vunpack.c.h.bf16 %v1161_v43  ;;  %v1553_v60 = vunpack.c.l.bf16 %v1169_v52  ;;  %1188 = vmatprep.subr.bf16.mxu0 %v1255_v21 }
  0x26   : > { %1783 = vst [vmem:[#allocation6_spill] sm:$0xff] %v1520_v31  ;;  %v360_v37 = vsel %vm281_vm0, %v275_v30, 0.0  ;;  %v1531_v42 = vunpack.c.l.bf16 %v1168_v32  ;;  %v475_v13 = vmul.f32 14.285714, %v1396_v7  ;;  %v490_v14 = vmul.f32 14.285714, %v1390_v4  ;;  %1189 = vmatpush3.bf16.msra.mxu0 %v1255_v21  ;;  %1224 = vmatprep.subr.bf16.mxu1 %v1255_v21 }
  0x27   : > { %1786 = vst [vmem:[#allocation9_spill] sm:$0xff] %v1534_v44  ;;  %1789 = vst [vmem:[#allocation12_spill] sm:$0xff] %v1553_v60  ;;  %v474_v15 = vmul.f32 14.285714, %v1392_v5  ;;  %v476_v23 = vmul.f32 14.285714, %v1400_v9  ;;  %1226 = vmatpush3.bf16.msra.mxu1 %v1255_v21 }
  0x28   : > { %298 = vadd.xlane.f32.xlu1 %v297_v40  ;;  %v261_v40 = vmul.f32 %v1520_v31, %v1520_v31  ;;  %1785 = vst [vmem:[#allocation8_spill] sm:$0xff] %v1531_v42  ;;  %v277_v51 = vmul.f32 %v1531_v42, %v1531_v42  ;;  %v495_v24 = vmul.f32 14.285714, %v1441_v35  ;;  %v481_v30 = vmul.f32 14.285714, %v1446_v38 }
  0x29   : > { %295 = vadd.xlane.f32.xlu0 %v294_v41  ;;  %v1529_v41 = vunpack.c.h.bf16 %v1168_v32  ;;  %v492_v32 = vmul.f32 14.285714, %v1415_v18 }
  0x2a   : > { %v318_v49 = vsel %vm281_vm0, %v261_v40, 0.0  ;;  %v366_v58 = vsel %vm281_vm0, %v277_v51, 0.0  ;;  %v478_v40 = vmul.f32 14.285714, %v1432_v29  ;;  %v501_v51 = vmul.f32 14.285714, %v1503_v16 }
  0x2b   : > { %1784 = vst [vmem:[#allocation7_spill] sm:$0xff] %v1529_v41  ;;  %v278_v50 = vmul.f32 %v1529_v41, %v1529_v41 }
  0x2c   : > { %346 = vadd.xlane.f32.xlu1 %v345_v47  ;;  %v1536_v47 = vunpack.c.l.bf16 %v1161_v43  ;;  %v499_v43 = vmul.f32 14.285714, %v1485_v63 }
  0x2d   : > { %343 = vadd.xlane.f32.xlu0 %v342_v48  ;;  %v321_v48 = vsel %vm281_vm0, %v262_v34, 0.0  ;;  %v369_v56 = vsel %vm281_vm0, %v278_v50, 0.0  ;;  %v493_v34 = vmul.f32 14.285714, %v1413_v17  ;;  %v480_v50 = vmul.f32 14.285714, %v1448_v39 }
  0x2e   : > { %1787 = vst [vmem:[#allocation10_spill] sm:$0xff] %v1536_v47 }
  0x30   : > { %304 = vadd.xlane.f32.xlu1 %v303_v54  ;;  %v264_v54 = vmul.f32 %v1534_v44, %v1534_v44 }
  0x31   : > { %301 = vadd.xlane.f32.xlu0 %v300_v55  ;;  %v1547_v55 = vunpack.c.h.bf16 %v1169_v52  ;;  %v496_v52 = vmul.f32 14.285714, %v1459_v46 }
  0x33   : > { %1788 = vst [vmem:[#allocation11_spill] sm:$0xff] %v1547_v55  ;;  %v280_v1 = vmul.f32 %v1547_v55, %v1547_v55 }
  0x34   : > { %352 = vadd.xlane.f32.xlu1 %v351_v59  ;;  %v263_v59 = vmul.f32 %v1536_v47, %v1536_v47 }
  0x35   : > { %349 = vadd.xlane.f32.xlu0 %v348_v61  ;;  %v327_v61 = vsel %vm281_vm0, %v264_v54, 0.0  ;;  %v487_v54 = vmul.f32 14.285714, %v1514_v25 }
  0x36   : > { %v324_v62 = vsel %vm281_vm0, %v263_v59, 0.0  ;;  %v498_v59 = vmul.f32 14.285714, %v1487_v0 }
  0x38   : > { %310 = vadd.xlane.f32.xlu1 %v309_v10  ;;  %v279_v10 = vmul.f32 %v1553_v60, %v1553_v60 }
  0x39   : > { %307 = vadd.xlane.f32.xlu0 %v306_v11  ;;  %v375_v11 = vsel %vm281_vm0, %v280_v1, 0.0  ;;  %v505_v1 = vmul.f32 14.285714, %v1547_v55 }
  0x3a   : > { %v372_v12 = vsel %vm281_vm0, %v279_v10, 0.0  ;;  %v500_v10 = vmul.f32 14.285714, %v1509_v22 }
  0x3c   : > { %358 = vadd.xlane.f32.xlu1 %v357_v19  ;;  %v491_v19 = vmul.f32 14.285714, %v1394_v6 }
  0x3d   : > { %355 = vadd.xlane.f32.xlu0 %v354_v20  ;;  %v479_v20 = vmul.f32 14.285714, %v1430_v28 }
  0x40   : > { %316 = vadd.xlane.f32.xlu1 %v315_v26  ;;  %v1256_v26 = vld [vmem:[%s1766_s1] sm:$0xff]  }
  0x41   : > { %313 = vadd.xlane.f32.xlu0 %v312_v27  ;;  %v477_v27 = vmul.f32 14.285714, %v1398_v8  ;;  %1190 = vmatprep.subr.bf16.mxu0 %v1256_v26 }
  0x42   : > { %1191 = vmatpush3.bf16.msra.mxu0 %v1256_v26  ;;  %1225 = vmatprep.subr.bf16.mxu1 %v1256_v26 }
  0x43   : > { %1227 = vmatpush3.bf16.msra.mxu1 %v1256_v26 }
  0x44   : > { %364 = vadd.xlane.f32.xlu1 %v363_v33  ;;  %v497_v33 = vmul.f32 14.285714, %v1457_v45 }
  0x45   : > { %361 = vadd.xlane.f32.xlu0 %v360_v37  ;;  %v483_v37 = vmul.f32 14.285714, %v1470_v53 }
  0x48   : > { %322 = vadd.xlane.f32.xlu1 %v321_v48  ;;  %v494_v48 = vmul.f32 14.285714, %v1443_v36 }
  0x49   : > { %319 = vadd.xlane.f32.xlu0 %v318_v49  ;;  %v485_v49 = vmul.f32 14.285714, %v1490_v2 }
  0x4c   : > { %370 = vadd.xlane.f32.xlu1 %v369_v56  ;;  %v482_v56 = vmul.f32 14.285714, %v1476_v57 }
  0x4d   : > { %367 = vadd.xlane.f32.xlu0 %v366_v58  ;;  %v503_v58 = vmul.f32 14.285714, %v1529_v41 }
  0x50   : > { %328 = vadd.xlane.f32.xlu1 %v327_v61  ;;  %v489_v61 = vmul.f32 14.285714, %v1534_v44 }
  0x51   : > { %325 = vadd.xlane.f32.xlu0 %v324_v62  ;;  %v484_v62 = vmul.f32 14.285714, %v1492_v3 }
  0x54   : > { %376 = vadd.xlane.f32.xlu1 %v375_v11  ;;  %v486_v11 = vmul.f32 14.285714, %v1520_v31 }
  0x55   : > { %373 = vadd.xlane.f32.xlu0 %v372_v12 }
  0x65   : > { %513 = vperm.xlu1 %1254, %v475_v13   ;;  %v502_v13 = vmul.f32 14.285714, %v1531_v42 }
  0x69   : > { %588 = vperm.xlu1 %1254, %v490_v14  }
  0x6b   : > { %508 = vperm.xlu0 %1253, %v474_v15  }
  0x6d   : > { %593 = vperm.xlu1 %1254, %v491_v19   ;;  %v488_v19 = vmul.f32 14.285714, %v1536_v47 }
  0x6f   : > { %533 = vperm.xlu0 %1253, %v479_v20  }
  0x71   : > { %518 = vperm.xlu1 %1254, %v476_v23   ;;  %v504_v23 = vmul.f32 14.285714, %v1553_v60 }
  0x73   : > { %613 = vperm.xlu0 %1253, %v495_v24  }
  0x75   : > { %523 = vperm.xlu1 %1254, %v477_v27  }
  0x77   : > { %543 = vperm.xlu0 %1253, %v481_v30  }
  0x79   : > { %598 = vperm.xlu1 %1254, %v492_v32  }
  0x7b   : > { %623 = vperm.xlu0 %1253, %v497_v33  }
  0x7d   : > { %603 = vperm.xlu1 %1254, %v493_v34  }
  0x7f   : > { %553 = vperm.xlu0 %1253, %v483_v37  }
  0x81   : > { %528 = vperm.xlu1 %1254, %v478_v40  }
  0x83   : > { %633 = vperm.xlu0 %1253, %v499_v43  }
  0x85   : > { %608 = vperm.xlu1 %1254, %v494_v48  }
  0x87   : > { %563 = vperm.xlu0 %1253, %v485_v49  }
  0x89   : > { %538 = vperm.xlu1 %1254, %v480_v50  }
  0x8b   : > { %643 = vperm.xlu0 %1253, %v501_v51  }
  0x8d   : > { %618 = vperm.xlu1 %1254, %v496_v52  }
  0x8f   : > { %573 = vperm.xlu0 %1253, %v487_v54  }
  0x91   : > { %548 = vperm.xlu1 %1254, %v482_v56  }
  0x93   : > { %653 = vperm.xlu0 %1253, %v503_v58  }
  0x95   : > { %628 = vperm.xlu1 %1254, %v498_v59  }
  0x97   : > { %583 = vperm.xlu0 %1253, %v489_v61  }
  0x99   : > { %558 = vperm.xlu1 %1254, %v484_v62  }
  0x9b   : > { %663 = vperm.xlu0 %1253, %v505_v1  }
  0x9d   : > { %638 = vperm.xlu1 %1254, %v500_v10  }
  0xa1   : > { %v332_v12 = vpop.xlane.xlu1 %331  ;;  %568 = vperm.xlu1 %1254, %v486_v11  }
  0xa2   : > { %v284_v14 = vpop.xlane.xlu0 %283  ;;  %v394_v11 = vmax.f32 %v332_v12, 1e-24 }
  0xa3   : > { %v378_v61 = vmax.f32 %v284_v14, 1e-24 }
  0xa5   : > { %v335_v15 = vpop.xlane.xlu1 %334  ;;  %648 = vperm.xlu1 %1254, %v502_v13   ;;  %1257 = vrsqrt.f32 %v378_v61 }
  0xa6   : > { %v287_v20 = vpop.xlane.xlu0 %286  ;;  %v395_v13 = vmax.f32 %v335_v15, 1e-24 }
  0xa7   : > { %v379_v62 = vmax.f32 %v287_v20, 1e-24 }
  0xa9   : > { %v293_v21 = vpop.xlane.xlu1 %292  ;;  %578 = vperm.xlu1 %1254, %v488_v19   ;;  %1259 = vrsqrt.f32 %v379_v62 }
  0xaa   : > { %v290_v24 = vpop.xlane.xlu0 %289  ;;  %1261 = vrsqrt.f32 %v394_v11  ;;  %v381_v14 = vmax.f32 %v293_v21, 1e-24 }
  0xab   : > { %1263 = vrsqrt.f32 %v395_v13  ;;  %v380_v20 = vmax.f32 %v290_v24, 1e-24 }
  0xac   : > { %1265 = vrsqrt.f32 %v381_v14 }
  0xad   : > { %v341_v26 = vpop.xlane.xlu1 %340  ;;  %658 = vperm.xlu1 %1254, %v504_v23   ;;  %1267 = vrsqrt.f32 %v380_v20 }
  0xae   : > { %v338_v27 = vpop.xlane.xlu0 %337  ;;  %v397_v62 = vmax.f32 %v341_v26, 1e-24 }
  0xaf   : > { %v396_v42 = vmax.f32 %v338_v27, 1e-24 }
  0xb0   : > { %1269 = vrsqrt.f32 %v397_v62 }
  0xb1   : > { %v299_v30 = vpop.xlane.xlu1 %298  ;;  %1271 = vrsqrt.f32 %v396_v42 }
  0xb2   : > { %v1601_v32 = vpop.xlane.xlu0 %295  ;;  %v1258_v12 = vpop.eup %1257  ;;  %v383_v14 = vmax.f32 %v299_v30, 1e-24 }
  0xb3   : > { %v442_v13 = vmul.f32 %v1258_v12, %v1392_v5  ;;  %v382_v16 = vmax.f32 %v1601_v32, 1e-24 }
  0xb4   : > { %1273 = vrsqrt.f32 %v383_v14 }
  0xb5   : > { %v1603_v33 = vpop.xlane.xlu1 %346  ;;  %1275 = vrsqrt.f32 %v382_v16 }
  0xb6   : > { %v1605_v34 = vpop.xlane.xlu0 %343  ;;  %v1260_v15 = vpop.eup %1259  ;;  %v399_v5 = vmax.f32 %v1603_v33, 1e-24 }
  0xb7   : > { %v1262_v41 = vpop.eup %1261  ;;  %v443_v11 = vmul.f32 %v1260_v15, %v1396_v7  ;;  %v398_v42 = vmax.f32 %v1605_v34, 1e-24 }
  0xb8   : > { %v1264_v31 = vpop.eup %1263  ;;  %v458_v20 = vmul.f32 %v1262_v41, %v1390_v4  ;;  %1277 = vrsqrt.f32 %v399_v5 }
  0xb9   : > { %v1607_v37 = vpop.xlane.xlu1 %304  ;;  %v459_v26 = vmul.f32 %v1264_v31, %v1394_v6  ;;  %v1266_v12 = vpop.eup %1265  ;;  %1279 = vrsqrt.f32 %v398_v42 }
  0xba   : > { %v1609_v40 = vpop.xlane.xlu0 %301  ;;  %v1268_v32 = vpop.eup %1267  ;;  %v385_v6 = vmax.f32 %v1607_v37, 1e-24 }
  0xbc   : > { %1281 = vrsqrt.f32 %v385_v6 }
  0xbd   : > { %v1611_v43 = vpop.xlane.xlu1 %352  ;;  %v1270_v34 = vpop.eup %1269 }
  0xbe   : > { %v1613_v48 = vpop.xlane.xlu0 %349  ;;  %v401_v62 = vmax.f32 %v1611_v43, 1e-24  ;;  %v461_v43 = vmul.f32 %v1270_v34, %v1413_v17 }
  0xc1   : > { %v1615_v49 = vpop.xlane.xlu1 %310 }
  0xc2   : > { %v1617_v50 = vpop.xlane.xlu0 %307 }
  0xc5   : > { %v1619_v51 = vpop.xlane.xlu1 %358 }
  0xc6   : > { %v1621_v52 = vpop.xlane.xlu0 %355 }
  0xc9   : > { %v1623_v54 = vpop.xlane.xlu1 %316 }
  0xca   : > { %v1625_v56 = vpop.xlane.xlu0 %313 }
  0xcb   : > { %v388_v6 = vmax.f32 %v1625_v56, 1e-24 }
  0xcd   : > { %v1627_v58 = vpop.xlane.xlu1 %364 }
  0xce   : > { %v1629_v59 = vpop.xlane.xlu0 %361 }
  0xd1   : > { %v1631_v1 = vpop.xlane.xlu1 %322 }
  0xd2   : > { %v1633_v10 = vpop.xlane.xlu0 %319 }
  0xd5   : > { %v1635_v19 = vpop.xlane.xlu1 %370 }
  0xd6   : > { %v1637_v23 = vpop.xlane.xlu0 %367 }
  0xd9   : > { %v1639_v60 = vpop.xlane.xlu1 %328 }
  0xda   : > { %v1641_v55 = vpop.xlane.xlu0 %325 }
  0xdd   : > { %v1643_v47 = vpop.xlane.xlu1 %376 }
  0xde   : > { %v1645_v44 = vpop.xlane.xlu0 %373 }
  0xdf   : > { %1790 = vst [vmem:[#allocation13_spill] sm:$0xff] %v1645_v44 }
  0xe1   : > { %v514_v61 = vpop.permute.xlu1 %513 }
  0xe2   : > { %v667_v24 = vmul.f32 %v514_v61, %v443_v11  ;;  %v1272_v11 = vpop.eup %1271 }
  0xe3   : > { %v460_v14 = vmul.f32 %v1272_v11, %v1415_v18 }
  0xe5   : > { %v589_v25 = vpop.permute.xlu1 %588 }
  0xe6   : > { %v509_v21 = vpop.permute.xlu0 %508  ;;  %v682_v7 = vmul.f32 %v589_v25, %v458_v20  ;;  %v445_v25 = vmul.f32 %v1266_v12, %v1398_v8 }
  0xe7   : > { %v666_v22 = vmul.f32 %v509_v21, %v442_v13  ;;  %v400_v13 = vmax.f32 %v1613_v48, 1e-24 }
  0xe9   : > { %v698_v27 = vpack.c.bf16 %v667_v24, %v666_v22  ;;  %v594_v3 = vpop.permute.xlu1 %593  ;;  %v444_v22 = vmul.f32 %v1268_v32, %v1400_v9  ;;  %v387_v9 = vmax.f32 %v1615_v49, 1e-24  ;;  %v386_v24 = vmax.f32 %v1617_v50, 1e-24 }
  0xea   : > { %v534_v44 = vpop.permute.xlu0 %533  ;;  %v683_v15 = vmul.f32 %v594_v3, %v459_v26  ;;  %v384_v3 = vmax.f32 %v1609_v40, 1e-24  ;;  %v1274_v40 = vpop.eup %1273  ;;  %v402_v49 = vmax.f32 %v1621_v52, 1e-24 }
  0xeb   : > { %1192 = vmatprep.mubr.msk.bf16.mxu0 %vm281_vm0, %v698_v27  ;;  %v1276_v20 = vpop.eup %1275 }
  0xec   : > { %v706_v30 = vpack.c.bf16 %v683_v15, %v682_v7  ;;  %1283 = vrsqrt.f32 %v384_v3  ;;  %v403_v7 = vmax.f32 %v1619_v51, 1e-24  ;;  %v447_v15 = vmul.f32 %v1274_v40, %v1430_v28  ;;  %v1278_v5 = vpop.eup %1277 }
  0xed   : > { %v519_v61 = vpop.permute.xlu1 %518  ;;  %1285 = vrsqrt.f32 %v401_v62  ;;  %v446_v50 = vmul.f32 %v1276_v20, %v1432_v29  ;;  %v1280_v42 = vpop.eup %1279  ;;  %v463_v51 = vmul.f32 %v1278_v5, %v1441_v35 }
  0xee   : > { %v614_v4 = vpop.permute.xlu0 %613  ;;  %1208 = vmatprep.mubr.msk.bf16.mxu1 %vm281_vm0, %v706_v30  ;;  %v668_v41 = vmul.f32 %v519_v61, %v444_v22  ;;  %1287 = vrsqrt.f32 %v400_v13  ;;  %v671_v17 = vmul.f32 %v534_v44, %v447_v15  ;;  %v389_v61 = vmax.f32 %v1623_v54, 1e-24  ;;  %v1282_v28 = vpop.eup %1281 }
  0xef   : > { %1289 = vrsqrt.f32 %v387_v9  ;;  %v462_v3 = vmul.f32 %v1280_v42, %v1443_v36  ;;  %v405_v44 = vmax.f32 %v1627_v58, 1e-24  ;;  %v449_v54 = vmul.f32 %v1282_v28, %v1446_v38 }
  0xf0   : > { %1291 = vrsqrt.f32 %v386_v24  ;;  %v391_v13 = vmax.f32 %v1631_v1, 1e-24  ;;  %v392_v15 = vmax.f32 %v1641_v55, 1e-24  ;;  %v409_v42 = vmax.f32 %v1643_v47, 1e-24 }
  0xf1   : > { %v524_v31 = vpop.permute.xlu1 %523  ;;  %1293 = vrsqrt.f32 %v403_v7  ;;  %v1792_v55 = vld [vmem:[#allocation2_spill] sm:$0xff]  ;;  %v1793_v47 = vld [vmem:[#allocation3_spill] sm:$0xff] }
  0xf2   : > { %v544_v16 = vpop.permute.xlu0 %543  ;;  %v669_v33 = vmul.f32 %v524_v31, %v445_v25  ;;  %1295 = vrsqrt.f32 %v402_v49  ;;  %v687_v25 = vmul.f32 %v614_v4, %v463_v51 }
  0xf3   : > { %1297 = vrsqrt.f32 %v389_v61  ;;  %v673_v11 = vmul.f32 %v544_v16, %v449_v54 }
  0xf4   : > { %v699_v37 = vpack.c.bf16 %v669_v33, %v668_v41  ;;  %1299 = vrsqrt.f32 %v388_v6  ;;  %v404_v33 = vmax.f32 %v1629_v59, 1e-24 }
  0xf5   : > { %v599_v21 = vpop.permute.xlu1 %598  ;;  %1301 = vrsqrt.f32 %v405_v44 }
  0xf6   : > { %1193 = vmatmul.mubr.msk.bf16.vlgmr.msra.gmra.mxu0 %vm281_vm0, %v699_v37  ;;  %v624_v8 = vpop.permute.xlu0 %623  ;;  %v684_v27 = vmul.f32 %v599_v21, %v460_v14  ;;  %1303 = vrsqrt.f32 %v404_v33  ;;  %v390_v37 = vmax.f32 %v1633_v10, 1e-24  ;;  %v407_v14 = vmax.f32 %v1635_v19, 1e-24  ;;  %v1795_v33 = vld [vmem:[#allocation5_spill] sm:$0xff] }
  0xf7   : > { %1305 = vrsqrt.f32 %v391_v13 }
  0xf8   : > { %1307 = vrsqrt.f32 %v390_v37  ;;  %v1797_v37 = vld [vmem:[#allocation7_spill] sm:$0xff] }
  0xf9   : > { %v604_v26 = vpop.permute.xlu1 %603  ;;  %v1284_v29 = vpop.eup %1283  ;;  %1309 = vrsqrt.f32 %v407_v14 }
  0xfa   : > { %v685_v48 = vmul.f32 %v604_v26, %v461_v43  ;;  %v554_v18 = vpop.permute.xlu0 %553  ;;  %v1286_v35 = vpop.eup %1285  ;;  %v448_v34 = vmul.f32 %v1284_v29, %v1448_v39  ;;  %v406_v43 = vmax.f32 %v1637_v23, 1e-24  ;;  %v1794_v29 = vld [vmem:[#allocation4_spill] sm:$0xff] }
  0xfb   : > { %v1288_v36 = vpop.eup %1287  ;;  %v465_v58 = vmul.f32 %v1286_v35, %v1457_v45 }
  0xfc   : > { %v707_v12 = vpack.c.bf16 %v685_v48, %v684_v27  ;;  %v1290_v38 = vpop.eup %1289  ;;  %v464_v59 = vmul.f32 %v1288_v36, %v1459_v46  ;;  %1311 = vrsqrt.f32 %v406_v43  ;;  %v1796_v36 = vld [vmem:[#allocation6_spill] sm:$0xff]  ;;  %v1799_v43 = vld [vmem:[#allocation9_spill] sm:$0xff] }
  0xfd   : > { %v529_v30 = vpop.permute.xlu1 %528  ;;  %v1292_v9 = vpop.eup %1291  ;;  %v689_v24 = vmul.f32 %v624_v8, %v465_v58  ;;  %v451_v1 = vmul.f32 %v1290_v38, %v1470_v53  ;;  %v393_v8 = vmax.f32 %v1639_v60, 1e-24 }
  0xfe   : > { %v670_v32 = vmul.f32 %v529_v30, %v446_v50  ;;  %1209 = vmatmul.mubr.msk.bf16.vlgmr.msra.gmra.mxu1 %vm281_vm0, %v707_v12  ;;  %v634_v41 = vpop.permute.xlu0 %633  ;;  %v1294_v45 = vpop.eup %1293  ;;  %v450_v20 = vmul.f32 %v1292_v9, %v1476_v57  ;;  %v1798_v9 = vld [vmem:[#allocation8_spill] sm:$0xff] }
  0xff   : > { %v1296_v46 = vpop.eup %1295  ;;  %v675_v27 = vmul.f32 %v554_v18, %v451_v1  ;;  %v467_v19 = vmul.f32 %v1294_v45, %v1485_v63  ;;  %1313 = vrsqrt.f32 %v393_v8  ;;  %v1791_v18 = vld [vmem:[#allocation13_spill] sm:$0xff] }
 0x100   : > { %v700_v52 = vpack.c.bf16 %v671_v17, %v670_v32  ;;  %v1298_v53 = vpop.eup %1297  ;;  %v466_v5 = vmul.f32 %v1296_v46, %v1487_v0  ;;  %1315 = vrsqrt.f32 %v392_v15  ;;  %v408_v30 = vmax.f32 %v1791_v18, 1e-24  ;;  %v1800_v46 = vld [vmem:[#allocation10_spill] sm:$0xff] }
 0x101   : > { %v609_v22 = vpop.permute.xlu1 %608  ;;  %v1300_v57 = vpop.eup %1299  ;;  %v691_v12 = vmul.f32 %v634_v41, %v467_v19  ;;  %v453_v60 = vmul.f32 %v1298_v53, %v1490_v2  ;;  %1317 = vrsqrt.f32 %v409_v42  ;;  %v1801_v53 = vld [vmem:[#allocation11_spill] sm:$0xff] }
 0x102   : > { %v686_v31 = vmul.f32 %v609_v22, %v462_v3  ;;  %1196 = vmatprep.mubr.msk.bf16.mxu0 %vm281_vm0, %v700_v52  ;;  %v564_v39 = vpop.permute.xlu0 %563  ;;  %v1302_v63 = vpop.eup %1301  ;;  %v452_v32 = vmul.f32 %v1300_v57, %v1792_v55  ;;  %1319 = vrsqrt.f32 %v408_v30 }
 0x103   : > { %v1304_v61 = vpop.eup %1303  ;;  %v677_v28 = vmul.f32 %v564_v39, %v453_v60  ;;  %v469_v3 = vmul.f32 %v1302_v63, %v1793_v47 }
 0x104   : > { %v708_v56 = vpack.c.bf16 %v687_v25, %v686_v31  ;;  %v1306_v52 = vpop.eup %1305  ;;  %v468_v22 = vmul.f32 %v1304_v61, %v1794_v29 }
 0x105   : > { %v539_v62 = vpop.permute.xlu1 %538  ;;  %v1308_v25 = vpop.eup %1307 }
 0x106   : > { %v672_v4 = vmul.f32 %v539_v62, %v448_v34  ;;  %1212 = vmatprep.mubr.msk.bf16.mxu1 %vm281_vm0, %v708_v56  ;;  %v644_v7 = vpop.permute.xlu0 %643  ;;  %v1310_v35 = vpop.eup %1309  ;;  %v455_v56 = vmul.f32 %v1306_v52, %v1795_v33  ;;  %v454_v62 = vmul.f32 %v1308_v25, %v1796_v36 }
 0x107   : > { %v693_v44 = vmul.f32 %v644_v7, %v469_v3 }
 0x108   : > { %v701_v21 = vpack.c.bf16 %v673_v11, %v672_v4 }
 0x109   : > { %v619_v40 = vpop.permute.xlu1 %618  ;;  %v1312_v11 = vpop.eup %1311 }
 0x10a   : > { %v688_v16 = vmul.f32 %v619_v40, %v464_v59  ;;  %1197 = vmatmul.mubr.msk.bf16.gmra.mxu0 %vm281_vm0, %v701_v21  ;;  %v574_v0 = vpop.permute.xlu0 %573  ;;  %v471_v21 = vmul.f32 %v1310_v35, %v1797_v37  ;;  %v470_v39 = vmul.f32 %v1312_v11, %v1798_v9 }
 0x10b   : > { %v679_v13 = vmul.f32 %v574_v0, %v455_v56 }
 0x10c   : > { %v709_v10 = vpack.c.bf16 %v689_v24, %v688_v16  ;;  %v1314_v38 = vpop.eup %1313 }
 0x10d   : > { %v549_v26 = vpop.permute.xlu1 %548  ;;  %v1316_v40 = vpop.eup %1315 }
 0x10e   : > { %v674_v48 = vmul.f32 %v549_v26, %v450_v20  ;;  %1213 = vmatmul.mubr.msk.bf16.gmra.mxu1 %vm281_vm0, %v709_v10  ;;  %v654_v41 = vpop.permute.xlu0 %653  ;;  %v1318_v45 = vpop.eup %1317  ;;  %v457_v10 = vmul.f32 %v1314_v38, %v1799_v43  ;;  %v456_v26 = vmul.f32 %v1316_v40, %v1800_v46 }
 0x10f   : > { %v695_v14 = vmul.f32 %v654_v41, %v471_v21  ;;  %v473_v15 = vmul.f32 %v1318_v45, %v1801_v53 }
 0x110   : > { %v702_v23 = vpack.c.bf16 %v675_v27, %v674_v48  ;;  %v1320_v27 = vpop.eup %1319 }
 0x111   : > { %v629_v49 = vpop.permute.xlu1 %628 }
 0x112   : > { %v690_v50 = vmul.f32 %v629_v49, %v466_v5  ;;  %1200 = vmatprep.mubr.msk.bf16.mxu0 %vm281_vm0, %v702_v23  ;;  %v584_v24 = vpop.permute.xlu0 %583  ;;  %v1802_v5 = vld [vmem:[#allocation12_spill] sm:$0xff] }
 0x113   : > { %v681_v8 = vmul.f32 %v584_v24, %v457_v10  ;;  %v472_v57 = vmul.f32 %v1320_v27, %v1802_v5 }
 0x114   : > { %v710_v17 = vpack.c.bf16 %v691_v12, %v690_v50 }
 0x115   : > { %v559_v51 = vpop.permute.xlu1 %558 }
 0x116   : > { %v676_v6 = vmul.f32 %v559_v51, %v452_v32  ;;  %1216 = vmatprep.mubr.msk.bf16.mxu1 %vm281_vm0, %v710_v17  ;;  %v664_v7 = vpop.permute.xlu0 %663 }
 0x117   : > { %v697_v12 = vmul.f32 %v664_v7, %v473_v15 }
 0x118   : > { %v703_v2 = vpack.c.bf16 %v677_v28, %v676_v6 }
 0x119   : > { %v639_v31 = vpop.permute.xlu1 %638 }
 0x11a   : > { %v692_v54 = vmul.f32 %v639_v31, %v468_v22  ;;  %1201 = vmatmul.mubr.msk.bf16.gmra.mxu0 %vm281_vm0, %v703_v2 }
 0x11c   : > { %v711_v34 = vpack.c.bf16 %v693_v44, %v692_v54 }
 0x11d   : > { %v569_v4 = vpop.permute.xlu1 %568 }
 0x11e   : > { %v678_v58 = vmul.f32 %v569_v4, %v454_v62  ;;  %1217 = vmatmul.mubr.msk.bf16.gmra.mxu1 %vm281_vm0, %v711_v34 }
 0x120   : > { %v704_v59 = vpack.c.bf16 %v679_v13, %v678_v58 }
 0x121   : > { %v649_v16 = vpop.permute.xlu1 %648 }
 0x122   : > { %v694_v1 = vmul.f32 %v649_v16, %v470_v39  ;;  %1204 = vmatprep.mubr.msk.bf16.mxu0 %vm281_vm0, %v704_v59 }
 0x124   : > { %v712_v20 = vpack.c.bf16 %v695_v14, %v694_v1 }
 0x125   : > { %v579_v48 = vpop.permute.xlu1 %578 }
 0x126   : > { %v680_v19 = vmul.f32 %v579_v48, %v456_v26  ;;  %1220 = vmatprep.mubr.msk.bf16.mxu1 %vm281_vm0, %v712_v20 }
 0x128   : > { %v705_v23 = vpack.c.bf16 %v681_v8, %v680_v19 }
 0x129   : > { %v659_v49 = vpop.permute.xlu1 %658 }
 0x12a   : > { %v696_v50 = vmul.f32 %v659_v49, %v472_v57  ;;  %1205 = vmatmul.mubr.msk.bf16.gmra.mxu0 %vm281_vm0, %v705_v23 }
 0x12c   : > { %v713_v42 = vpack.c.bf16 %v697_v12, %v696_v50 }
 0x12e   : > { %1221 = vmatmul.mubr.msk.bf16.gmra.mxu1 %vm281_vm0, %v713_v42 }
 0x1b6   : > { %v1194_v60 = vpop.f32.mrf.mxu0 }
 0x1b7   : > { %941 = vst [vmem:[%s1722_s25 + $0x10] sm:$0xff] %v1194_v60 }
 0x1b8   : > { %v812_v63 = vpop.f32.mrf.mxu0 }
 0x1b9   : > { %939 = vst [vmem:[%s1722_s25] sm:$0xff] %v812_v63 }
 0x1ba   : > { %v1195_v18 = vpop.f32.mrf.mxu0 }
 0x1bb   : > { %942 = vst [vmem:[%s1722_s25 + $0x18] sm:$0xff] %v1195_v18 }
 0x1bc   : > { %v815_v30 = vpop.f32.mrf.mxu0 }
 0x1bd   : > { %940 = vst [vmem:[%s1722_s25 + $0x8] sm:$0xff] %v815_v30 }
 0x1be   : > { %v1210_v17 = vpop.f32.mrf.mxu1 }
 0x1bf   : > { %957 = vst [vmem:[%s1722_s25 + $0x90] sm:$0xff] %v1210_v17 }
 0x1c0   : > { %v876_v55 = vpop.f32.mrf.mxu1 }
 0x1c1   : > { %955 = vst [vmem:[%s1722_s25 + $0x80] sm:$0xff] %v876_v55 }
 0x1c2   : > { %v1211_v32 = vpop.f32.mrf.mxu1 }
 0x1c3   : > { %958 = vst [vmem:[%s1722_s25 + $0x98] sm:$0xff] %v1211_v32 }
 0x1c4   : > { %v879_v61 = vpop.f32.mrf.mxu1 }
 0x1c5   : > { %956 = vst [vmem:[%s1722_s25 + $0x88] sm:$0xff] %v879_v61 }
 0x1ca   : > { %v1198_v0 = vpop.f32.mrf.mxu0 }
 0x1cb   : > { %945 = vst [vmem:[%s1722_s25 + $0x30] sm:$0xff] %v1198_v0 }
 0x1cc   : > { %v828_v51 = vpop.f32.mrf.mxu0 }
 0x1cd   : > { %943 = vst [vmem:[%s1722_s25 + $0x20] sm:$0xff] %v828_v51 }
 0x1ce   : > { %v1199_v28 = vpop.f32.mrf.mxu0  ;;  %v1214_v6 = vpop.f32.mrf.mxu1 }
 0x1cf   : > { %946 = vst [vmem:[%s1722_s25 + $0x38] sm:$0xff] %v1199_v28  ;;  %961 = vst [vmem:[%s1722_s25 + $0xb0] sm:$0xff] %v1214_v6 }
 0x1d0   : > { %v831_v52 = vpop.f32.mrf.mxu0  ;;  %v892_v47 = vpop.f32.mrf.mxu1 }
 0x1d1   : > { %944 = vst [vmem:[%s1722_s25 + $0x28] sm:$0xff] %v831_v52  ;;  %959 = vst [vmem:[%s1722_s25 + $0xa0] sm:$0xff] %v892_v47 }
 0x1d2   : > { %v1215_v3 = vpop.f32.mrf.mxu1 }
 0x1d3   : > { %962 = vst [vmem:[%s1722_s25 + $0xb8] sm:$0xff] %v1215_v3 }
 0x1d4   : > { %v895_v2 = vpop.f32.mrf.mxu1 }
 0x1d5   : > { %960 = vst [vmem:[%s1722_s25 + $0xa8] sm:$0xff] %v895_v2 }
 0x1da   : > { %v1202_v29 = vpop.f32.mrf.mxu0 }
 0x1db   : > { %949 = vst [vmem:[%s1722_s25 + $0x50] sm:$0xff] %v1202_v29 }
 0x1dc   : > { %v844_v22 = vpop.f32.mrf.mxu0 }
 0x1dd   : > { %947 = vst [vmem:[%s1722_s25 + $0x40] sm:$0xff] %v844_v22 }
 0x1de   : > { %v1203_v25 = vpop.f32.mrf.mxu0  ;;  %v1218_v31 = vpop.f32.mrf.mxu1 }
 0x1df   : > { %950 = vst [vmem:[%s1722_s25 + $0x58] sm:$0xff] %v1203_v25  ;;  %965 = vst [vmem:[%s1722_s25 + $0xd0] sm:$0xff] %v1218_v31 }
 0x1e0   : > { %v847_v44 = vpop.f32.mrf.mxu0  ;;  %v908_v54 = vpop.f32.mrf.mxu1 }
 0x1e1   : > { %948 = vst [vmem:[%s1722_s25 + $0x48] sm:$0xff] %v847_v44  ;;  %963 = vst [vmem:[%s1722_s25 + $0xc0] sm:$0xff] %v908_v54 }
 0x1e2   : > { %v1219_v41 = vpop.f32.mrf.mxu1 }
 0x1e3   : > { %966 = vst [vmem:[%s1722_s25 + $0xd8] sm:$0xff] %v1219_v41 }
 0x1e4   : > { %v911_v35 = vpop.f32.mrf.mxu1 }
 0x1e5   : > { %964 = vst [vmem:[%s1722_s25 + $0xc8] sm:$0xff] %v911_v35 }
 0x1ea   : > { %v1206_v33 = vpop.f32.mrf.mxu0 }
 0x1eb   : > { %953 = vst [vmem:[%s1722_s25 + $0x70] sm:$0xff] %v1206_v33 }
 0x1ec   : > { %v860_v56 = vpop.f32.mrf.mxu0 }
 0x1ed   : > { %951 = vst [vmem:[%s1722_s25 + $0x60] sm:$0xff] %v860_v56 }
 0x1ee   : > { %v1207_v34 = vpop.f32.mrf.mxu0  ;;  %v1222_v36 = vpop.f32.mrf.mxu1 }
 0x1ef   : > { %954 = vst [vmem:[%s1722_s25 + $0x78] sm:$0xff] %v1207_v34  ;;  %969 = vst [vmem:[%s1722_s25 + $0xf0] sm:$0xff] %v1222_v36 }
 0x1f0   : > { %v863_v62 = vpop.f32.mrf.mxu0  ;;  %v924_v11 = vpop.f32.mrf.mxu1 }
 0x1f1   : > { %952 = vst [vmem:[%s1722_s25 + $0x68] sm:$0xff] %v863_v62  ;;  %967 = vst [vmem:[%s1722_s25 + $0xe0] sm:$0xff] %v924_v11 }
 0x1f2   : > { %v1223_v4 = vpop.f32.mrf.mxu1 }
 0x1f3   : > { %970 = vst [vmem:[%s1722_s25 + $0xf8] sm:$0xff] %v1223_v4 }
 0x1f4   : > { %v927_v13 = vpop.f32.mrf.mxu1 }
 0x1f5   : > { %968 = vst [vmem:[%s1722_s25 + $0xe8] sm:$0xff] %v927_v13 }
 0x1f6 PF: > { %s12_s11 = sadd.s32 1, %s1343_s11   ;;  %s1803_s9 = smov %s1339_s10 }
 0x1f7   : > { %p9_p5 = scmp.ge.s32.totalorder %s12_s11, 4   ;;  %s1804_s10 = smov %s1806_s12 }
 0x1f9   :  { %11 = sbr.rel (!%p9_p5) target bundleno = 2 (0x2), region = 61 }

</bundles_post_ra>
